<compile_context>
chip_gen: v5e
topology: v5e:2x2
jax: 0.10.0
libtpu: 0.0.40
codegen_flags: <defaults>
</compile_context>

<pallas_src>
import functools

import jax
import jax.numpy as jnp
from jax.experimental import pallas as pl
from jax.experimental.pallas import tpu as pltpu

K_IN = 28 * 28        # 784
K_PAD = 896           # 7 * 128 (lane-dense K for the first matmul)
H = 512
N_OUT = 10
N_PAD = 128           # lane-dense output width (unmasked vst, full MXU columns)


def mlp_kernel(x_ref, w1_ref, b1_ref, w2_ref, b2_ref, w3_ref, b3_ref, o_ref):
    # x: (TILE_B, 896) bf16 ; w1: (896, 512) bf16 ; w2: (512, 512) bf16 ;
    # w3: (512, 128) bf16 ; biases f32 ; output (TILE_B, 128) f32.
    x = x_ref[...]
    # Layer 1: bf16 x bf16 matmul on MXU, f32 accumulate, f32 bias + sigmoid (VPU/EUP).
    h1 = jnp.dot(x, w1_ref[...], preferred_element_type=jnp.float32) + b1_ref[...]
    h1 = jax.nn.sigmoid(h1)
    # Layer 2
    h2 = jnp.dot(h1.astype(jnp.bfloat16), w2_ref[...],
                 preferred_element_type=jnp.float32) + b2_ref[...]
    h2 = jax.nn.sigmoid(h2)
    # Layer 3 (padded to 128 output lanes)
    logits = jnp.dot(h2.astype(jnp.bfloat16), w3_ref[...],
                     preferred_element_type=jnp.float32) + b3_ref[...]
    o_ref[...] = logits.astype(o_ref.dtype)


def _prepare_params(params):
    """Cast weights to bf16 and zero-pad to lane-dense shapes (exact zeros)."""
    w1 = jnp.zeros((K_PAD, H), jnp.bfloat16).at[:K_IN, :].set(
        params["w1"].astype(jnp.bfloat16))
    w2 = params["w2"].astype(jnp.bfloat16)
    w3 = jnp.zeros((H, N_PAD), jnp.bfloat16).at[:, :N_OUT].set(
        params["w3"].astype(jnp.bfloat16))
    b1 = params["b1"].astype(jnp.float32)
    b2 = params["b2"].astype(jnp.float32)
    b3 = jnp.zeros((1, N_PAD), jnp.float32).at[:, :N_OUT].set(
        params["b3"].astype(jnp.float32))
    return w1, b1, w2, b2, w3, b3


def neural_network_forward(x_nchw, params, tile_b=128):
    """Forward pass equivalent to the PyTorch NeuralNetwork module.

    x_nchw: (B, 1, 28, 28) float32
    params: dict with w1 (784,512), b1 (1,512), w2 (512,512), b2 (1,512),
            w3 (512,10), b3 (1,10)   [weights stored as (in, out)]
    returns logits (B, 10) float32
    """
    B = x_nchw.shape[0]
    x_flat = x_nchw.reshape(B, K_IN)                       # nn.Flatten (row-major C,H,W)

    # Pad batch to a multiple of the batch tile and K to a multiple of 128.
    num_tiles = pl.cdiv(B, tile_b)
    Bp = num_tiles * tile_b
    x_pad = jnp.zeros((Bp, K_PAD), jnp.bfloat16)
    x_pad = x_pad.at[:B, :K_IN].set(x_flat.astype(jnp.bfloat16))

    w1, b1, w2, b2, w3, b3 = _prepare_params(params)
    # TODO(synk): for a serving loop, pin the bf16/padded weights across calls instead
    # of re-preparing + re-DMA'ing them every invocation.

    const_map = lambda i: (0, 0)
    flops = 2 * Bp * (K_PAD * H + H * H + H * N_PAD)
    bytes_accessed = (
        x_pad.size * 2                                     # bf16 activations in
        + (w1.size + w2.size + w3.size) * 2                # bf16 weights
        + (b1.size + b2.size + b3.size) * 4                # f32 biases
        + Bp * N_PAD * 4                                   # f32 output
    )

    out = pl.pallas_call(
        mlp_kernel,
        out_shape=jax.ShapeDtypeStruct((Bp, N_PAD), jnp.float32),
        grid_spec=pltpu.PrefetchScalarGridSpec(
            num_scalar_prefetch=0,
            grid=(num_tiles,),
            in_specs=[
                pl.BlockSpec((tile_b, K_PAD), lambda i: (i, 0)),   # x tile streamed
                pl.BlockSpec((K_PAD, H), const_map),               # weights resident
                pl.BlockSpec((1, H), const_map),
                pl.BlockSpec((H, H), const_map),
                pl.BlockSpec((1, H), const_map),
                pl.BlockSpec((H, N_PAD), const_map),
                pl.BlockSpec((1, N_PAD), const_map),
            ],
            out_specs=pl.BlockSpec((tile_b, N_PAD), lambda i: (i, 0)),
        ),
        compiler_params=pltpu.CompilerParams(
            dimension_semantics=("parallel",),                     # megacore on v7x
        ),
        cost_estimate=pl.CostEstimate(
            flops=flops,
            transcendentals=Bp * 2 * H,                            # two sigmoids
            bytes_accessed=bytes_accessed,
        ),
    )(x_pad, w1, b1, w2, b2, w3, b3)

    return out[:B, :N_OUT]


def init_params(key):
    """Deterministic init mimicking nn.Linear's uniform(-1/sqrt(fan_in), +1/sqrt(fan_in))."""
    def linear_init(k, fan_in, fan_out):
        kw, kb = jax.random.split(k)
        bound = 1.0 / jnp.sqrt(jnp.float32(fan_in))
        # Stored as (in, out) so the kernel computes x @ W (== x @ W_torch.T).
        w = jax.random.uniform(kw, (fan_in, fan_out), jnp.float32, -bound, bound)
        b = jax.random.uniform(kb, (1, fan_out), jnp.float32, -bound, bound)
        return w, b

    k1, k2, k3 = jax.random.split(key, 3)
    w1, b1 = linear_init(k1, K_IN, H)
    w2, b2 = linear_init(k2, H, H)
    w3, b3 = linear_init(k3, H, N_OUT)
    return {"w1": w1, "b1": b1, "w2": w2, "b2": b2, "w3": w3, "b3": b3}


if __name__ == "__main__":
    key = jax.random.PRNGKey(0)
    k_params, k_x = jax.random.split(key)

    params = init_params(k_params)
    B = 8
    x = jax.random.normal(k_x, (B, 1, 28, 28), dtype=jnp.float32)  # NCHW, like MNIST batch

    logits = neural_network_forward(x, params)
    jax.block_until_ready(logits)

    # Sanity check vs. plain-JAX reference using the same bf16-operand / f32-accumulate math.
    x_flat = x.reshape(B, K_IN)
    w1b = params["w1"].astype(jnp.bfloat16)
    w2b = params["w2"].astype(jnp.bfloat16)
    w3b = params["w3"].astype(jnp.bfloat16)
    h1 = jax.nn.sigmoid(
        jnp.dot(x_flat.astype(jnp.bfloat16), w1b, preferred_element_type=jnp.float32)
        + params["b1"])
    h2 = jax.nn.sigmoid(
        jnp.dot(h1.astype(jnp.bfloat16), w2b, preferred_element_type=jnp.float32)
        + params["b2"])
    ref = jnp.dot(h2.astype(jnp.bfloat16), w3b, preferred_element_type=jnp.float32) + params["b3"]

    assert logits.shape == (B, N_OUT)
    assert jnp.allclose(logits, ref, atol=1e-3, rtol=1e-3)

    print("KERNEL_OK")
</pallas_src>

<mosaic_0001>
module attributes {stable_mosaic.version = 11 : i64} {
  func.func @mlp_kernel(%arg0: i32, %arg1: memref<128x896xbf16, #tpu.memory_space<vmem>>, %arg2: memref<896x512xbf16, #tpu.memory_space<vmem>>, %arg3: memref<1x512xf32, #tpu.memory_space<vmem>>, %arg4: memref<512x512xbf16, #tpu.memory_space<vmem>>, %arg5: memref<1x512xf32, #tpu.memory_space<vmem>>, %arg6: memref<512x128xbf16, #tpu.memory_space<vmem>>, %arg7: memref<1x128xf32, #tpu.memory_space<vmem>>, %arg8: memref<128x128xf32, #tpu.memory_space<vmem>>) attributes {dimension_semantics = [#tpu.dimension_semantics<parallel>], iteration_bounds = array<i64: 1>, scalar_prefetch = 0 : i64, scratch_operands = 0 : i64, tpu.core_type = #tpu.core_type<tc>, window_params = [{transform_indices = @transform_0, window_bounds = array<i64: 128, 896>}, {pipeline_mode = #tpu.pipeline_mode<synchronous>, transform_indices = @transform_1, window_bounds = array<i64: 896, 512>}, {pipeline_mode = #tpu.pipeline_mode<synchronous>, transform_indices = @transform_2, window_bounds = array<i64: 1, 512>}, {pipeline_mode = #tpu.pipeline_mode<synchronous>, transform_indices = @transform_3, window_bounds = array<i64: 512, 512>}, {pipeline_mode = #tpu.pipeline_mode<synchronous>, transform_indices = @transform_4, window_bounds = array<i64: 1, 512>}, {pipeline_mode = #tpu.pipeline_mode<synchronous>, transform_indices = @transform_5, window_bounds = array<i64: 512, 128>}, {pipeline_mode = #tpu.pipeline_mode<synchronous>, transform_indices = @transform_6, window_bounds = array<i64: 1, 128>}, {transform_indices = @transform_7, window_bounds = array<i64: 128, 128>}]} {
    %c0 = arith.constant 0 : index
    %c0_0 = arith.constant 0 : index
    %0 = vector.load %arg1[%c0, %c0_0] : memref<128x896xbf16, #tpu.memory_space<vmem>>, vector<128x896xbf16>
    %c0_1 = arith.constant 0 : index
    %c0_2 = arith.constant 0 : index
    %1 = vector.load %arg2[%c0_1, %c0_2] : memref<896x512xbf16, #tpu.memory_space<vmem>>, vector<896x512xbf16>
    %cst = arith.constant dense<0.000000e+00> : vector<128x512xf32>
    %2 = tpu.matmul %0, %1, %cst {dimension_numbers = #tpu.dot_dimension_numbers<[1], [0], [0], [1], [0, 0, 1, 1], [], []>} : vector<128x896xbf16>, vector<896x512xbf16>, vector<128x512xf32> -> vector<128x512xf32>
    %c0_3 = arith.constant 0 : index
    %c0_4 = arith.constant 0 : index
    %3 = vector.load %arg3[%c0_3, %c0_4] : memref<1x512xf32, #tpu.memory_space<vmem>>, vector<1x512xf32>
    %4 = vector.broadcast %3 : vector<1x512xf32> to vector<128x512xf32>
    %5 = arith.addf %2, %4 : vector<128x512xf32>
    %6 = arith.negf %5 : vector<128x512xf32>
    %7 = math.exp %6 : vector<128x512xf32>
    %cst_5 = arith.constant 1.000000e+00 : f32
    %8 = vector.broadcast %cst_5 : f32 to vector<128x512xf32>
    %9 = arith.addf %8, %7 : vector<128x512xf32>
    %10 = arith.divf %8, %9 : vector<128x512xf32>
    %11 = arith.truncf %10 : vector<128x512xf32> to vector<128x512xbf16>
    %c0_6 = arith.constant 0 : index
    %c0_7 = arith.constant 0 : index
    %12 = vector.load %arg4[%c0_6, %c0_7] : memref<512x512xbf16, #tpu.memory_space<vmem>>, vector<512x512xbf16>
    %cst_8 = arith.constant dense<0.000000e+00> : vector<128x512xf32>
    %13 = tpu.matmul %11, %12, %cst_8 {dimension_numbers = #tpu.dot_dimension_numbers<[1], [0], [0], [1], [0, 0, 1, 1], [], []>} : vector<128x512xbf16>, vector<512x512xbf16>, vector<128x512xf32> -> vector<128x512xf32>
    %c0_9 = arith.constant 0 : index
    %c0_10 = arith.constant 0 : index
    %14 = vector.load %arg5[%c0_9, %c0_10] : memref<1x512xf32, #tpu.memory_space<vmem>>, vector<1x512xf32>
    %15 = vector.broadcast %14 : vector<1x512xf32> to vector<128x512xf32>
    %16 = arith.addf %13, %15 : vector<128x512xf32>
    %17 = arith.negf %16 : vector<128x512xf32>
    %18 = math.exp %17 : vector<128x512xf32>
    %cst_11 = arith.constant 1.000000e+00 : f32
    %19 = vector.broadcast %cst_11 : f32 to vector<128x512xf32>
    %20 = arith.addf %19, %18 : vector<128x512xf32>
    %21 = arith.divf %19, %20 : vector<128x512xf32>
    %22 = arith.truncf %21 : vector<128x512xf32> to vector<128x512xbf16>
    %c0_12 = arith.constant 0 : index
    %c0_13 = arith.constant 0 : index
    %23 = vector.load %arg6[%c0_12, %c0_13] : memref<512x128xbf16, #tpu.memory_space<vmem>>, vector<512x128xbf16>
    %cst_14 = arith.constant dense<0.000000e+00> : vector<128x128xf32>
    %24 = tpu.matmul %22, %23, %cst_14 {dimension_numbers = #tpu.dot_dimension_numbers<[1], [0], [0], [1], [0, 0, 1, 1], [], []>} : vector<128x512xbf16>, vector<512x128xbf16>, vector<128x128xf32> -> vector<128x128xf32>
    %c0_15 = arith.constant 0 : index
    %c0_16 = arith.constant 0 : index
    %25 = vector.load %arg7[%c0_15, %c0_16] : memref<1x128xf32, #tpu.memory_space<vmem>>, vector<1x128xf32>
    %26 = vector.broadcast %25 : vector<1x128xf32> to vector<128x128xf32>
    %27 = arith.addf %24, %26 : vector<128x128xf32>
    %c0_17 = arith.constant 0 : index
    %c0_18 = arith.constant 0 : index
    %28 = vector.load %arg8[%c0_17, %c0_18] : memref<128x128xf32, #tpu.memory_space<vmem>>, vector<128x128xf32>
    tpu.vector_store %arg8[%c0_17, %c0_18], %27 {strides = array<i32>} : memref<128x128xf32, #tpu.memory_space<vmem>>, vector<128x128xf32>,
    return
  }
  func.func @transform_0(%arg0: i32) -> (i32, i32) {
    %c0_i32 = arith.constant 0 : i32
    %c0_i32_0 = arith.constant 0 : i32
    return %arg0, %c0_i32 : i32, i32
  }
  func.func @transform_1(%arg0: i32) -> (i32, i32) {
    %c0_i32 = arith.constant 0 : i32
    %c0_i32_0 = arith.constant 0 : i32
    %c0_i32_1 = arith.constant 0 : i32
    return %c0_i32, %c0_i32_0 : i32, i32
  }
  func.func @transform_2(%arg0: i32) -> (i32, i32) {
    %c0_i32 = arith.constant 0 : i32
    %c0_i32_0 = arith.constant 0 : i32
    %c0_i32_1 = arith.constant 0 : i32
    return %c0_i32, %c0_i32_0 : i32, i32
  }
  func.func @transform_3(%arg0: i32) -> (i32, i32) {
    %c0_i32 = arith.constant 0 : i32
    %c0_i32_0 = arith.constant 0 : i32
    %c0_i32_1 = arith.constant 0 : i32
    return %c0_i32, %c0_i32_0 : i32, i32
  }
  func.func @transform_4(%arg0: i32) -> (i32, i32) {
    %c0_i32 = arith.constant 0 : i32
    %c0_i32_0 = arith.constant 0 : i32
    %c0_i32_1 = arith.constant 0 : i32
    return %c0_i32, %c0_i32_0 : i32, i32
  }
  func.func @transform_5(%arg0: i32) -> (i32, i32) {
    %c0_i32 = arith.constant 0 : i32
    %c0_i32_0 = arith.constant 0 : i32
    %c0_i32_1 = arith.constant 0 : i32
    return %c0_i32, %c0_i32_0 : i32, i32
  }
  func.func @transform_6(%arg0: i32) -> (i32, i32) {
    %c0_i32 = arith.constant 0 : i32
    %c0_i32_0 = arith.constant 0 : i32
    %c0_i32_1 = arith.constant 0 : i32
    return %c0_i32, %c0_i32_0 : i32, i32
  }
  func.func @transform_7(%arg0: i32) -> (i32, i32) {
    %c0_i32 = arith.constant 0 : i32
    %c0_i32_0 = arith.constant 0 : i32
    return %arg0, %c0_i32 : i32, i32
  }
}

</mosaic_0001>

<bundles_post_ra>
// kernel: tpu_custom_call.1
= control target key start
LH: loop header
LB: loop body
LE: loop exit
PB: predicated region body
PF: predicated region fallthrough
CT: control target
= control target key end

     0   :  { %12 = vsyncpa [#allocation3], 0  ;;  %s14633_s0 = inlined_call_operand.hbm [shape: bf16[128,896], index: 0, kind: input, shape index: {}]   ;;  %s14634_s1 = inlined_call_operand.hbm [shape: bf16[896,512], index: 1, kind: input, shape index: {}]   ;;  %s14635_s2 = inlined_call_operand.hbm [shape: f32[1,512], index: 2, kind: input, shape index: {}]   ;;  %s14636_s3 = inlined_call_operand.hbm [shape: bf16[512,512], index: 3, kind: input, shape index: {}]   ;;  %s14637_s4 = inlined_call_operand.hbm [shape: f32[1,512], index: 4, kind: input, shape index: {}]   ;;  %s14638_s5 = inlined_call_operand.hbm [shape: bf16[512,128], index: 5, kind: input, shape index: {}]   ;;  %s14639_s6 = inlined_call_operand.vmem [shape: f32[1,128], index: 6, kind: input, shape index: {}]   ;;  %s14640_s7 = inlined_call_operand.hbm [shape: f32[128,128], index: 7, kind: output, shape index: {}]  }
   0x1   :  { %13 = vsyncpa [#allocation6], 0 }
   0x2   :  { %14 = vsyncpa [#allocation9], 0 }
   0x3   :  { %15 = vsyncpa [#allocation12], 0  ;;  %s34_s26 = sshll.u32 %s14634_s1, 4  ;;  %s35_s26 = int_to_ptr.hbm [resolvable:$true] %s34_s26 }
   0x4   :  { %16 = vsyncpa [#allocation4], 0  ;;  %s10785_s27 = smov [#allocation5]   ;;  %s58_s8 = sshll.u32 %s14636_s3, 4  ;;  %s59_s8 = int_to_ptr.hbm [resolvable:$true] %s58_s8 }
   0x5   :  { %s36_s28 = sshll.u32 %s10785_s27, 4  ;;  %s10786_s9 = smov 256   ;;  %s37_s28 = int_to_ptr.vmem [resolvable:$true] %s36_s28 }
   0x6   :  { %s10787_s10 = smov 16   ;;  %s10788_s11 = smov [#allocation8]  }
   0x7   :  { %42 = dma.hbm_to_vmem [thread:$0]  %s35_s26, 28672, %s37_s28, [#allocation6], %s10786_s9, %s10786_s9, %s10787_s10  }
   0x8   :  { %s60_s12 = sshll.u32 %s10788_s11, 4  ;;  %s21_s15 = sshll.u32 %s14633_s0, 4  ;;  %s61_s12 = int_to_ptr.vmem [resolvable:$true] %s60_s12  ;;  %s22_s15 = int_to_ptr.hbm [resolvable:$true] %s21_s15 }
   0x9   :  { %66 = dma.hbm_to_vmem [thread:$0]  %s59_s8, 16384, %s61_s12, [#allocation9], %s10786_s9, %s10786_s9, %s10787_s10  }
   0xa   :  { %s10789_s1 = smov [#allocation2]   ;;  %s48_s3 = sshll.u32 %s14635_s2, 4  ;;  %s49_s3 = int_to_ptr.hbm [resolvable:$true] %s48_s3 }
   0xb   :  { %s23_s16 = sshll.u32 %s10789_s1, 4  ;;  %s10790_s19 = smov 448   ;;  %s24_s16 = int_to_ptr.vmem [resolvable:$true] %s23_s16 }
   0xc   :  { %s10791_s20 = smov 28   ;;  %s10792_s21 = smov [#allocation7]  }
   0xd   :  { %29 = dma.hbm_to_vmem [thread:$0]  %s22_s15, 7168, %s24_s16, [#allocation3], %s10790_s19, %s10790_s19, %s10791_s20  }
   0xe   :  { %s50_s22 = sshll.u32 %s10792_s21, 4  ;;  %s72_s0 = sshll.u32 %s14637_s4, 4  ;;  %s51_s22 = int_to_ptr.vmem [resolvable:$true] %s50_s22  ;;  %s73_s0 = int_to_ptr.hbm [resolvable:$true] %s72_s0 }
   0xf   :  { %53 = dma.hbm_to_vmem [thread:$0]  %s49_s3, 64, %s51_s22, [#allocation6]  }
  0x10   :  { %s82_s27 = sshll.u32 %s14638_s5, 4  ;;  %s10793_s28 = smov [#allocation10]   ;;  %s83_s27 = int_to_ptr.hbm [resolvable:$true] %s82_s27 }
  0x11   :  { %s74_s29 = sshll.u32 %s10793_s28, 4  ;;  %s10794_s2 = smov [#allocation11]   ;;  %s75_s29 = int_to_ptr.vmem [resolvable:$true] %s74_s29 }
  0x12   :  { %77 = dma.hbm_to_vmem [thread:$0]  %s73_s0, 64, %s75_s29, [#allocation9]  }
  0x13   :  { %s84_s30 = sshll.u32 %s10794_s2, 4  ;;  %s10795_s8 = smov 64   ;;  %s85_s30 = int_to_ptr.vmem [resolvable:$true] %s84_s30 }
  0x14   :  { %s10796_s9 = smov 4  }
  0x15   :  { %90 = dma.hbm_to_vmem [thread:$0]  %s83_s27, 4096, %s85_s30, [#allocation12], %s10795_s8, %s10795_s8, %s10796_s9  }
  0x16   :  { %10775 = dma.done.wait [#allocation3], 7168  }
  0x17   :  { %10776 = vsyncadd [#allocation3], 4294960128 }
  0x18   :  { %10777 = dma.done.wait [#allocation6], 28736  }
  0x19   :  { %10778 = vsyncadd [#allocation6], 4294938560 }
  0x1a   :  { %10779 = dma.done.wait [#allocation9], 16448  }
  0x1b   :  { %10780 = vsyncadd [#allocation9], 4294950848 }
  0x1c   :  { %10781 = dma.done.wait [#allocation12], 4096  }
  0x1d   :  { %10782 = vsyncadd [#allocation12], 4294963200  ;;  %v8085_v0 = vld [vmem:[#allocation5 + $0xe0] sm:$0xf]  ;;  %v9721_v1 = vld [vmem:[#allocation5 + $0xec] sm:$0xf0] }
  0x1e   :  { %v8213_v2 = vld [vmem:[#allocation5 + $0x1e0] sm:$0xf]  ;;  %v8086_v3 = vor.u32 %v9721_v1, %v8085_v0  ;;  %v9753_v4 = vld [vmem:[#allocation5 + $0x1ec] sm:$0xf0]  ;;  %s7731_s13 = sshll.u32 %s14640_s7, 4  ;;  %s10798_s14 = smov 128   ;;  %s7732_s13 = int_to_ptr.hbm [resolvable:$true] %s7731_s13 }
  0x1f   :  { %v8341_v5 = vld [vmem:[#allocation5 + $0x2e0] sm:$0xf]  ;;  %v9785_v6 = vld [vmem:[#allocation5 + $0x2ec] sm:$0xf0]  ;;  %v8214_v7 = vor.u32 %v9753_v4, %v8213_v2  ;;  %s10799_s15 = smov 8  }
  0x20   :  { %v8342_v8 = vor.u32 %v9785_v6, %v8341_v5  ;;  %v8469_v9 = vld [vmem:[#allocation5 + $0x3e0] sm:$0xf]  ;;  %v9817_v10 = vld [vmem:[#allocation5 + $0x3ec] sm:$0xf0]  ;;  %1823 = vmatpush.bf16.msra.mxu0 %v8086_v3 }
  0x21   :  { %v8069_v11 = vld [vmem:[#allocation5 + $0xc0] sm:$0xf]  ;;  %v8470_v12 = vor.u32 %v9817_v10, %v8469_v9  ;;  %v9717_v13 = vld [vmem:[#allocation5 + $0xcc] sm:$0xf0]  ;;  %1872 = vmatpush.bf16.msra.mxu1 %v8214_v7 }
  0x22   :  { %v8197_v14 = vld [vmem:[#allocation5 + $0x1c0] sm:$0xf]  ;;  %v9749_v15 = vld [vmem:[#allocation5 + $0x1cc] sm:$0xf0]  ;;  %1921 = vmatpush.bf16.msra.mxu2 %v8342_v8  ;;  %v8070_v16 = vor.u32 %v9717_v13, %v8069_v11 }
  0x23   :  { %v8198_v17 = vor.u32 %v9749_v15, %v8197_v14  ;;  %v8325_v18 = vld [vmem:[#allocation5 + $0x2c0] sm:$0xf]  ;;  %v9781_v19 = vld [vmem:[#allocation5 + $0x2cc] sm:$0xf0]  ;;  %1970 = vmatpush.bf16.msra.mxu3 %v8470_v12 }
  0x24   :  { %v8453_v20 = vld [vmem:[#allocation5 + $0x3c0] sm:$0xf]  ;;  %v8326_v21 = vor.u32 %v9781_v19, %v8325_v18  ;;  %v9813_v22 = vld [vmem:[#allocation5 + $0x3cc] sm:$0xf0]  ;;  %1824 = vmatpush.bf16.msra.mxu0 %v8070_v16 }
  0x25   :  { %v8053_v23 = vld [vmem:[#allocation5 + $0xa0] sm:$0xf]  ;;  %v9713_v24 = vld [vmem:[#allocation5 + $0xac] sm:$0xf0]  ;;  %v8454_v25 = vor.u32 %v9813_v22, %v8453_v20  ;;  %1873 = vmatpush.bf16.msra.mxu1 %v8198_v17 }
  0x26   :  { %v8181_v26 = vld [vmem:[#allocation5 + $0x1a0] sm:$0xf]  ;;  %v9745_v27 = vld [vmem:[#allocation5 + $0x1ac] sm:$0xf0]  ;;  %v8054_v29 = vor.u32 %v9713_v24, %v8053_v23  ;;  %1922 = vmatpush.bf16.msra.mxu2 %v8326_v21 }
  0x27   :  { %v8309_v28 = vld [vmem:[#allocation5 + $0x2a0] sm:$0xf]  ;;  %v9777_v30 = vld [vmem:[#allocation5 + $0x2ac] sm:$0xf0]  ;;  %v8182_v33 = vor.u32 %v9745_v27, %v8181_v26  ;;  %1971 = vmatpush.bf16.msra.mxu3 %v8454_v25 }
  0x28   :  { %v8437_v31 = vld [vmem:[#allocation5 + $0x3a0] sm:$0xf]  ;;  %v9809_v32 = vld [vmem:[#allocation5 + $0x3ac] sm:$0xf0]  ;;  %v8310_v34 = vor.u32 %v9777_v30, %v8309_v28  ;;  %1825 = vmatpush.bf16.msra.mxu0 %v8054_v29  ;;  %v9638_v29 = vld [vmem:[#allocation2 + $0x18] sm:$0xf0] }
  0x29   :  { %v8037_v35 = vld [vmem:[#allocation5 + $0x80] sm:$0xf]  ;;  %v9709_v36 = vld [vmem:[#allocation5 + $0x8c] sm:$0xf0]  ;;  %v8438_v38 = vor.u32 %v9809_v32, %v8437_v31  ;;  %1874 = vmatpush.bf16.msra.mxu1 %v8182_v33  ;;  %v9635_v30 = vld [vmem:[#allocation2 + $0x4] sm:$0xf] }
  0x2a   :  { %v8165_v37 = vld [vmem:[#allocation5 + $0x180] sm:$0xf]  ;;  %v9741_v39 = vld [vmem:[#allocation5 + $0x18c] sm:$0xf0]  ;;  %v8038_v44 = vor.u32 %v9709_v36, %v8037_v35  ;;  %1923 = vmatpush.bf16.msra.mxu2 %v8310_v34  ;;  %v7757_v35 = vld [vmem:[#allocation2 + $0x8] sm:$0xf] }
  0x2b   :  { %v8293_v40 = vld [vmem:[#allocation5 + $0x280] sm:$0xf]  ;;  %v9773_v41 = vld [vmem:[#allocation5 + $0x28c] sm:$0xf0]  ;;  %v8166_v45 = vor.u32 %v9741_v39, %v8165_v37  ;;  %1972 = vmatpush.bf16.msra.mxu3 %v8438_v38  ;;  %v9719_v36 = vld [vmem:[#allocation5 + $0xe4] sm:$0xf] }
  0x2c   :  { %v8421_v42 = vld [vmem:[#allocation5 + $0x380] sm:$0xf]  ;;  %v9805_v43 = vld [vmem:[#allocation5 + $0x38c] sm:$0xf0]  ;;  %v8294_v46 = vor.u32 %v9773_v41, %v8293_v40  ;;  %1826 = vmatpush.bf16.msra.mxu0 %v8038_v44  ;;  %v8087_v37 = vld [vmem:[#allocation5 + $0xf0] sm:$0xf0] }
  0x2d   :  { %v8021_v47 = vld [vmem:[#allocation5 + $0x60] sm:$0xf]  ;;  %v9705_v48 = vld [vmem:[#allocation5 + $0x6c] sm:$0xf0]  ;;  %v8422_v50 = vor.u32 %v9805_v43, %v8421_v42  ;;  %1875 = vmatpush.bf16.msra.mxu1 %v8166_v45  ;;  %v9639_v40 = vld [vmem:[#allocation2 + $0x20] sm:$0xf0] }
  0x2e   :  { %v8149_v49 = vld [vmem:[#allocation5 + $0x160] sm:$0xf]  ;;  %v9737_v51 = vld [vmem:[#allocation5 + $0x16c] sm:$0xf0]  ;;  %v8022_v56 = vor.u32 %v9705_v48, %v8021_v47  ;;  %1924 = vmatpush.bf16.msra.mxu2 %v8294_v46  ;;  %v9636_v41 = vld [vmem:[#allocation2 + $0xc] sm:$0xf] }
  0x2f   :  { %v8277_v52 = vld [vmem:[#allocation5 + $0x260] sm:$0xf]  ;;  %v9769_v53 = vld [vmem:[#allocation5 + $0x26c] sm:$0xf0]  ;;  %v8150_v57 = vor.u32 %v9737_v51, %v8149_v49  ;;  %1973 = vmatpush.bf16.msra.mxu3 %v8422_v50  ;;  %v7759_v42 = vld [vmem:[#allocation2 + $0x24] sm:$0xf0]  ;;  %v8090_v49 = vor.u32 %v9719_v36, %v8087_v37 }
  0x30   :  { %v8405_v54 = vld [vmem:[#allocation5 + $0x360] sm:$0xf]  ;;  %v9801_v55 = vld [vmem:[#allocation5 + $0x36c] sm:$0xf0]  ;;  %v8278_v58 = vor.u32 %v9769_v53, %v8277_v52  ;;  %1827 = vmatpush.bf16.msra.mxu0 %v8022_v56  ;;  %v8071_v56 = vld [vmem:[#allocation5 + $0xd0] sm:$0xf0] }
  0x31   :  { %v8005_v59 = vld [vmem:[#allocation5 + $0x40] sm:$0xf]  ;;  %v9701_v60 = vld [vmem:[#allocation5 + $0x4c] sm:$0xf0]  ;;  %v8406_v62 = vor.u32 %v9801_v55, %v8405_v54  ;;  %1876 = vmatpush.bf16.msra.mxu1 %v8150_v57  ;;  %v10862_v54 = vor.u32 %v9639_v40, %v7757_v35  ;;  %v9715_v55 = vld [vmem:[#allocation5 + $0xc4] sm:$0xf]  ;;  %v10864_v57 = vor.u32 %v9636_v41, %v7759_v42 }
  0x32   :  { %v8133_v61 = vld [vmem:[#allocation5 + $0x140] sm:$0xf]  ;;  %v9733_v63 = vld [vmem:[#allocation5 + $0x14c] sm:$0xf0]  ;;  %v8006_v4 = vor.u32 %v9701_v60, %v8005_v59  ;;  %1925 = vmatpush.bf16.msra.mxu2 %v8278_v58  ;;  %v9652_v41 = vld [vmem:[#allocation2 + $0x88] sm:$0xf0] }
  0x33   :  { %v8261_v0 = vld [vmem:[#allocation5 + $0x240] sm:$0xf]  ;;  %v9765_v1 = vld [vmem:[#allocation5 + $0x24c] sm:$0xf0]  ;;  %v8134_v5 = vor.u32 %v9733_v63, %v8133_v61  ;;  %1974 = vmatpush.bf16.msra.mxu3 %v8406_v62  ;;  %14794 = vst [vmem:[#allocation20_spill] sm:$0xff] %v10862_v54  ;;  %v8074_v63 = vor.u32 %v9715_v55, %v8071_v56 }
  0x34   :  { %v8389_v2 = vld [vmem:[#allocation5 + $0x340] sm:$0xf]  ;;  %v9797_v3 = vld [vmem:[#allocation5 + $0x34c] sm:$0xf0]  ;;  %v8262_v6 = vor.u32 %v9765_v1, %v8261_v0  ;;  %1828 = vmatpush.bf16.msra.mxu0 %v8006_v4  ;;  %14795 = vst [vmem:[#allocation21_spill] sm:$0xff] %v10864_v57 }
  0x35   :  { %v7989_v7 = vld [vmem:[#allocation5 + $0x20] sm:$0xf]  ;;  %v9697_v8 = vld [vmem:[#allocation5 + $0x2c] sm:$0xf0]  ;;  %v8390_v10 = vor.u32 %v9797_v3, %v8389_v2  ;;  %1877 = vmatpush.bf16.msra.mxu1 %v8134_v5  ;;  %v9649_v42 = vld [vmem:[#allocation2 + $0x74] sm:$0xf] }
  0x36   :  { %v8117_v9 = vld [vmem:[#allocation5 + $0x120] sm:$0xf]  ;;  %v9729_v11 = vld [vmem:[#allocation5 + $0x12c] sm:$0xf0]  ;;  %v7990_v17 = vor.u32 %v9697_v8, %v7989_v7  ;;  %1926 = vmatpush.bf16.msra.mxu2 %v8262_v6 }
  0x37   :  { %v8245_v12 = vld [vmem:[#allocation5 + $0x220] sm:$0xf]  ;;  %v9761_v13 = vld [vmem:[#allocation5 + $0x22c] sm:$0xf0]  ;;  %v8118_v21 = vor.u32 %v9729_v11, %v8117_v9  ;;  %1975 = vmatpush.bf16.msra.mxu3 %v8390_v10  ;;  %v9711_v9 = vld [vmem:[#allocation5 + $0xa4] sm:$0xf] }
  0x38   :  { %v8373_v14 = vld [vmem:[#allocation5 + $0x320] sm:$0xf]  ;;  %v9793_v15 = vld [vmem:[#allocation5 + $0x32c] sm:$0xf0]  ;;  %v8246_v22 = vor.u32 %v9761_v13, %v8245_v12  ;;  %1829 = vmatpush.bf16.msra.mxu0 %v7990_v17  ;;  %v8055_v10 = vld [vmem:[#allocation5 + $0xb0] sm:$0xf0] }
  0x39   :  { %v7973_v16 = vld [vmem:[#allocation5] sm:$0xf]  ;;  %v9693_v18 = vld [vmem:[#allocation5 + $0xc] sm:$0xf0]  ;;  %v8374_v26 = vor.u32 %v9793_v15, %v8373_v14  ;;  %1878 = vmatpush.bf16.msra.mxu1 %v8118_v21  ;;  %v8058_v11 = vor.u32 %v9711_v9, %v8055_v10  ;;  %v9645_v17 = vld [vmem:[#allocation2 + $0x50] sm:$0xf0] }
  0x3a   :  { %v8101_v19 = vld [vmem:[#allocation5 + $0x100] sm:$0xf]  ;;  %v9725_v20 = vld [vmem:[#allocation5 + $0x10c] sm:$0xf0]  ;;  %v7974_v34 = vor.u32 %v9693_v18, %v7973_v16  ;;  %1927 = vmatpush.bf16.msra.mxu2 %v8246_v22  ;;  %v7777_v16 = vld [vmem:[#allocation2 + $0x38] sm:$0xf] }
  0x3b   :  { %v8229_v23 = vld [vmem:[#allocation5 + $0x200] sm:$0xf]  ;;  %v9757_v24 = vld [vmem:[#allocation5 + $0x20c] sm:$0xf0]  ;;  %v8102_v38 = vor.u32 %v9725_v20, %v8101_v19  ;;  %1976 = vmatpush.bf16.msra.mxu3 %v8374_v26  ;;  %v9642_v18 = vld [vmem:[#allocation2 + $0x3c] sm:$0xf] }
  0x3c   :  { %v8357_v25 = vld [vmem:[#allocation5 + $0x300] sm:$0xf]  ;;  %v9789_v27 = vld [vmem:[#allocation5 + $0x30c] sm:$0xf0]  ;;  %v8230_v39 = vor.u32 %v9757_v24, %v8229_v23  ;;  %1830 = vmatpush.bf16.msra.mxu0 %v7974_v34  ;;  %v7779_v19 = vld [vmem:[#allocation2 + $0x54] sm:$0xf0]  ;;  %v10870_v24 = vor.u32 %v9645_v17, %v7777_v16 }
  0x3d   :  { %v7749_v28 = vld [vmem:[#allocation2] sm:$0xf]  ;;  %v9913_v33 = vld [vmem:[#allocation5 + $0x6ec] sm:$0xf0]  ;;  %v8358_v43 = vor.u32 %v9789_v27, %v8357_v25  ;;  %1879 = vmatpush.bf16.msra.mxu1 %v8102_v38  ;;  %v9646_v21 = vld [vmem:[#allocation2 + $0x58] sm:$0xf0]  ;;  %v10872_v25 = vor.u32 %v9642_v18, %v7779_v19 }
  0x3e   :  { %v7751_v31 = vld [vmem:[#allocation2 + $0x1c] sm:$0xf0]  ;;  %v9849_v46 = vld [vmem:[#allocation5 + $0x4ec] sm:$0xf0]  ;;  %v10858_v48 = vor.u32 %v9638_v29, %v7749_v28  ;;  %1928 = vmatpush.bf16.msra.mxu2 %v8230_v39  ;;  %v9643_v22 = vld [vmem:[#allocation2 + $0x44] sm:$0xf] }
  0x3f   :  { %v8853_v32 = vld [vmem:[#allocation5 + $0x6e0] sm:$0xf]  ;;  %v9881_v50 = vld [vmem:[#allocation5 + $0x5ec] sm:$0xf0]  ;;  %v10860_v53 = vor.u32 %v9635_v30, %v7751_v31  ;;  %1977 = vmatpush.bf16.msra.mxu3 %v8358_v43  ;;  %14796 = vst [vmem:[#allocation22_spill] sm:$0xff] %v10870_v24 }
  0x40   :  { %v8854_v44 = vor.u32 %v9913_v33, %v8853_v32  ;;  %v8597_v45 = vld [vmem:[#allocation5 + $0x4e0] sm:$0xf]  ;;  %14793 = vst [vmem:[#allocation19_spill] sm:$0xff] %v10858_v48  ;;  %v9909_v52 = vld [vmem:[#allocation5 + $0x6cc] sm:$0xf0]  ;;  %1831 = vmatmul.bf16.vlgmr.msra.gmra.mxu0 %v10858_v48 }
  0x41   :  { %v8725_v47 = vld [vmem:[#allocation5 + $0x5e0] sm:$0xf]  ;;  %v8598_v58 = vor.u32 %v9849_v46, %v8597_v45  ;;  %v9845_v62 = vld [vmem:[#allocation5 + $0x4cc] sm:$0xf0]  ;;  %1880 = vmatmul.bf16.vlgmr.msra.gmra.mxu1 %v10860_v53  ;;  %1929 = vmatmul.bf16.vlgmr.msra.gmra.mxu2 %v10862_v54  ;;  %v9707_v33 = vld [vmem:[#allocation5 + $0x84] sm:$0xf] }
  0x42   :  { %v8837_v51 = vld [vmem:[#allocation5 + $0x6c0] sm:$0xf]  ;;  %2117 = vmatpush.bf16.msrb.mxu2 %v8854_v44  ;;  %v8726_v59 = vor.u32 %v9881_v50, %v8725_v47  ;;  %v9877_v1 = vld [vmem:[#allocation5 + $0x5cc] sm:$0xf0]  ;;  %1978 = vmatmul.bf16.vlgmr.msra.gmra.mxu3 %v10864_v57  ;;  %v8039_v34 = vld [vmem:[#allocation5 + $0x90] sm:$0xf0] }
  0x43   :  { %v8838_v60 = vor.u32 %v9909_v52, %v8837_v51  ;;  %v8581_v61 = vld [vmem:[#allocation5 + $0x4c0] sm:$0xf]  ;;  %2166 = vmatpush.bf16.msrb.mxu3 %v8090_v49  ;;  %2019 = vmatpush.bf16.msrb.mxu0 %v8598_v58  ;;  %v9905_v4 = vld [vmem:[#allocation5 + $0x6ac] sm:$0xf0]  ;;  %v8042_v36 = vor.u32 %v9707_v33, %v8039_v34  ;;  %v7813_v44 = vld [vmem:[#allocation2 + $0x78] sm:$0xf] }
  0x44   :  { %v8709_v0 = vld [vmem:[#allocation5 + $0x5c0] sm:$0xf]  ;;  %v8582_v2 = vor.u32 %v9845_v62, %v8581_v61  ;;  %2068 = vmatpush.bf16.msrb.mxu1 %v8726_v59  ;;  %v9841_v8 = vld [vmem:[#allocation5 + $0x4ac] sm:$0xf0]  ;;  %v9653_v45 = vld [vmem:[#allocation2 + $0x90] sm:$0xf0] }
  0x45   :  { %v8821_v3 = vld [vmem:[#allocation5 + $0x6a0] sm:$0xf]  ;;  %v8710_v6 = vor.u32 %v9877_v1, %v8709_v0  ;;  %v9873_v13 = vld [vmem:[#allocation5 + $0x5ac] sm:$0xf0]  ;;  %v9650_v46 = vld [vmem:[#allocation2 + $0x7c] sm:$0xf]  ;;  %v10886_v51 = vor.u32 %v9653_v45, %v7813_v44 }
  0x46   :  { %v8565_v5 = vld [vmem:[#allocation5 + $0x4a0] sm:$0xf]  ;;  %2118 = vmatpush.bf16.msrb.mxu2 %v8838_v60  ;;  %v8822_v7 = vor.u32 %v9905_v4, %v8821_v3  ;;  %v9901_v29 = vld [vmem:[#allocation5 + $0x68c] sm:$0xf0]  ;;  %v7815_v47 = vld [vmem:[#allocation2 + $0x94] sm:$0xf0] }
  0x47   :  { %2167 = vmatpush.bf16.msrb.mxu3 %v8074_v63  ;;  %v8693_v12 = vld [vmem:[#allocation5 + $0x5a0] sm:$0xf]  ;;  %2020 = vmatpush.bf16.msrb.mxu0 %v8582_v2  ;;  %v8566_v14 = vor.u32 %v9841_v8, %v8565_v5  ;;  %v9837_v32 = vld [vmem:[#allocation5 + $0x48c] sm:$0xf0]  ;;  %14801 = vst [vmem:[#allocation27_spill] sm:$0xff] %v10886_v51  ;;  %v10888_v52 = vor.u32 %v9650_v46, %v7815_v47 }
  0x48   :  { %2069 = vmatpush.bf16.msrb.mxu1 %v8710_v6  ;;  %v8694_v15 = vor.u32 %v9873_v13, %v8693_v12  ;;  %v7785_v20 = vld [vmem:[#allocation2 + $0x40] sm:$0xf]  ;;  %v9869_v38 = vld [vmem:[#allocation5 + $0x58c] sm:$0xf0]  ;;  %v9703_v61 = vld [vmem:[#allocation5 + $0x64] sm:$0xf] }
  0x49   :  { %v7787_v23 = vld [vmem:[#allocation2 + $0x5c] sm:$0xf0]  ;;  %v10874_v26 = vor.u32 %v9646_v21, %v7785_v20  ;;  %v7805_v40 = vld [vmem:[#allocation2 + $0x70] sm:$0xf]  ;;  %14802 = vst [vmem:[#allocation28_spill] sm:$0xff] %v10888_v52 }
  0x4a   :  { %2119 = vmatpush.bf16.msrb.mxu2 %v8822_v7  ;;  %v10876_v27 = vor.u32 %v9643_v22, %v7787_v23  ;;  %v8805_v28 = vld [vmem:[#allocation5 + $0x680] sm:$0xf]  ;;  %v7807_v43 = vld [vmem:[#allocation2 + $0x8c] sm:$0xf0]  ;;  %v10882_v49 = vor.u32 %v9652_v41, %v7805_v40  ;;  %v8023_v62 = vld [vmem:[#allocation5 + $0x70] sm:$0xf0] }
  0x4b   :  { %2168 = vmatpush.bf16.msrb.mxu3 %v8058_v11  ;;  %2021 = vmatpush.bf16.msrb.mxu0 %v8566_v14  ;;  %14797 = vst [vmem:[#allocation23_spill] sm:$0xff] %v10874_v26  ;;  %v8549_v30 = vld [vmem:[#allocation5 + $0x480] sm:$0xf]  ;;  %v8806_v31 = vor.u32 %v9901_v29, %v8805_v28  ;;  %v10884_v50 = vor.u32 %v9649_v42, %v7807_v43  ;;  %v9897_v56 = vld [vmem:[#allocation5 + $0x66c] sm:$0xf0] }
  0x4c   :  { %2070 = vmatpush.bf16.msrb.mxu1 %v8694_v15  ;;  %14798 = vst [vmem:[#allocation24_spill] sm:$0xff] %v10876_v27  ;;  %v8550_v35 = vor.u32 %v9837_v32, %v8549_v30  ;;  %v8677_v37 = vld [vmem:[#allocation5 + $0x580] sm:$0xf]  ;;  %v9833_v60 = vld [vmem:[#allocation5 + $0x46c] sm:$0xf0]  ;;  %v8026_v0 = vor.u32 %v9703_v61, %v8023_v62 }
  0x4d   :  { %v8678_v39 = vor.u32 %v9869_v38, %v8677_v37  ;;  %14799 = vst [vmem:[#allocation25_spill] sm:$0xff] %v10882_v49  ;;  %v8789_v55 = vld [vmem:[#allocation5 + $0x660] sm:$0xf]  ;;  %v9865_v2 = vld [vmem:[#allocation5 + $0x56c] sm:$0xf0] }
  0x4e   :  { %2120 = vmatpush.bf16.msrb.mxu2 %v8806_v31  ;;  %14800 = vst [vmem:[#allocation26_spill] sm:$0xff] %v10884_v50  ;;  %v8533_v58 = vld [vmem:[#allocation5 + $0x460] sm:$0xf]  ;;  %v8790_v59 = vor.u32 %v9897_v56, %v8789_v55  ;;  %v7833_v4 = vld [vmem:[#allocation2 + $0xa8] sm:$0xf] }
  0x4f   :  { %2022 = vmatpush.bf16.msrb.mxu0 %v8550_v35  ;;  %2169 = vmatpush.bf16.msrb.mxu3 %v8042_v36  ;;  %v8534_v63 = vor.u32 %v9833_v60, %v8533_v58  ;;  %v8661_v1 = vld [vmem:[#allocation5 + $0x560] sm:$0xf]  ;;  %v9659_v5 = vld [vmem:[#allocation2 + $0xc0] sm:$0xf0]  ;;  %v9656_v6 = vld [vmem:[#allocation2 + $0xac] sm:$0xf] }
  0x50   :  { %1836 = vmatmul.bf16.gmra.mxu0 %v10870_v24  ;;  %2071 = vmatpush.bf16.msrb.mxu1 %v8678_v39  ;;  %v8662_v3 = vor.u32 %v9865_v2, %v8661_v1  ;;  %v7835_v7 = vld [vmem:[#allocation2 + $0xc4] sm:$0xf0]  ;;  %v7841_v8 = vld [vmem:[#allocation2 + $0xb0] sm:$0xf]  ;;  %v9660_v9 = vld [vmem:[#allocation2 + $0xc8] sm:$0xf0]  ;;  %v10894_v12 = vor.u32 %v9659_v5, %v7833_v4 }
  0x51   :  { %1885 = vmatmul.bf16.gmra.mxu1 %v10872_v25  ;;  %1934 = vmatmul.bf16.gmra.mxu2 %v10874_v26  ;;  %v9657_v10 = vld [vmem:[#allocation2 + $0xb4] sm:$0xf]  ;;  %v7843_v11 = vld [vmem:[#allocation2 + $0xcc] sm:$0xf0]  ;;  %v10896_v13 = vor.u32 %v9656_v6, %v7835_v7  ;;  %v10898_v14 = vor.u32 %v9660_v9, %v7841_v8  ;;  %v8773_v16 = vld [vmem:[#allocation5 + $0x640] sm:$0xf] }
  0x52   :  { %1983 = vmatmul.bf16.gmra.mxu3 %v10876_v27  ;;  %2121 = vmatpush.bf16.msrb.mxu2 %v8790_v59  ;;  %14803 = vst [vmem:[#allocation29_spill] sm:$0xff] %v10894_v12  ;;  %v10900_v15 = vor.u32 %v9657_v10, %v7843_v11  ;;  %v9893_v17 = vld [vmem:[#allocation5 + $0x64c] sm:$0xf0]  ;;  %v8517_v18 = vld [vmem:[#allocation5 + $0x440] sm:$0xf] }
  0x53   :  { %2023 = vmatpush.bf16.msrb.mxu0 %v8534_v63  ;;  %2170 = vmatpush.bf16.msrb.mxu3 %v8026_v0  ;;  %14804 = vst [vmem:[#allocation30_spill] sm:$0xff] %v10896_v13  ;;  %v8774_v19 = vor.u32 %v9893_v17, %v8773_v16  ;;  %v9829_v20 = vld [vmem:[#allocation5 + $0x44c] sm:$0xf0]  ;;  %v9699_v21 = vld [vmem:[#allocation5 + $0x44] sm:$0xf] }
  0x54   :  { %2072 = vmatpush.bf16.msrb.mxu1 %v8662_v3  ;;  %v8007_v22 = vld [vmem:[#allocation5 + $0x50] sm:$0xf0]  ;;  %v8518_v23 = vor.u32 %v9829_v20, %v8517_v18  ;;  %v8645_v29 = vld [vmem:[#allocation5 + $0x540] sm:$0xf]  ;;  %v9861_v30 = vld [vmem:[#allocation5 + $0x54c] sm:$0xf0] }
  0x55   :  { %v8010_v28 = vor.u32 %v9699_v21, %v8007_v22  ;;  %v8646_v31 = vor.u32 %v9861_v30, %v8645_v29  ;;  %v7861_v32 = vld [vmem:[#allocation2 + $0xe0] sm:$0xf]  ;;  %v9666_v33 = vld [vmem:[#allocation2 + $0xf8] sm:$0xf0]  ;;  %v9663_v34 = vld [vmem:[#allocation2 + $0xe4] sm:$0xf] }
  0x56   :  { %2122 = vmatpush.bf16.msrb.mxu2 %v8774_v19  ;;  %v7863_v35 = vld [vmem:[#allocation2 + $0xfc] sm:$0xf0]  ;;  %v7869_v36 = vld [vmem:[#allocation2 + $0xe8] sm:$0xf]  ;;  %v9667_v37 = vld [vmem:[#allocation2 + $0x100] sm:$0xf0]  ;;  %v10906_v40 = vor.u32 %v9666_v33, %v7861_v32 }
  0x57   :  { %2024 = vmatpush.bf16.msrb.mxu0 %v8518_v23  ;;  %2171 = vmatpush.bf16.msrb.mxu3 %v8010_v28  ;;  %v9664_v38 = vld [vmem:[#allocation2 + $0xec] sm:$0xf]  ;;  %v7871_v39 = vld [vmem:[#allocation2 + $0x104] sm:$0xf0]  ;;  %v10908_v41 = vor.u32 %v9663_v34, %v7863_v35  ;;  %v10910_v42 = vor.u32 %v9667_v37, %v7869_v36  ;;  %v8757_v44 = vld [vmem:[#allocation5 + $0x620] sm:$0xf] }
  0x58   :  { %2073 = vmatpush.bf16.msrb.mxu1 %v8646_v31  ;;  %14805 = vst [vmem:[#allocation31_spill] sm:$0xff] %v10906_v40  ;;  %v10912_v43 = vor.u32 %v9664_v38, %v7871_v39  ;;  %v9889_v45 = vld [vmem:[#allocation5 + $0x62c] sm:$0xf0]  ;;  %v8501_v46 = vld [vmem:[#allocation5 + $0x420] sm:$0xf] }
  0x59   :  { %14806 = vst [vmem:[#allocation32_spill] sm:$0xff] %v10908_v41  ;;  %v8758_v47 = vor.u32 %v9889_v45, %v8757_v44  ;;  %v9825_v55 = vld [vmem:[#allocation5 + $0x42c] sm:$0xf0]  ;;  %v9695_v56 = vld [vmem:[#allocation5 + $0x24] sm:$0xf] }
  0x5a   :  { %14807 = vst [vmem:[#allocation33_spill] sm:$0xff] %v10912_v43  ;;  %v7991_v58 = vld [vmem:[#allocation5 + $0x30] sm:$0xf0]  ;;  %v8502_v59 = vor.u32 %v9825_v55, %v8501_v46  ;;  %v8629_v61 = vld [vmem:[#allocation5 + $0x520] sm:$0xf] }
  0x5b   :  { %v7994_v60 = vor.u32 %v9695_v56, %v7991_v58  ;;  %v9857_v62 = vld [vmem:[#allocation5 + $0x52c] sm:$0xf0]  ;;  %2123 = vmatpush.bf16.msrb.mxu2 %v8758_v47  ;;  %v7889_v0 = vld [vmem:[#allocation2 + $0x118] sm:$0xf]  ;;  %v9673_v1 = vld [vmem:[#allocation2 + $0x130] sm:$0xf0] }
  0x5c   :  { %v8630_v63 = vor.u32 %v9857_v62, %v8629_v61  ;;  %2025 = vmatpush.bf16.msrb.mxu0 %v8502_v59  ;;  %v9670_v2 = vld [vmem:[#allocation2 + $0x11c] sm:$0xf]  ;;  %v7891_v3 = vld [vmem:[#allocation2 + $0x134] sm:$0xf0]  ;;  %v7897_v4 = vld [vmem:[#allocation2 + $0x120] sm:$0xf]  ;;  %v10918_v8 = vor.u32 %v9673_v1, %v7889_v0 }
  0x5d   :  { %2172 = vmatpush.bf16.msrb.mxu3 %v7994_v60  ;;  %v9674_v5 = vld [vmem:[#allocation2 + $0x138] sm:$0xf0]  ;;  %v9671_v6 = vld [vmem:[#allocation2 + $0x124] sm:$0xf]  ;;  %v7899_v7 = vld [vmem:[#allocation2 + $0x13c] sm:$0xf0]  ;;  %v10920_v9 = vor.u32 %v9670_v2, %v7891_v3 }
  0x5e   :  { %2074 = vmatpush.bf16.msrb.mxu1 %v8630_v63  ;;  %14808 = vst [vmem:[#allocation34_spill] sm:$0xff] %v10918_v8  ;;  %v10922_v10 = vor.u32 %v9674_v5, %v7897_v4  ;;  %v10924_v11 = vor.u32 %v9671_v6, %v7899_v7  ;;  %v8741_v16 = vld [vmem:[#allocation5 + $0x600] sm:$0xf]  ;;  %v9885_v17 = vld [vmem:[#allocation5 + $0x60c] sm:$0xf0] }
  0x5f   :  { %14809 = vst [vmem:[#allocation35_spill] sm:$0xff] %v10920_v9  ;;  %v8485_v18 = vld [vmem:[#allocation5 + $0x400] sm:$0xf]  ;;  %v8742_v19 = vor.u32 %v9885_v17, %v8741_v16  ;;  %v9821_v20 = vld [vmem:[#allocation5 + $0x40c] sm:$0xf0] }
  0x60   :  { %1841 = vmatmul.bf16.gmra.mxu0 %v10882_v49  ;;  %14810 = vst [vmem:[#allocation36_spill] sm:$0xff] %v10922_v10  ;;  %v9691_v21 = vld [vmem:[#allocation5 + $0x4] sm:$0xf]  ;;  %v7975_v22 = vld [vmem:[#allocation5 + $0x10] sm:$0xf0]  ;;  %v8486_v23 = vor.u32 %v9821_v20, %v8485_v18 }
  0x61   :  { %1890 = vmatmul.bf16.gmra.mxu1 %v10884_v50  ;;  %1939 = vmatmul.bf16.gmra.mxu2 %v10886_v51  ;;  %14811 = vst [vmem:[#allocation37_spill] sm:$0xff] %v10924_v11  ;;  %v7978_v28 = vor.u32 %v9691_v21, %v7975_v22  ;;  %v8613_v29 = vld [vmem:[#allocation5 + $0x500] sm:$0xf]  ;;  %v9853_v30 = vld [vmem:[#allocation5 + $0x50c] sm:$0xf0] }
  0x62   :  { %1988 = vmatmul.bf16.gmra.mxu3 %v10888_v52  ;;  %2124 = vmatpush.bf16.msrb.mxu2 %v8742_v19  ;;  %v8614_v31 = vor.u32 %v9853_v30, %v8613_v29  ;;  %v7917_v32 = vld [vmem:[#allocation2 + $0x150] sm:$0xf]  ;;  %v9680_v33 = vld [vmem:[#allocation2 + $0x168] sm:$0xf0]  ;;  %v9677_v34 = vld [vmem:[#allocation2 + $0x154] sm:$0xf] }
  0x63   :  { %2026 = vmatpush.bf16.msrb.mxu0 %v8486_v23  ;;  %2173 = vmatpush.bf16.msrb.mxu3 %v7978_v28  ;;  %v7919_v35 = vld [vmem:[#allocation2 + $0x16c] sm:$0xf0]  ;;  %v7925_v36 = vld [vmem:[#allocation2 + $0x158] sm:$0xf]  ;;  %v9681_v37 = vld [vmem:[#allocation2 + $0x170] sm:$0xf0]  ;;  %v10930_v44 = vor.u32 %v9680_v33, %v7917_v32 }
  0x64   :  { %2075 = vmatpush.bf16.msrb.mxu1 %v8614_v31  ;;  %v9678_v38 = vld [vmem:[#allocation2 + $0x15c] sm:$0xf]  ;;  %v7927_v39 = vld [vmem:[#allocation2 + $0x174] sm:$0xf0]  ;;  %v10932_v45 = vor.u32 %v9677_v34, %v7919_v35  ;;  %v10934_v46 = vor.u32 %v9681_v37, %v7925_v36  ;;  %v9815_v55 = vld [vmem:[#allocation5 + $0x3e4] sm:$0xf] }
  0x65   :  { %14812 = vst [vmem:[#allocation38_spill] sm:$0xff] %v10930_v44  ;;  %v10936_v47 = vor.u32 %v9678_v38, %v7927_v39  ;;  %v8471_v56 = vld [vmem:[#allocation5 + $0x3f0] sm:$0xf0]  ;;  %v9751_v58 = vld [vmem:[#allocation5 + $0x1e4] sm:$0xf] }
  0x66   :  { %14813 = vst [vmem:[#allocation39_spill] sm:$0xff] %v10932_v45  ;;  %v8474_v59 = vor.u32 %v9815_v55, %v8471_v56  ;;  %v8215_v60 = vld [vmem:[#allocation5 + $0x1f0] sm:$0xf0]  ;;  %v9847_v61 = vld [vmem:[#allocation5 + $0x4e4] sm:$0xf] }
  0x67   :  { %14814 = vst [vmem:[#allocation40_spill] sm:$0xff] %v10934_v46  ;;  %v8599_v62 = vld [vmem:[#allocation5 + $0x4f0] sm:$0xf0]  ;;  %v8218_v63 = vor.u32 %v9751_v58, %v8215_v60  ;;  %v9783_v1 = vld [vmem:[#allocation5 + $0x2e4] sm:$0xf] }
  0x68   :  { %14815 = vst [vmem:[#allocation41_spill] sm:$0xff] %v10936_v47  ;;  %v8602_v0 = vor.u32 %v9847_v61, %v8599_v62  ;;  %2313 = vmatpush.bf16.msra.mxu2 %v8474_v59  ;;  %v8343_v2 = vld [vmem:[#allocation5 + $0x2f0] sm:$0xf0]  ;;  %v7945_v4 = vld [vmem:[#allocation2 + $0x188] sm:$0xf] }
  0x69   :  { %2215 = vmatpush.bf16.msra.mxu0 %v8218_v63  ;;  %v8346_v3 = vor.u32 %v9783_v1, %v8343_v2  ;;  %v9687_v5 = vld [vmem:[#allocation2 + $0x1a0] sm:$0xf0]  ;;  %v9684_v6 = vld [vmem:[#allocation2 + $0x18c] sm:$0xf]  ;;  %v7947_v7 = vld [vmem:[#allocation2 + $0x1a4] sm:$0xf0] }
  0x6a   :  { %2362 = vmatpush.bf16.msra.mxu3 %v8602_v0  ;;  %v7953_v16 = vld [vmem:[#allocation2 + $0x190] sm:$0xf]  ;;  %v9688_v17 = vld [vmem:[#allocation2 + $0x1a8] sm:$0xf0]  ;;  %v9685_v18 = vld [vmem:[#allocation2 + $0x194] sm:$0xf]  ;;  %v10942_v20 = vor.u32 %v9687_v5, %v7945_v4  ;;  %v10944_v21 = vor.u32 %v9684_v6, %v7947_v7 }
  0x6b   :  { %2264 = vmatpush.bf16.msra.mxu1 %v8346_v3  ;;  %v7955_v19 = vld [vmem:[#allocation2 + $0x1ac] sm:$0xf0]  ;;  %v10946_v22 = vor.u32 %v9688_v17, %v7953_v16  ;;  %v9811_v28 = vld [vmem:[#allocation5 + $0x3c4] sm:$0xf]  ;;  %v8455_v29 = vld [vmem:[#allocation5 + $0x3d0] sm:$0xf0] }
  0x6c   :  { %14816 = vst [vmem:[#allocation42_spill] sm:$0xff] %v10942_v20  ;;  %v10948_v23 = vor.u32 %v9685_v18, %v7955_v19  ;;  %v9747_v30 = vld [vmem:[#allocation5 + $0x1c4] sm:$0xf]  ;;  %v8458_v31 = vor.u32 %v9811_v28, %v8455_v29  ;;  %v8199_v32 = vld [vmem:[#allocation5 + $0x1d0] sm:$0xf0] }
  0x6d   :  { %14817 = vst [vmem:[#allocation43_spill] sm:$0xff] %v10944_v21  ;;  %v9843_v33 = vld [vmem:[#allocation5 + $0x4c4] sm:$0xf]  ;;  %v8583_v34 = vld [vmem:[#allocation5 + $0x4d0] sm:$0xf0]  ;;  %v8202_v35 = vor.u32 %v9747_v30, %v8199_v32 }
  0x6e   :  { %14818 = vst [vmem:[#allocation44_spill] sm:$0xff] %v10946_v22  ;;  %v8586_v36 = vor.u32 %v9843_v33, %v8583_v34  ;;  %v405_v37 = vld [vmem:[#allocation7] sm:$0xf]  ;;  %2314 = vmatpush.bf16.msra.mxu2 %v8458_v31  ;;  %v9779_v38 = vld [vmem:[#allocation5 + $0x2c4] sm:$0xf] }
  0x6f   :  { %14819 = vst [vmem:[#allocation45_spill] sm:$0xff] %v10948_v23  ;;  %2216 = vmatpush.bf16.msra.mxu0 %v8202_v35  ;;  %v8327_v39 = vld [vmem:[#allocation5 + $0x2d0] sm:$0xf0]  ;;  %v10954_v55 = vperm.slane %v405_v37, 0  ;;  %v7765_v58 = vld [vmem:[#allocation2 + $0x10] sm:$0xf] }
  0x70   :  { %1846 = vmatmul.bf16.gmra.mxu0 %v10894_v12  ;;  %2363 = vmatpush.bf16.msra.mxu3 %v8586_v36  ;;  %v8330_v56 = vor.u32 %v9779_v38, %v8327_v39  ;;  %v9640_v59 = vld [vmem:[#allocation2 + $0x28] sm:$0xf0]  ;;  %v9637_v60 = vld [vmem:[#allocation2 + $0x14] sm:$0xf]  ;;  %v7767_v61 = vld [vmem:[#allocation2 + $0x2c] sm:$0xf0] }
  0x71   :  { %1895 = vmatmul.bf16.gmra.mxu1 %v10896_v13  ;;  %1944 = vmatmul.bf16.gmra.mxu2 %v10898_v14  ;;  %v7773_v62 = vld [vmem:[#allocation2 + $0x18] sm:$0xf]  ;;  %v9641_v63 = vld [vmem:[#allocation2 + $0x30] sm:$0xf0]  ;;  %v10956_v0 = vor.u32 %v9640_v59, %v7765_v58  ;;  %v10958_v2 = vor.u32 %v9637_v60, %v7767_v61  ;;  %v9807_v7 = vld [vmem:[#allocation5 + $0x3a4] sm:$0xf] }
  0x72   :  { %1993 = vmatmul.bf16.gmra.mxu3 %v10900_v15  ;;  %2265 = vmatpush.bf16.msra.mxu1 %v8330_v56  ;;  %v10960_v3 = vor.u32 %v9641_v63, %v7773_v62  ;;  %v8439_v16 = vld [vmem:[#allocation5 + $0x3b0] sm:$0xf0]  ;;  %v9743_v17 = vld [vmem:[#allocation5 + $0x1a4] sm:$0xf]  ;;  %v7793_v60 = vld [vmem:[#allocation2 + $0x48] sm:$0xf] }
  0x73   :  { %14820 = vst [vmem:[#allocation46_spill] sm:$0xff] %v10956_v0  ;;  %v8442_v18 = vor.u32 %v9807_v7, %v8439_v16  ;;  %v8183_v19 = vld [vmem:[#allocation5 + $0x1b0] sm:$0xf0]  ;;  %v9839_v28 = vld [vmem:[#allocation5 + $0x4a4] sm:$0xf] }
  0x74   :  { %14821 = vst [vmem:[#allocation47_spill] sm:$0xff] %v10958_v2  ;;  %v8567_v29 = vld [vmem:[#allocation5 + $0x4b0] sm:$0xf0]  ;;  %v8186_v31 = vor.u32 %v9743_v17, %v8183_v19  ;;  %v9775_v39 = vld [vmem:[#allocation5 + $0x2a4] sm:$0xf] }
  0x75   :  { %14822 = vst [vmem:[#allocation48_spill] sm:$0xff] %v10960_v3  ;;  %v8570_v32 = vor.u32 %v9839_v28, %v8567_v29  ;;  %2315 = vmatpush.bf16.msra.mxu2 %v8442_v18  ;;  %v8311_v56 = vld [vmem:[#allocation5 + $0x2b0] sm:$0xf0]  ;;  %v9647_v61 = vld [vmem:[#allocation2 + $0x60] sm:$0xf0] }
  0x76   :  { %2217 = vmatpush.bf16.msra.mxu0 %v8186_v31  ;;  %v8314_v59 = vor.u32 %v9775_v39, %v8311_v56  ;;  %v9644_v62 = vld [vmem:[#allocation2 + $0x4c] sm:$0xf]  ;;  %v7795_v63 = vld [vmem:[#allocation2 + $0x64] sm:$0xf0]  ;;  %v8551_v39 = vld [vmem:[#allocation5 + $0x490] sm:$0xf0] }
  0x77   :  { %2364 = vmatpush.bf16.msra.mxu3 %v8570_v32  ;;  %v10972_v18 = vor.u32 %v9644_v62, %v7795_v63  ;;  %v9803_v32 = vld [vmem:[#allocation5 + $0x384] sm:$0xf] }
  0x78   :  { %2266 = vmatpush.bf16.msra.mxu1 %v8314_v59 }
  0x79   :  { %14824 = vst [vmem:[#allocation50_spill] sm:$0xff] %v10972_v18 }
  0x80   :  { %1851 = vmatmul.bf16.gmra.mxu0 %v10906_v40 }
  0x81   :  { %1900 = vmatmul.bf16.gmra.mxu1 %v10908_v41  ;;  %1949 = vmatmul.bf16.gmra.mxu2 %v10910_v42 }
  0x82   :  { %1998 = vmatmul.bf16.gmra.mxu3 %v10912_v43 }
  0x90   :  { %1856 = vmatmul.bf16.gmra.mxu0 %v10918_v8 }
  0x91   :  { %1905 = vmatmul.bf16.gmra.mxu1 %v10920_v9  ;;  %1954 = vmatmul.bf16.gmra.mxu2 %v10922_v10 }
  0x92   :  { %2003 = vmatmul.bf16.gmra.mxu3 %v10924_v11 }
  0xa0   :  { %1861 = vmatmul.bf16.gmra.mxu0 %v10930_v44 }
  0xa1   :  { %1910 = vmatmul.bf16.gmra.mxu1 %v10932_v45  ;;  %1959 = vmatmul.bf16.gmra.mxu2 %v10934_v46 }
  0xa2   :  { %2008 = vmatmul.bf16.gmra.mxu3 %v10936_v47 }
  0xb0   :  { %1866 = vmatmul.bf16.gmra.mxu0 %v10942_v20 }
  0xb1   :  { %1915 = vmatmul.bf16.gmra.mxu1 %v10944_v21  ;;  %1964 = vmatmul.bf16.gmra.mxu2 %v10946_v22  ;;  %v7969_v22 = vld [vmem:[#allocation2 + $0x1a0] sm:$0xf]  ;;  %v9690_v21 = vld [vmem:[#allocation2 + $0x1b8] sm:$0xf0] }
  0xb2   :  { %2013 = vmatmul.bf16.gmra.mxu3 %v10948_v23  ;;  %v9679_v23 = vld [vmem:[#allocation2 + $0x164] sm:$0xf] }
  0xbd   :  { %v1832_v1 = vpop.f32.mrf.mxu0 }
  0xbe   :  { %v1833_v4 = vadd.f32 %v1832_v1, %v10954_v55  ;;  %v1881_v5 = vpop.f32.mrf.mxu1  ;;  %v7801_v1 = vld [vmem:[#allocation2 + $0x50] sm:$0xf] }
  0xc0   :  { %v1882_v6 = vadd.f32 %v1881_v5, %v1833_v4  ;;  %2027 = vmatmul.bf16.vlgmr.msrb.gmra.mxu0 %v10956_v0  ;;  %v9648_v4 = vld [vmem:[#allocation2 + $0x68] sm:$0xf0] }
  0xc1   :  { %2076 = vmatmul.bf16.vlgmr.msrb.gmra.mxu1 %v10958_v2  ;;  %2125 = vmatmul.bf16.vlgmr.msrb.gmra.mxu2 %v10960_v3  ;;  %v10974_v19 = vor.u32 %v9648_v4, %v7801_v1  ;;  %v9672_v3 = vld [vmem:[#allocation2 + $0x12c] sm:$0xf]  ;;  %v9682_v2 = vld [vmem:[#allocation2 + $0x178] sm:$0xf0] }
  0xc2   :  { %2174 = vmatmul.bf16.vlgmr.msrb.gmra.mxu3 %v10858_v48  ;;  %v9675_v48 = vld [vmem:[#allocation2 + $0x140] sm:$0xf0] }
  0xc3   :  { %14825 = vst [vmem:[#allocation51_spill] sm:$0xff] %v10974_v19 }
  0xc4   :  { %v1930_v30 = vpop.f32.mrf.mxu2 }
  0xc5   :  { %v1931_v33 = vadd.f32 %v1930_v30, %v1882_v6  ;;  %v1979_v34 = vpop.f32.mrf.mxu3  ;;  %v1834_v35 = vpop.f32.mrf.mxu0  ;;  %v10970_v6 = vor.u32 %v9647_v61, %v7793_v60 }
  0xc6   :  { %v1835_v36 = vadd.f32 %v1834_v35, %v10954_v55  ;;  %v1883_v37 = vpop.f32.mrf.mxu1 }
  0xc7   :  { %v10968_v38 = vadd.f32 %v1979_v34, %v1931_v33  ;;  %14823 = vst [vmem:[#allocation49_spill] sm:$0xff] %v10970_v6  ;;  %v8423_v33 = vld [vmem:[#allocation5 + $0x390] sm:$0xf0]  ;;  %v9739_v34 = vld [vmem:[#allocation5 + $0x184] sm:$0xf] }
  0xc8   :  { %v1884_v58 = vadd.f32 %v1883_v37, %v1835_v36  ;;  %v8426_v35 = vor.u32 %v9803_v32, %v8423_v33  ;;  %v8167_v36 = vld [vmem:[#allocation5 + $0x190] sm:$0xf0]  ;;  %v9835_v37 = vld [vmem:[#allocation5 + $0x484] sm:$0xf]  ;;  %v7823_v33 = vld [vmem:[#allocation2 + $0x9c] sm:$0xf0] }
  0xc9   :  { %v8554_v59 = vor.u32 %v9835_v37, %v8551_v39  ;;  %v9651_v32 = vld [vmem:[#allocation2 + $0x84] sm:$0xf] }
  0xca   :  { %2316 = vmatpush.bf16.msra.mxu2 %v8426_v35 }
  0xcb   :  { %2365 = vmatpush.bf16.msra.mxu3 %v8554_v59 }
  0xcc   :  { %v1932_v5 = vpop.f32.mrf.mxu2 }
  0xcd   :  { %v1933_v7 = vadd.f32 %v1932_v5, %v1884_v58  ;;  %v1981_v16 = vpop.f32.mrf.mxu3  ;;  %v1837_v17 = vpop.f32.mrf.mxu0  ;;  %v8170_v58 = vor.u32 %v9739_v34, %v8167_v36  ;;  %v9771_v5 = vld [vmem:[#allocation5 + $0x284] sm:$0xf]  ;;  %v7829_v34 = vld [vmem:[#allocation2 + $0x88] sm:$0xf] }
  0xce   :  { %v1838_v28 = vadd.f32 %v1837_v17, %v10954_v55  ;;  %v1886_v29 = vpop.f32.mrf.mxu1 }
  0xcf   :  { %v10977_v30 = vadd.f32 %v1981_v16, %v1933_v7  ;;  %2218 = vmatpush.bf16.msra.mxu0 %v8170_v58  ;;  %v8295_v7 = vld [vmem:[#allocation5 + $0x290] sm:$0xf0]  ;;  %v10988_v58 = vor.u32 %v9651_v32, %v7823_v33 }
  0xd0   :  { %v1887_v31 = vadd.f32 %v1886_v29, %v1838_v28  ;;  %2032 = vmatmul.bf16.gmra.mxu0 %v10970_v6  ;;  %v8298_v17 = vor.u32 %v9771_v5, %v8295_v7  ;;  %v7821_v28 = vld [vmem:[#allocation2 + $0x80] sm:$0xf]  ;;  %v9654_v29 = vld [vmem:[#allocation2 + $0x98] sm:$0xf0]  ;;  %v8407_v5 = vld [vmem:[#allocation5 + $0x370] sm:$0xf0] }
  0xd1   :  { %2081 = vmatmul.bf16.gmra.mxu1 %v10972_v18  ;;  %2130 = vmatmul.bf16.gmra.mxu2 %v10974_v19  ;;  %v10986_v35 = vor.u32 %v9654_v29, %v7821_v28  ;;  %14827 = vst [vmem:[#allocation53_spill] sm:$0xff] %v10988_v58  ;;  %v9735_v7 = vld [vmem:[#allocation5 + $0x164] sm:$0xf]  ;;  %v8535_v29 = vld [vmem:[#allocation5 + $0x470] sm:$0xf0] }
  0xd2   :  { %2179 = vmatmul.bf16.gmra.mxu3 %v10870_v24  ;;  %2267 = vmatpush.bf16.msra.mxu1 %v8298_v17  ;;  %v8151_v17 = vld [vmem:[#allocation5 + $0x170] sm:$0xf0]  ;;  %v9831_v28 = vld [vmem:[#allocation5 + $0x464] sm:$0xf]  ;;  %v9658_v24 = vld [vmem:[#allocation2 + $0xbc] sm:$0xf] }
  0xd3   :  { %14826 = vst [vmem:[#allocation52_spill] sm:$0xff] %v10986_v35  ;;  %v8154_v33 = vor.u32 %v9735_v7, %v8151_v17  ;;  %v7851_v7 = vld [vmem:[#allocation2 + $0xd4] sm:$0xf0]  ;;  %v7857_v17 = vld [vmem:[#allocation2 + $0xc0] sm:$0xf] }
  0xd4   :  { %v1935_v56 = vpop.f32.mrf.mxu2  ;;  %v9668_v19 = vld [vmem:[#allocation2 + $0x108] sm:$0xf0]  ;;  %v9665_v18 = vld [vmem:[#allocation2 + $0xf4] sm:$0xf] }
  0xd5   :  { %v1936_v60 = vadd.f32 %v1935_v56, %v1887_v31  ;;  %v1984_v61 = vpop.f32.mrf.mxu3  ;;  %v1839_v62 = vpop.f32.mrf.mxu0  ;;  %v9655_v31 = vld [vmem:[#allocation2 + $0xa0] sm:$0xf0]  ;;  %2219 = vmatpush.bf16.msra.mxu0 %v8154_v33 }
  0xd6   :  { %v1840_v63 = vadd.f32 %v1839_v62, %v10954_v55  ;;  %v1888_v1 = vpop.f32.mrf.mxu1  ;;  %v10990_v59 = vor.u32 %v9655_v31, %v7829_v34  ;;  %v8538_v34 = vor.u32 %v9831_v28, %v8535_v29 }
  0xd7   :  { %v10984_v4 = vadd.f32 %v1984_v61, %v1936_v60 }
  0xd8   :  { %v1889_v16 = vadd.f32 %v1888_v1, %v1840_v63  ;;  %14828 = vst [vmem:[#allocation54_spill] sm:$0xff] %v10990_v59  ;;  %v9799_v1 = vld [vmem:[#allocation5 + $0x364] sm:$0xf]  ;;  %2366 = vmatpush.bf16.msra.mxu3 %v8538_v34  ;;  %v11004_v34 = vor.u32 %v9658_v24, %v7851_v7 }
  0xd9   :  { %v9731_v24 = vld [vmem:[#allocation5 + $0x144] sm:$0xf] }
  0xda   :  { %14829 = vst [vmem:[#allocation55_spill] sm:$0xff] %v11004_v34 }
  0xdc   :  { %v1937_v36 = vpop.f32.mrf.mxu2 }
  0xdd   :  { %v1938_v37 = vadd.f32 %v1937_v36, %v1889_v16  ;;  %v1986_v39 = vpop.f32.mrf.mxu3  ;;  %v1842_v56 = vpop.f32.mrf.mxu0  ;;  %v8410_v16 = vor.u32 %v9799_v1, %v8407_v5 }
  0xde   :  { %v1843_v60 = vadd.f32 %v1842_v56, %v10954_v55  ;;  %v1891_v61 = vpop.f32.mrf.mxu1 }
  0xdf   :  { %v10993_v62 = vadd.f32 %v1986_v39, %v1938_v37  ;;  %2317 = vmatpush.bf16.msra.mxu2 %v8410_v16 }
  0xe0   :  { %v1892_v63 = vadd.f32 %v1891_v61, %v1843_v60  ;;  %2037 = vmatmul.bf16.gmra.mxu0 %v10986_v35  ;;  %v9767_v61 = vld [vmem:[#allocation5 + $0x264] sm:$0xf] }
  0xe1   :  { %2086 = vmatmul.bf16.gmra.mxu1 %v10988_v58  ;;  %2135 = vmatmul.bf16.gmra.mxu2 %v10990_v59  ;;  %v7849_v59 = vld [vmem:[#allocation2 + $0xb8] sm:$0xf]  ;;  %v9661_v58 = vld [vmem:[#allocation2 + $0xd0] sm:$0xf0] }
  0xe2   :  { %2184 = vmatmul.bf16.gmra.mxu3 %v10882_v49  ;;  %v8279_v49 = vld [vmem:[#allocation5 + $0x270] sm:$0xf0]  ;;  %v11002_v16 = vor.u32 %v9661_v58, %v7849_v59  ;;  %v9795_v58 = vld [vmem:[#allocation5 + $0x344] sm:$0xf] }
  0xe3   :  { %v8282_v5 = vor.u32 %v9767_v61, %v8279_v49  ;;  %v8391_v59 = vld [vmem:[#allocation5 + $0x350] sm:$0xf0] }
  0xe4   :  { %v1940_v32 = vpop.f32.mrf.mxu2  ;;  %v8135_v61 = vld [vmem:[#allocation5 + $0x150] sm:$0xf0] }
  0xe5   :  { %v1941_v31 = vadd.f32 %v1940_v32, %v1892_v63  ;;  %v1989_v36 = vpop.f32.mrf.mxu3  ;;  %v1844_v37 = vpop.f32.mrf.mxu0  ;;  %v9662_v63 = vld [vmem:[#allocation2 + $0xd8] sm:$0xf0]  ;;  %2268 = vmatpush.bf16.msra.mxu1 %v8282_v5  ;;  %v8519_v5 = vld [vmem:[#allocation5 + $0x450] sm:$0xf0] }
  0xe6   :  { %v1845_v39 = vadd.f32 %v1844_v37, %v10954_v55  ;;  %v1893_v56 = vpop.f32.mrf.mxu1 }
  0xe7   :  { %v11000_v60 = vadd.f32 %v1989_v36, %v1941_v31  ;;  %v11006_v31 = vor.u32 %v9662_v63, %v7857_v17  ;;  %v8138_v17 = vor.u32 %v9731_v24, %v8135_v61  ;;  %v7879_v24 = vld [vmem:[#allocation2 + $0x10c] sm:$0xf0]  ;;  %v7885_v61 = vld [vmem:[#allocation2 + $0xf8] sm:$0xf] }
  0xe8   :  { %v1894_v1 = vadd.f32 %v1893_v56, %v1845_v39  ;;  %v8394_v56 = vor.u32 %v9795_v58, %v8391_v59 }
  0xe9   :  { %14830 = vst [vmem:[#allocation56_spill] sm:$0xff] %v11006_v31  ;;  %2220 = vmatpush.bf16.msra.mxu0 %v8138_v17 }
  0xea   :  { %2318 = vmatpush.bf16.msra.mxu2 %v8394_v56 }
  0xec   :  { %v1942_v28 = vpop.f32.mrf.mxu2 }
  0xed   :  { %v1943_v29 = vadd.f32 %v1942_v28, %v1894_v1  ;;  %v1991_v32 = vpop.f32.mrf.mxu3  ;;  %v1847_v33 = vpop.f32.mrf.mxu0  ;;  %v9827_v1 = vld [vmem:[#allocation5 + $0x444] sm:$0xf] }
  0xee   :  { %v1848_v36 = vadd.f32 %v1847_v33, %v10954_v55  ;;  %v1896_v49 = vpop.f32.mrf.mxu1  ;;  %v8522_v63 = vor.u32 %v9827_v1, %v8519_v5 }
  0xef   :  { %v11009_v37 = vadd.f32 %v1991_v32, %v1943_v29 }
  0xf0   :  { %v1897_v39 = vadd.f32 %v1896_v49, %v1848_v36  ;;  %2042 = vmatmul.bf16.gmra.mxu0 %v11002_v16  ;;  %2367 = vmatpush.bf16.msra.mxu3 %v8522_v63  ;;  %v11020_v63 = vor.u32 %v9665_v18, %v7879_v24  ;;  %v9727_v18 = vld [vmem:[#allocation5 + $0x124] sm:$0xf] }
  0xf1   :  { %2091 = vmatmul.bf16.gmra.mxu1 %v11004_v34  ;;  %2140 = vmatmul.bf16.gmra.mxu2 %v11006_v31  ;;  %v8263_v31 = vld [vmem:[#allocation5 + $0x250] sm:$0xf0]  ;;  %v7877_v34 = vld [vmem:[#allocation2 + $0xf0] sm:$0xf] }
  0xf2   :  { %2189 = vmatmul.bf16.gmra.mxu3 %v10894_v12  ;;  %v9763_v12 = vld [vmem:[#allocation5 + $0x244] sm:$0xf]  ;;  %v11018_v56 = vor.u32 %v9668_v19, %v7877_v34  ;;  %14832 = vst [vmem:[#allocation58_spill] sm:$0xff] %v11020_v63  ;;  %v8375_v34 = vld [vmem:[#allocation5 + $0x330] sm:$0xf0] }
  0xf3   :  { %v8266_v59 = vor.u32 %v9763_v12, %v8263_v31  ;;  %v9791_v19 = vld [vmem:[#allocation5 + $0x324] sm:$0xf] }
  0xf4   :  { %v1945_v7 = vpop.f32.mrf.mxu2  ;;  %14831 = vst [vmem:[#allocation57_spill] sm:$0xff] %v11018_v56 }
  0xf5   :  { %v1946_v28 = vadd.f32 %v1945_v7, %v1897_v39  ;;  %v1994_v29 = vpop.f32.mrf.mxu3  ;;  %v1849_v32 = vpop.f32.mrf.mxu0  ;;  %v9669_v39 = vld [vmem:[#allocation2 + $0x110] sm:$0xf0]  ;;  %2269 = vmatpush.bf16.msra.mxu1 %v8266_v59 }
  0xf6   :  { %v1850_v33 = vadd.f32 %v1849_v32, %v10954_v55  ;;  %v1898_v36 = vpop.f32.mrf.mxu1  ;;  %v8503_v59 = vld [vmem:[#allocation5 + $0x430] sm:$0xf0] }
  0xf7   :  { %v11016_v49 = vadd.f32 %v1994_v29, %v1946_v28  ;;  %v11022_v28 = vor.u32 %v9669_v39, %v7885_v61 }
  0xf8   :  { %v1899_v58 = vadd.f32 %v1898_v36, %v1850_v33  ;;  %v8378_v33 = vor.u32 %v9791_v19, %v8375_v34  ;;  %v8119_v36 = vld [vmem:[#allocation5 + $0x130] sm:$0xf0] }
  0xf9   :  { %14833 = vst [vmem:[#allocation59_spill] sm:$0xff] %v11022_v28  ;;  %v8122_v61 = vor.u32 %v9727_v18, %v8119_v36  ;;  %v7907_v18 = vld [vmem:[#allocation2 + $0x144] sm:$0xf0]  ;;  %v7913_v36 = vld [vmem:[#allocation2 + $0x130] sm:$0xf] }
  0xfa   :  { %2319 = vmatpush.bf16.msra.mxu2 %v8378_v33 }
  0xfb   :  { %2221 = vmatpush.bf16.msra.mxu0 %v8122_v61 }
  0xfc   :  { %v1947_v1 = vpop.f32.mrf.mxu2 }
  0xfd   :  { %v1948_v5 = vadd.f32 %v1947_v1, %v1899_v58  ;;  %v1996_v7 = vpop.f32.mrf.mxu3  ;;  %v1852_v17 = vpop.f32.mrf.mxu0  ;;  %v9823_v58 = vld [vmem:[#allocation5 + $0x424] sm:$0xf] }
  0xfe   :  { %v1853_v29 = vadd.f32 %v1852_v17, %v10954_v55  ;;  %v1901_v12 = vpop.f32.mrf.mxu1  ;;  %v8506_v39 = vor.u32 %v9823_v58, %v8503_v59 }
  0xff   :  { %v11025_v31 = vadd.f32 %v1996_v7, %v1948_v5 }
 0x100   :  { %v1902_v32 = vadd.f32 %v1901_v12, %v1853_v29  ;;  %2047 = vmatmul.bf16.gmra.mxu0 %v11018_v56  ;;  %2368 = vmatpush.bf16.msra.mxu3 %v8506_v39  ;;  %v11036_v39 = vor.u32 %v9672_v3, %v7907_v18  ;;  %v9723_v3 = vld [vmem:[#allocation5 + $0x104] sm:$0xf] }
 0x101   :  { %2096 = vmatmul.bf16.gmra.mxu1 %v11020_v63  ;;  %2145 = vmatmul.bf16.gmra.mxu2 %v11022_v28  ;;  %v8247_v28 = vld [vmem:[#allocation5 + $0x230] sm:$0xf0]  ;;  %v7905_v63 = vld [vmem:[#allocation2 + $0x128] sm:$0xf] }
 0x102   :  { %2194 = vmatmul.bf16.gmra.mxu3 %v10906_v40  ;;  %v9759_v40 = vld [vmem:[#allocation5 + $0x224] sm:$0xf]  ;;  %v11034_v33 = vor.u32 %v9675_v48, %v7905_v63  ;;  %14835 = vst [vmem:[#allocation61_spill] sm:$0xff] %v11036_v39  ;;  %v8359_v63 = vld [vmem:[#allocation5 + $0x310] sm:$0xf0] }
 0x103   :  { %v8250_v34 = vor.u32 %v9759_v40, %v8247_v28  ;;  %v9787_v48 = vld [vmem:[#allocation5 + $0x304] sm:$0xf] }
 0x104   :  { %v1950_v24 = vpop.f32.mrf.mxu2  ;;  %14834 = vst [vmem:[#allocation60_spill] sm:$0xff] %v11034_v33 }
 0x105   :  { %v1951_v1 = vadd.f32 %v1950_v24, %v1902_v32  ;;  %v1999_v5 = vpop.f32.mrf.mxu3  ;;  %v1854_v7 = vpop.f32.mrf.mxu0  ;;  %v9676_v32 = vld [vmem:[#allocation2 + $0x148] sm:$0xf0]  ;;  %2270 = vmatpush.bf16.msra.mxu1 %v8250_v34  ;;  %v8487_v34 = vld [vmem:[#allocation5 + $0x410] sm:$0xf0] }
 0x106   :  { %v1855_v17 = vadd.f32 %v1854_v7, %v10954_v55  ;;  %v1903_v29 = vpop.f32.mrf.mxu1 }
 0x107   :  { %v11032_v12 = vadd.f32 %v1999_v5, %v1951_v1  ;;  %v11038_v1 = vor.u32 %v9676_v32, %v7913_v36 }
 0x108   :  { %v1904_v19 = vadd.f32 %v1903_v29, %v1855_v17  ;;  %v8362_v17 = vor.u32 %v9787_v48, %v8359_v63  ;;  %v8103_v29 = vld [vmem:[#allocation5 + $0x110] sm:$0xf0] }
 0x109   :  { %14836 = vst [vmem:[#allocation62_spill] sm:$0xff] %v11038_v1  ;;  %v8106_v36 = vor.u32 %v9723_v3, %v8103_v29  ;;  %v7935_v3 = vld [vmem:[#allocation2 + $0x17c] sm:$0xf0]  ;;  %v7941_v29 = vld [vmem:[#allocation2 + $0x168] sm:$0xf] }
 0x10a   :  { %2320 = vmatpush.bf16.msra.mxu2 %v8362_v17 }
 0x10b   :  { %2222 = vmatpush.bf16.msra.mxu0 %v8106_v36 }
 0x10c   :  { %v1952_v58 = vpop.f32.mrf.mxu2 }
 0x10d   :  { %v1953_v59 = vadd.f32 %v1952_v58, %v1904_v19  ;;  %v2001_v24 = vpop.f32.mrf.mxu3  ;;  %v1857_v61 = vpop.f32.mrf.mxu0  ;;  %v9819_v19 = vld [vmem:[#allocation5 + $0x404] sm:$0xf] }
 0x10e   :  { %v1858_v5 = vadd.f32 %v1857_v61, %v10954_v55  ;;  %v1906_v40 = vpop.f32.mrf.mxu1  ;;  %v8490_v32 = vor.u32 %v9819_v19, %v8487_v34 }
 0x10f   :  { %v11041_v28 = vadd.f32 %v2001_v24, %v1953_v59 }
 0x110   :  { %v1907_v7 = vadd.f32 %v1906_v40, %v1858_v5  ;;  %2052 = vmatmul.bf16.gmra.mxu0 %v11034_v33  ;;  %2369 = vmatpush.bf16.msra.mxu3 %v8490_v32  ;;  %v11052_v32 = vor.u32 %v9679_v23, %v7935_v3  ;;  %v9879_v23 = vld [vmem:[#allocation5 + $0x5e4] sm:$0xf] }
 0x111   :  { %2101 = vmatmul.bf16.gmra.mxu1 %v11036_v39  ;;  %2150 = vmatmul.bf16.gmra.mxu2 %v11038_v1  ;;  %v8231_v1 = vld [vmem:[#allocation5 + $0x210] sm:$0xf0]  ;;  %v7933_v39 = vld [vmem:[#allocation2 + $0x160] sm:$0xf] }
 0x112   :  { %2199 = vmatmul.bf16.gmra.mxu3 %v10918_v8  ;;  %v9755_v8 = vld [vmem:[#allocation5 + $0x204] sm:$0xf]  ;;  %v11050_v17 = vor.u32 %v9682_v2, %v7933_v39  ;;  %14838 = vst [vmem:[#allocation64_spill] sm:$0xff] %v11052_v32  ;;  %v8093_v2 = vld [vmem:[#allocation5 + $0xe8] sm:$0xf] }
 0x113   :  { %v8234_v63 = vor.u32 %v9755_v8, %v8231_v1  ;;  %v9722_v39 = vld [vmem:[#allocation5 + $0xf4] sm:$0xf0] }
 0x114   :  { %v1955_v18 = vpop.f32.mrf.mxu2  ;;  %14837 = vst [vmem:[#allocation63_spill] sm:$0xff] %v11050_v17 }
 0x115   :  { %v1956_v58 = vadd.f32 %v1955_v18, %v1907_v7  ;;  %v2004_v59 = vpop.f32.mrf.mxu3  ;;  %v1859_v24 = vpop.f32.mrf.mxu0  ;;  %v9683_v7 = vld [vmem:[#allocation2 + $0x180] sm:$0xf0]  ;;  %2271 = vmatpush.bf16.msra.mxu1 %v8234_v63  ;;  %v9754_v63 = vld [vmem:[#allocation5 + $0x1f4] sm:$0xf0] }
 0x116   :  { %v1860_v61 = vadd.f32 %v1859_v24, %v10954_v55  ;;  %v1908_v5 = vpop.f32.mrf.mxu1 }
 0x117   :  { %v11048_v40 = vadd.f32 %v2004_v59, %v1956_v58  ;;  %v11054_v58 = vor.u32 %v9683_v7, %v7941_v29 }
 0x118   :  { %v1909_v48 = vadd.f32 %v1908_v5, %v1860_v61  ;;  %v8094_v61 = vor.u32 %v9722_v39, %v8093_v2  ;;  %v8727_v5 = vld [vmem:[#allocation5 + $0x5f0] sm:$0xf0]  ;;  %v9686_v39 = vld [vmem:[#allocation2 + $0x19c] sm:$0xf] }
 0x119   :  { %14839 = vst [vmem:[#allocation65_spill] sm:$0xff] %v11054_v58  ;;  %v8730_v29 = vor.u32 %v9879_v23, %v8727_v5  ;;  %v9689_v2 = vld [vmem:[#allocation2 + $0x1b0] sm:$0xf0] }
 0x11a   :  { %2509 = vmatpush.bf16.msrb.mxu2 %v8094_v61 }
 0x11b   :  { %2411 = vmatpush.bf16.msrb.mxu0 %v8730_v29 }
 0x11c   :  { %v1957_v19 = vpop.f32.mrf.mxu2 }
 0x11d   :  { %v1958_v34 = vadd.f32 %v1957_v19, %v1909_v48  ;;  %v2006_v18 = vpop.f32.mrf.mxu3  ;;  %v1862_v36 = vpop.f32.mrf.mxu0  ;;  %v8221_v48 = vld [vmem:[#allocation5 + $0x1e8] sm:$0xf] }
 0x11e   :  { %v1863_v59 = vadd.f32 %v1862_v36, %v10954_v55  ;;  %v1911_v8 = vpop.f32.mrf.mxu1  ;;  %v8222_v7 = vor.u32 %v9754_v63, %v8221_v48 }
 0x11f   :  { %v11057_v1 = vadd.f32 %v2006_v18, %v1958_v34 }
 0x120   :  { %v1912_v24 = vadd.f32 %v1911_v8, %v1863_v59  ;;  %2057 = vmatmul.bf16.gmra.mxu0 %v11050_v17  ;;  %2558 = vmatpush.bf16.msrb.mxu3 %v8222_v7 }
 0x121   :  { %2106 = vmatmul.bf16.gmra.mxu1 %v11052_v32  ;;  %2155 = vmatmul.bf16.gmra.mxu2 %v11054_v58  ;;  %v7961_v58 = vld [vmem:[#allocation2 + $0x198] sm:$0xf] }
 0x122   :  { %2204 = vmatmul.bf16.gmra.mxu3 %v10930_v44  ;;  %v7963_v32 = vld [vmem:[#allocation2 + $0x1b4] sm:$0xf0]  ;;  %v11066_v5 = vor.u32 %v9689_v2, %v7961_v58 }
 0x123   :  { %v11068_v63 = vor.u32 %v9686_v39, %v7963_v32 }
 0x124   :  { %v1960_v3 = vpop.f32.mrf.mxu2  ;;  %14840 = vst [vmem:[#allocation66_spill] sm:$0xff] %v11066_v5 }
 0x125   :  { %v1961_v19 = vadd.f32 %v1960_v3, %v1912_v24  ;;  %v2009_v34 = vpop.f32.mrf.mxu3  ;;  %v1864_v18 = vpop.f32.mrf.mxu0  ;;  %v11070_v3 = vor.u32 %v9690_v21, %v7969_v22 }
 0x126   :  { %v1865_v36 = vadd.f32 %v1864_v18, %v10954_v55  ;;  %v1913_v59 = vpop.f32.mrf.mxu1 }
 0x127   :  { %v11064_v8 = vadd.f32 %v2009_v34, %v1961_v19  ;;  %14841 = vst [vmem:[#allocation67_spill] sm:$0xff] %v11070_v3 }
 0x128   :  { %v1914_v44 = vadd.f32 %v1913_v59, %v1865_v36 }
 0x12c   :  { %v1962_v23 = vpop.f32.mrf.mxu2 }
 0x12d   :  { %v1963_v24 = vadd.f32 %v1962_v23, %v1914_v44  ;;  %v2011_v48 = vpop.f32.mrf.mxu3  ;;  %v1867_v61 = vpop.f32.mrf.mxu0 }
 0x12e   :  { %v1868_v29 = vadd.f32 %v1867_v61, %v10954_v55  ;;  %v1916_v7 = vpop.f32.mrf.mxu1  ;;  %v8855_v61 = vld [vmem:[#allocation5 + $0x6f0] sm:$0xf0] }
 0x12f   :  { %v11073_v19 = vadd.f32 %v2011_v48, %v1963_v24  ;;  %v9911_v48 = vld [vmem:[#allocation5 + $0x6e4] sm:$0xf] }
 0x130   :  { %v1917_v34 = vadd.f32 %v1916_v7, %v1868_v29  ;;  %2062 = vmatmul.bf16.gmra.mxu0 %v11066_v5 }
 0x131   :  { %2111 = vmatmul.bf16.gmra.mxu1 %v11068_v63  ;;  %2160 = vmatmul.bf16.gmra.mxu2 %v11070_v3 }
 0x132   :  { %2209 = vmatmul.bf16.gmra.mxu3 %v10942_v20  ;;  %v8858_v20 = vor.u32 %v9911_v48, %v8855_v61 }
 0x134   :  { %v1965_v44 = vpop.f32.mrf.mxu2  ;;  %2460 = vmatpush.bf16.msrb.mxu1 %v8858_v20  ;;  %v8205_v20 = vld [vmem:[#allocation5 + $0x1c8] sm:$0xf] }
 0x135   :  { %v1966_v58 = vadd.f32 %v1965_v44, %v1917_v34  ;;  %v2014_v32 = vpop.f32.mrf.mxu3  ;;  %v1869_v18 = vpop.f32.mrf.mxu0 }
 0x136   :  { %v1870_v21 = vadd.f32 %v1869_v18, %v10954_v55  ;;  %v1918_v22 = vpop.f32.mrf.mxu1  ;;  %v9718_v18 = vld [vmem:[#allocation5 + $0xd4] sm:$0xf0] }
 0x137   :  { %v11080_v36 = vadd.f32 %v2014_v32, %v1966_v58 }
 0x138   :  { %v1919_v59 = vadd.f32 %v1918_v22, %v1870_v21  ;;  %v9875_v21 = vld [vmem:[#allocation5 + $0x5c4] sm:$0xf] }
 0x13c   :  { %v1967_v2 = vpop.f32.mrf.mxu2 }
 0x13d   :  { %v1968_v39 = vadd.f32 %v1967_v2, %v1919_v59  ;;  %v2016_v23 = vpop.f32.mrf.mxu3  ;;  %v2028_v24 = vpop.f32.mrf.mxu0 }
 0x13e   :  { %v2029_v29 = vadd.f32 %v2028_v24, %v10968_v38  ;;  %v2077_v7 = vpop.f32.mrf.mxu1  ;;  %v8077_v38 = vld [vmem:[#allocation5 + $0xc8] sm:$0xf] }
 0x13f   :  { %v11083_v3 = vadd.f32 %v2016_v23, %v1968_v39  ;;  %v8078_v2 = vor.u32 %v9718_v18, %v8077_v38  ;;  %v8711_v39 = vld [vmem:[#allocation5 + $0x5d0] sm:$0xf0]  ;;  %v9750_v23 = vld [vmem:[#allocation5 + $0x1d4] sm:$0xf0] }
 0x140   :  { %v2078_v34 = vadd.f32 %v2077_v7, %v2029_v29  ;;  %2223 = vmatmul.bf16.vlgmr.msra.gmra.mxu0 %v10860_v53  ;;  %v8714_v48 = vor.u32 %v9875_v21, %v8711_v39  ;;  %v8206_v61 = vor.u32 %v9750_v23, %v8205_v20  ;;  %v9907_v7 = vld [vmem:[#allocation5 + $0x6c4] sm:$0xf]  ;;  %v8189_v20 = vld [vmem:[#allocation5 + $0x1a8] sm:$0xf] }
 0x141   :  { %2272 = vmatmul.bf16.vlgmr.msra.gmra.mxu1 %v10862_v54  ;;  %2321 = vmatmul.bf16.vlgmr.msra.gmra.mxu2 %v10864_v57 }
 0x142   :  { %2370 = vmatmul.bf16.vlgmr.msra.gmra.mxu3 %v10956_v0  ;;  %2510 = vmatpush.bf16.msrb.mxu2 %v8078_v2  ;;  %v9871_v2 = vld [vmem:[#allocation5 + $0x5a4] sm:$0xf] }
 0x143   :  { %2412 = vmatpush.bf16.msrb.mxu0 %v8714_v48  ;;  %2559 = vmatpush.bf16.msrb.mxu3 %v8206_v61 }
 0x144   :  { %v2126_v55 = vpop.f32.mrf.mxu2 }
 0x145   :  { %v2127_v44 = vadd.f32 %v2126_v55, %v2078_v34  ;;  %v11089_v58 = vpop.f32.mrf.mxu3  ;;  %v2030_v32 = vpop.f32.mrf.mxu0  ;;  %v8839_v34 = vld [vmem:[#allocation5 + $0x6d0] sm:$0xf0] }
 0x146   :  { %v2031_v22 = vadd.f32 %v2030_v32, %v10977_v30  ;;  %v2079_v59 = vpop.f32.mrf.mxu1  ;;  %v8842_v0 = vor.u32 %v9907_v7, %v8839_v34 }
 0x147   :  { %v8867_v24 = vmul.f32 -1.442695, %v2127_v44 }
 0x148   :  { %v2080_v29 = vadd.f32 %v2079_v59, %v2031_v22  ;;  %2461 = vmatpush.bf16.msrb.mxu1 %v8842_v0  ;;  %v8061_v59 = vld [vmem:[#allocation5 + $0xa8] sm:$0xf] }
 0x149   :  { %10091 = vpow2.f32 %v8867_v24 }
 0x14c   :  { %v2128_v55 = vpop.f32.mrf.mxu2 }
 0x14d   :  { %v2129_v57 = vadd.f32 %v2128_v55, %v2080_v29  ;;  %v11092_v54 = vpop.f32.mrf.mxu3  ;;  %v2033_v30 = vpop.f32.mrf.mxu0  ;;  %v9746_v29 = vld [vmem:[#allocation5 + $0x1b4] sm:$0xf0] }
 0x14e   :  { %v2034_v32 = vadd.f32 %v2033_v30, %v10984_v4  ;;  %v2082_v38 = vpop.f32.mrf.mxu1  ;;  %v9714_v4 = vld [vmem:[#allocation5 + $0xb4] sm:$0xf0]  ;;  %v8190_v55 = vor.u32 %v9746_v29, %v8189_v20 }
 0x14f   :  { %v10092_v44 = vpop.eup %10091  ;;  %v8871_v18 = vmul.f32 -1.442695, %v2129_v57  ;;  %v8062_v39 = vor.u32 %v9714_v4, %v8061_v59  ;;  %v8695_v57 = vld [vmem:[#allocation5 + $0x5b0] sm:$0xf0] }
 0x150   :  { %v11095_v21 = vadd.f32 1.0, %v10092_v44  ;;  %v2083_v22 = vadd.f32 %v2082_v38, %v2034_v32  ;;  %2228 = vmatmul.bf16.gmra.mxu0 %v10872_v25  ;;  %v8698_v61 = vor.u32 %v9871_v2, %v8695_v57  ;;  %2560 = vmatpush.bf16.msrb.mxu3 %v8190_v55  ;;  %v8823_v4 = vld [vmem:[#allocation5 + $0x6b0] sm:$0xf0] }
 0x151   :  { %10093 = vpow2.f32 %v8871_v18  ;;  %2277 = vmatmul.bf16.gmra.mxu1 %v10874_v26  ;;  %2326 = vmatmul.bf16.gmra.mxu2 %v10876_v27 }
 0x152   :  { %10095 = vrcp.f32 %v11095_v21  ;;  %2375 = vmatmul.bf16.gmra.mxu3 %v10970_v6  ;;  %2511 = vmatpush.bf16.msrb.mxu2 %v8062_v39  ;;  %vm3456_vm1 = vweird.f32 %v11095_v21 }
 0x153   :  { %2413 = vmatpush.bf16.msrb.mxu0 %v8698_v61 }
 0x154   :  { %v2131_v0 = vpop.f32.mrf.mxu2 }
 0x155   :  { %v2132_v23 = vadd.f32 %v2131_v0, %v2083_v22  ;;  %v11102_v24 = vpop.f32.mrf.mxu3  ;;  %v2035_v48 = vpop.f32.mrf.mxu0 }
 0x156   :  { %v2036_v7 = vadd.f32 %v2035_v48, %v10993_v62  ;;  %v2084_v34 = vpop.f32.mrf.mxu1  ;;  %v9903_v62 = vld [vmem:[#allocation5 + $0x6a4] sm:$0xf] }
 0x157   :  { %v10094_v30 = vpop.eup %10093  ;;  %v8875_v32 = vmul.f32 -1.442695, %v2132_v23  ;;  %v8826_v0 = vor.u32 %v9903_v62, %v8823_v4  ;;  %v8045_v4 = vld [vmem:[#allocation5 + $0x88] sm:$0xf] }
 0x158   :  { %v11105_v38 = vpop.eup %10095  ;;  %v11107_v44 = vadd.f32 1.0, %v10094_v30  ;;  %v2085_v18 = vadd.f32 %v2084_v34, %v2036_v7 }
 0x159   :  { %v3452_v22 = vmul.f32 %v11105_v38, %v11095_v21  ;;  %10097 = vpow2.f32 %v8875_v32  ;;  %2462 = vmatpush.bf16.msrb.mxu1 %v8826_v0  ;;  %vm3457_vm0 = vweird.f32 %v11105_v38 }
 0x15a   :  { %10099 = vrcp.f32 %v11107_v44  ;;  %v3522_v62 = vand.u32 2147483648, %v11107_v44  ;;  %vm11135_vm3 = vmor %vm3456_vm1, %vm3457_vm0  ;;  %vm3516_vm4 = vweird.f32 %v11107_v44 }
 0x15b   :  { %v3453_v59 = vsub.f32 1.0, %v3452_v22  ;;  %v3520_v22 = vand.u32 2147483647, %v11107_v44 }
 0x15c   :  { %v2133_v2 = vpop.f32.mrf.mxu2 }
 0x15d   :  { %v2134_v39 = vadd.f32 %v2133_v2, %v2085_v18  ;;  %v11112_v57 = vpop.f32.mrf.mxu3  ;;  %v2038_v20 = vpop.f32.mrf.mxu0  ;;  %v3454_v29 = vmul.f32 %v11105_v38, %v3453_v59  ;;  %v3460_v18 = vand.u32 2147483647, %v11095_v21  ;;  %v9710_v2 = vld [vmem:[#allocation5 + $0x94] sm:$0xf0]  ;;  %vm3521_vm7 = vcmp.eq.f32.partialorder %v3520_v22, 8.507059e+37 }
 0x15e   :  { %v2039_v23 = vadd.f32 %v2038_v20, %v11000_v60  ;;  %v2087_v48 = vpop.f32.mrf.mxu1  ;;  %v3462_v60 = vand.u32 2147483648, %v11095_v21  ;;  %v8046_v20 = vor.u32 %v9710_v2, %v8045_v4 }
 0x15f   :  { %v10098_v61 = vpop.eup %10097  ;;  %v8879_v7 = vmul.f32 -1.442695, %v2134_v39  ;;  %v3455_v0 = vadd.f32 %v11105_v38, %v3454_v29  ;;  %vm3461_vm5 = vcmp.eq.f32.partialorder %v3460_v18, 8.507059e+37 }
 0x160   :  { %v10100_v34 = vpop.eup %10099  ;;  %v11116_v55 = vadd.f32 1.0, %v10098_v61  ;;  %v2088_v30 = vadd.f32 %v2087_v48, %v2039_v23  ;;  %2233 = vmatmul.bf16.gmra.mxu0 %v10884_v50  ;;  %v9867_v23 = vld [vmem:[#allocation5 + $0x584] sm:$0xf]  ;;  %v8679_v48 = vld [vmem:[#allocation5 + $0x590] sm:$0xf0]  ;;  %v3463_v21 = vor.u32 1.1754944e-38, %v3462_v60  ;;  %2512 = vmatpush.bf16.msrb.mxu2 %v8046_v20 }
 0x161   :  { %v3512_v32 = vmul.f32 %v10100_v34, %v11107_v44  ;;  %10101 = vpow2.f32 %v8879_v7  ;;  %2282 = vmatmul.bf16.gmra.mxu1 %v10886_v51  ;;  %2331 = vmatmul.bf16.gmra.mxu2 %v10888_v52  ;;  %v8173_v61 = vld [vmem:[#allocation5 + $0x188] sm:$0xf]  ;;  %v8682_v6 = vor.u32 %v9867_v23, %v8679_v48  ;;  %vm3517_vm2 = vweird.f32 %v10100_v34  ;;  %v9899_v44 = vld [vmem:[#allocation5 + $0x684] sm:$0xf] }
 0x162   :  { %10103 = vrcp.f32 %v11116_v55  ;;  %2380 = vmatmul.bf16.gmra.mxu3 %v10986_v35  ;;  %vm3518_vm6 = vmor %vm3516_vm4, %vm3517_vm2  ;;  %vm3576_vm9 = vweird.f32 %v11116_v55 }
 0x163   :  { %v3513_v59 = vsub.f32 1.0, %v3512_v32  ;;  %v9742_v32 = vld [vmem:[#allocation5 + $0x194] sm:$0xf0]  ;;  %2414 = vmatpush.bf16.msrb.mxu0 %v8682_v6 }
 0x164   :  { %v2136_v39 = vpop.f32.mrf.mxu2  ;;  %v8174_v2 = vor.u32 %v9742_v32, %v8173_v61 }
 0x165   :  { %v3514_v7 = vmul.f32 %v10100_v34, %v3513_v59  ;;  %v2137_v35 = vadd.f32 %v2136_v39, %v2088_v30  ;;  %v11131_v52 = vpop.f32.mrf.mxu3  ;;  %v2040_v51 = vpop.f32.mrf.mxu0  ;;  %v3459_v39 = vsel %vm11135_vm3, %v11105_v38, %v3455_v0  ;;  %v8807_v0 = vld [vmem:[#allocation5 + $0x690] sm:$0xf0] }
 0x166   :  { %v2041_v29 = vadd.f32 %v2040_v51, %v11009_v37  ;;  %v2089_v4 = vpop.f32.mrf.mxu1  ;;  %2561 = vmatpush.bf16.msrb.mxu3 %v8174_v2  ;;  %v3523_v51 = vor.u32 1.1754944e-38, %v3522_v62  ;;  %v3464_v27 = vsel %vm3461_vm5, %v3463_v21, %v3459_v39  ;;  %v8810_v18 = vor.u32 %v9899_v44, %v8807_v0  ;;  %v9863_v0 = vld [vmem:[#allocation5 + $0x564] sm:$0xf] }
 0x167   :  { %v10102_v59 = vpop.eup %10101  ;;  %v8883_v30 = vmul.f32 -1.442695, %v2137_v35  ;;  %v3515_v23 = vadd.f32 %v10100_v34, %v3514_v7 }
 0x168   :  { %v11144_v48 = vpop.eup %10103  ;;  %v11146_v26 = vadd.f32 1.0, %v10102_v59  ;;  %v2090_v60 = vadd.f32 %v2089_v4, %v2041_v29  ;;  %2463 = vmatpush.bf16.msrb.mxu1 %v8810_v18  ;;  %v8157_v18 = vld [vmem:[#allocation5 + $0x168] sm:$0xf] }
 0x169   :  { %v3572_v37 = vmul.f32 %v11144_v48, %v11116_v55  ;;  %10105 = vpow2.f32 %v8883_v30  ;;  %v3519_v6 = vsel %vm3518_vm6, %v10100_v34, %v3515_v23  ;;  %v3582_v23 = vand.u32 2147483648, %v11116_v55 }
 0x16a   :  { %10107 = vrcp.f32 %v11146_v26  ;;  %v3524_v35 = vsel %vm3521_vm7, %v3523_v51, %v3519_v6  ;;  %v9706_v6 = vld [vmem:[#allocation5 + $0x74] sm:$0xf0]  ;;  %vm3577_vm8 = vweird.f32 %v11144_v48  ;;  %vm3636_vm13 = vweird.f32 %v11146_v26 }
 0x16b   :  { %v3573_v38 = vsub.f32 1.0, %v3572_v37  ;;  %v11152_v20 = vpack.c.bf16 %v3524_v35, %v3464_v27  ;;  %v8029_v37 = vld [vmem:[#allocation5 + $0x68] sm:$0xf]  ;;  %v3642_v35 = vand.u32 2147483648, %v11146_v26  ;;  %vm11178_vm11 = vmor %vm3576_vm9, %vm3577_vm8 }
 0x16c   :  { %v2138_v61 = vpop.f32.mrf.mxu2  ;;  %v8030_v44 = vor.u32 %v9706_v6, %v8029_v37 }
 0x16d   :  { %14844 = vst [vmem:[#allocation68_spill] sm:$0xff] %v11152_v20  ;;  %v2139_v7 = vadd.f32 %v2138_v61, %v2090_v60  ;;  %v11154_v32 = vpop.f32.mrf.mxu3  ;;  %v2043_v62 = vpop.f32.mrf.mxu0  ;;  %v3574_v21 = vmul.f32 %v11144_v48, %v3573_v38  ;;  %v3640_v60 = vand.u32 2147483647, %v11146_v26  ;;  %v8663_v61 = vld [vmem:[#allocation5 + $0x570] sm:$0xf0] }
 0x16e   :  { %v2044_v29 = vadd.f32 %v2043_v62, %v11016_v49  ;;  %v2092_v4 = vpop.f32.mrf.mxu1  ;;  %v3580_v49 = vand.u32 2147483647, %v11116_v55  ;;  %2513 = vmatpush.bf16.msrb.mxu2 %v8030_v44 }
 0x16f   :  { %v10106_v34 = vpop.eup %10105  ;;  %v8887_v22 = vmul.f32 -1.442695, %v2139_v7  ;;  %v3575_v27 = vadd.f32 %v11144_v48, %v3574_v21  ;;  %vm3641_vm15 = vcmp.eq.f32.partialorder %v3640_v60, 8.507059e+37 }
 0x170   :  { %v10108_v2 = vpop.eup %10107  ;;  %v11158_v59 = vadd.f32 1.0, %v10106_v34  ;;  %v2093_v30 = vadd.f32 %v2092_v4, %v2044_v29  ;;  %2238 = vmatmul.bf16.gmra.mxu0 %v10896_v13  ;;  %v8666_v4 = vor.u32 %v9863_v0, %v8663_v61  ;;  %v9738_v34 = vld [vmem:[#allocation5 + $0x174] sm:$0xf0]  ;;  %vm11182_vm12 = vcmp.eq.f32.partialorder %v3580_v49, 8.507059e+37 }
 0x171   :  { %v3632_v39 = vmul.f32 %v10108_v2, %v11146_v26  ;;  %10109 = vpow2.f32 %v8887_v22  ;;  %2287 = vmatmul.bf16.gmra.mxu1 %v10898_v14  ;;  %2336 = vmatmul.bf16.gmra.mxu2 %v10900_v15  ;;  %vm3637_vm10 = vweird.f32 %v10108_v2  ;;  %v8158_v20 = vor.u32 %v9738_v34, %v8157_v18 }
 0x172   :  { %10111 = vrcp.f32 %v11158_v59  ;;  %2385 = vmatmul.bf16.gmra.mxu3 %v11002_v16  ;;  %2415 = vmatpush.bf16.msrb.mxu0 %v8666_v4  ;;  %v3583_v49 = vor.u32 1.1754944e-38, %v3582_v23  ;;  %vm3638_vm14 = vmor %vm3636_vm13, %vm3637_vm10  ;;  %v3643_v61 = vor.u32 1.1754944e-38, %v3642_v35  ;;  %v8791_v4 = vld [vmem:[#allocation5 + $0x670] sm:$0xf0]  ;;  %vm3696_vm1 = vweird.f32 %v11158_v59 }
 0x173   :  { %v3633_v51 = vsub.f32 1.0, %v3632_v39  ;;  %2562 = vmatpush.bf16.msrb.mxu3 %v8158_v20 }
 0x174   :  { %v2141_v38 = vpop.f32.mrf.mxu2 }
 0x175   :  { %v2142_v7 = vadd.f32 %v2141_v38, %v2093_v30  ;;  %v11173_v62 = vpop.f32.mrf.mxu3  ;;  %v2045_v29 = vpop.f32.mrf.mxu0  ;;  %v3634_v22 = vmul.f32 %v10108_v2, %v3633_v51 }
 0x176   :  { %v2046_v21 = vadd.f32 %v2045_v29, %v11025_v31  ;;  %v2094_v39 = vpop.f32.mrf.mxu1  ;;  %v3579_v31 = vsel %vm11178_vm11, %v11144_v48, %v3575_v27  ;;  %v9895_v29 = vld [vmem:[#allocation5 + $0x664] sm:$0xf] }
 0x177   :  { %v10110_v30 = vpop.eup %10109  ;;  %v8891_v6 = vmul.f32 -1.442695, %v2142_v7  ;;  %v3635_v51 = vadd.f32 %v10108_v2, %v3634_v22  ;;  %v3584_v26 = vsel %vm11182_vm12, %v3583_v49, %v3579_v31  ;;  %v8794_v34 = vor.u32 %v9895_v29, %v8791_v4  ;;  %v9859_v4 = vld [vmem:[#allocation5 + $0x544] sm:$0xf] }
 0x178   :  { %v11190_v38 = vpop.eup %10111  ;;  %v11192_v44 = vadd.f32 1.0, %v10110_v30  ;;  %v2095_v0 = vadd.f32 %v2094_v39, %v2046_v21 }
 0x179   :  { %v3692_v18 = vmul.f32 %v11190_v38, %v11158_v59  ;;  %10113 = vpow2.f32 %v8891_v6  ;;  %v3639_v7 = vsel %vm3638_vm14, %v10108_v2, %v3635_v51  ;;  %2464 = vmatpush.bf16.msrb.mxu1 %v8794_v34  ;;  %vm3697_vm0 = vweird.f32 %v11190_v38  ;;  %v8141_v34 = vld [vmem:[#allocation5 + $0x148] sm:$0xf] }
 0x17a   :  { %10115 = vrcp.f32 %v11192_v44  ;;  %v3644_v48 = vsel %vm3641_vm15, %v3643_v61, %v3639_v7  ;;  %v3760_v49 = vand.u32 2147483647, %v11192_v44  ;;  %v9702_v7 = vld [vmem:[#allocation5 + $0x54] sm:$0xf0]  ;;  %vm11226_vm3 = vmor %vm3696_vm1, %vm3697_vm0  ;;  %vm3756_vm5 = vweird.f32 %v11192_v44 }
 0x17b   :  { %v3693_v27 = vsub.f32 1.0, %v3692_v18  ;;  %v11200_v20 = vpack.c.bf16 %v3644_v48, %v3584_v26  ;;  %v8013_v18 = vld [vmem:[#allocation5 + $0x48] sm:$0xf]  ;;  %v3762_v48 = vand.u32 2147483648, %v11192_v44 }
 0x17c   :  { %v2143_v23 = vpop.f32.mrf.mxu2  ;;  %v8014_v29 = vor.u32 %v9702_v7, %v8013_v18  ;;  %vm3761_vm7 = vcmp.eq.f32.partialorder %v3760_v49, 8.507059e+37 }
 0x17d   :  { %14849 = vst [vmem:[#allocation69_spill] sm:$0xff] %v11200_v20  ;;  %v2144_v35 = vadd.f32 %v2143_v23, %v2095_v0  ;;  %v11202_v22 = vpop.f32.mrf.mxu3  ;;  %v2048_v21 = vpop.f32.mrf.mxu0  ;;  %v3694_v55 = vmul.f32 %v11190_v38, %v3693_v27  ;;  %v3702_v0 = vand.u32 2147483648, %v11158_v59  ;;  %v8647_v23 = vld [vmem:[#allocation5 + $0x550] sm:$0xf0] }
 0x17e   :  { %v2049_v2 = vadd.f32 %v2048_v21, %v11032_v12  ;;  %v2097_v60 = vpop.f32.mrf.mxu1  ;;  %v3700_v12 = vand.u32 2147483647, %v11158_v59  ;;  %2514 = vmatpush.bf16.msrb.mxu2 %v8014_v29 }
 0x17f   :  { %v10114_v39 = vpop.eup %10113  ;;  %v8895_v37 = vmul.f32 -1.442695, %v2144_v35  ;;  %v3695_v26 = vadd.f32 %v11190_v38, %v3694_v55 }
 0x180   :  { %v10116_v30 = vpop.eup %10115  ;;  %v11206_v6 = vadd.f32 1.0, %v10114_v39  ;;  %v2098_v31 = vadd.f32 %v2097_v60, %v2049_v2  ;;  %2243 = vmatmul.bf16.gmra.mxu0 %v10908_v41  ;;  %v8650_v60 = vor.u32 %v9859_v4, %v8647_v23  ;;  %v9734_v39 = vld [vmem:[#allocation5 + $0x154] sm:$0xf0]  ;;  %vm11230_vm4 = vcmp.eq.f32.partialorder %v3700_v12, 8.507059e+37 }
 0x181   :  { %v3752_v51 = vmul.f32 %v10116_v30, %v11192_v44  ;;  %10117 = vpow2.f32 %v8895_v37  ;;  %2292 = vmatmul.bf16.gmra.mxu1 %v10910_v42  ;;  %2341 = vmatmul.bf16.gmra.mxu2 %v10912_v43  ;;  %vm3757_vm2 = vweird.f32 %v10116_v30  ;;  %v8142_v20 = vor.u32 %v9734_v39, %v8141_v34 }
 0x182   :  { %10119 = vrcp.f32 %v11206_v6  ;;  %2390 = vmatmul.bf16.gmra.mxu3 %v11018_v56  ;;  %2416 = vmatpush.bf16.msrb.mxu0 %v8650_v60  ;;  %v3703_v12 = vor.u32 1.1754944e-38, %v3702_v0  ;;  %vm3758_vm6 = vmor %vm3756_vm5, %vm3757_vm2  ;;  %v3763_v23 = vor.u32 1.1754944e-38, %v3762_v48  ;;  %v8775_v60 = vld [vmem:[#allocation5 + $0x650] sm:$0xf0]  ;;  %vm3816_vm10 = vweird.f32 %v11206_v6  ;;  %v8717_v56 = vld [vmem:[#allocation5 + $0x5c8] sm:$0xf] }
 0x183   :  { %v3753_v61 = vsub.f32 1.0, %v3752_v51  ;;  %2563 = vmatpush.bf16.msrb.mxu3 %v8142_v20 }
 0x184   :  { %v2146_v27 = vpop.f32.mrf.mxu2 }
 0x185   :  { %v2147_v35 = vadd.f32 %v2146_v27, %v2098_v31  ;;  %v11221_v21 = vpop.f32.mrf.mxu3  ;;  %v2050_v2 = vpop.f32.mrf.mxu0  ;;  %v3754_v37 = vmul.f32 %v10116_v30, %v3753_v61 }
 0x186   :  { %v2051_v55 = vadd.f32 %v2050_v2, %v11041_v28  ;;  %v2099_v51 = vpop.f32.mrf.mxu1  ;;  %v3699_v28 = vsel %vm11226_vm3, %v11190_v38, %v3695_v26  ;;  %v9891_v2 = vld [vmem:[#allocation5 + $0x644] sm:$0xf] }
 0x187   :  { %v10118_v31 = vpop.eup %10117  ;;  %v8899_v7 = vmul.f32 -1.442695, %v2147_v35  ;;  %v3755_v61 = vadd.f32 %v10116_v30, %v3754_v37  ;;  %v3704_v38 = vsel %vm11230_vm4, %v3703_v12, %v3699_v28  ;;  %v8778_v39 = vor.u32 %v9891_v2, %v8775_v60 }
 0x188   :  { %v11238_v27 = vpop.eup %10119  ;;  %v11240_v29 = vadd.f32 1.0, %v10118_v31  ;;  %v2100_v4 = vadd.f32 %v2099_v51, %v2051_v55  ;;  %v3820_v51 = vand.u32 2147483647, %v11206_v6  ;;  %v3822_v12 = vand.u32 2147483648, %v11206_v6 }
 0x189   :  { %v3812_v34 = vmul.f32 %v11238_v27, %v11206_v6  ;;  %10121 = vpow2.f32 %v8899_v7  ;;  %v3759_v35 = vsel %vm3758_vm6, %v10116_v30, %v3755_v61  ;;  %2465 = vmatpush.bf16.msrb.mxu1 %v8778_v39  ;;  %vm3817_vm9 = vweird.f32 %v11238_v27  ;;  %v8631_v39 = vld [vmem:[#allocation5 + $0x530] sm:$0xf0] }
 0x18a   :  { %10123 = vrcp.f32 %v11240_v29  ;;  %v3764_v44 = vsel %vm3761_vm7, %v3763_v23, %v3759_v35  ;;  %vm11263_vm8 = vcmp.eq.f32.partialorder %v3820_v51, 8.507059e+37  ;;  %v3880_v23 = vand.u32 2147483647, %v11240_v29  ;;  %v7997_v35 = vld [vmem:[#allocation5 + $0x28] sm:$0xf]  ;;  %vm11278_vm12 = vmor %vm3816_vm10, %vm3817_vm9 }
 0x18b   :  { %v3813_v26 = vsub.f32 1.0, %v3812_v34  ;;  %v11248_v20 = vpack.c.bf16 %v3764_v44, %v3704_v38  ;;  %v9698_v38 = vld [vmem:[#allocation5 + $0x34] sm:$0xf0]  ;;  %v3823_v6 = vor.u32 1.1754944e-38, %v3822_v12  ;;  %vm3876_vm13 = vweird.f32 %v11240_v29 }
 0x18c   :  { %v2148_v0 = vpop.f32.mrf.mxu2  ;;  %v7998_v60 = vor.u32 %v9698_v38, %v7997_v35  ;;  %vm3881_vm14 = vcmp.eq.f32.partialorder %v3880_v23, 8.507059e+37 }
 0x18d   :  { %14854 = vst [vmem:[#allocation70_spill] sm:$0xff] %v11248_v20  ;;  %v2149_v48 = vadd.f32 %v2148_v0, %v2100_v4  ;;  %v11250_v37 = vpop.f32.mrf.mxu3  ;;  %v2053_v55 = vpop.f32.mrf.mxu0  ;;  %v3814_v31 = vmul.f32 %v11238_v27, %v3813_v26  ;;  %v3882_v26 = vand.u32 2147483648, %v11240_v29  ;;  %v9855_v0 = vld [vmem:[#allocation5 + $0x524] sm:$0xf] }
 0x18e   :  { %v2054_v30 = vadd.f32 %v2053_v55, %v11048_v40  ;;  %v2102_v49 = vpop.f32.mrf.mxu1  ;;  %v8634_v51 = vor.u32 %v9855_v0, %v8631_v39  ;;  %2515 = vmatpush.bf16.msrb.mxu2 %v7998_v60  ;;  %v9887_v39 = vld [vmem:[#allocation5 + $0x624] sm:$0xf] }
 0x18f   :  { %v10122_v18 = vpop.eup %10121  ;;  %v8903_v59 = vmul.f32 -1.442695, %v2149_v48  ;;  %v3815_v44 = vadd.f32 %v11238_v27, %v3814_v31  ;;  %v8125_v48 = vld [vmem:[#allocation5 + $0x128] sm:$0xf] }
 0x190   :  { %v10124_v7 = vpop.eup %10123  ;;  %v11255_v28 = vadd.f32 1.0, %v10122_v18  ;;  %v2103_v61 = vadd.f32 %v2102_v49, %v2054_v30  ;;  %2248 = vmatmul.bf16.gmra.mxu0 %v10920_v9  ;;  %v9730_v18 = vld [vmem:[#allocation5 + $0x134] sm:$0xf0] }
 0x191   :  { %v3872_v4 = vmul.f32 %v10124_v7, %v11240_v29  ;;  %10125 = vpow2.f32 %v8903_v59  ;;  %2297 = vmatmul.bf16.gmra.mxu1 %v10922_v10  ;;  %2346 = vmatmul.bf16.gmra.mxu2 %v10924_v11  ;;  %vm3877_vm11 = vweird.f32 %v10124_v7  ;;  %v8126_v20 = vor.u32 %v9730_v18, %v8125_v48  ;;  %v8759_v48 = vld [vmem:[#allocation5 + $0x630] sm:$0xf0]  ;;  %v7981_v18 = vld [vmem:[#allocation5 + $0x8] sm:$0xf]  ;;  %v9846_v11 = vld [vmem:[#allocation5 + $0x4d4] sm:$0xf0] }
 0x192   :  { %10127 = vrcp.f32 %v11255_v28  ;;  %2395 = vmatmul.bf16.gmra.mxu3 %v11034_v33  ;;  %2417 = vmatpush.bf16.msrb.mxu0 %v8634_v51  ;;  %vm3878_vm15 = vmor %vm3876_vm13, %vm3877_vm11  ;;  %v3883_v29 = vor.u32 1.1754944e-38, %v3882_v26  ;;  %v9851_v26 = vld [vmem:[#allocation5 + $0x504] sm:$0xf]  ;;  %vm3936_vm1 = vweird.f32 %v11255_v28  ;;  %v8589_v33 = vld [vmem:[#allocation5 + $0x4c8] sm:$0xf] }
 0x193   :  { %v3873_v34 = vsub.f32 1.0, %v3872_v4  ;;  %2564 = vmatpush.bf16.msrb.mxu3 %v8126_v20  ;;  %v9782_v10 = vld [vmem:[#allocation5 + $0x2d4] sm:$0xf0] }
 0x194   :  { %v2151_v2 = vpop.f32.mrf.mxu2 }
 0x195   :  { %v2152_v55 = vadd.f32 %v2151_v2, %v2103_v61  ;;  %v11273_v30 = vpop.f32.mrf.mxu3  ;;  %v2055_v49 = vpop.f32.mrf.mxu0  ;;  %v3874_v59 = vmul.f32 %v10124_v7, %v3873_v34  ;;  %v3819_v34 = vsel %vm11278_vm12, %v11238_v27, %v3815_v44 }
 0x196   :  { %v2056_v31 = vadd.f32 %v2055_v49, %v11057_v1  ;;  %v2104_v4 = vpop.f32.mrf.mxu1  ;;  %v3824_v27 = vsel %vm11263_vm8, %v3823_v6, %v3819_v34 }
 0x197   :  { %v10126_v61 = vpop.eup %10125  ;;  %v8907_v38 = vmul.f32 -1.442695, %v2152_v55  ;;  %v3875_v1 = vadd.f32 %v10124_v7, %v3874_v59  ;;  %v8762_v55 = vor.u32 %v9887_v39, %v8759_v48  ;;  %v9694_v59 = vld [vmem:[#allocation5 + $0x14] sm:$0xf0]  ;;  %v9883_v48 = vld [vmem:[#allocation5 + $0x604] sm:$0xf] }
 0x198   :  { %v11286_v2 = vpop.eup %10127  ;;  %v11288_v60 = vadd.f32 1.0, %v10126_v61  ;;  %v2105_v0 = vadd.f32 %v2104_v4, %v2056_v31  ;;  %v7982_v61 = vor.u32 %v9694_v59, %v7981_v18 }
 0x199   :  { %v3932_v12 = vmul.f32 %v11286_v2, %v11255_v28  ;;  %10129 = vpow2.f32 %v8907_v38  ;;  %v3879_v49 = vsel %vm3878_vm15, %v10124_v7, %v3875_v1  ;;  %2466 = vmatpush.bf16.msrb.mxu1 %v8762_v55  ;;  %v8615_v7 = vld [vmem:[#allocation5 + $0x510] sm:$0xf0]  ;;  %v8109_v38 = vld [vmem:[#allocation5 + $0x108] sm:$0xf]  ;;  %v9726_v1 = vld [vmem:[#allocation5 + $0x114] sm:$0xf0]  ;;  %vm3937_vm0 = vweird.f32 %v11286_v2 }
 0x19a   :  { %10131 = vrcp.f32 %v11288_v60  ;;  %v3884_v23 = vsel %vm3881_vm14, %v3883_v29, %v3879_v49  ;;  %v8618_v34 = vor.u32 %v9851_v26, %v8615_v7  ;;  %v8110_v39 = vor.u32 %v9726_v1, %v8109_v38  ;;  %v8743_v29 = vld [vmem:[#allocation5 + $0x610] sm:$0xf0]  ;;  %2516 = vmatpush.bf16.msrb.mxu2 %v7982_v61  ;;  %vm11320_vm3 = vmor %vm3936_vm1, %vm3937_vm0 }
 0x19b   :  { %v3933_v44 = vsub.f32 1.0, %v3932_v12  ;;  %v11296_v20 = vpack.c.bf16 %v3884_v23, %v3824_v27  ;;  %v8746_v49 = vor.u32 %v9883_v48, %v8743_v29  ;;  %vm3996_vm5 = vweird.f32 %v11288_v60 }
 0x19c   :  { %v2153_v51 = vpop.f32.mrf.mxu2  ;;  %2565 = vmatpush.bf16.msrb.mxu3 %v8110_v39  ;;  %2418 = vmatpush.bf16.msrb.mxu0 %v8618_v34 }
 0x19d   :  { %14859 = vst [vmem:[#allocation71_spill] sm:$0xff] %v11296_v20  ;;  %v2154_v31 = vadd.f32 %v2153_v51, %v2105_v0  ;;  %v11298_v4 = vpop.f32.mrf.mxu3  ;;  %v2058_v35 = vpop.f32.mrf.mxu0  ;;  %v3934_v0 = vmul.f32 %v11286_v2, %v3933_v44  ;;  %v3940_v44 = vand.u32 2147483647, %v11255_v28  ;;  %2467 = vmatpush.bf16.msrb.mxu1 %v8746_v49 }
 0x19e   :  { %v2059_v40 = vadd.f32 %v2058_v35, %v11064_v8  ;;  %v2107_v6 = vpop.f32.mrf.mxu1  ;;  %v4002_v35 = vand.u32 2147483648, %v11288_v60 }
 0x19f   :  { %v10130_v12 = vpop.eup %10129  ;;  %v8911_v55 = vmul.f32 -1.442695, %v2154_v31  ;;  %v3935_v59 = vadd.f32 %v11286_v2, %v3934_v0  ;;  %v3942_v31 = vand.u32 2147483648, %v11255_v28  ;;  %vm11324_vm4 = vcmp.eq.f32.partialorder %v3940_v44, 8.507059e+37 }
 0x1a0   :  { %v10132_v27 = vpop.eup %10131  ;;  %v11302_v23 = vadd.f32 1.0, %v10130_v12  ;;  %v2108_v51 = vadd.f32 %v2107_v6, %v2059_v40  ;;  %2253 = vmatmul.bf16.gmra.mxu0 %v10932_v45  ;;  %v4000_v40 = vand.u32 2147483647, %v11288_v60 }
 0x1a1   :  { %v3992_v8 = vmul.f32 %v10132_v27, %v11288_v60  ;;  %10133 = vpow2.f32 %v8911_v55  ;;  %2302 = vmatmul.bf16.gmra.mxu1 %v10934_v46  ;;  %2351 = vmatmul.bf16.gmra.mxu2 %v10936_v47  ;;  %vm3997_vm2 = vweird.f32 %v10132_v27  ;;  %v3939_v12 = vsel %vm11320_vm3, %v11286_v2, %v3935_v59 }
 0x1a2   :  { %10135 = vrcp.f32 %v11302_v23  ;;  %2400 = vmatmul.bf16.gmra.mxu3 %v11050_v17  ;;  %vm3998_vm6 = vmor %vm3996_vm5, %vm3997_vm2  ;;  %vm4001_vm7 = vcmp.eq.f32.partialorder %v4000_v40, 8.507059e+37  ;;  %v4062_v40 = vand.u32 2147483648, %v11302_v23  ;;  %vm4056_vm9 = vweird.f32 %v11302_v23  ;;  %v9818_v17 = vld [vmem:[#allocation5 + $0x3f4] sm:$0xf0] }
 0x1a3   :  { %v3993_v18 = vsub.f32 1.0, %v3992_v8  ;;  %v4003_v8 = vor.u32 1.1754944e-38, %v4002_v35 }
 0x1a4   :  { %v2156_v26 = vpop.f32.mrf.mxu2 }
 0x1a5   :  { %v2157_v61 = vadd.f32 %v2156_v26, %v2108_v51  ;;  %v11316_v7 = vpop.f32.mrf.mxu3  ;;  %v2060_v38 = vpop.f32.mrf.mxu0  ;;  %v3994_v1 = vmul.f32 %v10132_v27, %v3993_v18  ;;  %v3943_v51 = vor.u32 1.1754944e-38, %v3942_v31 }
 0x1a6   :  { %v2061_v6 = vadd.f32 %v2060_v38, %v11073_v19  ;;  %v2109_v34 = vpop.f32.mrf.mxu1 }
 0x1a7   :  { %v10134_v28 = vpop.eup %10133  ;;  %v8915_v29 = vmul.f32 -1.442695, %v2157_v61  ;;  %v3995_v55 = vadd.f32 %v10132_v27, %v3994_v1  ;;  %v3944_v2 = vsel %vm11324_vm4, %v3943_v51, %v3939_v12 }
 0x1a8   :  { %v11332_v49 = vpop.eup %10135  ;;  %v11334_v19 = vadd.f32 1.0, %v10134_v28  ;;  %v2110_v0 = vadd.f32 %v2109_v34, %v2061_v6 }
 0x1a9   :  { %v4052_v44 = vmul.f32 %v11332_v49, %v11302_v23  ;;  %10137 = vpow2.f32 %v8915_v29  ;;  %v3999_v18 = vsel %vm3998_vm6, %v10132_v27, %v3995_v55  ;;  %v4060_v27 = vand.u32 2147483647, %v11302_v23 }
 0x1aa   :  { %10139 = vrcp.f32 %v11334_v19  ;;  %v4004_v60 = vsel %vm4001_vm7, %v4003_v8, %v3999_v18  ;;  %v4120_v28 = vand.u32 2147483647, %v11334_v19  ;;  %vm4057_vm8 = vweird.f32 %v11332_v49  ;;  %v14867_v18 = vld [vmem:[#allocation45_spill] sm:$0xff] }
 0x1ab   :  { %v4053_v59 = vsub.f32 1.0, %v4052_v44  ;;  %v11342_v26 = vpack.c.bf16 %v4004_v60, %v3944_v2  ;;  %v14866_v44 = vld [vmem:[#allocation44_spill] sm:$0xff]  ;;  %vm11369_vm10 = vcmp.eq.f32.partialorder %v4060_v27, 8.507059e+37  ;;  %v4063_v60 = vor.u32 1.1754944e-38, %v4062_v40  ;;  %vm11377_vm11 = vmor %vm4056_vm9, %vm4057_vm8  ;;  %v8349_v40 = vld [vmem:[#allocation5 + $0x2e8] sm:$0xf] }
 0x1ac   :  { %v2158_v61 = vpop.f32.mrf.mxu2  ;;  %vm11381_vm12 = vcmp.eq.f32.partialorder %v4120_v28, 8.507059e+37  ;;  %vm4116_vm14 = vweird.f32 %v11334_v19 }
 0x1ad   :  { %14864 = vst [vmem:[#allocation72_spill] sm:$0xff] %v11342_v26  ;;  %v2159_v31 = vadd.f32 %v2158_v61, %v2110_v0  ;;  %v11344_v38 = vpop.f32.mrf.mxu3  ;;  %v2063_v35 = vpop.f32.mrf.mxu0  ;;  %v4054_v48 = vmul.f32 %v11332_v49, %v4053_v59  ;;  %v14865_v0 = vld [vmem:[#allocation43_spill] sm:$0xff]  ;;  %v4122_v59 = vand.u32 2147483648, %v11334_v19 }
 0x1ae   :  { %v2064_v1 = vadd.f32 %v2063_v35, %v11080_v36  ;;  %v2112_v6 = vpop.f32.mrf.mxu1  ;;  %v11357_v36 = vld [vmem:[#allocation7] sm:$0xf]  ;;  %v9850_v35 = vld [vmem:[#allocation5 + $0x4f4] sm:$0xf0]  ;;  %v8733_v26 = vld [vmem:[#allocation5 + $0x5e8] sm:$0xf] }
 0x1af   :  { %v10138_v34 = vpop.eup %10137  ;;  %v8919_v39 = vmul.f32 -1.442695, %v2159_v31  ;;  %v11360_v51 = vperm.slane %v11357_v36, 1  ;;  %v8605_v31 = vld [vmem:[#allocation5 + $0x4e8] sm:$0xf] }
 0x1b0   :  { %v11351_v29 = vpop.eup %10139  ;;  %v11353_v12 = vadd.f32 1.0, %v10138_v34  ;;  %v2113_v55 = vadd.f32 %v2112_v6, %v2064_v1  ;;  %2258 = vmatmul.bf16.gmra.mxu0 %v14865_v0  ;;  %v4055_v1 = vadd.f32 %v11332_v49, %v4054_v48  ;;  %v8606_v34 = vor.u32 %v9850_v35, %v8605_v31 }
 0x1b1   :  { %v4112_v8 = vmul.f32 %v11351_v29, %v11334_v19  ;;  %10141 = vpow2.f32 %v8919_v39  ;;  %2307 = vmatmul.bf16.gmra.mxu1 %v14866_v44  ;;  %2356 = vmatmul.bf16.gmra.mxu2 %v14867_v18  ;;  %v9786_v39 = vld [vmem:[#allocation5 + $0x2f4] sm:$0xf0]  ;;  %v8477_v44 = vld [vmem:[#allocation5 + $0x3e8] sm:$0xf]  ;;  %vm4117_vm13 = vweird.f32 %v11351_v29 }
 0x1b2   :  { %10143 = vrcp.f32 %v11353_v12  ;;  %2405 = vmatmul.bf16.gmra.mxu3 %v11066_v5  ;;  %v8350_v48 = vor.u32 %v9786_v39, %v8349_v40  ;;  %v9882_v18 = vld [vmem:[#allocation5 + $0x5f4] sm:$0xf0]  ;;  %2705 = vmatpush.bf16.msra.mxu2 %v8606_v34  ;;  %v8478_v35 = vor.u32 %v9818_v17, %v8477_v44  ;;  %v8590_v39 = vor.u32 %v9846_v11, %v8589_v33  ;;  %v8461_v34 = vld [vmem:[#allocation5 + $0x3c8] sm:$0xf]  ;;  %vm4118_vm15 = vmor %vm4116_vm14, %vm4117_vm13 }
 0x1b3   :  { %v4113_v61 = vsub.f32 1.0, %v4112_v8  ;;  %v8734_v31 = vor.u32 %v9882_v18, %v8733_v26  ;;  %v9878_v18 = vld [vmem:[#allocation5 + $0x5d4] sm:$0xf0]  ;;  %v4123_v11 = vor.u32 1.1754944e-38, %v4122_v59  ;;  %vm4176_vm1 = vweird.f32 %v11353_v12 }
 0x1b4   :  { %v2161_v27 = vpop.f32.mrf.mxu2  ;;  %2607 = vmatpush.bf16.msra.mxu0 %v8350_v48  ;;  %2656 = vmatpush.bf16.msra.mxu1 %v8478_v35 }
 0x1b5   :  { %v2162_v8 = vadd.f32 %v2161_v27, %v2113_v55  ;;  %v11385_v20 = vpop.f32.mrf.mxu3  ;;  %v2065_v5 = vpop.f32.mrf.mxu0  ;;  %v4114_v47 = vmul.f32 %v11351_v29, %v4113_v61  ;;  %v8333_v55 = vld [vmem:[#allocation5 + $0x2c8] sm:$0xf]  ;;  %v4059_v61 = vsel %vm11377_vm11, %v11332_v49, %v4055_v1  ;;  %2754 = vmatpush.bf16.msra.mxu3 %v8734_v31  ;;  %v9814_v49 = vld [vmem:[#allocation5 + $0x3d4] sm:$0xf0] }
 0x1b6   :  { %v2066_v28 = vadd.f32 %v2065_v5, %v11083_v3  ;;  %v2114_v46 = vpop.f32.mrf.mxu1  ;;  %v8334_v44 = vor.u32 %v9782_v10, %v8333_v55  ;;  %2706 = vmatpush.bf16.msra.mxu2 %v8590_v39  ;;  %v8462_v10 = vor.u32 %v9814_v49, %v8461_v34  ;;  %v14875_v39 = vld [vmem:[#allocation47_spill] sm:$0xff] }
 0x1b7   :  { %v10142_v27 = vpop.eup %10141  ;;  %v8923_v40 = vmul.f32 -1.442695, %v2162_v8  ;;  %v4115_v5 = vadd.f32 %v11351_v29, %v4114_v47  ;;  %v8718_v47 = vor.u32 %v9878_v18, %v8717_v56  ;;  %v2176_v56 = vadd.f32 %v11089_v58, %v11360_v51  ;;  %v8573_v34 = vld [vmem:[#allocation5 + $0x4a8] sm:$0xf] }
 0x1b8   :  { %v11395_v3 = vpop.eup %10143  ;;  %v11397_v17 = vadd.f32 1.0, %v10142_v27  ;;  %v2115_v26 = vadd.f32 %v2114_v46, %v2066_v28  ;;  %v4064_v46 = vsel %vm11369_vm10, %v4063_v60, %v4059_v61  ;;  %2608 = vmatpush.bf16.msra.mxu0 %v8334_v44  ;;  %2657 = vmatpush.bf16.msra.mxu1 %v8462_v10  ;;  %v14876_v61 = vld [vmem:[#allocation48_spill] sm:$0xff]  ;;  %v4182_v44 = vand.u32 2147483648, %v11353_v12  ;;  %v8701_v10 = vld [vmem:[#allocation5 + $0x5a8] sm:$0xf] }
 0x1b9   :  { %v4172_v33 = vmul.f32 %v11395_v3, %v11353_v12  ;;  %10145 = vpow2.f32 %v8923_v40  ;;  %v4119_v1 = vsel %vm4118_vm15, %v11351_v29, %v4115_v5  ;;  %2755 = vmatpush.bf16.msra.mxu3 %v8718_v47  ;;  %v14877_v5 = vld [vmem:[#allocation19_spill] sm:$0xff]  ;;  %v2178_v18 = vadd.f32 %v11092_v54, %v11360_v51 }
 0x1ba   :  { %10147 = vrcp.f32 %v11397_v17  ;;  %v4124_v19 = vsel %vm11381_vm12, %v4123_v11, %v4119_v1  ;;  %v9842_v11 = vld [vmem:[#allocation5 + $0x4b4] sm:$0xf0]  ;;  %vm4177_vm0 = vweird.f32 %v11395_v3  ;;  %v4240_v54 = vand.u32 2147483647, %v11397_v17 }
 0x1bb   :  { %v4173_v23 = vsub.f32 1.0, %v4172_v33  ;;  %v11411_v59 = vpack.c.bf16 %v4124_v19, %v4064_v46  ;;  %v8317_v33 = vld [vmem:[#allocation5 + $0x2a8] sm:$0xf]  ;;  %v8574_v49 = vor.u32 %v9842_v11, %v8573_v34  ;;  %v9778_v1 = vld [vmem:[#allocation5 + $0x2b4] sm:$0xf0]  ;;  %vm11442_vm3 = vmor %vm4176_vm1, %vm4177_vm0  ;;  %vm4236_vm4 = vweird.f32 %v11397_v17 }
 0x1bc   :  { %v2163_v8 = vpop.f32.mrf.mxu2  ;;  %v8445_v11 = vld [vmem:[#allocation5 + $0x3a8] sm:$0xf]  ;;  %vm4241_vm7 = vcmp.eq.f32.partialorder %v4240_v54, 8.507059e+37 }
 0x1bd   :  { %14874 = vst [vmem:[#allocation73_spill] sm:$0xff] %v11411_v59  ;;  %v2164_v29 = vadd.f32 %v2163_v8, %v2115_v26  ;;  %v11415_v48 = vpop.f32.mrf.mxu3  ;;  %v2224_v28 = vpop.f32.mrf.mxu0  ;;  %v4174_v6 = vmul.f32 %v11395_v3, %v4173_v23  ;;  %v4180_v26 = vand.u32 2147483647, %v11353_v12  ;;  %v8318_v23 = vor.u32 %v9778_v1, %v8317_v33  ;;  %2707 = vmatpush.bf16.msra.mxu2 %v8574_v49  ;;  %v9810_v33 = vld [vmem:[#allocation5 + $0x3b4] sm:$0xf0] }
 0x1be   :  { %v2225_v31 = vadd.f32 %v2224_v28, %v2176_v56  ;;  %v2273_v2 = vpop.f32.mrf.mxu1  ;;  %v9874_v56 = vld [vmem:[#allocation5 + $0x5b4] sm:$0xf0]  ;;  %v4242_v8 = vand.u32 2147483648, %v11397_v17 }
 0x1bf   :  { %v10146_v60 = vpop.eup %10145  ;;  %v8927_v35 = vmul.f32 -1.442695, %v2164_v29  ;;  %v4175_v46 = vadd.f32 %v11395_v3, %v4174_v6  ;;  %2609 = vmatpush.bf16.msra.mxu0 %v8318_v23  ;;  %vm4181_vm6 = vcmp.eq.f32.partialorder %v4180_v26, 8.507059e+37 }
 0x1c0   :  { %v11418_v55 = vpop.eup %10147  ;;  %v11420_v27 = vadd.f32 1.0, %v10146_v60  ;;  %v2274_v40 = vadd.f32 %v2273_v2, %v2225_v31  ;;  %2419 = vmatmul.bf16.vlgmr.msrb.gmra.mxu0 %v14875_v39  ;;  %v8702_v2 = vor.u32 %v9874_v56, %v8701_v10 }
 0x1c1   :  { %v4232_v58 = vmul.f32 %v11418_v55, %v11397_v17  ;;  %10149 = vpow2.f32 %v8927_v35  ;;  %2468 = vmatmul.bf16.vlgmr.msrb.gmra.mxu1 %v14876_v61  ;;  %2517 = vmatmul.bf16.vlgmr.msrb.gmra.mxu2 %v14877_v5  ;;  %vm4237_vm2 = vweird.f32 %v11418_v55 }
 0x1c2   :  { %10151 = vrcp.f32 %v11420_v27  ;;  %2566 = vmatmul.bf16.vlgmr.msrb.gmra.mxu3 %v10860_v53  ;;  %vm4238_vm5 = vmor %vm4236_vm4, %vm4237_vm2  ;;  %vm4296_vm8 = vweird.f32 %v11420_v27 }
 0x1c3   :  { %v4233_v47 = vsub.f32 1.0, %v4232_v58  ;;  %v4183_v58 = vor.u32 1.1754944e-38, %v4182_v44  ;;  %2756 = vmatpush.bf16.msra.mxu3 %v8702_v2  ;;  %v8446_v44 = vor.u32 %v9810_v33, %v8445_v11  ;;  %v14882_v11 = vld [vmem:[#allocation51_spill] sm:$0xff]  ;;  %v14883_v33 = vld [vmem:[#allocation22_spill] sm:$0xff] }
 0x1c4   :  { %v2322_v19 = vpop.f32.mrf.mxu2 }
 0x1c5   :  { %v2323_v29 = vadd.f32 %v2322_v19, %v2274_v40  ;;  %v2371_v28 = vpop.f32.mrf.mxu3  ;;  %v2226_v31 = vpop.f32.mrf.mxu0  ;;  %v4234_v60 = vmul.f32 %v11418_v55, %v4233_v47  ;;  %v4179_v47 = vsel %vm11442_vm3, %v11395_v3, %v4175_v46  ;;  %v4243_v19 = vor.u32 1.1754944e-38, %v4242_v8  ;;  %2658 = vmatpush.bf16.msra.mxu1 %v8446_v44  ;;  %v8301_v44 = vld [vmem:[#allocation5 + $0x288] sm:$0xf] }
 0x1c6   :  { %v2227_v35 = vadd.f32 %v2226_v31, %v2178_v18  ;;  %v2275_v6 = vpop.f32.mrf.mxu1  ;;  %v4184_v17 = vsel %vm4181_vm6, %v4183_v58, %v4179_v47  ;;  %v14881_v58 = vld [vmem:[#allocation50_spill] sm:$0xff]  ;;  %v2183_v47 = vadd.f32 %v11112_v57, %v11360_v51  ;;  %v4302_v57 = vand.u32 2147483648, %v11420_v27 }
 0x1c7   :  { %v10150_v34 = vpop.eup %10149  ;;  %v11446_v40 = vadd.f32 %v2371_v28, %v2323_v29  ;;  %v4235_v18 = vadd.f32 %v11418_v55, %v4234_v60  ;;  %v2181_v28 = vadd.f32 %v11102_v24, %v11360_v51  ;;  %v4300_v24 = vand.u32 2147483647, %v11420_v27 }
 0x1c8   :  { %v11453_v49 = vpop.eup %10151  ;;  %v11455_v1 = vadd.f32 1.0, %v10150_v34  ;;  %v2276_v10 = vadd.f32 %v2275_v6, %v2227_v35 }
 0x1c9   :  { %v4292_v23 = vmul.f32 %v11453_v49, %v11420_v27  ;;  %v4239_v3 = vsel %vm4238_vm5, %v11418_v55, %v4235_v18  ;;  %v8557_v18 = vld [vmem:[#allocation5 + $0x488] sm:$0xf]  ;;  %vm4297_vm9 = vweird.f32 %v11453_v49  ;;  %vm4301_vm14 = vcmp.eq.f32.partialorder %v4300_v24, 8.507059e+37  ;;  %v14887_v24 = vld [vmem:[#allocation53_spill] sm:$0xff] }
 0x1ca   :  { %10153 = vrcp.f32 %v11455_v1  ;;  %v4244_v46 = vsel %vm4241_vm7, %v4243_v19, %v4239_v3  ;;  %v9774_v3 = vld [vmem:[#allocation5 + $0x294] sm:$0xf0]  ;;  %vm11488_vm11 = vmor %vm4296_vm8, %vm4297_vm9  ;;  %vm4356_vm12 = vweird.f32 %v11455_v1 }
 0x1cb   :  { %v4293_v56 = vsub.f32 1.0, %v4292_v23  ;;  %v11463_v29 = vpack.c.bf16 %v4244_v46, %v4184_v17  ;;  %v8685_v17 = vld [vmem:[#allocation5 + $0x588] sm:$0xf] }
 0x1cc   :  { %v2324_v31 = vpop.f32.mrf.mxu2 }
 0x1cd   :  { %14880 = vst [vmem:[#allocation48_spill] sm:$0xff] %v11463_v29  ;;  %v2325_v8 = vadd.f32 %v2324_v31, %v2276_v10  ;;  %v2373_v2 = vpop.f32.mrf.mxu3  ;;  %v2229_v60 = vpop.f32.mrf.mxu0  ;;  %v4294_v55 = vmul.f32 %v11453_v49, %v4293_v56  ;;  %v9838_v10 = vld [vmem:[#allocation5 + $0x494] sm:$0xf0] }
 0x1ce   :  { %v2230_v35 = vadd.f32 %v2229_v60, %v2181_v28  ;;  %v2278_v26 = vpop.f32.mrf.mxu1  ;;  %v8558_v23 = vor.u32 %v9838_v10, %v8557_v18  ;;  %v8302_v28 = vor.u32 %v9774_v3, %v8301_v44  ;;  %v9870_v31 = vld [vmem:[#allocation5 + $0x594] sm:$0xf0]  ;;  %v8541_v44 = vld [vmem:[#allocation5 + $0x468] sm:$0xf] }
 0x1cf   :  { %v11467_v6 = vadd.f32 %v2373_v2, %v2325_v8  ;;  %v4295_v46 = vadd.f32 %v11453_v49, %v4294_v55  ;;  %v4360_v8 = vand.u32 2147483647, %v11455_v1  ;;  %v4362_v2 = vand.u32 2147483648, %v11455_v1 }
 0x1d0   :  { %v10154_v54 = vpop.eup %10153  ;;  %v2279_v12 = vadd.f32 %v2278_v26, %v2230_v35  ;;  %2424 = vmatmul.bf16.gmra.mxu0 %v14881_v58  ;;  %2708 = vmatpush.bf16.msra.mxu2 %v8558_v23 }
 0x1d1   :  { %v4352_v34 = vmul.f32 %v10154_v54, %v11455_v1  ;;  %2473 = vmatmul.bf16.gmra.mxu1 %v14882_v11  ;;  %2522 = vmatmul.bf16.gmra.mxu2 %v14883_v33  ;;  %vm4357_vm10 = vweird.f32 %v10154_v54  ;;  %v4363_v27 = vor.u32 1.1754944e-38, %v4362_v2  ;;  %vm4361_vm15 = vcmp.eq.f32.partialorder %v4360_v8, 8.507059e+37  ;;  %v14889_v8 = vld [vmem:[#allocation25_spill] sm:$0xff] }
 0x1d2   :  { %2571 = vmatmul.bf16.gmra.mxu3 %v10872_v25  ;;  %2610 = vmatpush.bf16.msra.mxu0 %v8302_v28  ;;  %v4303_v28 = vor.u32 1.1754944e-38, %v4302_v57  ;;  %vm4358_vm13 = vmor %vm4356_vm12, %vm4357_vm10 }
 0x1d3   :  { %v4353_v19 = vsub.f32 1.0, %v4352_v34  ;;  %v8686_v34 = vor.u32 %v9870_v31, %v8685_v17 }
 0x1d4   :  { %v2327_v56 = vpop.f32.mrf.mxu2 }
 0x1d5   :  { %v2328_v60 = vadd.f32 %v2327_v56, %v2279_v12  ;;  %v2376_v35 = vpop.f32.mrf.mxu3  ;;  %v2231_v26 = vpop.f32.mrf.mxu0  ;;  %v4354_v18 = vmul.f32 %v10154_v54, %v4353_v19  ;;  %2757 = vmatpush.bf16.msra.mxu3 %v8686_v34  ;;  %v8429_v12 = vld [vmem:[#allocation5 + $0x388] sm:$0xf]  ;;  %v9806_v56 = vld [vmem:[#allocation5 + $0x394] sm:$0xf0]  ;;  %v4299_v19 = vsel %vm11488_vm11, %v11453_v49, %v4295_v46  ;;  %v2186_v49 = vadd.f32 %v11131_v52, %v11360_v51 }
 0x1d6   :  { %v2232_v10 = vadd.f32 %v2231_v26, %v2183_v47  ;;  %v2280_v55 = vpop.f32.mrf.mxu1  ;;  %v8430_v17 = vor.u32 %v9806_v56, %v8429_v12  ;;  %v9834_v12 = vld [vmem:[#allocation5 + $0x474] sm:$0xf0]  ;;  %v8285_v52 = vld [vmem:[#allocation5 + $0x268] sm:$0xf] }
 0x1d7   :  { %v11492_v3 = vadd.f32 %v2376_v35, %v2328_v60  ;;  %v4355_v47 = vadd.f32 %v10154_v54, %v4354_v18  ;;  %v4304_v60 = vsel %vm4301_vm14, %v4303_v28, %v4299_v19  ;;  %v8542_v56 = vor.u32 %v9834_v12, %v8541_v44  ;;  %v9770_v19 = vld [vmem:[#allocation5 + $0x274] sm:$0xf0] }
 0x1d8   :  { %v2281_v23 = vadd.f32 %v2280_v55, %v2232_v10  ;;  %2659 = vmatpush.bf16.msra.mxu1 %v8430_v17  ;;  %v2188_v17 = vadd.f32 %v11154_v32, %v11360_v51  ;;  %v2191_v32 = vadd.f32 %v11173_v62, %v11360_v51  ;;  %v8269_v62 = vld [vmem:[#allocation5 + $0x248] sm:$0xf] }
 0x1d9   :  { %v4359_v31 = vsel %vm4358_vm13, %v10154_v54, %v4355_v47  ;;  %v14888_v54 = vld [vmem:[#allocation54_spill] sm:$0xff]  ;;  %v8669_v47 = vld [vmem:[#allocation5 + $0x568] sm:$0xf]  ;;  %2709 = vmatpush.bf16.msra.mxu2 %v8542_v56 }
 0x1da   :  { %v4364_v35 = vsel %vm4361_vm15, %v4363_v27, %v4359_v31  ;;  %v8286_v27 = vor.u32 %v9770_v19, %v8285_v52 }
 0x1db   :  { %v11499_v26 = vpack.c.bf16 %v4364_v35, %v4304_v60 }
 0x1dc   :  { %v2329_v46 = vpop.f32.mrf.mxu2  ;;  %2611 = vmatpush.bf16.msra.mxu0 %v8286_v27  ;;  %v14891_v27 = vld [vmem:[#allocation56_spill] sm:$0xff] }
 0x1dd   :  { %14886 = vst [vmem:[#allocation19_spill] sm:$0xff] %v11499_v26  ;;  %v2330_v34 = vadd.f32 %v2329_v46, %v2281_v23  ;;  %v2378_v1 = vpop.f32.mrf.mxu3  ;;  %v2234_v18 = vpop.f32.mrf.mxu0  ;;  %v9866_v23 = vld [vmem:[#allocation5 + $0x574] sm:$0xf0] }
 0x1de   :  { %v2235_v10 = vadd.f32 %v2234_v18, %v2186_v49  ;;  %v2283_v57 = vpop.f32.mrf.mxu1  ;;  %v8670_v31 = vor.u32 %v9866_v23, %v8669_v47  ;;  %v8413_v18 = vld [vmem:[#allocation5 + $0x368] sm:$0xf] }
 0x1df   :  { %v11503_v55 = vadd.f32 %v2378_v1, %v2330_v34 }
 0x1e0   :  { %v2284_v2 = vadd.f32 %v2283_v57, %v2235_v10  ;;  %2429 = vmatmul.bf16.gmra.mxu0 %v14887_v24  ;;  %2758 = vmatpush.bf16.msra.mxu3 %v8670_v31  ;;  %v9802_v10 = vld [vmem:[#allocation5 + $0x374] sm:$0xf0] }
 0x1e1   :  { %2478 = vmatmul.bf16.gmra.mxu1 %v14888_v54  ;;  %2527 = vmatmul.bf16.gmra.mxu2 %v14889_v8  ;;  %v8414_v44 = vor.u32 %v9802_v10, %v8413_v18  ;;  %v14892_v31 = vld [vmem:[#allocation29_spill] sm:$0xff]  ;;  %v2193_v10 = vadd.f32 %v11202_v22, %v11360_v51  ;;  %v2196_v22 = vadd.f32 %v11221_v21, %v11360_v51  ;;  %v8253_v21 = vld [vmem:[#allocation5 + $0x228] sm:$0xf] }
 0x1e2   :  { %2576 = vmatmul.bf16.gmra.mxu3 %v10884_v50  ;;  %v9862_v18 = vld [vmem:[#allocation5 + $0x554] sm:$0xf0]  ;;  %v9708_v50 = vld [vmem:[#allocation5 + $0x8c] sm:$0xf] }
 0x1e3   :  { %2660 = vmatpush.bf16.msra.mxu1 %v8414_v44 }
 0x1e4   :  { %v2332_v28 = vpop.f32.mrf.mxu2 }
 0x1e5   :  { %v2333_v60 = vadd.f32 %v2332_v28, %v2284_v2  ;;  %v2381_v35 = vpop.f32.mrf.mxu3  ;;  %v2236_v49 = vpop.f32.mrf.mxu0  ;;  %v14890_v28 = vld [vmem:[#allocation55_spill] sm:$0xff] }
 0x1e6   :  { %v2237_v46 = vadd.f32 %v2236_v49, %v2188_v17  ;;  %v2285_v34 = vpop.f32.mrf.mxu1 }
 0x1e7   :  { %v11511_v1 = vadd.f32 %v2381_v35, %v2333_v60  ;;  %v8525_v60 = vld [vmem:[#allocation5 + $0x448] sm:$0xf]  ;;  %v9830_v35 = vld [vmem:[#allocation5 + $0x454] sm:$0xf0] }
 0x1e8   :  { %v2286_v57 = vadd.f32 %v2285_v34, %v2237_v46  ;;  %v8526_v49 = vor.u32 %v9830_v35, %v8525_v60  ;;  %v9766_v46 = vld [vmem:[#allocation5 + $0x254] sm:$0xf0]  ;;  %v8653_v34 = vld [vmem:[#allocation5 + $0x548] sm:$0xf] }
 0x1e9   :  { %v8270_v44 = vor.u32 %v9766_v46, %v8269_v62  ;;  %v8397_v60 = vld [vmem:[#allocation5 + $0x348] sm:$0xf]  ;;  %v9798_v35 = vld [vmem:[#allocation5 + $0x354] sm:$0xf0] }
 0x1ea   :  { %2710 = vmatpush.bf16.msra.mxu2 %v8526_v49  ;;  %v8398_v29 = vor.u32 %v9798_v35, %v8397_v60  ;;  %v2198_v60 = vadd.f32 %v11250_v37, %v11360_v51  ;;  %v2201_v37 = vadd.f32 %v11273_v30, %v11360_v51  ;;  %v8237_v30 = vld [vmem:[#allocation5 + $0x208] sm:$0xf] }
 0x1eb   :  { %2612 = vmatpush.bf16.msra.mxu0 %v8270_v44  ;;  %v14893_v44 = vld [vmem:[#allocation58_spill] sm:$0xff] }
 0x1ec   :  { %v2334_v12 = vpop.f32.mrf.mxu2  ;;  %2661 = vmatpush.bf16.msra.mxu1 %v8398_v29  ;;  %v8509_v29 = vld [vmem:[#allocation5 + $0x428] sm:$0xf] }
 0x1ed   :  { %v2335_v52 = vadd.f32 %v2334_v12, %v2286_v57  ;;  %v2383_v2 = vpop.f32.mrf.mxu3  ;;  %v2239_v19 = vpop.f32.mrf.mxu0 }
 0x1ee   :  { %v2240_v47 = vadd.f32 %v2239_v19, %v2191_v32  ;;  %v2288_v56 = vpop.f32.mrf.mxu1  ;;  %v8654_v32 = vor.u32 %v9862_v18, %v8653_v34 }
 0x1ef   :  { %v11515_v23 = vadd.f32 %v2383_v2, %v2335_v52 }
 0x1f0   :  { %v2289_v17 = vadd.f32 %v2288_v56, %v2240_v47  ;;  %2434 = vmatmul.bf16.gmra.mxu0 %v14890_v28  ;;  %2759 = vmatpush.bf16.msra.mxu3 %v8654_v32  ;;  %v14894_v32 = vld [vmem:[#allocation59_spill] sm:$0xff] }
 0x1f1   :  { %2483 = vmatmul.bf16.gmra.mxu1 %v14891_v27  ;;  %2532 = vmatmul.bf16.gmra.mxu2 %v14892_v31 }
 0x1f2   :  { %2581 = vmatmul.bf16.gmra.mxu3 %v10896_v13 }
 0x1f4   :  { %v2337_v57 = vpop.f32.mrf.mxu2 }
 0x1f5   :  { %v2338_v12 = vadd.f32 %v2337_v57, %v2289_v17  ;;  %v2386_v52 = vpop.f32.mrf.mxu3  ;;  %v2241_v2 = vpop.f32.mrf.mxu0 }
 0x1f6   :  { %v2242_v19 = vadd.f32 %v2241_v2, %v2193_v10  ;;  %v2290_v47 = vpop.f32.mrf.mxu1 }
 0x1f7   :  { %v11523_v56 = vadd.f32 %v2386_v52, %v2338_v12  ;;  %v14895_v12 = vld [vmem:[#allocation31_spill] sm:$0xff]  ;;  %v9826_v52 = vld [vmem:[#allocation5 + $0x434] sm:$0xf0] }
 0x1f8   :  { %v2291_v26 = vadd.f32 %v2290_v47, %v2242_v19  ;;  %v8510_v2 = vor.u32 %v9826_v52, %v8509_v29  ;;  %v8637_v19 = vld [vmem:[#allocation5 + $0x528] sm:$0xf]  ;;  %v9858_v47 = vld [vmem:[#allocation5 + $0x534] sm:$0xf0] }
 0x1f9   :  { %v8381_v29 = vld [vmem:[#allocation5 + $0x328] sm:$0xf]  ;;  %v9794_v52 = vld [vmem:[#allocation5 + $0x334] sm:$0xf0] }
 0x1fa   :  { %2711 = vmatpush.bf16.msra.mxu2 %v8510_v2 }
 0x1fc   :  { %v2339_v62 = vpop.f32.mrf.mxu2 }
 0x1fd   :  { %v2340_v46 = vadd.f32 %v2339_v62, %v2291_v26  ;;  %v2388_v17 = vpop.f32.mrf.mxu3  ;;  %v2244_v34 = vpop.f32.mrf.mxu0  ;;  %v9762_v26 = vld [vmem:[#allocation5 + $0x234] sm:$0xf0]  ;;  %v8638_v62 = vor.u32 %v9858_v47, %v8637_v19 }
 0x1fe   :  { %v2245_v18 = vadd.f32 %v2244_v34, %v2196_v22  ;;  %v2293_v49 = vpop.f32.mrf.mxu1  ;;  %v8254_v22 = vor.u32 %v9762_v26, %v8253_v21 }
 0x1ff   :  { %v11527_v10 = vadd.f32 %v2388_v17, %v2340_v46  ;;  %2760 = vmatpush.bf16.msra.mxu3 %v8638_v62  ;;  %v14897_v62 = vld [vmem:[#allocation62_spill] sm:$0xff] }
 0x200   :  { %v2294_v57 = vadd.f32 %v2293_v49, %v2245_v18  ;;  %2439 = vmatmul.bf16.gmra.mxu0 %v14893_v44 }
 0x201   :  { %2488 = vmatmul.bf16.gmra.mxu1 %v14894_v32  ;;  %2537 = vmatmul.bf16.gmra.mxu2 %v14895_v12  ;;  %v8382_v12 = vor.u32 %v9794_v52, %v8381_v29  ;;  %v2203_v29 = vadd.f32 %v11298_v4, %v11360_v51  ;;  %v2206_v4 = vadd.f32 %v11316_v7, %v11360_v51  ;;  %v8063_v32 = vld [vmem:[#allocation5 + $0xb8] sm:$0xf0] }
 0x202   :  { %2586 = vmatmul.bf16.gmra.mxu3 %v10908_v41  ;;  %2613 = vmatpush.bf16.msra.mxu0 %v8254_v22  ;;  %v14896_v22 = vld [vmem:[#allocation61_spill] sm:$0xff]  ;;  %v2208_v7 = vadd.f32 %v11344_v38, %v11360_v51 }
 0x203   :  { %2662 = vmatpush.bf16.msra.mxu1 %v8382_v12  ;;  %v8493_v12 = vld [vmem:[#allocation5 + $0x408] sm:$0xf] }
 0x204   :  { %v2342_v35 = vpop.f32.mrf.mxu2 }
 0x205   :  { %v2343_v46 = vadd.f32 %v2342_v35, %v2294_v57  ;;  %v2391_v17 = vpop.f32.mrf.mxu3  ;;  %v2246_v34 = vpop.f32.mrf.mxu0 }
 0x206   :  { %v2247_v18 = vadd.f32 %v2246_v34, %v2198_v60  ;;  %v2295_v49 = vpop.f32.mrf.mxu1 }
 0x207   :  { %v11535_v59 = vadd.f32 %v2391_v17, %v2343_v46  ;;  %v14898_v46 = vld [vmem:[#allocation34_spill] sm:$0xff]  ;;  %v9822_v17 = vld [vmem:[#allocation5 + $0x414] sm:$0xf0] }
 0x208   :  { %v2296_v41 = vadd.f32 %v2295_v49, %v2247_v18  ;;  %v8494_v34 = vor.u32 %v9822_v17, %v8493_v12  ;;  %v8621_v18 = vld [vmem:[#allocation5 + $0x508] sm:$0xf]  ;;  %v9854_v49 = vld [vmem:[#allocation5 + $0x514] sm:$0xf0] }
 0x209   :  { %v8365_v12 = vld [vmem:[#allocation5 + $0x308] sm:$0xf]  ;;  %v9790_v17 = vld [vmem:[#allocation5 + $0x314] sm:$0xf0] }
 0x20a   :  { %2712 = vmatpush.bf16.msra.mxu2 %v8494_v34 }
 0x20c   :  { %v2344_v21 = vpop.f32.mrf.mxu2 }
 0x20d   :  { %v2345_v26 = vadd.f32 %v2344_v21, %v2296_v41  ;;  %v2393_v57 = vpop.f32.mrf.mxu3  ;;  %v2249_v19 = vpop.f32.mrf.mxu0  ;;  %v9758_v41 = vld [vmem:[#allocation5 + $0x214] sm:$0xf0]  ;;  %v8622_v21 = vor.u32 %v9854_v49, %v8621_v18 }
 0x20e   :  { %v2250_v47 = vadd.f32 %v2249_v19, %v2201_v37  ;;  %v2298_v2 = vpop.f32.mrf.mxu1  ;;  %v8238_v37 = vor.u32 %v9758_v41, %v8237_v30 }
 0x20f   :  { %v11539_v60 = vadd.f32 %v2393_v57, %v2345_v26  ;;  %2761 = vmatpush.bf16.msra.mxu3 %v8622_v21  ;;  %v14900_v21 = vld [vmem:[#allocation65_spill] sm:$0xff] }
 0x210   :  { %v2299_v35 = vadd.f32 %v2298_v2, %v2250_v47  ;;  %2444 = vmatmul.bf16.gmra.mxu0 %v14896_v22 }
 0x211   :  { %2493 = vmatmul.bf16.gmra.mxu1 %v14897_v62  ;;  %2542 = vmatmul.bf16.gmra.mxu2 %v14898_v46  ;;  %v8366_v62 = vor.u32 %v9790_v17, %v8365_v12 }
 0x212   :  { %2591 = vmatmul.bf16.gmra.mxu3 %v10920_v9  ;;  %2614 = vmatpush.bf16.msra.mxu0 %v8238_v37  ;;  %v14899_v37 = vld [vmem:[#allocation64_spill] sm:$0xff] }
 0x213   :  { %2663 = vmatpush.bf16.msra.mxu1 %v8366_v62 }
 0x214   :  { %v2347_v52 = vpop.f32.mrf.mxu2 }
 0x215   :  { %v2348_v26 = vadd.f32 %v2347_v52, %v2299_v35  ;;  %v2396_v57 = vpop.f32.mrf.mxu3  ;;  %v2251_v19 = vpop.f32.mrf.mxu0 }
 0x216   :  { %v2252_v47 = vadd.f32 %v2251_v19, %v2203_v29  ;;  %v2300_v2 = vpop.f32.mrf.mxu1 }
 0x217   :  { %v11547_v9 = vadd.f32 %v2396_v57, %v2348_v26  ;;  %v14901_v26 = vld [vmem:[#allocation38_spill] sm:$0xff] }
 0x218   :  { %v2301_v46 = vadd.f32 %v2300_v2, %v2252_v47 }
 0x21c   :  { %v2349_v30 = vpop.f32.mrf.mxu2 }
 0x21d   :  { %v2350_v41 = vadd.f32 %v2349_v30, %v2301_v46  ;;  %v2398_v35 = vpop.f32.mrf.mxu3  ;;  %v2254_v18 = vpop.f32.mrf.mxu0 }
 0x21e   :  { %v2255_v49 = vadd.f32 %v2254_v18, %v2206_v4  ;;  %v2303_v34 = vpop.f32.mrf.mxu1  ;;  %v2211_v4 = vadd.f32 %v11385_v20, %v11360_v51  ;;  %v2213_v20 = vadd.f32 %v11415_v48, %v11360_v51  ;;  %v8095_v51 = vld [vmem:[#allocation5 + $0xf8] sm:$0xf0] }
 0x21f   :  { %v11551_v29 = vadd.f32 %v2398_v35, %v2350_v41 }
 0x220   :  { %v2304_v52 = vadd.f32 %v2303_v34, %v2255_v49  ;;  %2449 = vmatmul.bf16.gmra.mxu0 %v14899_v37 }
 0x221   :  { %2498 = vmatmul.bf16.gmra.mxu1 %v14900_v21  ;;  %2547 = vmatmul.bf16.gmra.mxu2 %v14901_v26  ;;  %v9720_v26 = vld [vmem:[#allocation5 + $0xec] sm:$0xf] }
 0x222   :  { %2596 = vmatmul.bf16.gmra.mxu3 %v10932_v45  ;;  %v8098_v48 = vor.u32 %v9720_v26, %v8095_v51  ;;  %v11580_v26 = vperm.slane %v11357_v36, 2  ;;  %v8207_v51 = vld [vmem:[#allocation5 + $0x1d8] sm:$0xf0]  ;;  %v9910_v36 = vld [vmem:[#allocation5 + $0x6d4] sm:$0xf0] }
 0x223   :  { %v9712_v21 = vld [vmem:[#allocation5 + $0xac] sm:$0xf] }
 0x224   :  { %v2352_v62 = vpop.f32.mrf.mxu2  ;;  %2852 = vmatpush.bf16.msrb.mxu1 %v8098_v48  ;;  %v8845_v48 = vld [vmem:[#allocation5 + $0x6c8] sm:$0xf]  ;;  %v8066_v13 = vor.u32 %v9712_v21, %v8063_v32 }
 0x225   :  { %v2353_v46 = vadd.f32 %v2352_v62, %v2304_v52  ;;  %v2401_v57 = vpop.f32.mrf.mxu3  ;;  %v2256_v19 = vpop.f32.mrf.mxu0  ;;  %v14902_v52 = vld [vmem:[#allocation67_spill] sm:$0xff] }
 0x226   :  { %v2257_v47 = vadd.f32 %v2256_v19, %v2208_v7  ;;  %v2305_v2 = vpop.f32.mrf.mxu1  ;;  %v14903_v7 = vld [vmem:[#allocation42_spill] sm:$0xff] }
 0x227   :  { %v11559_v12 = vadd.f32 %v2401_v57, %v2353_v46 }
 0x228   :  { %v2306_v17 = vadd.f32 %v2305_v2, %v2257_v47 }
 0x22c   :  { %v2354_v30 = vpop.f32.mrf.mxu2 }
 0x22d   :  { %v2355_v41 = vadd.f32 %v2354_v30, %v2306_v17  ;;  %v2403_v35 = vpop.f32.mrf.mxu3  ;;  %v2259_v18 = vpop.f32.mrf.mxu0  ;;  %v9752_v30 = vld [vmem:[#allocation5 + $0x1ec] sm:$0xf] }
 0x22e   :  { %v2260_v49 = vadd.f32 %v2259_v18, %v2211_v4  ;;  %v2308_v34 = vpop.f32.mrf.mxu1 }
 0x22f   :  { %v11563_v45 = vadd.f32 %v2403_v35, %v2355_v41  ;;  %v8223_v41 = vld [vmem:[#allocation5 + $0x1f8] sm:$0xf0]  ;;  %v8861_v35 = vld [vmem:[#allocation5 + $0x6e8] sm:$0xf] }
 0x230   :  { %v2309_v38 = vadd.f32 %v2308_v34, %v2260_v49  ;;  %2454 = vmatmul.bf16.gmra.mxu0 %v11068_v63  ;;  %v8226_v18 = vor.u32 %v9752_v30, %v8223_v41  ;;  %v9914_v49 = vld [vmem:[#allocation5 + $0x6f4] sm:$0xf0]  ;;  %v9784_v34 = vld [vmem:[#allocation5 + $0x2ec] sm:$0xf]  ;;  %v14904_v30 = vld [vmem:[#allocation20_spill] sm:$0xff] }
 0x231   :  { %2503 = vmatmul.bf16.gmra.mxu1 %v14902_v52  ;;  %2552 = vmatmul.bf16.gmra.mxu2 %v14903_v7  ;;  %v8351_v7 = vld [vmem:[#allocation5 + $0x2f8] sm:$0xf0]  ;;  %v14906_v41 = vld [vmem:[#allocation46_spill] sm:$0xff] }
 0x232   :  { %2601 = vmatmul.bf16.gmra.mxu3 %v14865_v0  ;;  %v8862_v0 = vor.u32 %v9914_v49, %v8861_v35  ;;  %v8354_v52 = vor.u32 %v9784_v34, %v8351_v7  ;;  %2901 = vmatpush.bf16.msrb.mxu2 %v8226_v18  ;;  %v14905_v7 = vld [vmem:[#allocation21_spill] sm:$0xff]  ;;  %v9748_v34 = vld [vmem:[#allocation5 + $0x1cc] sm:$0xf] }
 0x234   :  { %v2357_v62 = vpop.f32.mrf.mxu2  ;;  %2803 = vmatpush.bf16.msrb.mxu0 %v8862_v0  ;;  %2950 = vmatpush.bf16.msrb.mxu3 %v8354_v52 }
 0x235   :  { %v2358_v46 = vadd.f32 %v2357_v62, %v2309_v38  ;;  %v2406_v57 = vpop.f32.mrf.mxu3  ;;  %v2261_v19 = vpop.f32.mrf.mxu0 }
 0x236   :  { %v2262_v47 = vadd.f32 %v2261_v19, %v2213_v20  ;;  %v2310_v2 = vpop.f32.mrf.mxu1 }
 0x237   :  { %v11571_v17 = vadd.f32 %v2406_v57, %v2358_v46 }
 0x238   :  { %v2311_v4 = vadd.f32 %v2310_v2, %v2262_v47 }
 0x23c   :  { %v2359_v38 = vpop.f32.mrf.mxu2 }
 0x23d   :  { %v2360_v20 = vadd.f32 %v2359_v38, %v2311_v4  ;;  %v2408_v62 = vpop.f32.mrf.mxu3  ;;  %v2420_v46 = vpop.f32.mrf.mxu0 }
 0x23e   :  { %v2421_v57 = vadd.f32 %v2420_v46, %v11446_v40  ;;  %v2469_v19 = vpop.f32.mrf.mxu1  ;;  %v8335_v46 = vld [vmem:[#allocation5 + $0x2d8] sm:$0xf0] }
 0x23f   :  { %v11574_v47 = vadd.f32 %v2408_v62, %v2360_v20  ;;  %v8210_v20 = vor.u32 %v9748_v34, %v8207_v51  ;;  %v9780_v62 = vld [vmem:[#allocation5 + $0x2cc] sm:$0xf] }
 0x240   :  { %v2470_v2 = vadd.f32 %v2469_v19, %v2421_v57  ;;  %2615 = vmatmul.bf16.vlgmr.msra.gmra.mxu0 %v14904_v30  ;;  %v8846_v19 = vor.u32 %v9910_v36, %v8845_v48  ;;  %v14907_v48 = vld [vmem:[#allocation23_spill] sm:$0xff] }
 0x241   :  { %2664 = vmatmul.bf16.vlgmr.msra.gmra.mxu1 %v14905_v7  ;;  %2713 = vmatmul.bf16.vlgmr.msra.gmra.mxu2 %v14906_v41 }
 0x242   :  { %v8868_v0 = vmul.f32 -1.442695, %v2470_v2  ;;  %2762 = vmatmul.bf16.vlgmr.msra.gmra.mxu3 %v14875_v39  ;;  %v8338_v2 = vor.u32 %v9780_v62, %v8335_v46  ;;  %v8079_v39 = vld [vmem:[#allocation5 + $0xd8] sm:$0xf0]  ;;  %2902 = vmatpush.bf16.msrb.mxu2 %v8210_v20  ;;  %v14908_v20 = vld [vmem:[#allocation24_spill] sm:$0xff] }
 0x243   :  { %2804 = vmatpush.bf16.msrb.mxu0 %v8846_v19 }
 0x244   :  { %10155 = vpow2.f32 %v8868_v0  ;;  %v2518_v52 = vpop.f32.mrf.mxu2  ;;  %v9716_v0 = vld [vmem:[#allocation5 + $0xcc] sm:$0xf]  ;;  %2951 = vmatpush.bf16.msrb.mxu3 %v8338_v2 }
 0x245   :  { %v2519_v40 = vadd.f32 %v2518_v52, %v11580_v26  ;;  %v2567_v4 = vpop.f32.mrf.mxu3  ;;  %v2422_v35 = vpop.f32.mrf.mxu0  ;;  %v8082_v52 = vor.u32 %v9716_v0, %v8079_v39 }
 0x246   :  { %v2423_v18 = vadd.f32 %v2422_v35, %v11467_v6  ;;  %v2471_v49 = vpop.f32.mrf.mxu1 }
 0x247   :  { %v11585_v38 = vadd.f32 %v2567_v4, %v2519_v40  ;;  %2853 = vmatpush.bf16.msrb.mxu1 %v8082_v52 }
 0x248   :  { %v2472_v57 = vadd.f32 %v2471_v49, %v2423_v18 }
 0x24a   :  { %v10156_v41 = vpop.eup %10155  ;;  %v8872_v7 = vmul.f32 -1.442695, %v2472_v57 }
 0x24b   :  { %v11587_v6 = vadd.f32 1.0, %v10156_v41  ;;  %v14909_v41 = vld [vmem:[#allocation49_spill] sm:$0xff]  ;;  %2854 = vmatpush.bf16.msrb.mxu1 %v8066_v13 }
 0x24c   :  { %10157 = vpow2.f32 %v8872_v7  ;;  %v2520_v40 = vpop.f32.mrf.mxu2 }
 0x24d   :  { %10159 = vrcp.f32 %v11587_v6  ;;  %v2521_v4 = vadd.f32 %v2520_v40, %v11580_v26  ;;  %v2569_v35 = vpop.f32.mrf.mxu3  ;;  %v2425_v18 = vpop.f32.mrf.mxu0  ;;  %vm3471_vm0 = vweird.f32 %v11587_v6 }
 0x24e   :  { %v2426_v49 = vadd.f32 %v2425_v18, %v11492_v3  ;;  %v2474_v34 = vpop.f32.mrf.mxu1  ;;  %v8191_v18 = vld [vmem:[#allocation5 + $0x1b8] sm:$0xf0] }
 0x24f   :  { %v11592_v51 = vadd.f32 %v2569_v35, %v2521_v4  ;;  %v9744_v35 = vld [vmem:[#allocation5 + $0x1ac] sm:$0xf] }
 0x250   :  { %v2475_v39 = vadd.f32 %v2474_v34, %v2426_v49  ;;  %2620 = vmatmul.bf16.gmra.mxu0 %v14907_v48  ;;  %v8194_v34 = vor.u32 %v9744_v35, %v8191_v18 }
 0x251   :  { %2669 = vmatmul.bf16.gmra.mxu1 %v14908_v20  ;;  %2718 = vmatmul.bf16.gmra.mxu2 %v14909_v41  ;;  %v8319_v20 = vld [vmem:[#allocation5 + $0x2b8] sm:$0xf0] }
 0x252   :  { %v10158_v7 = vpop.eup %10157  ;;  %v8876_v36 = vmul.f32 -1.442695, %v2475_v39  ;;  %2767 = vmatmul.bf16.gmra.mxu3 %v14881_v58  ;;  %v8829_v39 = vld [vmem:[#allocation5 + $0x6a8] sm:$0xf]  ;;  %v9776_v58 = vld [vmem:[#allocation5 + $0x2ac] sm:$0xf]  ;;  %2903 = vmatpush.bf16.msrb.mxu2 %v8194_v34 }
 0x253   :  { %v11598_v62 = vpop.eup %10159  ;;  %v11600_v46 = vadd.f32 1.0, %v10158_v7  ;;  %v9906_v7 = vld [vmem:[#allocation5 + $0x6b4] sm:$0xf0]  ;;  %v3475_v34 = vand.u32 2147483647, %v11587_v6 }
 0x254   :  { %v3467_v3 = vmul.f32 %v11598_v62, %v11587_v6  ;;  %10161 = vpow2.f32 %v8876_v36  ;;  %v2523_v57 = vpop.f32.mrf.mxu2  ;;  %v8830_v41 = vor.u32 %v9906_v7, %v8829_v39  ;;  %vm3472_vm1 = vweird.f32 %v11598_v62 }
 0x255   :  { %10163 = vrcp.f32 %v11600_v46  ;;  %v2524_v19 = vadd.f32 %v2523_v57, %v11580_v26  ;;  %v2572_v2 = vpop.f32.mrf.mxu3  ;;  %v2427_v0 = vpop.f32.mrf.mxu0  ;;  %v8322_v57 = vor.u32 %v9776_v58, %v8319_v20  ;;  %v3537_v35 = vand.u32 2147483648, %v11600_v46  ;;  %vm11628_vm3 = vmor %vm3471_vm0, %vm3472_vm1 }
 0x256   :  { %v3468_v52 = vsub.f32 1.0, %v3467_v3  ;;  %v2428_v40 = vadd.f32 %v2427_v0, %v11503_v55  ;;  %v2476_v4 = vpop.f32.mrf.mxu1  ;;  %2805 = vmatpush.bf16.msrb.mxu0 %v8830_v41  ;;  %vm3531_vm4 = vweird.f32 %v11600_v46  ;;  %vm3476_vm5 = vcmp.eq.f32.partialorder %v3475_v34, 8.507059e+37 }
 0x257   :  { %v11607_v49 = vadd.f32 %v2572_v2, %v2524_v19  ;;  %2952 = vmatpush.bf16.msrb.mxu3 %v8322_v57  ;;  %v3535_v57 = vand.u32 2147483647, %v11600_v46 }
 0x258   :  { %v2477_v36 = vadd.f32 %v2476_v4, %v2428_v40  ;;  %v3469_v55 = vmul.f32 %v11598_v62, %v3468_v52  ;;  %v3477_v4 = vand.u32 2147483648, %v11587_v6 }
 0x259   :  { %vm3536_vm7 = vcmp.eq.f32.partialorder %v3535_v57, 8.507059e+37  ;;  %v8813_v57 = vld [vmem:[#allocation5 + $0x688] sm:$0xf] }
 0x25a   :  { %v10162_v3 = vpop.eup %10161  ;;  %v8880_v0 = vmul.f32 -1.442695, %v2477_v36  ;;  %v3470_v13 = vadd.f32 %v11598_v62, %v3469_v55  ;;  %v14910_v36 = vld [vmem:[#allocation27_spill] sm:$0xff]  ;;  %v14914_v55 = vld [vmem:[#allocation52_spill] sm:$0xff] }
 0x25b   :  { %v10164_v31 = vpop.eup %10163  ;;  %v11610_v19 = vadd.f32 1.0, %v10162_v3  ;;  %v14913_v3 = vld [vmem:[#allocation28_spill] sm:$0xff] }
 0x25c   :  { %v3527_v2 = vmul.f32 %v10164_v31, %v11600_v46  ;;  %10165 = vpow2.f32 %v8880_v0  ;;  %v2525_v40 = vpop.f32.mrf.mxu2  ;;  %vm3532_vm2 = vweird.f32 %v10164_v31 }
 0x25d   :  { %10167 = vrcp.f32 %v11610_v19  ;;  %v2526_v58 = vadd.f32 %v2525_v40, %v11580_v26  ;;  %v2574_v32 = vpop.f32.mrf.mxu3  ;;  %v2430_v21 = vpop.f32.mrf.mxu0  ;;  %v3474_v40 = vsel %vm11628_vm3, %v11598_v62, %v3470_v13  ;;  %vm3533_vm6 = vmor %vm3531_vm4, %vm3532_vm2  ;;  %vm3591_vm8 = vweird.f32 %v11610_v19 }
 0x25e   :  { %v3528_v20 = vsub.f32 1.0, %v3527_v2  ;;  %v2431_v41 = vadd.f32 %v2430_v21, %v11511_v1  ;;  %v2479_v52 = vpop.f32.mrf.mxu1 }
 0x25f   :  { %v11621_v18 = vadd.f32 %v2574_v32, %v2526_v58  ;;  %v3478_v32 = vor.u32 1.1754944e-38, %v3477_v4 }
 0x260   :  { %v3529_v39 = vmul.f32 %v10164_v31, %v3528_v20  ;;  %v2480_v7 = vadd.f32 %v2479_v52, %v2431_v41  ;;  %2625 = vmatmul.bf16.gmra.mxu0 %v14910_v36  ;;  %v3538_v20 = vor.u32 1.1754944e-38, %v3537_v35  ;;  %v9740_v35 = vld [vmem:[#allocation5 + $0x18c] sm:$0xf]  ;;  %v8303_v36 = vld [vmem:[#allocation5 + $0x298] sm:$0xf0] }
 0x261   :  { %2674 = vmatmul.bf16.gmra.mxu1 %v14913_v3  ;;  %2723 = vmatmul.bf16.gmra.mxu2 %v14914_v55  ;;  %v3479_v4 = vsel %vm3476_vm5, %v3478_v32, %v3474_v40  ;;  %v9772_v3 = vld [vmem:[#allocation5 + $0x28c] sm:$0xf]  ;;  %v8047_v40 = vld [vmem:[#allocation5 + $0x98] sm:$0xf0] }
 0x262   :  { %v10166_v0 = vpop.eup %10165  ;;  %v8884_v2 = vmul.f32 -1.442695, %v2480_v7  ;;  %2772 = vmatmul.bf16.gmra.mxu3 %v14887_v24  ;;  %v3530_v58 = vadd.f32 %v10164_v31, %v3529_v39  ;;  %v8175_v24 = vld [vmem:[#allocation5 + $0x198] sm:$0xf0]  ;;  %v8306_v32 = vor.u32 %v9772_v3, %v8303_v36 }
 0x263   :  { %v11639_v6 = vpop.eup %10167  ;;  %v11641_v21 = vadd.f32 1.0, %v10166_v0 }
 0x264   :  { %v3587_v46 = vmul.f32 %v11639_v6, %v11610_v19  ;;  %10169 = vpow2.f32 %v8884_v2  ;;  %v2528_v41 = vpop.f32.mrf.mxu2  ;;  %v3534_v52 = vsel %vm3533_vm6, %v10164_v31, %v3530_v58  ;;  %v8178_v31 = vor.u32 %v9740_v35, %v8175_v24  ;;  %v9902_v58 = vld [vmem:[#allocation5 + $0x694] sm:$0xf0]  ;;  %2953 = vmatpush.bf16.msrb.mxu3 %v8306_v32 }
 0x265   :  { %10171 = vrcp.f32 %v11641_v21  ;;  %v2529_v62 = vadd.f32 %v2528_v41, %v11580_v26  ;;  %v2577_v13 = vpop.f32.mrf.mxu3  ;;  %v2432_v39 = vpop.f32.mrf.mxu0  ;;  %v3539_v7 = vsel %vm3536_vm7, %v3538_v20, %v3534_v52  ;;  %v8814_v41 = vor.u32 %v9902_v58, %v8813_v57 }
 0x266   :  { %v3588_v1 = vsub.f32 1.0, %v3587_v46  ;;  %v2433_v34 = vadd.f32 %v2432_v39, %v11515_v23  ;;  %v2481_v0 = vpop.f32.mrf.mxu1  ;;  %v11649_v55 = vpack.c.bf16 %v3539_v7, %v3479_v4  ;;  %2904 = vmatpush.bf16.msrb.mxu2 %v8178_v31  ;;  %v8050_v20 = vor.u32 %v9708_v50, %v8047_v40 }
 0x267   :  { %v11651_v2 = vadd.f32 %v2577_v13, %v2529_v62  ;;  %2806 = vmatpush.bf16.msrb.mxu0 %v8814_v41  ;;  %vm3592_vm9 = vweird.f32 %v11639_v6  ;;  %v3597_v35 = vand.u32 2147483648, %v11610_v19  ;;  %v3657_v31 = vand.u32 2147483648, %v11641_v21  ;;  %v9898_v41 = vld [vmem:[#allocation5 + $0x674] sm:$0xf0] }
 0x268   :  { %14915 = vst [vmem:[#allocation51_spill] sm:$0xff] %v11649_v55  ;;  %v2482_v27 = vadd.f32 %v2481_v0, %v2433_v34  ;;  %v3589_v52 = vmul.f32 %v11639_v6, %v3588_v1  ;;  %2855 = vmatpush.bf16.msrb.mxu1 %v8050_v20  ;;  %v3595_v0 = vand.u32 2147483647, %v11610_v19  ;;  %vm11674_vm11 = vmor %vm3591_vm8, %vm3592_vm9  ;;  %vm3651_vm12 = vweird.f32 %v11641_v21  ;;  %v9704_v55 = vld [vmem:[#allocation5 + $0x6c] sm:$0xf] }
 0x269   :  { %v3598_v19 = vor.u32 1.1754944e-38, %v3597_v35  ;;  %v9736_v35 = vld [vmem:[#allocation5 + $0x16c] sm:$0xf] }
 0x26a   :  { %v10170_v23 = vpop.eup %10169  ;;  %v8888_v46 = vmul.f32 -1.442695, %v2482_v27  ;;  %v3590_v1 = vadd.f32 %v11639_v6, %v3589_v52  ;;  %vm3596_vm13 = vcmp.eq.f32.partialorder %v3595_v0, 8.507059e+37 }
 0x26b   :  { %v10172_v39 = vpop.eup %10171  ;;  %v11654_v62 = vadd.f32 1.0, %v10170_v23 }
 0x26c   :  { %v3647_v24 = vmul.f32 %v10172_v39, %v11641_v21  ;;  %10173 = vpow2.f32 %v8888_v46  ;;  %v2530_v13 = vpop.f32.mrf.mxu2  ;;  %vm3652_vm10 = vweird.f32 %v10172_v39  ;;  %v3594_v20 = vsel %vm11674_vm11, %v11639_v6, %v3590_v1 }
 0x26d   :  { %10175 = vrcp.f32 %v11654_v62  ;;  %v2531_v4 = vadd.f32 %v2530_v13, %v11580_v26  ;;  %v2579_v36 = vpop.f32.mrf.mxu3  ;;  %v2435_v50 = vpop.f32.mrf.mxu0  ;;  %vm3653_vm14 = vmor %vm3651_vm12, %vm3652_vm10  ;;  %vm3711_vm0 = vweird.f32 %v11654_v62 }
 0x26e   :  { %v3648_v27 = vsub.f32 1.0, %v3647_v24  ;;  %v2436_v3 = vadd.f32 %v2435_v50, %v11523_v56  ;;  %v2484_v7 = vpop.f32.mrf.mxu1  ;;  %v3655_v56 = vand.u32 2147483647, %v11641_v21  ;;  %v3658_v24 = vor.u32 1.1754944e-38, %v3657_v31  ;;  %v8159_v31 = vld [vmem:[#allocation5 + $0x178] sm:$0xf0] }
 0x26f   :  { %v11663_v34 = vadd.f32 %v2579_v36, %v2531_v4 }
 0x270   :  { %v2485_v57 = vadd.f32 %v2484_v7, %v2436_v3  ;;  %2630 = vmatmul.bf16.gmra.mxu0 %v10898_v14  ;;  %v3649_v58 = vmul.f32 %v10172_v39, %v3648_v27  ;;  %vm3656_vm15 = vcmp.eq.f32.partialorder %v3655_v56, 8.507059e+37  ;;  %v3599_v27 = vsel %vm3596_vm13, %v3598_v19, %v3594_v20  ;;  %v8797_v56 = vld [vmem:[#allocation5 + $0x668] sm:$0xf]  ;;  %v8031_v20 = vld [vmem:[#allocation5 + $0x78] sm:$0xf0] }
 0x271   :  { %2679 = vmatmul.bf16.gmra.mxu1 %v10900_v15  ;;  %2728 = vmatmul.bf16.gmra.mxu2 %v11002_v16 }
 0x272   :  { %v10174_v40 = vpop.eup %10173  ;;  %v8892_v32 = vmul.f32 -1.442695, %v2485_v57  ;;  %2777 = vmatmul.bf16.gmra.mxu3 %v14890_v28  ;;  %v3650_v23 = vadd.f32 %v10172_v39, %v3649_v58 }
 0x273   :  { %v11683_v46 = vpop.eup %10175  ;;  %v11685_v52 = vadd.f32 1.0, %v10174_v40  ;;  %v9768_v40 = vld [vmem:[#allocation5 + $0x26c] sm:$0xf] }
 0x274   :  { %v3707_v13 = vmul.f32 %v11683_v46, %v11654_v62  ;;  %10177 = vpow2.f32 %v8892_v32  ;;  %v2533_v4 = vpop.f32.mrf.mxu2  ;;  %v3654_v36 = vsel %vm3653_vm14, %v10172_v39, %v3650_v23  ;;  %v8162_v39 = vor.u32 %v9736_v35, %v8159_v31 }
 0x275   :  { %10179 = vrcp.f32 %v11685_v52  ;;  %v2534_v6 = vadd.f32 %v2533_v4, %v11580_v26  ;;  %v2582_v21 = vpop.f32.mrf.mxu3  ;;  %v2437_v50 = vpop.f32.mrf.mxu0  ;;  %v3659_v3 = vsel %vm3656_vm15, %v3658_v24, %v3654_v36  ;;  %v8798_v23 = vor.u32 %v9898_v41, %v8797_v56  ;;  %v8287_v4 = vld [vmem:[#allocation5 + $0x278] sm:$0xf0] }
 0x276   :  { %v3708_v7 = vsub.f32 1.0, %v3707_v13  ;;  %v2438_v1 = vadd.f32 %v2437_v50, %v11527_v10  ;;  %v2486_v0 = vpop.f32.mrf.mxu1  ;;  %v11693_v57 = vpack.c.bf16 %v3659_v3, %v3599_v27  ;;  %2905 = vmatpush.bf16.msrb.mxu2 %v8162_v39  ;;  %v8290_v19 = vor.u32 %v9768_v40, %v8287_v4  ;;  %v14919_v4 = vld [vmem:[#allocation57_spill] sm:$0xff] }
 0x277   :  { %v11695_v58 = vadd.f32 %v2582_v21, %v2534_v6  ;;  %v8034_v24 = vor.u32 %v9704_v55, %v8031_v20  ;;  %2807 = vmatpush.bf16.msrb.mxu0 %v8798_v23  ;;  %vm3712_vm1 = vweird.f32 %v11683_v46  ;;  %v3715_v56 = vand.u32 2147483647, %v11654_v62 }
 0x278   :  { %14918 = vst [vmem:[#allocation22_spill] sm:$0xff] %v11693_v57  ;;  %v2487_v32 = vadd.f32 %v2486_v0, %v2438_v1  ;;  %v3709_v36 = vmul.f32 %v11683_v46, %v3708_v7  ;;  %2954 = vmatpush.bf16.msrb.mxu3 %v8290_v19  ;;  %v3717_v41 = vand.u32 2147483648, %v11654_v62  ;;  %v3777_v40 = vand.u32 2147483648, %v11685_v52  ;;  %vm11718_vm3 = vmor %vm3711_vm0, %vm3712_vm1  ;;  %v8271_v57 = vld [vmem:[#allocation5 + $0x258] sm:$0xf0] }
 0x279   :  { %2856 = vmatpush.bf16.msrb.mxu1 %v8034_v24  ;;  %vm3771_vm4 = vweird.f32 %v11685_v52  ;;  %vm3716_vm5 = vcmp.eq.f32.partialorder %v3715_v56, 8.507059e+37 }
 0x27a   :  { %v10178_v10 = vpop.eup %10177  ;;  %v8896_v13 = vmul.f32 -1.442695, %v2487_v32  ;;  %v3710_v31 = vadd.f32 %v11683_v46, %v3709_v36  ;;  %v3718_v62 = vor.u32 1.1754944e-38, %v3717_v41 }
 0x27b   :  { %v10180_v50 = vpop.eup %10179  ;;  %v11698_v6 = vadd.f32 1.0, %v10178_v10 }
 0x27c   :  { %v3767_v21 = vmul.f32 %v10180_v50, %v11685_v52  ;;  %10181 = vpow2.f32 %v8896_v13  ;;  %v2535_v27 = vpop.f32.mrf.mxu2  ;;  %vm3772_vm2 = vweird.f32 %v10180_v50  ;;  %v3714_v10 = vsel %vm11718_vm3, %v11683_v46, %v3710_v31 }
 0x27d   :  { %10183 = vrcp.f32 %v11698_v6  ;;  %v2536_v3 = vadd.f32 %v2535_v27, %v11580_v26  ;;  %v2584_v1 = vpop.f32.mrf.mxu3  ;;  %v2440_v55 = vpop.f32.mrf.mxu0  ;;  %vm3773_vm6 = vmor %vm3771_vm4, %vm3772_vm2  ;;  %v3778_v27 = vor.u32 1.1754944e-38, %v3777_v40  ;;  %v9732_v40 = vld [vmem:[#allocation5 + $0x14c] sm:$0xf]  ;;  %vm3831_vm8 = vweird.f32 %v11698_v6 }
 0x27e   :  { %v3768_v0 = vsub.f32 1.0, %v3767_v21  ;;  %v2441_v7 = vadd.f32 %v2440_v55, %v11535_v59  ;;  %v2489_v35 = vpop.f32.mrf.mxu1  ;;  %v3775_v59 = vand.u32 2147483647, %v11685_v52 }
 0x27f   :  { %v11707_v39 = vadd.f32 %v2584_v1, %v2536_v3 }
 0x280   :  { %v2490_v32 = vadd.f32 %v2489_v35, %v2441_v7  ;;  %2635 = vmatmul.bf16.gmra.mxu0 %v10910_v42  ;;  %v3769_v23 = vmul.f32 %v10180_v50, %v3768_v0  ;;  %vm3776_vm7 = vcmp.eq.f32.partialorder %v3775_v59, 8.507059e+37  ;;  %v3719_v7 = vsel %vm3716_vm5, %v3718_v62, %v3714_v10  ;;  %v8781_v59 = vld [vmem:[#allocation5 + $0x648] sm:$0xf]  ;;  %v8015_v10 = vld [vmem:[#allocation5 + $0x58] sm:$0xf0] }
 0x281   :  { %2684 = vmatmul.bf16.gmra.mxu1 %v10912_v43  ;;  %2733 = vmatmul.bf16.gmra.mxu2 %v14919_v4  ;;  %v14929_v43 = vld [vmem:[#allocation40_spill] sm:$0xff] }
 0x282   :  { %v10182_v19 = vpop.eup %10181  ;;  %v8900_v24 = vmul.f32 -1.442695, %v2490_v32  ;;  %2782 = vmatmul.bf16.gmra.mxu3 %v14893_v44  ;;  %v3770_v13 = vadd.f32 %v10180_v50, %v3769_v23  ;;  %v8143_v32 = vld [vmem:[#allocation5 + $0x158] sm:$0xf0]  ;;  %v9700_v44 = vld [vmem:[#allocation5 + $0x4c] sm:$0xf] }
 0x283   :  { %v11727_v36 = vpop.eup %10183  ;;  %v11729_v21 = vadd.f32 1.0, %v10182_v19  ;;  %v9894_v19 = vld [vmem:[#allocation5 + $0x654] sm:$0xf0] }
 0x284   :  { %v3827_v3 = vmul.f32 %v11727_v36, %v11698_v6  ;;  %10185 = vpow2.f32 %v8900_v24  ;;  %v2538_v1 = vpop.f32.mrf.mxu2  ;;  %v3774_v55 = vsel %vm3773_vm6, %v10180_v50, %v3770_v13  ;;  %v8146_v50 = vor.u32 %v9732_v40, %v8143_v32  ;;  %v9764_v24 = vld [vmem:[#allocation5 + $0x24c] sm:$0xf] }
 0x285   :  { %10187 = vrcp.f32 %v11729_v21  ;;  %v2539_v46 = vadd.f32 %v2538_v1, %v11580_v26  ;;  %v2587_v52 = vpop.f32.mrf.mxu3  ;;  %v2442_v0 = vpop.f32.mrf.mxu0  ;;  %v3779_v35 = vsel %vm3776_vm7, %v3778_v27, %v3774_v55  ;;  %v8782_v1 = vor.u32 %v9894_v19, %v8781_v59 }
 0x286   :  { %v3828_v31 = vsub.f32 1.0, %v3827_v3  ;;  %v2443_v56 = vadd.f32 %v2442_v0, %v11539_v60  ;;  %v2491_v41 = vpop.f32.mrf.mxu1  ;;  %v11737_v23 = vpack.c.bf16 %v3779_v35, %v3719_v7  ;;  %2906 = vmatpush.bf16.msrb.mxu2 %v8146_v50  ;;  %v8274_v62 = vor.u32 %v9764_v24, %v8271_v57 }
 0x287   :  { %v11739_v20 = vadd.f32 %v2587_v52, %v2539_v46  ;;  %v8018_v27 = vor.u32 %v9700_v44, %v8015_v10  ;;  %2808 = vmatpush.bf16.msrb.mxu0 %v8782_v1  ;;  %vm3832_vm9 = vweird.f32 %v11727_v36  ;;  %v3835_v50 = vand.u32 2147483647, %v11698_v6  ;;  %v14924_v10 = vld [vmem:[#allocation37_spill] sm:$0xff] }
 0x288   :  { %14922 = vst [vmem:[#allocation54_spill] sm:$0xff] %v11737_v23  ;;  %v2492_v13 = vadd.f32 %v2491_v41, %v2443_v56  ;;  %v3829_v55 = vmul.f32 %v11727_v36, %v3828_v31  ;;  %2955 = vmatpush.bf16.msrb.mxu3 %v8274_v62  ;;  %v3837_v59 = vand.u32 2147483648, %v11698_v6  ;;  %v3897_v19 = vand.u32 2147483648, %v11729_v21  ;;  %v14925_v62 = vld [vmem:[#allocation60_spill] sm:$0xff]  ;;  %vm11762_vm11 = vmor %vm3831_vm8, %vm3832_vm9  ;;  %v9760_v23 = vld [vmem:[#allocation5 + $0x22c] sm:$0xf] }
 0x289   :  { %2857 = vmatpush.bf16.msrb.mxu1 %v8018_v27  ;;  %vm3891_vm12 = vweird.f32 %v11729_v21  ;;  %vm3836_vm13 = vcmp.eq.f32.partialorder %v3835_v50, 8.507059e+37  ;;  %v8127_v27 = vld [vmem:[#allocation5 + $0x138] sm:$0xf0] }
 0x28a   :  { %v10186_v60 = vpop.eup %10185  ;;  %v8904_v3 = vmul.f32 -1.442695, %v2492_v13  ;;  %v3830_v40 = vadd.f32 %v11727_v36, %v3829_v55  ;;  %v14923_v13 = vld [vmem:[#allocation36_spill] sm:$0xff]  ;;  %v3838_v6 = vor.u32 1.1754944e-38, %v3837_v59 }
 0x28b   :  { %v10188_v0 = vpop.eup %10187  ;;  %v11742_v46 = vadd.f32 1.0, %v10186_v60 }
 0x28c   :  { %v3887_v52 = vmul.f32 %v10188_v0, %v11729_v21  ;;  %10189 = vpow2.f32 %v8904_v3  ;;  %v2540_v7 = vpop.f32.mrf.mxu2  ;;  %vm3892_vm10 = vweird.f32 %v10188_v0  ;;  %v3834_v55 = vsel %vm11762_vm11, %v11727_v36, %v3830_v40 }
 0x28d   :  { %10191 = vrcp.f32 %v11742_v46  ;;  %v2541_v35 = vadd.f32 %v2540_v7, %v11580_v26  ;;  %v2589_v57 = vpop.f32.mrf.mxu3  ;;  %v2445_v44 = vpop.f32.mrf.mxu0  ;;  %vm3893_vm14 = vmor %vm3891_vm12, %vm3892_vm10  ;;  %v3839_v40 = vsel %vm3836_vm13, %v3838_v6, %v3834_v55  ;;  %v7999_v55 = vld [vmem:[#allocation5 + $0x38] sm:$0xf0]  ;;  %vm3951_vm0 = vweird.f32 %v11742_v46 }
 0x28e   :  { %v3888_v56 = vsub.f32 1.0, %v3887_v52  ;;  %v2446_v31 = vadd.f32 %v2445_v44, %v11547_v9  ;;  %v2494_v41 = vpop.f32.mrf.mxu1  ;;  %v3895_v9 = vand.u32 2147483647, %v11729_v21  ;;  %v3957_v4 = vand.u32 2147483648, %v11742_v46 }
 0x28f   :  { %v11751_v32 = vadd.f32 %v2589_v57, %v2541_v35  ;;  %v3898_v57 = vor.u32 1.1754944e-38, %v3897_v19  ;;  %v9728_v19 = vld [vmem:[#allocation5 + $0x12c] sm:$0xf] }
 0x290   :  { %v2495_v24 = vadd.f32 %v2494_v41, %v2446_v31  ;;  %2640 = vmatmul.bf16.gmra.mxu0 %v14923_v13  ;;  %v3889_v1 = vmul.f32 %v10188_v0, %v3888_v56  ;;  %vm3896_vm15 = vcmp.eq.f32.partialorder %v3895_v9, 8.507059e+37  ;;  %v8765_v9 = vld [vmem:[#allocation5 + $0x628] sm:$0xf] }
 0x291   :  { %2689 = vmatmul.bf16.gmra.mxu1 %v14924_v10  ;;  %2738 = vmatmul.bf16.gmra.mxu2 %v14925_v62  ;;  %v8255_v62 = vld [vmem:[#allocation5 + $0x238] sm:$0xf0]  ;;  %v9696_v10 = vld [vmem:[#allocation5 + $0x2c] sm:$0xf] }
 0x292   :  { %v10190_v60 = vpop.eup %10189  ;;  %v8908_v3 = vmul.f32 -1.442695, %v2495_v24  ;;  %2787 = vmatmul.bf16.gmra.mxu3 %v14896_v22  ;;  %v3890_v52 = vadd.f32 %v10188_v0, %v3889_v1  ;;  %v8258_v6 = vor.u32 %v9760_v23, %v8255_v62  ;;  %v9724_v23 = vld [vmem:[#allocation5 + $0x10c] sm:$0xf]  ;;  %v8749_v62 = vld [vmem:[#allocation5 + $0x608] sm:$0xf] }
 0x293   :  { %v11771_v7 = vpop.eup %10191  ;;  %v11773_v35 = vadd.f32 1.0, %v10190_v60 }
 0x294   :  { %v3947_v44 = vmul.f32 %v11771_v7, %v11742_v46  ;;  %10193 = vpow2.f32 %v8908_v3  ;;  %v2543_v56 = vpop.f32.mrf.mxu2  ;;  %v3894_v31 = vsel %vm3893_vm14, %v10188_v0, %v3890_v52  ;;  %v8130_v0 = vor.u32 %v9728_v19, %v8127_v27  ;;  %v9890_v52 = vld [vmem:[#allocation5 + $0x634] sm:$0xf0]  ;;  %2956 = vmatpush.bf16.msrb.mxu3 %v8258_v6  ;;  %v9756_v27 = vld [vmem:[#allocation5 + $0x20c] sm:$0xf] }
 0x295   :  { %10195 = vrcp.f32 %v11773_v35  ;;  %v2544_v36 = vadd.f32 %v2543_v56, %v11580_v26  ;;  %v2592_v21 = vpop.f32.mrf.mxu3  ;;  %v2447_v41 = vpop.f32.mrf.mxu0  ;;  %v3899_v24 = vsel %vm3896_vm15, %v3898_v57, %v3894_v31  ;;  %v8766_v56 = vor.u32 %v9890_v52, %v8765_v9  ;;  %v9886_v19 = vld [vmem:[#allocation5 + $0x614] sm:$0xf0] }
 0x296   :  { %v3948_v50 = vsub.f32 1.0, %v3947_v44  ;;  %v2448_v59 = vadd.f32 %v2447_v41, %v11551_v29  ;;  %v2496_v1 = vpop.f32.mrf.mxu1  ;;  %v11781_v60 = vpack.c.bf16 %v3899_v24, %v3839_v40  ;;  %2907 = vmatpush.bf16.msrb.mxu2 %v8130_v0  ;;  %v8002_v57 = vor.u32 %v9696_v10, %v7999_v55  ;;  %v8111_v10 = vld [vmem:[#allocation5 + $0x118] sm:$0xf0] }
 0x297   :  { %v11783_v3 = vadd.f32 %v2592_v21, %v2544_v36  ;;  %2809 = vmatpush.bf16.msrb.mxu0 %v8766_v56  ;;  %v3955_v21 = vand.u32 2147483647, %v11742_v46  ;;  %vm3952_vm1 = vweird.f32 %v11771_v7  ;;  %v8239_v0 = vld [vmem:[#allocation5 + $0x218] sm:$0xf0]  ;;  %v8750_v6 = vor.u32 %v9886_v19, %v8749_v62  ;;  %v14931_v62 = vld [vmem:[#allocation63_spill] sm:$0xff] }
 0x298   :  { %14928 = vst [vmem:[#allocation25_spill] sm:$0xff] %v11781_v60  ;;  %v2497_v22 = vadd.f32 %v2496_v1, %v2448_v59  ;;  %v3949_v29 = vmul.f32 %v11771_v7, %v3948_v50  ;;  %2858 = vmatpush.bf16.msrb.mxu1 %v8002_v57  ;;  %v8114_v1 = vor.u32 %v9724_v23, %v8111_v10  ;;  %v4017_v23 = vand.u32 2147483648, %v11773_v35  ;;  %vm11813_vm3 = vmor %vm3951_vm0, %vm3952_vm1 }
 0x299   :  { %v8242_v57 = vor.u32 %v9756_v27, %v8239_v0  ;;  %vm4011_vm4 = vweird.f32 %v11773_v35  ;;  %vm3956_vm5 = vcmp.eq.f32.partialorder %v3955_v21, 8.507059e+37  ;;  %v3958_v0 = vor.u32 1.1754944e-38, %v3957_v4 }
 0x29a   :  { %v10194_v44 = vpop.eup %10193  ;;  %v8912_v31 = vmul.f32 -1.442695, %v2497_v22  ;;  %v3950_v9 = vadd.f32 %v11771_v7, %v3949_v29  ;;  %2908 = vmatpush.bf16.msrb.mxu2 %v8114_v1 }
 0x29b   :  { %v11786_v41 = vpop.eup %10195  ;;  %v11788_v36 = vadd.f32 1.0, %v10194_v44  ;;  %v9692_v44 = vld [vmem:[#allocation5 + $0xc] sm:$0xf]  ;;  %2957 = vmatpush.bf16.msrb.mxu3 %v8242_v57  ;;  %2810 = vmatpush.bf16.msrb.mxu0 %v8750_v6 }
 0x29c   :  { %v4007_v40 = vmul.f32 %v11786_v41, %v11773_v35  ;;  %10197 = vpow2.f32 %v8912_v31  ;;  %v2545_v24 = vpop.f32.mrf.mxu2  ;;  %v7983_v31 = vld [vmem:[#allocation5 + $0x18] sm:$0xf0]  ;;  %vm4012_vm2 = vweird.f32 %v11786_v41  ;;  %v3954_v1 = vsel %vm11813_vm3, %v11771_v7, %v3950_v9 }
 0x29d   :  { %10199 = vrcp.f32 %v11788_v36  ;;  %v2546_v22 = vadd.f32 %v2545_v24, %v11580_v26  ;;  %v2594_v50 = vpop.f32.mrf.mxu3  ;;  %v2450_v59 = vpop.f32.mrf.mxu0  ;;  %v7986_v24 = vor.u32 %v9692_v44, %v7983_v31  ;;  %vm4013_vm6 = vmor %vm4011_vm4, %vm4012_vm2  ;;  %v3959_v21 = vsel %vm3956_vm5, %v3958_v0, %v3954_v1 }
 0x29e   :  { %v4008_v52 = vsub.f32 1.0, %v4007_v40  ;;  %v2451_v56 = vadd.f32 %v2450_v59, %v11559_v12  ;;  %v2499_v55 = vpop.f32.mrf.mxu1  ;;  %v4015_v12 = vand.u32 2147483647, %v11773_v35  ;;  %v14930_v40 = vld [vmem:[#allocation41_spill] sm:$0xff]  ;;  %vm4071_vm9 = vweird.f32 %v11788_v36 }
 0x29f   :  { %v11799_v60 = vadd.f32 %v2594_v50, %v2546_v22  ;;  %2859 = vmatpush.bf16.msrb.mxu1 %v7986_v24  ;;  %v4077_v0 = vand.u32 2147483648, %v11788_v36 }
 0x2a0   :  { %v2500_v10 = vadd.f32 %v2499_v55, %v2451_v56  ;;  %2645 = vmatmul.bf16.gmra.mxu0 %v14929_v43  ;;  %v4009_v29 = vmul.f32 %v11786_v41, %v4008_v52  ;;  %v4018_v52 = vor.u32 1.1754944e-38, %v4017_v23  ;;  %vm4016_vm7 = vcmp.eq.f32.partialorder %v4015_v12, 8.507059e+37 }
 0x2a1   :  { %2694 = vmatmul.bf16.gmra.mxu1 %v14930_v40  ;;  %2743 = vmatmul.bf16.gmra.mxu2 %v14931_v62  ;;  %v4078_v40 = vor.u32 1.1754944e-38, %v4077_v0  ;;  %v8463_v0 = vld [vmem:[#allocation5 + $0x3d8] sm:$0xf0] }
 0x2a2   :  { %v10198_v50 = vpop.eup %10197  ;;  %v8916_v59 = vmul.f32 -1.442695, %v2500_v10  ;;  %2792 = vmatmul.bf16.gmra.mxu3 %v14899_v37  ;;  %v4010_v19 = vadd.f32 %v11786_v41, %v4009_v29  ;;  %v4075_v29 = vand.u32 2147483647, %v11788_v36  ;;  %v8607_v37 = vld [vmem:[#allocation5 + $0x4f8] sm:$0xf0] }
 0x2a3   :  { %v11823_v27 = vpop.eup %10199  ;;  %v11825_v46 = vadd.f32 1.0, %v10198_v50 }
 0x2a4   :  { %v4067_v56 = vmul.f32 %v11823_v27, %v11788_v36  ;;  %10201 = vpow2.f32 %v8916_v59  ;;  %v2548_v7 = vpop.f32.mrf.mxu2  ;;  %v4014_v9 = vsel %vm4013_vm6, %v11786_v41, %v4010_v19  ;;  %vm4072_vm8 = vweird.f32 %v11823_v27 }
 0x2a5   :  { %10203 = vrcp.f32 %v11825_v46  ;;  %v2549_v35 = vadd.f32 %v2548_v7, %v11580_v26  ;;  %v2597_v55 = vpop.f32.mrf.mxu3  ;;  %v2452_v6 = vpop.f32.mrf.mxu0  ;;  %v4019_v4 = vsel %vm4016_vm7, %v4018_v52, %v4014_v9  ;;  %vm11853_vm10 = vcmp.eq.f32.partialorder %v4075_v29, 8.507059e+37  ;;  %vm11861_vm11 = vmor %vm4071_vm9, %vm4072_vm8  ;;  %v8479_v29 = vld [vmem:[#allocation5 + $0x3f8] sm:$0xf0] }
 0x2a6   :  { %v4068_v57 = vsub.f32 1.0, %v4067_v56  ;;  %v2453_v44 = vadd.f32 %v2452_v6, %v11563_v45  ;;  %v2501_v31 = vpop.f32.mrf.mxu1  ;;  %v11835_v24 = vpack.c.bf16 %v4019_v4, %v3959_v21  ;;  %v9880_v4 = vld [vmem:[#allocation5 + $0x5ec] sm:$0xf]  ;;  %vm4131_vm14 = vweird.f32 %v11825_v46 }
 0x2a7   :  { %v11837_v23 = vadd.f32 %v2597_v55, %v2549_v35  ;;  %v4135_v35 = vand.u32 2147483647, %v11825_v46 }
 0x2a8   :  { %14934 = vst [vmem:[#allocation55_spill] sm:$0xff] %v11835_v24  ;;  %v2502_v10 = vadd.f32 %v2501_v31, %v2453_v44  ;;  %v4069_v41 = vmul.f32 %v11823_v27, %v4068_v57  ;;  %v8735_v57 = vld [vmem:[#allocation5 + $0x5f8] sm:$0xf0]  ;;  %v4137_v44 = vand.u32 2147483648, %v11825_v46  ;;  %v9848_v24 = vld [vmem:[#allocation5 + $0x4ec] sm:$0xf] }
 0x2a9   :  { %vm11876_vm13 = vcmp.eq.f32.partialorder %v4135_v35, 8.507059e+37 }
 0x2aa   :  { %v10202_v12 = vpop.eup %10201  ;;  %v8920_v22 = vmul.f32 -1.442695, %v2502_v10  ;;  %v4070_v1 = vadd.f32 %v11823_v27, %v4069_v41  ;;  %v8738_v10 = vor.u32 %v9880_v4, %v8735_v57  ;;  %v9816_v41 = vld [vmem:[#allocation5 + $0x3ec] sm:$0xf]  ;;  %v8610_v57 = vor.u32 %v9848_v24, %v8607_v37 }
 0x2ab   :  { %v11841_v50 = vpop.eup %10203  ;;  %v11843_v59 = vadd.f32 1.0, %v10202_v12  ;;  %v9912_v12 = vld [vmem:[#allocation5 + $0x6ec] sm:$0xf] }
 0x2ac   :  { %v4127_v45 = vmul.f32 %v11841_v50, %v11825_v46  ;;  %10205 = vpow2.f32 %v8920_v22  ;;  %v2550_v19 = vpop.f32.mrf.mxu2  ;;  %vm4132_vm12 = vweird.f32 %v11841_v50  ;;  %3097 = vmatpush.bf16.msra.mxu2 %v8738_v10  ;;  %v9812_v24 = vld [vmem:[#allocation5 + $0x3cc] sm:$0xf]  ;;  %3048 = vmatpush.bf16.msra.mxu1 %v8610_v57 }
 0x2ad   :  { %10207 = vrcp.f32 %v11843_v59  ;;  %v2551_v52 = vadd.f32 %v2550_v19, %v11580_v26  ;;  %v2599_v56 = vpop.f32.mrf.mxu3  ;;  %v2455_v7 = vpop.f32.mrf.mxu0  ;;  %v8482_v19 = vor.u32 %v9816_v41, %v8479_v29  ;;  %vm11891_vm15 = vmor %vm4131_vm14, %vm4132_vm12  ;;  %vm4191_vm1 = vweird.f32 %v11843_v59 }
 0x2ae   :  { %v4128_v55 = vsub.f32 1.0, %v4127_v45  ;;  %v2456_v6 = vadd.f32 %v2455_v7, %v11571_v17  ;;  %v2504_v21 = vpop.f32.mrf.mxu1  ;;  %v4074_v17 = vsel %vm11861_vm11, %v11823_v27, %v4070_v1  ;;  %v14939_v45 = vld [vmem:[#allocation44_spill] sm:$0xff]  ;;  %v8863_v7 = vld [vmem:[#allocation5 + $0x6f8] sm:$0xf0] }
 0x2af   :  { %v11866_v31 = vadd.f32 %v2599_v56, %v2551_v52  ;;  %v14940_v52 = vld [vmem:[#allocation45_spill] sm:$0xff]  ;;  %v14941_v56 = vld [vmem:[#allocation66_spill] sm:$0xff]  ;;  %v8866_v4 = vor.u32 %v9912_v12, %v8863_v7  ;;  %2999 = vmatpush.bf16.msra.mxu0 %v8482_v19  ;;  %v4079_v35 = vsel %vm11853_vm10, %v4078_v40, %v4074_v17  ;;  %v9908_v19 = vld [vmem:[#allocation5 + $0x6cc] sm:$0xf] }
 0x2b0   :  { %v2505_v22 = vadd.f32 %v2504_v21, %v2456_v6  ;;  %2650 = vmatmul.bf16.gmra.mxu0 %v14939_v45  ;;  %v4129_v62 = vmul.f32 %v11841_v50, %v4128_v55  ;;  %v9876_v21 = vld [vmem:[#allocation5 + $0x5cc] sm:$0xf]  ;;  %v8719_v55 = vld [vmem:[#allocation5 + $0x5d8] sm:$0xf0] }
 0x2b1   :  { %2699 = vmatmul.bf16.gmra.mxu1 %v14940_v52  ;;  %2748 = vmatmul.bf16.gmra.mxu2 %v14941_v56  ;;  %v8722_v37 = vor.u32 %v9876_v21, %v8719_v55  ;;  %v8847_v7 = vld [vmem:[#allocation5 + $0x6d8] sm:$0xf0] }
 0x2b2   :  { %v10206_v1 = vpop.eup %10205  ;;  %v8924_v6 = vmul.f32 -1.442695, %v2505_v22  ;;  %2797 = vmatmul.bf16.gmra.mxu3 %v11068_v63  ;;  %v4130_v36 = vadd.f32 %v11841_v50, %v4129_v62  ;;  %v4138_v62 = vor.u32 1.1754944e-38, %v4137_v44  ;;  %v8466_v22 = vor.u32 %v9812_v24, %v8463_v0 }
 0x2b3   :  { %v11883_v41 = vpop.eup %10207  ;;  %v11885_v29 = vadd.f32 1.0, %v10206_v1  ;;  %3146 = vmatpush.bf16.msra.mxu3 %v8866_v4  ;;  %v8850_v44 = vor.u32 %v9908_v19, %v8847_v7  ;;  %3098 = vmatpush.bf16.msra.mxu2 %v8722_v37 }
 0x2b4   :  { %v4187_v46 = vmul.f32 %v11883_v41, %v11843_v59  ;;  %10209 = vpow2.f32 %v8924_v6  ;;  %v2553_v12 = vpop.f32.mrf.mxu2  ;;  %v4134_v40 = vsel %vm11891_vm15, %v11841_v50, %v4130_v36  ;;  %3000 = vmatpush.bf16.msra.mxu0 %v8466_v22  ;;  %v9844_v50 = vld [vmem:[#allocation5 + $0x4cc] sm:$0xf]  ;;  %v8591_v36 = vld [vmem:[#allocation5 + $0x4d8] sm:$0xf0]  ;;  %vm4192_vm0 = vweird.f32 %v11883_v41 }
 0x2b5   :  { %10211 = vrcp.f32 %v11885_v29  ;;  %v2554_v9 = vadd.f32 %v2553_v12, %v11580_v26  ;;  %v2602_v17 = vpop.f32.mrf.mxu3  ;;  %v2457_v4 = vpop.f32.mrf.mxu0  ;;  %v4139_v1 = vsel %vm11876_vm13, %v4138_v62, %v4134_v40  ;;  %v8594_v10 = vor.u32 %v9844_v50, %v8591_v36  ;;  %vm11928_vm2 = vmor %vm4191_vm1, %vm4192_vm0 }
 0x2b6   :  { %v4188_v6 = vsub.f32 1.0, %v4187_v46  ;;  %v2458_v57 = vadd.f32 %v2457_v4, %v11574_v47  ;;  %v2506_v21 = vpop.f32.mrf.mxu1  ;;  %v11905_v55 = vpack.c.bf16 %v4139_v1, %v4079_v35  ;;  %v4197_v47 = vand.u32 2147483648, %v11843_v59 }
 0x2b7   :  { %v11907_v24 = vadd.f32 %v2602_v17, %v2554_v9  ;;  %3147 = vmatpush.bf16.msra.mxu3 %v8850_v44  ;;  %3049 = vmatpush.bf16.msra.mxu1 %v8594_v10  ;;  %v4195_v22 = vand.u32 2147483647, %v11843_v59  ;;  %v4255_v4 = vand.u32 2147483647, %v11885_v29  ;;  %vm4251_vm6 = vweird.f32 %v11885_v29 }
 0x2b8   :  { %v2507_v0 = vadd.f32 %v2506_v21, %v2458_v57  ;;  %v4189_v12 = vmul.f32 %v11883_v41, %v4188_v6  ;;  %v4257_v21 = vand.u32 2147483648, %v11885_v29 }
 0x2b9   :  { %vm11937_vm4 = vcmp.eq.f32.partialorder %v4195_v22, 8.507059e+37  ;;  %vm11941_vm5 = vcmp.eq.f32.partialorder %v4255_v4, 8.507059e+37  ;;  %v8447_v22 = vld [vmem:[#allocation5 + $0x3b8] sm:$0xf0] }
 0x2ba   :  { %v10210_v19 = vpop.eup %10209  ;;  %v8928_v27 = vmul.f32 -1.442695, %v2507_v0  ;;  %v4190_v17 = vadd.f32 %v11883_v41, %v4189_v12  ;;  %v4198_v0 = vor.u32 1.1754944e-38, %v4197_v47  ;;  %v9904_v47 = vld [vmem:[#allocation5 + $0x6ac] sm:$0xf] }
 0x2bb   :  { %v10212_v62 = vpop.eup %10211  ;;  %v11910_v46 = vadd.f32 1.0, %v10210_v19  ;;  %v9872_v19 = vld [vmem:[#allocation5 + $0x5ac] sm:$0xf] }
 0x2bc   :  { %v4247_v37 = vmul.f32 %v10212_v62, %v11885_v29  ;;  %10213 = vpow2.f32 %v8928_v27  ;;  %v2555_v35 = vpop.f32.mrf.mxu2  ;;  %vm4252_vm3 = vweird.f32 %v10212_v62  ;;  %v9808_v27 = vld [vmem:[#allocation5 + $0x3ac] sm:$0xf] }
 0x2bd   :  { %10215 = vrcp.f32 %v11910_v46  ;;  %v2556_v7 = vadd.f32 %v2555_v35, %v11580_v26  ;;  %v2604_v40 = vpop.f32.mrf.mxu3  ;;  %v2616_v9 = vpop.f32.mrf.mxu0  ;;  %vm4253_vm7 = vmor %vm4251_vm6, %vm4252_vm3  ;;  %vm4311_vm10 = vweird.f32 %v11910_v46 }
 0x2be   :  { %v4248_v44 = vsub.f32 1.0, %v4247_v37  ;;  %v2617_v1 = vadd.f32 %v2616_v9, %v11585_v38  ;;  %v2665_v6 = vpop.f32.mrf.mxu1  ;;  %v4194_v38 = vsel %vm11928_vm2, %v11883_v41, %v4190_v17  ;;  %v8450_v9 = vor.u32 %v9808_v27, %v8447_v22  ;;  %v8831_v17 = vld [vmem:[#allocation5 + $0x6b8] sm:$0xf0] }
 0x2bf   :  { %v11921_v57 = vadd.f32 %v2604_v40, %v2556_v7  ;;  %v4258_v7 = vor.u32 1.1754944e-38, %v4257_v21  ;;  %v4199_v4 = vsel %vm11937_vm4, %v4198_v0, %v4194_v38  ;;  %v8834_v26 = vor.u32 %v9904_v47, %v8831_v17  ;;  %v8575_v38 = vld [vmem:[#allocation5 + $0x4b8] sm:$0xf0] }
 0x2c0   :  { %v2666_v50 = vadd.f32 %v2665_v6, %v2617_v1  ;;  %2811 = vmatmul.bf16.vlgmr.msrb.gmra.mxu0 %v14876_v61  ;;  %v4249_v36 = vmul.f32 %v10212_v62, %v4248_v44 }
 0x2c1   :  { %2860 = vmatmul.bf16.vlgmr.msrb.gmra.mxu1 %v14877_v5  ;;  %2909 = vmatmul.bf16.vlgmr.msrb.gmra.mxu2 %v10860_v53  ;;  %v8703_v5 = vld [vmem:[#allocation5 + $0x5b8] sm:$0xf0] }
 0x2c2   :  { %v10214_v12 = vpop.eup %10213  ;;  %2958 = vmatmul.bf16.vlgmr.msrb.gmra.mxu3 %v14904_v30  ;;  %v4250_v53 = vadd.f32 %v10212_v62, %v4249_v36  ;;  %v8706_v35 = vor.u32 %v9872_v19, %v8703_v5  ;;  %3001 = vmatpush.bf16.msra.mxu0 %v8450_v9 }
 0x2c3   :  { %v11947_v37 = vpop.eup %10215  ;;  %v11949_v41 = vadd.f32 1.0, %v10214_v12  ;;  %3148 = vmatpush.bf16.msra.mxu3 %v8834_v26 }
 0x2c4   :  { %v4307_v40 = vmul.f32 %v11947_v37, %v11910_v46  ;;  %v2714_v30 = vpop.f32.mrf.mxu2  ;;  %v4254_v29 = vsel %vm4253_vm7, %v10212_v62, %v4250_v53  ;;  %3099 = vmatpush.bf16.msra.mxu2 %v8706_v35  ;;  %v9840_v62 = vld [vmem:[#allocation5 + $0x4ac] sm:$0xf]  ;;  %vm4312_vm8 = vweird.f32 %v11947_v37 }
 0x2c5   :  { %10217 = vrcp.f32 %v11949_v41  ;;  %v2715_v44 = vadd.f32 %v2714_v30, %v2666_v50  ;;  %v2763_v1 = vpop.f32.mrf.mxu3  ;;  %v2618_v6 = vpop.f32.mrf.mxu0  ;;  %v4259_v21 = vsel %vm11941_vm5, %v4258_v7, %v4254_v29  ;;  %v8578_v0 = vor.u32 %v9840_v62, %v8575_v38  ;;  %vm11976_vm11 = vmor %vm4311_vm10, %vm4312_vm8  ;;  %v8687_v62 = vld [vmem:[#allocation5 + $0x598] sm:$0xf0]  ;;  %v9804_v38 = vld [vmem:[#allocation5 + $0x38c] sm:$0xf] }
 0x2c6   :  { %v4308_v36 = vsub.f32 1.0, %v4307_v40  ;;  %v2619_v12 = vadd.f32 %v2618_v6, %v11592_v51  ;;  %v2667_v19 = vpop.f32.mrf.mxu1  ;;  %v11960_v5 = vpack.c.bf16 %v4259_v21, %v4199_v4  ;;  %v4315_v51 = vand.u32 2147483647, %v11910_v46 }
 0x2c7   :  { %v11962_v59 = vadd.f32 %v2763_v1, %v2715_v44  ;;  %3050 = vmatpush.bf16.msra.mxu1 %v8578_v0  ;;  %v4317_v40 = vand.u32 2147483648, %v11910_v46  ;;  %v4377_v30 = vand.u32 2147483648, %v11949_v41  ;;  %vm4371_vm12 = vweird.f32 %v11949_v41  ;;  %v9900_v0 = vld [vmem:[#allocation5 + $0x68c] sm:$0xf] }
 0x2c8   :  { %14952 = vst [vmem:[#allocation20_spill] sm:$0xff] %v11960_v5  ;;  %v2668_v50 = vadd.f32 %v2667_v19, %v2619_v12  ;;  %v4309_v27 = vmul.f32 %v11947_v37, %v4308_v36  ;;  %vm11984_vm13 = vcmp.eq.f32.partialorder %v4315_v51, 8.507059e+37  ;;  %v9868_v19 = vld [vmem:[#allocation5 + $0x58c] sm:$0xf] }
 0x2c9   :  { %v4318_v46 = vor.u32 1.1754944e-38, %v4317_v40  ;;  %v4378_v12 = vor.u32 1.1754944e-38, %v4377_v30 }
 0x2ca   :  { %v4310_v29 = vadd.f32 %v11947_v37, %v4309_v27  ;;  %v8815_v27 = vld [vmem:[#allocation5 + $0x698] sm:$0xf0] }
 0x2cb   :  { %v10218_v53 = vpop.eup %10217  ;;  %v8818_v51 = vor.u32 %v9900_v0, %v8815_v27  ;;  %v8415_v0 = vld [vmem:[#allocation5 + $0x378] sm:$0xf0]  ;;  %v9896_v27 = vld [vmem:[#allocation5 + $0x66c] sm:$0xf] }
 0x2cc   :  { %v4367_v10 = vmul.f32 %v10218_v53, %v11949_v41  ;;  %v2716_v35 = vpop.f32.mrf.mxu2  ;;  %vm4372_vm9 = vweird.f32 %v10218_v53 }
 0x2cd   :  { %v2717_v22 = vadd.f32 %v2716_v35, %v2668_v50  ;;  %v2765_v47 = vpop.f32.mrf.mxu3  ;;  %v2621_v7 = vpop.f32.mrf.mxu0  ;;  %vm11988_vm14 = vmor %vm4371_vm12, %vm4372_vm9  ;;  %v8431_v50 = vld [vmem:[#allocation5 + $0x398] sm:$0xf0]  ;;  %3149 = vmatpush.bf16.msra.mxu3 %v8818_v51 }
 0x2ce   :  { %v4368_v9 = vsub.f32 1.0, %v4367_v10  ;;  %v2622_v17 = vadd.f32 %v2621_v7, %v11607_v49  ;;  %v2670_v4 = vpop.f32.mrf.mxu1  ;;  %v4375_v49 = vand.u32 2147483647, %v11949_v41  ;;  %v8690_v41 = vor.u32 %v9868_v19, %v8687_v62  ;;  %v14959_v62 = vld [vmem:[#allocation26_spill] sm:$0xff] }
 0x2cf   :  { %v11972_v44 = vadd.f32 %v2765_v47, %v2717_v22  ;;  %v8434_v35 = vor.u32 %v9804_v38, %v8431_v50  ;;  %v14960_v38 = vld [vmem:[#allocation27_spill] sm:$0xff] }
 0x2d0   :  { %v2671_v1 = vadd.f32 %v2670_v4, %v2622_v17  ;;  %2816 = vmatmul.bf16.gmra.mxu0 %v14882_v11  ;;  %v4369_v26 = vmul.f32 %v10218_v53, %v4368_v9  ;;  %vm4376_vm15 = vcmp.eq.f32.partialorder %v4375_v49, 8.507059e+37  ;;  %3100 = vmatpush.bf16.msra.mxu2 %v8690_v41  ;;  %v9800_v41 = vld [vmem:[#allocation5 + $0x36c] sm:$0xf] }
 0x2d1   :  { %2865 = vmatmul.bf16.gmra.mxu1 %v14883_v33  ;;  %2914 = vmatmul.bf16.gmra.mxu2 %v10872_v25  ;;  %v4314_v33 = vsel %vm11976_vm11, %v11947_v37, %v4310_v29  ;;  %v9836_v29 = vld [vmem:[#allocation5 + $0x48c] sm:$0xf] }
 0x2d2   :  { %2963 = vmatmul.bf16.gmra.mxu3 %v14907_v48  ;;  %v4370_v25 = vadd.f32 %v10218_v53, %v4369_v26  ;;  %v4319_v40 = vsel %vm11984_vm13, %v4318_v46, %v4314_v33  ;;  %3002 = vmatpush.bf16.msra.mxu0 %v8434_v35  ;;  %v9864_v33 = vld [vmem:[#allocation5 + $0x56c] sm:$0xf]  ;;  %v8418_v35 = vor.u32 %v9800_v41, %v8415_v0  ;;  %v8399_v41 = vld [vmem:[#allocation5 + $0x358] sm:$0xf0] }
 0x2d3   :  { %v8783_v0 = vld [vmem:[#allocation5 + $0x658] sm:$0xf0] }
 0x2d4   :  { %v2719_v10 = vpop.f32.mrf.mxu2  ;;  %v4374_v22 = vsel %vm11988_vm14, %v10218_v53, %v4370_v25  ;;  %v8559_v53 = vld [vmem:[#allocation5 + $0x498] sm:$0xf0] }
 0x2d5   :  { %v2720_v48 = vadd.f32 %v2719_v10, %v2671_v1  ;;  %v2768_v47 = vpop.f32.mrf.mxu3  ;;  %v2623_v7 = vpop.f32.mrf.mxu0  ;;  %v4379_v37 = vsel %vm4376_vm15, %v4378_v12, %v4374_v22  ;;  %v8562_v1 = vor.u32 %v9836_v29, %v8559_v53  ;;  %v8671_v25 = vld [vmem:[#allocation5 + $0x578] sm:$0xf0] }
 0x2d6   :  { %v2624_v30 = vadd.f32 %v2623_v7, %v11621_v18  ;;  %v2672_v9 = vpop.f32.mrf.mxu1  ;;  %v12001_v17 = vpack.c.bf16 %v4379_v37, %v4319_v40  ;;  %v8674_v50 = vor.u32 %v9864_v33, %v8671_v25  ;;  %v8799_v10 = vld [vmem:[#allocation5 + $0x678] sm:$0xf0]  ;;  %3003 = vmatpush.bf16.msra.mxu0 %v8418_v35  ;;  %v9832_v37 = vld [vmem:[#allocation5 + $0x46c] sm:$0xf] }
 0x2d7   :  { %v12003_v4 = vadd.f32 %v2768_v47, %v2720_v48  ;;  %3051 = vmatpush.bf16.msra.mxu1 %v8562_v1  ;;  %v8802_v51 = vor.u32 %v9896_v27, %v8799_v10  ;;  %v9796_v33 = vld [vmem:[#allocation5 + $0x34c] sm:$0xf] }
 0x2d8   :  { %v2673_v6 = vadd.f32 %v2672_v9, %v2624_v30  ;;  %3101 = vmatpush.bf16.msra.mxu2 %v8674_v50  ;;  %v8543_v30 = vld [vmem:[#allocation5 + $0x478] sm:$0xf0]  ;;  %v9892_v50 = vld [vmem:[#allocation5 + $0x64c] sm:$0xf]  ;;  %v8402_v27 = vor.u32 %v9796_v33, %v8399_v41 }
 0x2d9   :  { %3150 = vmatpush.bf16.msra.mxu3 %v8802_v51  ;;  %v8546_v29 = vor.u32 %v9832_v37, %v8543_v30  ;;  %v8786_v10 = vor.u32 %v9892_v50, %v8783_v0  ;;  %v8383_v33 = vld [vmem:[#allocation5 + $0x338] sm:$0xf0] }
 0x2da   :  { %3004 = vmatpush.bf16.msra.mxu0 %v8402_v27  ;;  %v8767_v41 = vld [vmem:[#allocation5 + $0x638] sm:$0xf0] }
 0x2db   :  { %3052 = vmatpush.bf16.msra.mxu1 %v8546_v29 }
 0x2dc   :  { %v2721_v26 = vpop.f32.mrf.mxu2 }
 0x2dd   :  { %v2722_v49 = vadd.f32 %v2721_v26, %v2673_v6  ;;  %v2770_v36 = vpop.f32.mrf.mxu3  ;;  %v2626_v21 = vpop.f32.mrf.mxu0  ;;  %3151 = vmatpush.bf16.msra.mxu3 %v8786_v10 }
 0x2de   :  { %v2627_v46 = vadd.f32 %v2626_v21, %v11651_v2  ;;  %v2675_v12 = vpop.f32.mrf.mxu1 }
 0x2df   :  { %v12006_v18 = vadd.f32 %v2770_v36, %v2722_v49 }
 0x2e0   :  { %v2676_v19 = vadd.f32 %v2675_v12, %v2627_v46  ;;  %2821 = vmatmul.bf16.gmra.mxu0 %v14888_v54  ;;  %v14961_v46 = vld [vmem:[#allocation56_spill] sm:$0xff]  ;;  %v14962_v12 = vld [vmem:[#allocation29_spill] sm:$0xff] }
 0x2e1   :  { %2870 = vmatmul.bf16.gmra.mxu1 %v14889_v8  ;;  %2919 = vmatmul.bf16.gmra.mxu2 %v14959_v62  ;;  %v9860_v62 = vld [vmem:[#allocation5 + $0x54c] sm:$0xf] }
 0x2e2   :  { %2968 = vmatmul.bf16.gmra.mxu3 %v14960_v38  ;;  %v8655_v38 = vld [vmem:[#allocation5 + $0x558] sm:$0xf0] }
 0x2e3   :  { %v8658_v25 = vor.u32 %v9860_v62, %v8655_v38  ;;  %v9792_v62 = vld [vmem:[#allocation5 + $0x32c] sm:$0xf] }
 0x2e4   :  { %v2724_v2 = vpop.f32.mrf.mxu2  ;;  %v8386_v50 = vor.u32 %v9792_v62, %v8383_v33  ;;  %v8367_v62 = vld [vmem:[#allocation5 + $0x318] sm:$0xf0] }
 0x2e5   :  { %v2725_v22 = vadd.f32 %v2724_v2, %v2676_v19  ;;  %v2773_v48 = vpop.f32.mrf.mxu3  ;;  %v2628_v47 = vpop.f32.mrf.mxu0  ;;  %v14963_v19 = vld [vmem:[#allocation30_spill] sm:$0xff]  ;;  %3102 = vmatpush.bf16.msra.mxu2 %v8658_v25  ;;  %v9888_v25 = vld [vmem:[#allocation5 + $0x62c] sm:$0xf]  ;;  %v8751_v33 = vld [vmem:[#allocation5 + $0x618] sm:$0xf0] }
 0x2e6   :  { %v2629_v8 = vadd.f32 %v2628_v47, %v11663_v34  ;;  %v2677_v7 = vpop.f32.mrf.mxu1  ;;  %v9828_v47 = vld [vmem:[#allocation5 + $0x44c] sm:$0xf]  ;;  %v8770_v0 = vor.u32 %v9888_v25, %v8767_v41  ;;  %3005 = vmatpush.bf16.msra.mxu0 %v8386_v50 }
 0x2e7   :  { %v12013_v40 = vadd.f32 %v2773_v48, %v2725_v22 }
 0x2e8   :  { %v2678_v9 = vadd.f32 %v2677_v7, %v2629_v8  ;;  %v8527_v8 = vld [vmem:[#allocation5 + $0x458] sm:$0xf0]  ;;  %3152 = vmatpush.bf16.msra.mxu3 %v8770_v0 }
 0x2e9   :  { %v8530_v37 = vor.u32 %v9828_v47, %v8527_v8 }
 0x2eb   :  { %3053 = vmatpush.bf16.msra.mxu1 %v8530_v37 }
 0x2ec   :  { %v2726_v53 = vpop.f32.mrf.mxu2 }
 0x2ed   :  { %v2727_v6 = vadd.f32 %v2726_v53, %v2678_v9  ;;  %v2775_v1 = vpop.f32.mrf.mxu3  ;;  %v2631_v26 = vpop.f32.mrf.mxu0 }
 0x2ee   :  { %v2632_v49 = vadd.f32 %v2631_v26, %v11695_v58  ;;  %v2680_v36 = vpop.f32.mrf.mxu1 }
 0x2ef   :  { %v12016_v21 = vadd.f32 %v2775_v1, %v2727_v6 }
 0x2f0   :  { %v2681_v34 = vadd.f32 %v2680_v36, %v2632_v49  ;;  %2826 = vmatmul.bf16.gmra.mxu0 %v14961_v46  ;;  %v14964_v49 = vld [vmem:[#allocation59_spill] sm:$0xff] }
 0x2f1   :  { %2875 = vmatmul.bf16.gmra.mxu1 %v14962_v12  ;;  %2924 = vmatmul.bf16.gmra.mxu2 %v14963_v19  ;;  %v14965_v36 = vld [vmem:[#allocation31_spill] sm:$0xff]  ;;  %v8639_v19 = vld [vmem:[#allocation5 + $0x538] sm:$0xf0] }
 0x2f2   :  { %2973 = vmatmul.bf16.gmra.mxu3 %v10898_v14  ;;  %v9856_v12 = vld [vmem:[#allocation5 + $0x52c] sm:$0xf] }
 0x2f3   :  { %v8642_v38 = vor.u32 %v9856_v12, %v8639_v19  ;;  %v9788_v12 = vld [vmem:[#allocation5 + $0x30c] sm:$0xf] }
 0x2f4   :  { %v2729_v58 = vpop.f32.mrf.mxu2  ;;  %v8370_v25 = vor.u32 %v9788_v12, %v8367_v62 }
 0x2f5   :  { %v2730_v2 = vadd.f32 %v2729_v58, %v2681_v34  ;;  %v2778_v35 = vpop.f32.mrf.mxu3  ;;  %v2633_v51 = vpop.f32.mrf.mxu0  ;;  %v14966_v34 = vld [vmem:[#allocation32_spill] sm:$0xff]  ;;  %3103 = vmatpush.bf16.msra.mxu2 %v8642_v38  ;;  %v9884_v38 = vld [vmem:[#allocation5 + $0x60c] sm:$0xf] }
 0x2f6   :  { %v2634_v22 = vadd.f32 %v2633_v51, %v11707_v39  ;;  %v2682_v48 = vpop.f32.mrf.mxu1  ;;  %v9824_v51 = vld [vmem:[#allocation5 + $0x42c] sm:$0xf]  ;;  %v8754_v41 = vor.u32 %v9884_v38, %v8751_v33  ;;  %3006 = vmatpush.bf16.msra.mxu0 %v8370_v25 }
 0x2f7   :  { %v12023_v14 = vadd.f32 %v2778_v35, %v2730_v2 }
 0x2f8   :  { %v2683_v7 = vadd.f32 %v2682_v48, %v2634_v22  ;;  %v8511_v22 = vld [vmem:[#allocation5 + $0x438] sm:$0xf0]  ;;  %3153 = vmatpush.bf16.msra.mxu3 %v8754_v41 }
 0x2f9   :  { %v8514_v47 = vor.u32 %v9824_v51, %v8511_v22 }
 0x2fb   :  { %3054 = vmatpush.bf16.msra.mxu1 %v8514_v47 }
 0x2fc   :  { %v2731_v30 = vpop.f32.mrf.mxu2 }
 0x2fd   :  { %v2732_v9 = vadd.f32 %v2731_v30, %v2683_v7  ;;  %v2780_v29 = vpop.f32.mrf.mxu3  ;;  %v2636_v53 = vpop.f32.mrf.mxu0 }
 0x2fe   :  { %v2637_v6 = vadd.f32 %v2636_v53, %v11739_v20  ;;  %v2685_v1 = vpop.f32.mrf.mxu1 }
 0x2ff   :  { %v12026_v26 = vadd.f32 %v2780_v29, %v2732_v9 }
 0x300   :  { %v2686_v39 = vadd.f32 %v2685_v1, %v2637_v6  ;;  %2831 = vmatmul.bf16.gmra.mxu0 %v14964_v49  ;;  %v14967_v6 = vld [vmem:[#allocation62_spill] sm:$0xff] }
 0x301   :  { %2880 = vmatmul.bf16.gmra.mxu1 %v14965_v36  ;;  %2929 = vmatmul.bf16.gmra.mxu2 %v14966_v34  ;;  %v14968_v1 = vld [vmem:[#allocation34_spill] sm:$0xff]  ;;  %v9852_v36 = vld [vmem:[#allocation5 + $0x50c] sm:$0xf]  ;;  %v8623_v34 = vld [vmem:[#allocation5 + $0x518] sm:$0xf0] }
 0x302   :  { %2978 = vmatmul.bf16.gmra.mxu3 %v10910_v42  ;;  %v8626_v19 = vor.u32 %v9852_v36, %v8623_v34 }
 0x304   :  { %v2734_v20 = vpop.f32.mrf.mxu2  ;;  %3104 = vmatpush.bf16.msra.mxu2 %v8626_v19 }
 0x305   :  { %v2735_v58 = vadd.f32 %v2734_v20, %v2686_v39  ;;  %v2783_v27 = vpop.f32.mrf.mxu3  ;;  %v2638_v10 = vpop.f32.mrf.mxu0  ;;  %v14969_v39 = vld [vmem:[#allocation35_spill] sm:$0xff] }
 0x306   :  { %v2639_v2 = vadd.f32 %v2638_v10, %v11751_v32  ;;  %v2687_v35 = vpop.f32.mrf.mxu1  ;;  %v9820_v10 = vld [vmem:[#allocation5 + $0x40c] sm:$0xf] }
 0x307   :  { %v12033_v42 = vadd.f32 %v2783_v27, %v2735_v58 }
 0x308   :  { %v2688_v48 = vadd.f32 %v2687_v35, %v2639_v2  ;;  %v8495_v2 = vld [vmem:[#allocation5 + $0x418] sm:$0xf0] }
 0x309   :  { %v8498_v51 = vor.u32 %v9820_v10, %v8495_v2 }
 0x30b   :  { %3055 = vmatpush.bf16.msra.mxu1 %v8498_v51 }
 0x30c   :  { %v2736_v8 = vpop.f32.mrf.mxu2 }
 0x30d   :  { %v2737_v7 = vadd.f32 %v2736_v8, %v2688_v48  ;;  %v2785_v37 = vpop.f32.mrf.mxu3  ;;  %v2641_v30 = vpop.f32.mrf.mxu0 }
 0x30e   :  { %v2642_v9 = vadd.f32 %v2641_v30, %v11783_v3  ;;  %v2690_v29 = vpop.f32.mrf.mxu1 }
 0x30f   :  { %v12036_v53 = vadd.f32 %v2785_v37, %v2737_v7 }
 0x310   :  { %v2691_v32 = vadd.f32 %v2690_v29, %v2642_v9  ;;  %2836 = vmatmul.bf16.gmra.mxu0 %v14967_v6  ;;  %v14970_v9 = vld [vmem:[#allocation65_spill] sm:$0xff]  ;;  %v14971_v29 = vld [vmem:[#allocation38_spill] sm:$0xff] }
 0x311   :  { %2885 = vmatmul.bf16.gmra.mxu1 %v14968_v1  ;;  %2934 = vmatmul.bf16.gmra.mxu2 %v14969_v39 }
 0x312   :  { %2983 = vmatmul.bf16.gmra.mxu3 %v14923_v13 }
 0x314   :  { %v2739_v3 = vpop.f32.mrf.mxu2 }
 0x315   :  { %v2740_v20 = vadd.f32 %v2739_v3, %v2691_v32  ;;  %v2788_v50 = vpop.f32.mrf.mxu3  ;;  %v2643_v0 = vpop.f32.mrf.mxu0  ;;  %v14972_v32 = vld [vmem:[#allocation39_spill] sm:$0xff] }
 0x316   :  { %v2644_v58 = vadd.f32 %v2643_v0, %v11799_v60  ;;  %v2692_v27 = vpop.f32.mrf.mxu1  ;;  %v14973_v0 = vld [vmem:[#allocation67_spill] sm:$0xff] }
 0x317   :  { %v12043_v13 = vadd.f32 %v2788_v50, %v2740_v20 }
 0x318   :  { %v2693_v35 = vadd.f32 %v2692_v27, %v2644_v58  ;;  %v14974_v58 = vld [vmem:[#allocation42_spill] sm:$0xff]  ;;  %v14975_v27 = vld [vmem:[#allocation43_spill] sm:$0xff] }
 0x31c   :  { %v2741_v22 = vpop.f32.mrf.mxu2 }
 0x31d   :  { %v2742_v48 = vadd.f32 %v2741_v22, %v2693_v35  ;;  %v2790_v47 = vpop.f32.mrf.mxu3  ;;  %v2646_v8 = vpop.f32.mrf.mxu0 }
 0x31e   :  { %v2647_v7 = vadd.f32 %v2646_v8, %v11837_v23  ;;  %v2695_v37 = vpop.f32.mrf.mxu1 }
 0x31f   :  { %v12046_v30 = vadd.f32 %v2790_v47, %v2742_v48 }
 0x320   :  { %v2696_v60 = vadd.f32 %v2695_v37, %v2647_v7  ;;  %2841 = vmatmul.bf16.gmra.mxu0 %v14970_v9 }
 0x321   :  { %2890 = vmatmul.bf16.gmra.mxu1 %v14971_v29  ;;  %2939 = vmatmul.bf16.gmra.mxu2 %v14972_v32 }
 0x322   :  { %2988 = vmatmul.bf16.gmra.mxu3 %v14929_v43 }
 0x324   :  { %v2744_v1 = vpop.f32.mrf.mxu2 }
 0x325   :  { %v2745_v39 = vadd.f32 %v2744_v1, %v2696_v60  ;;  %v2793_v36 = vpop.f32.mrf.mxu3  ;;  %v2648_v34 = vpop.f32.mrf.mxu0  ;;  %v10604_v60 = vld [vmem:[#allocation7] sm:$0xf] }
 0x326   :  { %v2649_v12 = vadd.f32 %v2648_v34, %v11866_v31  ;;  %v2697_v19 = vpop.f32.mrf.mxu1  ;;  %v12065_v29 = vperm.slane %v10604_v60, 3  ;;  %v14977_v34 = vld [vmem:[#allocation46_spill] sm:$0xff] }
 0x327   :  { %v12053_v23 = vadd.f32 %v2793_v36, %v2745_v39  ;;  %v14976_v36 = vld [vmem:[#allocation21_spill] sm:$0xff]  ;;  %v14981_v60 = vld [vmem:[#allocation50_spill] sm:$0xff] }
 0x328   :  { %v2698_v62 = vadd.f32 %v2697_v19, %v2649_v12  ;;  %v14978_v12 = vld [vmem:[#allocation47_spill] sm:$0xff] }
 0x32c   :  { %v2746_v38 = vpop.f32.mrf.mxu2 }
 0x32d   :  { %v2747_v33 = vadd.f32 %v2746_v38, %v2698_v62  ;;  %v2795_v3 = vpop.f32.mrf.mxu3  ;;  %v2651_v25 = vpop.f32.mrf.mxu0 }
 0x32e   :  { %v2652_v41 = vadd.f32 %v2651_v25, %v11907_v24  ;;  %v2700_v20 = vpop.f32.mrf.mxu1 }
 0x32f   :  { %v12056_v50 = vadd.f32 %v2795_v3, %v2747_v33 }
 0x330   :  { %v2701_v43 = vadd.f32 %v2700_v20, %v2652_v41  ;;  %2846 = vmatmul.bf16.gmra.mxu0 %v14973_v0 }
 0x331   :  { %2895 = vmatmul.bf16.gmra.mxu1 %v14974_v58  ;;  %2944 = vmatmul.bf16.gmra.mxu2 %v14975_v27 }
 0x332   :  { %2993 = vmatmul.bf16.gmra.mxu3 %v14939_v45 }
 0x334   :  { %v2749_v31 = vpop.f32.mrf.mxu2 }
 0x335   :  { %v2750_v10 = vadd.f32 %v2749_v31, %v2701_v43  ;;  %v2798_v2 = vpop.f32.mrf.mxu3  ;;  %v2653_v35 = vpop.f32.mrf.mxu0 }
 0x336   :  { %v2654_v51 = vadd.f32 %v2653_v35, %v11921_v57  ;;  %v2702_v22 = vpop.f32.mrf.mxu1 }
 0x337   :  { %v12063_v24 = vadd.f32 %v2798_v2, %v2750_v10 }
 0x338   :  { %v2703_v48 = vadd.f32 %v2702_v22, %v2654_v51 }
 0x33c   :  { %v2751_v47 = vpop.f32.mrf.mxu2 }
 0x33d   :  { %v2752_v8 = vadd.f32 %v2751_v47, %v2703_v48  ;;  %v2800_v7 = vpop.f32.mrf.mxu3  ;;  %v2812_v37 = vpop.f32.mrf.mxu0  ;;  %v14979_v48 = vld [vmem:[#allocation24_spill] sm:$0xff] }
 0x33e   :  { %v2813_v32 = vadd.f32 %v2812_v37, %v11962_v59  ;;  %v2861_v45 = vpop.f32.mrf.mxu1  ;;  %v14980_v37 = vld [vmem:[#allocation49_spill] sm:$0xff] }
 0x33f   :  { %v12068_v1 = vadd.f32 %v2800_v7, %v2752_v8  ;;  %v2862_v57 = vadd.f32 %v2861_v45, %v12065_v29 }
 0x340   :  { %v8869_v39 = vmul.f32 -1.442695, %v2813_v32  ;;  %3007 = vmatmul.bf16.vlgmr.msra.gmra.mxu0 %v14976_v36 }
 0x341   :  { %3056 = vmatmul.bf16.vlgmr.msra.gmra.mxu1 %v14977_v34  ;;  %3105 = vmatmul.bf16.vlgmr.msra.gmra.mxu2 %v14978_v12 }
 0x342   :  { %10219 = vpow2.f32 %v8869_v39  ;;  %3154 = vmatmul.bf16.vlgmr.msra.gmra.mxu3 %v14876_v61 }
 0x344   :  { %v2910_v19 = vpop.f32.mrf.mxu2 }
 0x345   :  { %v2911_v62 = vadd.f32 %v2910_v19, %v2862_v57  ;;  %v2959_v38 = vpop.f32.mrf.mxu3  ;;  %v2814_v33 = vpop.f32.mrf.mxu0 }
 0x346   :  { %v2815_v59 = vadd.f32 %v2814_v33, %v11972_v44  ;;  %v2863_v3 = vpop.f32.mrf.mxu1 }
 0x347   :  { %v12076_v25 = vadd.f32 %v2959_v38, %v2911_v62  ;;  %v2864_v58 = vadd.f32 %v2863_v3, %v12065_v29 }
 0x348   :  { %v10220_v41 = vpop.eup %10219  ;;  %v8873_v20 = vmul.f32 -1.442695, %v2815_v59 }
 0x349   :  { %v12078_v43 = vadd.f32 1.0, %v10220_v41 }
 0x34a   :  { %10221 = vpow2.f32 %v8873_v20 }
 0x34b   :  { %10223 = vrcp.f32 %v12078_v43  ;;  %v3492_v41 = vand.u32 2147483648, %v12078_v43  ;;  %vm3486_vm0 = vweird.f32 %v12078_v43 }
 0x34c   :  { %v2912_v27 = vpop.f32.mrf.mxu2 }
 0x34d   :  { %v2913_v61 = vadd.f32 %v2912_v27, %v2864_v58  ;;  %v2961_v31 = vpop.f32.mrf.mxu3  ;;  %v2817_v10 = vpop.f32.mrf.mxu0  ;;  %v9301_v27 = vld [vmem:[#allocation8 + $0x2e0] sm:$0xf] }
 0x34e   :  { %v2818_v2 = vadd.f32 %v2817_v10, %v12003_v4  ;;  %v2866_v35 = vpop.f32.mrf.mxu1 }
 0x34f   :  { %v12083_v44 = vadd.f32 %v2961_v31, %v2913_v61  ;;  %v2867_v7 = vadd.f32 %v2866_v35, %v12065_v29  ;;  %v10009_v61 = vld [vmem:[#allocation8 + $0x2ec] sm:$0xf0] }
 0x350   :  { %v10222_v51 = vpop.eup %10221  ;;  %v8877_v22 = vmul.f32 -1.442695, %v2818_v2  ;;  %3012 = vmatmul.bf16.gmra.mxu0 %v14979_v48  ;;  %v3490_v48 = vand.u32 2147483647, %v12078_v43 }
 0x351   :  { %v12086_v47 = vpop.eup %10223  ;;  %v12088_v8 = vadd.f32 1.0, %v10222_v51  ;;  %3061 = vmatmul.bf16.gmra.mxu1 %v14980_v37  ;;  %3110 = vmatmul.bf16.gmra.mxu2 %v14981_v60 }
 0x352   :  { %v3482_v4 = vmul.f32 %v12086_v47, %v12078_v43  ;;  %10225 = vpow2.f32 %v8877_v22  ;;  %3159 = vmatmul.bf16.gmra.mxu3 %v14882_v11  ;;  %vm3487_vm1 = vweird.f32 %v12086_v47  ;;  %v9302_v22 = vor.u32 %v10009_v61, %v9301_v27  ;;  %v9045_v61 = vld [vmem:[#allocation8 + $0xe0] sm:$0xf] }
 0x353   :  { %10227 = vrcp.f32 %v12088_v8  ;;  %v3552_v10 = vand.u32 2147483648, %v12088_v8  ;;  %vm12118_vm3 = vmor %vm3486_vm0, %vm3487_vm1  ;;  %vm3546_vm4 = vweird.f32 %v12088_v8  ;;  %vm3491_vm5 = vcmp.eq.f32.partialorder %v3490_v48, 8.507059e+37  ;;  %v9429_v48 = vld [vmem:[#allocation8 + $0x3e0] sm:$0xf] }
 0x354   :  { %v3483_v32 = vsub.f32 1.0, %v3482_v4  ;;  %v2915_v45 = vpop.f32.mrf.mxu2  ;;  %v3550_v4 = vand.u32 2147483647, %v12088_v8  ;;  %5319 = vmatpush.bf16.msrb.mxu2 %v9302_v22 }
 0x355   :  { %v2916_v39 = vadd.f32 %v2915_v45, %v2867_v7  ;;  %v2964_v36 = vpop.f32.mrf.mxu3  ;;  %v2819_v57 = vpop.f32.mrf.mxu0  ;;  %v3493_v45 = vor.u32 1.1754944e-38, %v3492_v41 }
 0x356   :  { %v2820_v34 = vadd.f32 %v2819_v57, %v12006_v18  ;;  %v2868_v12 = vpop.f32.mrf.mxu1  ;;  %v3484_v38 = vmul.f32 %v12086_v47, %v3483_v32  ;;  %v14984_v57 = vld [vmem:[#allocation28_spill] sm:$0xff]  ;;  %vm3551_vm7 = vcmp.eq.f32.partialorder %v3550_v4, 8.507059e+37 }
 0x357   :  { %v12098_v19 = vadd.f32 %v2964_v36, %v2916_v39  ;;  %v2869_v20 = vadd.f32 %v2868_v12, %v12065_v29  ;;  %v9977_v4 = vld [vmem:[#allocation8 + $0x1ec] sm:$0xf0] }
 0x358   :  { %v10226_v62 = vpop.eup %10225  ;;  %v8881_v33 = vmul.f32 -1.442695, %v2820_v34  ;;  %v3485_v31 = vadd.f32 %v12086_v47, %v3484_v38 }
 0x359   :  { %v10228_v59 = vpop.eup %10227  ;;  %v12101_v3 = vadd.f32 1.0, %v10226_v62 }
 0x35a   :  { %v3542_v11 = vmul.f32 %v10228_v59, %v12088_v8  ;;  %10229 = vpow2.f32 %v8881_v33  ;;  %vm3547_vm2 = vweird.f32 %v10228_v59  ;;  %v3489_v34 = vsel %vm12118_vm3, %v12086_v47, %v3485_v31  ;;  %v14985_v33 = vld [vmem:[#allocation52_spill] sm:$0xff] }
 0x35b   :  { %10231 = vrcp.f32 %v12101_v3  ;;  %vm3548_vm6 = vmor %vm3546_vm4, %vm3547_vm2  ;;  %v3553_v8 = vor.u32 1.1754944e-38, %v3552_v10  ;;  %v9945_v31 = vld [vmem:[#allocation8 + $0xec] sm:$0xf0]  ;;  %vm3606_vm8 = vweird.f32 %v12101_v3 }
 0x35c   :  { %v3543_v18 = vsub.f32 1.0, %v3542_v11  ;;  %v2917_v58 = vpop.f32.mrf.mxu2  ;;  %v14986_v11 = vld [vmem:[#allocation53_spill] sm:$0xff]  ;;  %v9046_v22 = vor.u32 %v9945_v31, %v9045_v61  ;;  %v3612_v31 = vand.u32 2147483648, %v12101_v3 }
 0x35d   :  { %v2918_v2 = vadd.f32 %v2917_v58, %v2869_v20  ;;  %v2966_v35 = vpop.f32.mrf.mxu3  ;;  %v2822_v51 = vpop.f32.mrf.mxu0  ;;  %v3494_v20 = vsel %vm3491_vm5, %v3493_v45, %v3489_v34 }
 0x35e   :  { %v3544_v7 = vmul.f32 %v10228_v59, %v3543_v18  ;;  %v2823_v37 = vadd.f32 %v2822_v51, %v12013_v40  ;;  %v2871_v60 = vpop.f32.mrf.mxu1  ;;  %5221 = vmatpush.bf16.msrb.mxu0 %v9046_v22 }
 0x35f   :  { %v12122_v39 = vadd.f32 %v2966_v35, %v2918_v2  ;;  %v2872_v38 = vadd.f32 %v2871_v60, %v12065_v29 }
 0x360   :  { %v10230_v36 = vpop.eup %10229  ;;  %v8885_v40 = vmul.f32 -1.442695, %v2823_v37  ;;  %3017 = vmatmul.bf16.gmra.mxu0 %v14984_v57  ;;  %v3545_v12 = vadd.f32 %v10228_v59, %v3544_v7  ;;  %v10041_v7 = vld [vmem:[#allocation8 + $0x3ec] sm:$0xf0]  ;;  %v9173_v37 = vld [vmem:[#allocation8 + $0x1e0] sm:$0xf] }
 0x361   :  { %v12129_v43 = vpop.eup %10231  ;;  %v12131_v62 = vadd.f32 1.0, %v10230_v36  ;;  %3066 = vmatmul.bf16.gmra.mxu1 %v14985_v33  ;;  %3115 = vmatmul.bf16.gmra.mxu2 %v14986_v11  ;;  %v9430_v60 = vor.u32 %v10041_v7, %v9429_v48  ;;  %v9174_v45 = vor.u32 %v9977_v4, %v9173_v37  ;;  %v3610_v33 = vand.u32 2147483647, %v12101_v3 }
 0x362   :  { %v3602_v41 = vmul.f32 %v12129_v43, %v12101_v3  ;;  %10233 = vpow2.f32 %v8885_v40  ;;  %3164 = vmatmul.bf16.gmra.mxu3 %v14888_v54  ;;  %v3549_v47 = vsel %vm3548_vm6, %v10228_v59, %v3545_v12  ;;  %vm3607_vm9 = vweird.f32 %v12129_v43 }
 0x363   :  { %10235 = vrcp.f32 %v12131_v62  ;;  %v3554_v18 = vsel %vm3551_vm7, %v3553_v8, %v3549_v47  ;;  %5368 = vmatpush.bf16.msrb.mxu3 %v9430_v60  ;;  %5270 = vmatpush.bf16.msrb.mxu1 %v9174_v45  ;;  %v10005_v47 = vld [vmem:[#allocation8 + $0x2cc] sm:$0xf0]  ;;  %v3670_v48 = vand.u32 2147483647, %v12131_v62  ;;  %vm12164_vm11 = vmor %vm3606_vm8, %vm3607_vm9  ;;  %vm12168_vm12 = vcmp.eq.f32.partialorder %v3610_v33, 8.507059e+37 }
 0x364   :  { %v3603_v58 = vsub.f32 1.0, %v3602_v41  ;;  %v2920_v27 = vpop.f32.mrf.mxu2  ;;  %v12141_v2 = vpack.c.bf16 %v3554_v18, %v3494_v20  ;;  %v9285_v41 = vld [vmem:[#allocation8 + $0x2c0] sm:$0xf]  ;;  %vm3666_vm13 = vweird.f32 %v12131_v62  ;;  %v9941_v33 = vld [vmem:[#allocation8 + $0xcc] sm:$0xf0] }
 0x365   :  { %v2921_v35 = vadd.f32 %v2920_v27, %v2872_v38  ;;  %v2969_v10 = vpop.f32.mrf.mxu3  ;;  %v2824_v51 = vpop.f32.mrf.mxu0  ;;  %v9286_v61 = vor.u32 %v10005_v47, %v9285_v41  ;;  %vm3671_vm15 = vcmp.eq.f32.partialorder %v3670_v48, 8.507059e+37 }
 0x366   :  { %v2825_v54 = vadd.f32 %v2824_v51, %v12016_v21  ;;  %v2873_v59 = vpop.f32.mrf.mxu1  ;;  %v3604_v57 = vmul.f32 %v12129_v43, %v3603_v58 }
 0x367   :  { %v12144_v32 = vadd.f32 %v2969_v10, %v2921_v35  ;;  %v2874_v21 = vadd.f32 %v2873_v59, %v12065_v29  ;;  %v3672_v35 = vand.u32 2147483648, %v12131_v62  ;;  %5320 = vmatpush.bf16.msrb.mxu2 %v9286_v61 }
 0x368   :  { %v10234_v36 = vpop.eup %10233  ;;  %v8889_v40 = vmul.f32 -1.442695, %v2825_v54  ;;  %v3605_v20 = vadd.f32 %v12129_v43, %v3604_v57 }
 0x369   :  { %v10236_v34 = vpop.eup %10235  ;;  %v12147_v12 = vadd.f32 1.0, %v10234_v36 }
 0x36a   :  { %v3662_v38 = vmul.f32 %v10236_v34, %v12131_v62  ;;  %10237 = vpow2.f32 %v8889_v40  ;;  %vm3667_vm10 = vweird.f32 %v10236_v34  ;;  %v3609_v60 = vsel %vm12164_vm11, %v12129_v43, %v3605_v20 }
 0x36b   :  { %10239 = vrcp.f32 %v12147_v12  ;;  %v3613_v40 = vor.u32 1.1754944e-38, %v3612_v31  ;;  %vm3668_vm14 = vmor %vm3666_vm13, %vm3667_vm10  ;;  %v9973_v31 = vld [vmem:[#allocation8 + $0x1cc] sm:$0xf0]  ;;  %vm3726_vm0 = vweird.f32 %v12147_v12 }
 0x36c   :  { %v3663_v11 = vsub.f32 1.0, %v3662_v38  ;;  %v2922_v8 = vpop.f32.mrf.mxu2 }
 0x36d   :  { %v2923_v18 = vadd.f32 %v2922_v8, %v2874_v21  ;;  %v2971_v58 = vpop.f32.mrf.mxu3  ;;  %v2827_v27 = vpop.f32.mrf.mxu0  ;;  %v3614_v57 = vsel %vm12168_vm12, %v3613_v40, %v3609_v60  ;;  %v9029_v21 = vld [vmem:[#allocation8 + $0xc0] sm:$0xf]  ;;  %v10001_v40 = vld [vmem:[#allocation8 + $0x2ac] sm:$0xf0] }
 0x36e   :  { %v2828_v10 = vadd.f32 %v2827_v27, %v12023_v14  ;;  %v2876_v51 = vpop.f32.mrf.mxu1  ;;  %v3664_v22 = vmul.f32 %v10236_v34, %v3663_v11  ;;  %v9030_v20 = vor.u32 %v9941_v33, %v9029_v21 }
 0x36f   :  { %v12160_v7 = vadd.f32 %v2971_v58, %v2923_v18  ;;  %v2877_v36 = vadd.f32 %v2876_v51, %v12065_v29  ;;  %v9413_v18 = vld [vmem:[#allocation8 + $0x3c0] sm:$0xf] }
 0x370   :  { %v10238_v59 = vpop.eup %10237  ;;  %v8893_v14 = vmul.f32 -1.442695, %v2828_v10  ;;  %3022 = vmatmul.bf16.gmra.mxu0 %v10900_v15  ;;  %v3665_v4 = vadd.f32 %v10236_v34, %v3664_v22  ;;  %v3673_v15 = vor.u32 1.1754944e-38, %v3672_v35 }
 0x371   :  { %v12177_v3 = vpop.eup %10239  ;;  %v12179_v45 = vadd.f32 1.0, %v10238_v59  ;;  %3071 = vmatmul.bf16.gmra.mxu1 %v11002_v16  ;;  %3120 = vmatmul.bf16.gmra.mxu2 %v14890_v28 }
 0x372   :  { %v3722_v43 = vmul.f32 %v12177_v3, %v12147_v12  ;;  %10241 = vpow2.f32 %v8893_v14  ;;  %3169 = vmatmul.bf16.gmra.mxu3 %v14961_v46  ;;  %v3669_v62 = vsel %vm3668_vm14, %v10236_v34, %v3665_v4  ;;  %v10037_v46 = vld [vmem:[#allocation8 + $0x3cc] sm:$0xf0]  ;;  %v9157_v34 = vld [vmem:[#allocation8 + $0x1c0] sm:$0xf]  ;;  %5222 = vmatpush.bf16.msrb.mxu0 %v9030_v20  ;;  %v3730_v14 = vand.u32 2147483647, %v12147_v12 }
 0x373   :  { %10243 = vrcp.f32 %v12179_v45  ;;  %v3674_v16 = vsel %vm3671_vm15, %v3673_v15, %v3669_v62  ;;  %v9414_v61 = vor.u32 %v10037_v46, %v9413_v18  ;;  %v9158_v10 = vor.u32 %v9973_v31, %v9157_v34  ;;  %v14995_v34 = vld [vmem:[#allocation33_spill] sm:$0xff] }
 0x374   :  { %v3723_v38 = vsub.f32 1.0, %v3722_v43  ;;  %v2925_v28 = vpop.f32.mrf.mxu2  ;;  %v12191_v11 = vpack.c.bf16 %v3674_v16, %v3614_v57  ;;  %vm3727_vm1 = vweird.f32 %v12177_v3  ;;  %vm12218_vm4 = vcmp.eq.f32.partialorder %v3730_v14, 8.507059e+37 }
 0x375   :  { %v2926_v8 = vadd.f32 %v2925_v28, %v2877_v36  ;;  %v2974_v41 = vpop.f32.mrf.mxu3  ;;  %v2829_v47 = vpop.f32.mrf.mxu0  ;;  %5369 = vmatpush.bf16.msrb.mxu3 %v9414_v61  ;;  %5271 = vmatpush.bf16.msrb.mxu1 %v9158_v10  ;;  %v9269_v36 = vld [vmem:[#allocation8 + $0x2a0] sm:$0xf]  ;;  %v3792_v28 = vand.u32 2147483648, %v12179_v45  ;;  %vm12214_vm3 = vmor %vm3726_vm0, %vm3727_vm1  ;;  %vm3786_vm5 = vweird.f32 %v12179_v45  ;;  %v14996_v10 = vld [vmem:[#allocation57_spill] sm:$0xff] }
 0x376   :  { %v2830_v58 = vadd.f32 %v2829_v47, %v12026_v26  ;;  %v2878_v27 = vpop.f32.mrf.mxu1  ;;  %v3724_v48 = vmul.f32 %v12177_v3, %v3723_v38  ;;  %v9270_v16 = vor.u32 %v10001_v40, %v9269_v36  ;;  %v3732_v38 = vand.u32 2147483648, %v12147_v12  ;;  %v9937_v36 = vld [vmem:[#allocation8 + $0xac] sm:$0xf0] }
 0x377   :  { %v12194_v35 = vadd.f32 %v2974_v41, %v2926_v8  ;;  %v2879_v26 = vadd.f32 %v2878_v27, %v12065_v29  ;;  %v3790_v41 = vand.u32 2147483647, %v12179_v45 }
 0x378   :  { %v10242_v51 = vpop.eup %10241  ;;  %v8897_v22 = vmul.f32 -1.442695, %v2830_v58  ;;  %v3725_v15 = vadd.f32 %v12177_v3, %v3724_v48  ;;  %5321 = vmatpush.bf16.msrb.mxu2 %v9270_v16  ;;  %v3793_v48 = vor.u32 1.1754944e-38, %v3792_v28  ;;  %v9397_v16 = vld [vmem:[#allocation8 + $0x3a0] sm:$0xf] }
 0x379   :  { %v10244_v37 = vpop.eup %10243  ;;  %v12197_v54 = vadd.f32 1.0, %v10242_v51  ;;  %v14997_v51 = vld [vmem:[#allocation58_spill] sm:$0xff]  ;;  %vm3791_vm7 = vcmp.eq.f32.partialorder %v3790_v41, 8.507059e+37 }
 0x37a   :  { %v3782_v59 = vmul.f32 %v10244_v37, %v12179_v45  ;;  %10245 = vpow2.f32 %v8897_v22  ;;  %vm3787_vm2 = vweird.f32 %v10244_v37  ;;  %v3729_v58 = vsel %vm12214_vm3, %v12177_v3, %v3725_v15 }
 0x37b   :  { %10247 = vrcp.f32 %v12197_v54  ;;  %v3733_v22 = vor.u32 1.1754944e-38, %v3732_v38  ;;  %vm3788_vm6 = vmor %vm3786_vm5, %vm3787_vm2  ;;  %vm3846_vm9 = vweird.f32 %v12197_v54 }
 0x37c   :  { %v3783_v60 = vsub.f32 1.0, %v3782_v59  ;;  %v2927_v4 = vpop.f32.mrf.mxu2 }
 0x37d   :  { %v2928_v43 = vadd.f32 %v2927_v4, %v2879_v26  ;;  %v2976_v62 = vpop.f32.mrf.mxu3  ;;  %v2832_v57 = vpop.f32.mrf.mxu0  ;;  %v3734_v59 = vsel %vm12218_vm4, %v3733_v22, %v3729_v58  ;;  %v9013_v4 = vld [vmem:[#allocation8 + $0xa0] sm:$0xf]  ;;  %v3850_v58 = vand.u32 2147483647, %v12197_v54 }
 0x37e   :  { %v2833_v21 = vadd.f32 %v2832_v57, %v12033_v42  ;;  %v2881_v33 = vpop.f32.mrf.mxu1  ;;  %v3784_v8 = vmul.f32 %v10244_v37, %v3783_v60  ;;  %v9014_v57 = vor.u32 %v9937_v36, %v9013_v4  ;;  %v8997_v36 = vld [vmem:[#allocation8 + $0x80] sm:$0xf] }
 0x37f   :  { %v12210_v47 = vadd.f32 %v2976_v62, %v2928_v43  ;;  %v2882_v31 = vadd.f32 %v2881_v33, %v12065_v29  ;;  %v9969_v33 = vld [vmem:[#allocation8 + $0x1ac] sm:$0xf0]  ;;  %vm12275_vm12 = vcmp.eq.f32.partialorder %v3850_v58, 8.507059e+37 }
 0x380   :  { %v10246_v46 = vpop.eup %10245  ;;  %v8901_v42 = vmul.f32 -1.442695, %v2833_v21  ;;  %3027 = vmatmul.bf16.gmra.mxu0 %v14995_v34  ;;  %v3785_v27 = vadd.f32 %v10244_v37, %v3784_v8 }
 0x381   :  { %v12227_v12 = vpop.eup %10247  ;;  %v12229_v61 = vadd.f32 1.0, %v10246_v46  ;;  %3076 = vmatmul.bf16.gmra.mxu1 %v14996_v10  ;;  %3125 = vmatmul.bf16.gmra.mxu2 %v14997_v51 }
 0x382   :  { %v3842_v3 = vmul.f32 %v12227_v12, %v12197_v54  ;;  %10249 = vpow2.f32 %v8901_v42  ;;  %3174 = vmatmul.bf16.gmra.mxu3 %v14964_v49  ;;  %v3789_v45 = vsel %vm3788_vm6, %v10244_v37, %v3785_v27  ;;  %v10033_v49 = vld [vmem:[#allocation8 + $0x3ac] sm:$0xf0]  ;;  %v9141_v37 = vld [vmem:[#allocation8 + $0x1a0] sm:$0xf]  ;;  %5223 = vmatpush.bf16.msrb.mxu0 %v9014_v57  ;;  %vm3847_vm8 = vweird.f32 %v12227_v12 }
 0x383   :  { %10251 = vrcp.f32 %v12229_v61  ;;  %v3794_v26 = vsel %vm3791_vm7, %v3793_v48, %v3789_v45  ;;  %v9398_v21 = vor.u32 %v10033_v49, %v9397_v16  ;;  %v9142_v41 = vor.u32 %v9969_v33, %v9141_v37  ;;  %v9253_v48 = vld [vmem:[#allocation8 + $0x280] sm:$0xf]  ;;  %v9965_v49 = vld [vmem:[#allocation8 + $0x18c] sm:$0xf0]  ;;  %vm12271_vm11 = vmor %vm3846_vm9, %vm3847_vm8 }
 0x384   :  { %v3843_v14 = vsub.f32 1.0, %v3842_v3  ;;  %v2930_v60 = vpop.f32.mrf.mxu2  ;;  %v12241_v40 = vpack.c.bf16 %v3794_v26, %v3734_v59  ;;  %v3910_v10 = vand.u32 2147483647, %v12229_v61  ;;  %v9997_v3 = vld [vmem:[#allocation8 + $0x28c] sm:$0xf0]  ;;  %v3912_v59 = vand.u32 2147483648, %v12229_v61 }
 0x385   :  { %v2931_v15 = vadd.f32 %v2930_v60, %v2882_v31  ;;  %v2979_v43 = vpop.f32.mrf.mxu3  ;;  %v2834_v62 = vpop.f32.mrf.mxu0  ;;  %5370 = vmatpush.bf16.msrb.mxu3 %v9398_v21  ;;  %5272 = vmatpush.bf16.msrb.mxu1 %v9142_v41  ;;  %v3852_v31 = vand.u32 2147483648, %v12197_v54  ;;  %v9254_v4 = vor.u32 %v9997_v3, %v9253_v48  ;;  %vm3906_vm14 = vweird.f32 %v12229_v61  ;;  %v8981_v3 = vld [vmem:[#allocation8 + $0x60] sm:$0xf]  ;;  %v9957_v54 = vld [vmem:[#allocation8 + $0x14c] sm:$0xf0] }
 0x386   :  { %v2835_v38 = vadd.f32 %v2834_v62, %v12036_v53  ;;  %v2883_v28 = vpop.f32.mrf.mxu1  ;;  %v3844_v46 = vmul.f32 %v12227_v12, %v3843_v14  ;;  %vm12279_vm13 = vcmp.eq.f32.partialorder %v3910_v10, 8.507059e+37 }
 0x387   :  { %v12244_v8 = vadd.f32 %v2979_v43, %v2931_v15  ;;  %v2884_v27 = vadd.f32 %v2883_v28, %v12065_v29  ;;  %v9933_v15 = vld [vmem:[#allocation8 + $0x8c] sm:$0xf0]  ;;  %v9125_v43 = vld [vmem:[#allocation8 + $0x180] sm:$0xf]  ;;  %5322 = vmatpush.bf16.msrb.mxu2 %v9254_v4 }
 0x388   :  { %v10250_v20 = vpop.eup %10249  ;;  %v8905_v18 = vmul.f32 -1.442695, %v2835_v38  ;;  %v3845_v45 = vadd.f32 %v12227_v12, %v3844_v46  ;;  %v8998_v16 = vor.u32 %v9933_v15, %v8997_v36  ;;  %v9126_v38 = vor.u32 %v9965_v49, %v9125_v43  ;;  %v9993_v46 = vld [vmem:[#allocation8 + $0x26c] sm:$0xf0]  ;;  %v9109_v36 = vld [vmem:[#allocation8 + $0x160] sm:$0xf] }
 0x389   :  { %v12247_v42 = vpop.eup %10251  ;;  %v12249_v34 = vadd.f32 1.0, %v10250_v20  ;;  %v15004_v20 = vld [vmem:[#allocation37_spill] sm:$0xff]  ;;  %v9961_v15 = vld [vmem:[#allocation8 + $0x16c] sm:$0xf0]  ;;  %v9381_v49 = vld [vmem:[#allocation8 + $0x380] sm:$0xf] }
 0x38a   :  { %v3902_v53 = vmul.f32 %v12247_v42, %v12229_v61  ;;  %10253 = vpow2.f32 %v8905_v18  ;;  %vm3907_vm10 = vweird.f32 %v12247_v42  ;;  %v9237_v18 = vld [vmem:[#allocation8 + $0x260] sm:$0xf]  ;;  %v3913_v61 = vor.u32 1.1754944e-38, %v3912_v59  ;;  %5224 = vmatpush.bf16.msrb.mxu0 %v8998_v16  ;;  %5273 = vmatpush.bf16.msrb.mxu1 %v9126_v38  ;;  %v9925_v38 = vld [vmem:[#allocation8 + $0x4c] sm:$0xf0] }
 0x38b   :  { %10255 = vrcp.f32 %v12249_v34  ;;  %v9238_v48 = vor.u32 %v9993_v46, %v9237_v18  ;;  %vm12298_vm15 = vmor %vm3906_vm14, %vm3907_vm10  ;;  %v8965_v18 = vld [vmem:[#allocation8 + $0x40] sm:$0xf]  ;;  %vm3966_vm1 = vweird.f32 %v12249_v34 }
 0x38c   :  { %v3903_v51 = vsub.f32 1.0, %v3902_v53  ;;  %v2932_v22 = vpop.f32.mrf.mxu2  ;;  %v3849_v53 = vsel %vm12271_vm11, %v12227_v12, %v3845_v45  ;;  %v9093_v46 = vld [vmem:[#allocation8 + $0x140] sm:$0xf] }
 0x38d   :  { %v12261_v26 = vadd.f32 %v2932_v22, %v2884_v27  ;;  %v12263_v14 = vpop.f32.mrf.mxu3  ;;  %v2837_v60 = vpop.f32.mrf.mxu0  ;;  %v15006_v22 = vld [vmem:[#allocation61_spill] sm:$0xff]  ;;  %5323 = vmatpush.bf16.msrb.mxu2 %v9238_v48  ;;  %v9094_v48 = vor.u32 %v9957_v54, %v9093_v46 }
 0x38e   :  { %v2838_v62 = vadd.f32 %v2837_v60, %v12043_v13  ;;  %v2886_v57 = vpop.f32.mrf.mxu1  ;;  %v3904_v37 = vmul.f32 %v12247_v42, %v3903_v51  ;;  %v3853_v13 = vor.u32 1.1754944e-38, %v3852_v31  ;;  %v15005_v51 = vld [vmem:[#allocation60_spill] sm:$0xff] }
 0x38f   :  { %v2887_v10 = vadd.f32 %v2886_v57, %v12065_v29  ;;  %v9929_v60 = vld [vmem:[#allocation8 + $0x6c] sm:$0xf0] }
 0x390   :  { %v10254_v33 = vpop.eup %10253  ;;  %v8909_v41 = vmul.f32 -1.442695, %v2838_v62  ;;  %3032 = vmatmul.bf16.gmra.mxu0 %v15004_v20  ;;  %v3905_v58 = vadd.f32 %v12247_v42, %v3904_v37  ;;  %v8982_v4 = vor.u32 %v9929_v60, %v8981_v3  ;;  %v9110_v62 = vor.u32 %v9961_v15, %v9109_v36  ;;  %v10029_v37 = vld [vmem:[#allocation8 + $0x38c] sm:$0xf0]  ;;  %v9077_v15 = vld [vmem:[#allocation8 + $0x120] sm:$0xf] }
 0x391   :  { %v12289_v27 = vpop.eup %10255  ;;  %v12291_v31 = vadd.f32 1.0, %v10254_v33  ;;  %3081 = vmatmul.bf16.gmra.mxu1 %v15005_v51  ;;  %3130 = vmatmul.bf16.gmra.mxu2 %v15006_v22  ;;  %v3854_v59 = vsel %vm12275_vm12, %v3853_v13, %v3849_v53  ;;  %v9382_v20 = vor.u32 %v10029_v37, %v9381_v49  ;;  %v8966_v13 = vor.u32 %v9925_v38, %v8965_v18  ;;  %v9221_v53 = vld [vmem:[#allocation8 + $0x240] sm:$0xf]  ;;  %v9989_v51 = vld [vmem:[#allocation8 + $0x24c] sm:$0xf0] }
 0x392   :  { %v3962_v45 = vmul.f32 %v12289_v27, %v12249_v34  ;;  %10257 = vpow2.f32 %v8909_v41  ;;  %3179 = vmatmul.bf16.gmra.mxu3 %v14967_v6  ;;  %v3909_v43 = vsel %vm12298_vm15, %v12247_v42, %v3905_v58  ;;  %5225 = vmatpush.bf16.msrb.mxu0 %v8982_v4  ;;  %v9222_v12 = vor.u32 %v9989_v51, %v9221_v53  ;;  %v9205_v49 = vld [vmem:[#allocation8 + $0x220] sm:$0xf]  ;;  %v9985_v37 = vld [vmem:[#allocation8 + $0x22c] sm:$0xf0] }
 0x393   :  { %10259 = vrcp.f32 %v12291_v31  ;;  %v3914_v57 = vsel %vm12279_vm13, %v3913_v61, %v3909_v43  ;;  %5371 = vmatpush.bf16.msrb.mxu3 %v9382_v20  ;;  %5274 = vmatpush.bf16.msrb.mxu1 %v9110_v62  ;;  %v8949_v61 = vld [vmem:[#allocation8 + $0x20] sm:$0xf]  ;;  %v9953_v43 = vld [vmem:[#allocation8 + $0x12c] sm:$0xf0]  ;;  %vm3967_vm0 = vweird.f32 %v12289_v27  ;;  %vm4026_vm5 = vweird.f32 %v12291_v31 }
 0x394   :  { %v3963_v6 = vsub.f32 1.0, %v3962_v45  ;;  %v2935_v16 = vpop.f32.mrf.mxu2  ;;  %v12313_v28 = vpack.c.bf16 %v3914_v57, %v3854_v59  ;;  %v9921_v45 = vld [vmem:[#allocation8 + $0x2c] sm:$0xf0]  ;;  %v3972_v59 = vand.u32 2147483648, %v12249_v34  ;;  %5324 = vmatpush.bf16.msrb.mxu2 %v9222_v12  ;;  %v8933_v18 = vld [vmem:[#allocation8] sm:$0xf]  ;;  %vm12343_vm3 = vmor %vm3966_vm1, %vm3967_vm0 }
 0x395   :  { %v2936_v33 = vadd.f32 %v2935_v16, %v2887_v10  ;;  %v2984_v41 = vpop.f32.mrf.mxu3  ;;  %v2839_v42 = vpop.f32.mrf.mxu0  ;;  %v3970_v10 = vand.u32 2147483647, %v12249_v34  ;;  %v8950_v16 = vor.u32 %v9921_v45, %v8949_v61  ;;  %v9917_v38 = vld [vmem:[#allocation8 + $0xc] sm:$0xf0]  ;;  %v9061_v53 = vld [vmem:[#allocation8 + $0x100] sm:$0xf] }
 0x396   :  { %15009 = vst [vmem:[#allocation23_spill] sm:$0xff] %v12313_v28  ;;  %v2840_v58 = vadd.f32 %v2839_v42, %v12046_v30  ;;  %v2888_v21 = vpop.f32.mrf.mxu1  ;;  %v3964_v30 = vmul.f32 %v12289_v27, %v3963_v6  ;;  %5226 = vmatpush.bf16.msrb.mxu0 %v8966_v13  ;;  %v9078_v6 = vor.u32 %v9953_v43, %v9077_v15  ;;  %v9949_v51 = vld [vmem:[#allocation8 + $0x10c] sm:$0xf0] }
 0x397   :  { %v12316_v22 = vadd.f32 %v2984_v41, %v2936_v33  ;;  %v2889_v57 = vadd.f32 %v2888_v21, %v12065_v29  ;;  %5275 = vmatpush.bf16.msrb.mxu1 %v9094_v48  ;;  %v9206_v33 = vor.u32 %v9985_v37, %v9205_v49  ;;  %v4030_v41 = vand.u32 2147483647, %v12291_v31  ;;  %v9189_v48 = vld [vmem:[#allocation8 + $0x200] sm:$0xf]  ;;  %v9981_v61 = vld [vmem:[#allocation8 + $0x20c] sm:$0xf0] }
 0x398   :  { %v10258_v3 = vpop.eup %10257  ;;  %v8913_v60 = vmul.f32 -1.442695, %v2840_v58  ;;  %v3965_v46 = vadd.f32 %v12289_v27, %v3964_v30  ;;  %v4032_v58 = vand.u32 2147483648, %v12291_v31  ;;  %v8934_v12 = vor.u32 %v9917_v38, %v8933_v18 }
 0x399   :  { %v12320_v36 = vpop.eup %10259  ;;  %v12322_v4 = vadd.f32 1.0, %v10258_v3  ;;  %5325 = vmatpush.bf16.msrb.mxu2 %v9206_v33  ;;  %v9062_v30 = vor.u32 %v9949_v51, %v9061_v53  ;;  %v9190_v15 = vor.u32 %v9981_v61, %v9189_v48  ;;  %vm12347_vm4 = vcmp.eq.f32.partialorder %v3970_v10, 8.507059e+37  ;;  %v15015_v33 = vld [vmem:[#allocation63_spill] sm:$0xff]  ;;  %v10025_v53 = vld [vmem:[#allocation8 + $0x36c] sm:$0xf0] }
 0x39a   :  { %v4022_v62 = vmul.f32 %v12320_v36, %v12291_v31  ;;  %10261 = vpow2.f32 %v8913_v60  ;;  %5227 = vmatpush.bf16.msrb.mxu0 %v8950_v16  ;;  %vm4027_vm2 = vweird.f32 %v12320_v36  ;;  %v3969_v16 = vsel %vm12343_vm3, %v12289_v27, %v3965_v46 }
 0x39b   :  { %10263 = vrcp.f32 %v12322_v4  ;;  %5276 = vmatpush.bf16.msrb.mxu1 %v9078_v6  ;;  %vm4028_vm6 = vmor %vm4026_vm5, %vm4027_vm2  ;;  %v4033_v18 = vor.u32 1.1754944e-38, %v4032_v58  ;;  %vm4031_vm7 = vcmp.eq.f32.partialorder %v4030_v41, 8.507059e+37  ;;  %vm4086_vm8 = vweird.f32 %v12322_v4 }
 0x39c   :  { %v4023_v42 = vsub.f32 1.0, %v4022_v62  ;;  %v2937_v20 = vpop.f32.mrf.mxu2 }
 0x39d   :  { %v12333_v21 = vadd.f32 %v2937_v20, %v2889_v57  ;;  %v12335_v13 = vpop.f32.mrf.mxu3  ;;  %v2842_v54 = vpop.f32.mrf.mxu0  ;;  %v15014_v57 = vld [vmem:[#allocation41_spill] sm:$0xff]  ;;  %v3973_v20 = vor.u32 1.1754944e-38, %v3972_v59  ;;  %5326 = vmatpush.bf16.msrb.mxu2 %v9190_v15 }
 0x39e   :  { %v2843_v3 = vadd.f32 %v2842_v54, %v12053_v23  ;;  %v2891_v60 = vpop.f32.mrf.mxu1  ;;  %v4024_v45 = vmul.f32 %v12320_v36, %v4023_v42  ;;  %v15016_v42 = vld [vmem:[#allocation64_spill] sm:$0xff]  ;;  %5228 = vmatpush.bf16.msrb.mxu0 %v8934_v12  ;;  %v9365_v54 = vld [vmem:[#allocation8 + $0x360] sm:$0xf] }
 0x39f   :  { %v2892_v10 = vadd.f32 %v2891_v60, %v12065_v29  ;;  %5277 = vmatpush.bf16.msrb.mxu1 %v9062_v30  ;;  %v3974_v59 = vsel %vm12347_vm4, %v3973_v20, %v3969_v16  ;;  %v9366_v60 = vor.u32 %v10025_v53, %v9365_v54  ;;  %v9349_v16 = vld [vmem:[#allocation8 + $0x340] sm:$0xf] }
 0x3a0   :  { %v10262_v34 = vpop.eup %10261  ;;  %v8917_v62 = vmul.f32 -1.442695, %v2843_v3  ;;  %3037 = vmatmul.bf16.gmra.mxu0 %v15014_v57  ;;  %v4025_v49 = vadd.f32 %v12320_v36, %v4024_v45 }
 0x3a1   :  { %v12357_v37 = vpop.eup %10263  ;;  %v12359_v6 = vadd.f32 1.0, %v10262_v34  ;;  %3086 = vmatmul.bf16.gmra.mxu1 %v15015_v33  ;;  %3135 = vmatmul.bf16.gmra.mxu2 %v15016_v42 }
 0x3a2   :  { %v4082_v27 = vmul.f32 %v12357_v37, %v12322_v4  ;;  %10265 = vpow2.f32 %v8917_v62  ;;  %3184 = vmatmul.bf16.gmra.mxu3 %v14970_v9  ;;  %v4029_v31 = vsel %vm4028_vm6, %v12320_v36, %v4025_v49  ;;  %v10021_v49 = vld [vmem:[#allocation8 + $0x34c] sm:$0xf0]  ;;  %vm4087_vm9 = vweird.f32 %v12357_v37 }
 0x3a3   :  { %10267 = vrcp.f32 %v12359_v6  ;;  %v4034_v38 = vsel %vm4031_vm7, %v4033_v18, %v4029_v31  ;;  %5372 = vmatpush.bf16.msrb.mxu3 %v9366_v60  ;;  %v9350_v18 = vor.u32 %v10021_v49, %v9349_v16  ;;  %v4152_v31 = vand.u32 2147483648, %v12359_v6  ;;  %vm12396_vm11 = vmor %vm4086_vm8, %vm4087_vm9 }
 0x3a4   :  { %v4083_v46 = vsub.f32 1.0, %v4082_v27  ;;  %v2940_v58 = vpop.f32.mrf.mxu2  ;;  %v12373_v51 = vpack.c.bf16 %v4034_v38, %v3974_v59  ;;  %v4092_v27 = vand.u32 2147483648, %v12322_v4  ;;  %vm4146_vm13 = vweird.f32 %v12359_v6 }
 0x3a5   :  { %v2941_v48 = vadd.f32 %v2940_v58, %v2892_v10  ;;  %v2989_v9 = vpop.f32.mrf.mxu3  ;;  %v2844_v3 = vpop.f32.mrf.mxu0  ;;  %v4150_v58 = vand.u32 2147483647, %v12359_v6 }
 0x3a6   :  { %v2845_v36 = vadd.f32 %v2844_v3, %v12056_v50  ;;  %v2893_v41 = vpop.f32.mrf.mxu1  ;;  %v4084_v30 = vmul.f32 %v12357_v37, %v4083_v46  ;;  %v4090_v50 = vand.u32 2147483647, %v12322_v4 }
 0x3a7   :  { %v12376_v12 = vadd.f32 %v2989_v9, %v2941_v48  ;;  %v2894_v34 = vadd.f32 %v2893_v41, %v12065_v29  ;;  %5373 = vmatpush.bf16.msrb.mxu3 %v9350_v18  ;;  %v4093_v41 = vor.u32 1.1754944e-38, %v4092_v27  ;;  %vm4151_vm15 = vcmp.eq.f32.partialorder %v4150_v58, 8.507059e+37 }
 0x3a8   :  { %v10266_v61 = vpop.eup %10265  ;;  %v8921_v45 = vmul.f32 -1.442695, %v2845_v36  ;;  %v4085_v10 = vadd.f32 %v12357_v37, %v4084_v30  ;;  %vm12400_vm12 = vcmp.eq.f32.partialorder %v4090_v50, 8.507059e+37 }
 0x3a9   :  { %v10268_v15 = vpop.eup %10267  ;;  %v12379_v43 = vadd.f32 1.0, %v10266_v61 }
 0x3aa   :  { %v4142_v23 = vmul.f32 %v10268_v15, %v12359_v6  ;;  %10269 = vpow2.f32 %v8921_v45  ;;  %vm4147_vm10 = vweird.f32 %v10268_v15 }
 0x3ab   :  { %10271 = vrcp.f32 %v12379_v43  ;;  %vm4148_vm14 = vmor %vm4146_vm13, %vm4147_vm10  ;;  %vm4206_vm1 = vweird.f32 %v12379_v43  ;;  %v4212_v54 = vand.u32 2147483648, %v12379_v43 }
 0x3ac   :  { %v4143_v62 = vsub.f32 1.0, %v4142_v23  ;;  %v2942_v57 = vpop.f32.mrf.mxu2 }
 0x3ad   :  { %v12388_v33 = vadd.f32 %v2942_v57, %v2894_v34  ;;  %v12390_v42 = vpop.f32.mrf.mxu3  ;;  %v2847_v20 = vpop.f32.mrf.mxu0 }
 0x3ae   :  { %v2848_v59 = vadd.f32 %v2847_v20, %v12063_v24  ;;  %v2896_v38 = vpop.f32.mrf.mxu1  ;;  %v4144_v46 = vmul.f32 %v10268_v15, %v4143_v62  ;;  %v4089_v24 = vsel %vm12396_vm11, %v12357_v37, %v4085_v10 }
 0x3af   :  { %v2897_v36 = vadd.f32 %v2896_v38, %v12065_v29  ;;  %v4094_v61 = vsel %vm12400_vm12, %v4093_v41, %v4089_v24 }
 0x3b0   :  { %v10270_v48 = vpop.eup %10269  ;;  %v8925_v4 = vmul.f32 -1.442695, %v2848_v59  ;;  %3042 = vmatmul.bf16.gmra.mxu0 %v14940_v52  ;;  %v4145_v9 = vadd.f32 %v10268_v15, %v4144_v46  ;;  %v4153_v52 = vor.u32 1.1754944e-38, %v4152_v31 }
 0x3b1   :  { %v12409_v3 = vpop.eup %10271  ;;  %v12411_v60 = vadd.f32 1.0, %v10270_v48  ;;  %3091 = vmatmul.bf16.gmra.mxu1 %v14941_v56  ;;  %3140 = vmatmul.bf16.gmra.mxu2 %v11068_v63 }
 0x3b2   :  { %v4202_v37 = vmul.f32 %v12409_v3, %v12379_v43  ;;  %10273 = vpow2.f32 %v8925_v4  ;;  %3189 = vmatmul.bf16.gmra.mxu3 %v14973_v0  ;;  %v4149_v6 = vsel %vm4148_vm14, %v10268_v15, %v4145_v9  ;;  %vm4207_vm0 = vweird.f32 %v12409_v3 }
 0x3b3   :  { %10275 = vrcp.f32 %v12411_v60  ;;  %v4154_v56 = vsel %vm4151_vm15, %v4153_v52, %v4149_v6  ;;  %v4272_v53 = vand.u32 2147483648, %v12411_v60  ;;  %v4270_v24 = vand.u32 2147483647, %v12411_v60  ;;  %vm12446_vm3 = vmor %vm4206_vm1, %vm4207_vm0  ;;  %v15023_v52 = vld [vmem:[#allocation68_spill] sm:$0xff] }
 0x3b4   :  { %v4203_v45 = vsub.f32 1.0, %v4202_v37  ;;  %v2945_v63 = vpop.f32.mrf.mxu2  ;;  %v12423_v30 = vpack.c.bf16 %v4154_v56, %v4094_v61  ;;  %vm4266_vm4 = vweird.f32 %v12411_v60  ;;  %v15024_v56 = vld [vmem:[#allocation51_spill] sm:$0xff] }
 0x3b5   :  { %v2946_v23 = vadd.f32 %v2945_v63, %v2897_v36  ;;  %v2994_v34 = vpop.f32.mrf.mxu3  ;;  %v2849_v50 = vpop.f32.mrf.mxu0  ;;  %vm4271_vm7 = vcmp.eq.f32.partialorder %v4270_v24, 8.507059e+37  ;;  %v10013_v36 = vld [vmem:[#allocation8 + $0x30c] sm:$0xf0] }
 0x3b6   :  { %v2850_v62 = vadd.f32 %v2849_v50, %v12068_v1  ;;  %v2898_v57 = vpop.f32.mrf.mxu1  ;;  %v4204_v49 = vmul.f32 %v12409_v3, %v4203_v45  ;;  %v4273_v45 = vor.u32 1.1754944e-38, %v4272_v53 }
 0x3b7   :  { %v12426_v16 = vadd.f32 %v2994_v34, %v2946_v23  ;;  %v2899_v27 = vadd.f32 %v2898_v57, %v12065_v29  ;;  %v4210_v29 = vand.u32 2147483647, %v12379_v43 }
 0x3b8   :  { %v10274_v0 = vpop.eup %10273  ;;  %v8929_v15 = vmul.f32 -1.442695, %v2850_v62  ;;  %v4205_v1 = vadd.f32 %v12409_v3, %v4204_v49 }
 0x3b9   :  { %v10276_v10 = vpop.eup %10275  ;;  %v12429_v20 = vadd.f32 1.0, %v10274_v0  ;;  %vm4211_vm6 = vcmp.eq.f32.partialorder %v4210_v29, 8.507059e+37 }
 0x3ba   :  { %v4262_v18 = vmul.f32 %v10276_v10, %v12411_v60  ;;  %10277 = vpow2.f32 %v8929_v15  ;;  %vm4267_vm2 = vweird.f32 %v10276_v10  ;;  %v4209_v37 = vsel %vm12446_vm3, %v12409_v3, %v4205_v1  ;;  %v10017_v1 = vld [vmem:[#allocation8 + $0x32c] sm:$0xf0] }
 0x3bb   :  { %10279 = vrcp.f32 %v12429_v20  ;;  %vm4268_vm5 = vmor %vm4266_vm4, %vm4267_vm2  ;;  %vm4326_vm10 = vweird.f32 %v12429_v20 }
 0x3bc   :  { %v4263_v31 = vsub.f32 1.0, %v4262_v18  ;;  %v2947_v59 = vpop.f32.mrf.mxu2 }
 0x3bd   :  { %v12436_v38 = vadd.f32 %v2947_v59, %v2899_v27  ;;  %v12438_v46 = vpop.f32.mrf.mxu3  ;;  %v3008_v58 = vpop.f32.mrf.mxu0  ;;  %v9333_v59 = vld [vmem:[#allocation8 + $0x320] sm:$0xf] }
 0x3be   :  { %v3057_v48 = vpop.f32.mrf.mxu1  ;;  %v4264_v4 = vmul.f32 %v10276_v10, %v4263_v31  ;;  %v3009_v9 = vadd.f32 %v3008_v58, %v12076_v25  ;;  %v4213_v25 = vor.u32 1.1754944e-38, %v4212_v54 }
 0x3c0   :  { %v10278_v41 = vpop.eup %10277  ;;  %5229 = vmatmul.bf16.vlgmr.msrb.gmra.mxu0 %v15023_v52  ;;  %v4265_v6 = vadd.f32 %v10276_v10, %v4264_v4  ;;  %v3058_v3 = vadd.f32 %v3057_v48, %v3009_v9  ;;  %v4214_v60 = vsel %vm4211_vm6, %v4213_v25, %v4209_v37  ;;  %v9317_v9 = vld [vmem:[#allocation8 + $0x300] sm:$0xf] }
 0x3c1   :  { %v12455_v43 = vpop.eup %10279  ;;  %v12457_v61 = vadd.f32 1.0, %v10278_v41  ;;  %5278 = vmatmul.bf16.vlgmr.msrb.gmra.mxu1 %v15024_v56  ;;  %5327 = vmatmul.bf16.vlgmr.msrb.gmra.mxu2 %v12141_v2 }
 0x3c2   :  { %v4322_v63 = vmul.f32 %v12455_v43, %v12429_v20  ;;  %v4269_v23 = vsel %vm4268_vm5, %v10276_v10, %v4265_v6  ;;  %v9334_v10 = vor.u32 %v10017_v1, %v9333_v59  ;;  %vm4327_vm8 = vweird.f32 %v12455_v43 }
 0x3c3   :  { %10281 = vrcp.f32 %v12457_v61  ;;  %v4274_v34 = vsel %vm4271_vm7, %v4273_v45, %v4269_v23  ;;  %v9318_v6 = vor.u32 %v10013_v36, %v9317_v9  ;;  %v4392_v45 = vand.u32 2147483648, %v12457_v61  ;;  %vm12480_vm11 = vmor %vm4326_vm10, %vm4327_vm8 }
 0x3c4   :  { %v3106_v50 = vpop.f32.mrf.mxu2  ;;  %v12464_v62 = vpack.c.bf16 %v4274_v34, %v4214_v60  ;;  %v4323_v57 = vsub.f32 1.0, %v4322_v63  ;;  %5374 = vmatpush.bf16.msrb.mxu3 %v9334_v10  ;;  %v4332_v23 = vand.u32 2147483648, %v12429_v20  ;;  %v4390_v60 = vand.u32 2147483647, %v12457_v61 }
 0x3c5   :  { %v3107_v0 = vadd.f32 %v3106_v50, %v3058_v3  ;;  %v3155_v15 = vpop.f32.mrf.mxu3  ;;  %v3010_v49 = vpop.f32.mrf.mxu0  ;;  %vm4386_vm12 = vweird.f32 %v12457_v61 }
 0x3c6   :  { %15025 = vst [vmem:[#allocation36_spill] sm:$0xff] %v12464_v62  ;;  %v3059_v18 = vpop.f32.mrf.mxu1  ;;  %v3011_v31 = vadd.f32 %v3010_v49, %v12083_v44  ;;  %v4324_v53 = vmul.f32 %v12455_v43, %v4323_v57  ;;  %v4330_v57 = vand.u32 2147483647, %v12429_v20  ;;  %v4393_v20 = vor.u32 1.1754944e-38, %v4392_v45 }
 0x3c7   :  { %v3156_v27 = vadd.f32 %v3155_v15, %v3107_v0  ;;  %v15026_v0 = vld [vmem:[#allocation69_spill] sm:$0xff]  ;;  %v4333_v1 = vor.u32 1.1754944e-38, %v4332_v23  ;;  %vm4391_vm14 = vcmp.eq.f32.partialorder %v4390_v60, 8.507059e+37  ;;  %v15030_v15 = vld [vmem:[#allocation70_spill] sm:$0xff] }
 0x3c8   :  { %v3060_v29 = vadd.f32 %v3059_v18, %v3011_v31  ;;  %v4325_v25 = vadd.f32 %v12455_v43, %v4324_v53  ;;  %5375 = vmatpush.bf16.msrb.mxu3 %v9318_v6  ;;  %v15029_v31 = vld [vmem:[#allocation22_spill] sm:$0xff]  ;;  %vm4331_vm15 = vcmp.eq.f32.partialorder %v4330_v57, 8.507059e+37 }
 0x3c9   :  { %v10282_v58 = vpop.eup %10281  ;;  %v8870_v54 = vmul.f32 -1.442695, %v3156_v27 }
 0x3ca   :  { %v4382_v48 = vmul.f32 %v10282_v58, %v12457_v61  ;;  %vm4387_vm9 = vweird.f32 %v10282_v58 }
 0x3cb   :  { %10283 = vpow2.f32 %v8870_v54  ;;  %vm4388_vm13 = vmor %vm4386_vm12, %vm4387_vm9 }
 0x3cc   :  { %v4383_v4 = vsub.f32 1.0, %v4382_v48  ;;  %v3108_v24 = vpop.f32.mrf.mxu2 }
 0x3cd   :  { %v3109_v41 = vadd.f32 %v3108_v24, %v3060_v29  ;;  %v3157_v44 = vpop.f32.mrf.mxu3  ;;  %v3013_v37 = vpop.f32.mrf.mxu0 }
 0x3ce   :  { %v3062_v63 = vpop.f32.mrf.mxu1  ;;  %v4384_v3 = vmul.f32 %v10282_v58, %v4383_v4  ;;  %v3014_v50 = vadd.f32 %v3013_v37, %v12098_v19  ;;  %v4329_v19 = vsel %vm12480_vm11, %v12455_v43, %v4325_v25 }
 0x3cf   :  { %v3158_v34 = vadd.f32 %v3157_v44, %v3109_v41  ;;  %v4334_v48 = vsel %vm4331_vm15, %v4333_v1, %v4329_v19  ;;  %v15031_v19 = vld [vmem:[#allocation54_spill] sm:$0xff] }
 0x3d0   :  { %5234 = vmatmul.bf16.gmra.mxu0 %v15026_v0  ;;  %v4385_v49 = vadd.f32 %v10282_v58, %v4384_v3  ;;  %v3063_v61 = vadd.f32 %v3062_v63, %v3014_v50 }
 0x3d1   :  { %v10284_v18 = vpop.eup %10283  ;;  %v8874_v27 = vmul.f32 -1.442695, %v3158_v34  ;;  %5283 = vmatmul.bf16.gmra.mxu1 %v15029_v31  ;;  %5332 = vmatmul.bf16.gmra.mxu2 %v12191_v11 }
 0x3d2   :  { %v12491_v59 = vadd.f32 1.0, %v10284_v18  ;;  %v4389_v10 = vsel %vm4388_vm13, %v10282_v58, %v4385_v49 }
 0x3d3   :  { %10285 = vpow2.f32 %v8874_v27  ;;  %v4394_v54 = vsel %vm4391_vm14, %v4393_v20, %v4389_v10 }
 0x3d4   :  { %10287 = vrcp.f32 %v12491_v59  ;;  %v3111_v53 = vpop.f32.mrf.mxu2  ;;  %v12494_v43 = vpack.c.bf16 %v4394_v54, %v4334_v48  ;;  %v3507_v10 = vand.u32 2147483648, %v12491_v59  ;;  %vm3501_vm1 = vweird.f32 %v12491_v59 }
 0x3d5   :  { %v3112_v29 = vadd.f32 %v3111_v53, %v3063_v61  ;;  %v3160_v4 = vpop.f32.mrf.mxu3  ;;  %v3015_v24 = vpop.f32.mrf.mxu0  ;;  %v3505_v53 = vand.u32 2147483647, %v12491_v59 }
 0x3d6   :  { %v3064_v9 = vpop.f32.mrf.mxu1  ;;  %v3016_v41 = vadd.f32 %v3015_v24, %v12122_v39 }
 0x3d7   :  { %v3161_v36 = vadd.f32 %v3160_v4, %v3112_v29  ;;  %vm3506_vm5 = vcmp.eq.f32.partialorder %v3505_v53, 8.507059e+37 }
 0x3d8   :  { %v3065_v45 = vadd.f32 %v3064_v9, %v3016_v41  ;;  %v10007_v41 = vld [vmem:[#allocation8 + $0x2e4] sm:$0xf] }
 0x3d9   :  { %v10286_v44 = vpop.eup %10285  ;;  %v8878_v58 = vmul.f32 -1.442695, %v3161_v36 }
 0x3da   :  { %v12497_v37 = vpop.eup %10287  ;;  %v12499_v6 = vadd.f32 1.0, %v10286_v44  ;;  %v9303_v44 = vld [vmem:[#allocation8 + $0x2f0] sm:$0xf0] }
 0x3db   :  { %v3497_v25 = vmul.f32 %v12497_v37, %v12491_v59  ;;  %10289 = vpow2.f32 %v8878_v58  ;;  %vm3502_vm0 = vweird.f32 %v12497_v37  ;;  %v3508_v59 = vor.u32 1.1754944e-38, %v3507_v10 }
 0x3dc   :  { %10291 = vrcp.f32 %v12499_v6  ;;  %v3113_v63 = vpop.f32.mrf.mxu2  ;;  %v3565_v48 = vand.u32 2147483647, %v12499_v6  ;;  %v3567_v4 = vand.u32 2147483648, %v12499_v6  ;;  %vm12523_vm3 = vmor %vm3501_vm1, %vm3502_vm0  ;;  %vm3561_vm4 = vweird.f32 %v12499_v6 }
 0x3dd   :  { %v3498_v23 = vsub.f32 1.0, %v3497_v25  ;;  %v3114_v3 = vadd.f32 %v3113_v63, %v3065_v45  ;;  %v3162_v60 = vpop.f32.mrf.mxu3  ;;  %v3018_v34 = vpop.f32.mrf.mxu0  ;;  %v9306_v45 = vor.u32 %v10007_v41, %v9303_v44  ;;  %v9943_v63 = vld [vmem:[#allocation8 + $0xe4] sm:$0xf] }
 0x3de   :  { %v3067_v50 = vpop.f32.mrf.mxu1  ;;  %v3019_v57 = vadd.f32 %v3018_v34, %v12144_v32  ;;  %vm3566_vm7 = vcmp.eq.f32.partialorder %v3565_v48, 8.507059e+37  ;;  %v3568_v10 = vor.u32 1.1754944e-38, %v3567_v4 }
 0x3df   :  { %v3163_v39 = vadd.f32 %v3162_v60, %v3114_v3  ;;  %v3499_v18 = vmul.f32 %v12497_v37, %v3498_v23  ;;  %v9047_v23 = vld [vmem:[#allocation8 + $0xf0] sm:$0xf0]  ;;  %v10039_v3 = vld [vmem:[#allocation8 + $0x3e4] sm:$0xf]  ;;  %5515 = vmatpush.bf16.msra.mxu2 %v9306_v45 }
 0x3e0   :  { %5239 = vmatmul.bf16.gmra.mxu0 %v15030_v15  ;;  %v3068_v54 = vadd.f32 %v3067_v50, %v3019_v57  ;;  %v9431_v57 = vld [vmem:[#allocation8 + $0x3f0] sm:$0xf0] }
 0x3e1   :  { %v10290_v49 = vpop.eup %10289  ;;  %v8882_v27 = vmul.f32 -1.442695, %v3163_v39  ;;  %5288 = vmatmul.bf16.gmra.mxu1 %v15031_v19  ;;  %5337 = vmatmul.bf16.gmra.mxu2 %v12241_v40  ;;  %v3500_v58 = vadd.f32 %v12497_v37, %v3499_v18  ;;  %v9050_v39 = vor.u32 %v9943_v63, %v9047_v23 }
 0x3e2   :  { %v10292_v20 = vpop.eup %10291  ;;  %v12509_v1 = vadd.f32 1.0, %v10290_v49  ;;  %v9975_v49 = vld [vmem:[#allocation8 + $0x1e4] sm:$0xf] }
 0x3e3   :  { %v3557_v61 = vmul.f32 %v10292_v20, %v12499_v6  ;;  %10293 = vpow2.f32 %v8882_v27  ;;  %vm3562_vm2 = vweird.f32 %v10292_v20  ;;  %v9175_v27 = vld [vmem:[#allocation8 + $0x1f0] sm:$0xf0]  ;;  %5417 = vmatpush.bf16.msra.mxu0 %v9050_v39  ;;  %v15034_v39 = vld [vmem:[#allocation71_spill] sm:$0xff] }
 0x3e4   :  { %10295 = vrcp.f32 %v12509_v1  ;;  %v3116_v32 = vpop.f32.mrf.mxu2  ;;  %vm3563_vm6 = vmor %vm3561_vm4, %vm3562_vm2  ;;  %vm3621_vm9 = vweird.f32 %v12509_v1 }
 0x3e5   :  { %v3558_v29 = vsub.f32 1.0, %v3557_v61  ;;  %v3117_v24 = vadd.f32 %v3116_v32, %v3068_v54  ;;  %v3165_v9 = vpop.f32.mrf.mxu3  ;;  %v3020_v36 = vpop.f32.mrf.mxu0  ;;  %v9434_v61 = vor.u32 %v10039_v3, %v9431_v57  ;;  %v9178_v54 = vor.u32 %v9975_v49, %v9175_v27 }
 0x3e6   :  { %v3069_v25 = vpop.f32.mrf.mxu1  ;;  %v3021_v50 = vadd.f32 %v3020_v36, %v12160_v7  ;;  %v3504_v7 = vsel %vm12523_vm3, %v12497_v37, %v3500_v58 }
 0x3e7   :  { %v3559_v60 = vmul.f32 %v10292_v20, %v3558_v29  ;;  %v3166_v34 = vadd.f32 %v3165_v9, %v3117_v24  ;;  %5564 = vmatpush.bf16.msra.mxu3 %v9434_v61  ;;  %5466 = vmatpush.bf16.msra.mxu1 %v9178_v54  ;;  %v3509_v58 = vsel %vm3506_vm5, %v3508_v59, %v3504_v7  ;;  %v3627_v54 = vand.u32 2147483648, %v12509_v1 }
 0x3e8   :  { %v3070_v41 = vadd.f32 %v3069_v25, %v3021_v50  ;;  %v15035_v50 = vld [vmem:[#allocation25_spill] sm:$0xff] }
 0x3e9   :  { %v10294_v32 = vpop.eup %10293  ;;  %v8886_v29 = vmul.f32 -1.442695, %v3166_v34  ;;  %v3560_v24 = vadd.f32 %v10292_v20, %v3559_v60 }
 0x3ea   :  { %v12531_v9 = vpop.eup %10295  ;;  %v12533_v36 = vadd.f32 1.0, %v10294_v32 }
 0x3eb   :  { %v3617_v6 = vmul.f32 %v12531_v9, %v12509_v1  ;;  %10297 = vpow2.f32 %v8886_v29  ;;  %v3564_v44 = vsel %vm3563_vm6, %v10292_v20, %v3560_v24  ;;  %vm3622_vm8 = vweird.f32 %v12531_v9 }
 0x3ec   :  { %10299 = vrcp.f32 %v12533_v36  ;;  %v3118_v37 = vpop.f32.mrf.mxu2  ;;  %v3569_v45 = vsel %vm3566_vm7, %v3568_v10, %v3564_v44  ;;  %v3685_v32 = vand.u32 2147483647, %v12533_v36  ;;  %vm12561_vm11 = vmor %vm3621_vm9, %vm3622_vm8  ;;  %vm3681_vm13 = vweird.f32 %v12533_v36 }
 0x3ed   :  { %v3618_v63 = vsub.f32 1.0, %v3617_v6  ;;  %v3119_v23 = vadd.f32 %v3118_v37, %v3070_v41  ;;  %v3167_v53 = vpop.f32.mrf.mxu3  ;;  %v3023_v3 = vpop.f32.mrf.mxu0  ;;  %v12539_v60 = vpack.c.bf16 %v3569_v45, %v3509_v58  ;;  %v10003_v6 = vld [vmem:[#allocation8 + $0x2c4] sm:$0xf]  ;;  %v9287_v41 = vld [vmem:[#allocation8 + $0x2d0] sm:$0xf0]  ;;  %v3687_v37 = vand.u32 2147483648, %v12533_v36 }
 0x3ee   :  { %v3072_v48 = vpop.f32.mrf.mxu1  ;;  %v3024_v34 = vadd.f32 %v3023_v3, %v12194_v35  ;;  %v3625_v35 = vand.u32 2147483647, %v12509_v1  ;;  %v9290_v45 = vor.u32 %v10003_v6, %v9287_v41  ;;  %vm3686_vm15 = vcmp.eq.f32.partialorder %v3685_v32, 8.507059e+37 }
 0x3ef   :  { %v3168_v4 = vadd.f32 %v3167_v53, %v3119_v23  ;;  %5376 = vmatmul.bf16.vlgmr.msrb.gmra.mxu3 %v12539_v60  ;;  %v3619_v57 = vmul.f32 %v12531_v9, %v3618_v63  ;;  %v9939_v63 = vld [vmem:[#allocation8 + $0xc4] sm:$0xf]  ;;  %v9031_v23 = vld [vmem:[#allocation8 + $0xd0] sm:$0xf0]  ;;  %v3688_v41 = vor.u32 1.1754944e-38, %v3687_v37  ;;  %v2982_v1 = vadd.f32 %v12263_v14, %v12261_v26 }
 0x3f0   :  { %5244 = vmatmul.bf16.gmra.mxu0 %v15034_v39  ;;  %v3073_v59 = vadd.f32 %v3072_v48, %v3024_v34  ;;  %v10035_v53 = vld [vmem:[#allocation8 + $0x3c4] sm:$0xf]  ;;  %v9034_v34 = vor.u32 %v9939_v63, %v9031_v23  ;;  %5516 = vmatpush.bf16.msra.mxu2 %v9290_v45  ;;  %vm12565_vm12 = vcmp.eq.f32.partialorder %v3625_v35, 8.507059e+37  ;;  %v3628_v35 = vor.u32 1.1754944e-38, %v3627_v54 }
 0x3f1   :  { %v10298_v20 = vpop.eup %10297  ;;  %v8890_v25 = vmul.f32 -1.442695, %v3168_v4  ;;  %5293 = vmatmul.bf16.gmra.mxu1 %v15035_v50  ;;  %5342 = vmatmul.bf16.gmra.mxu2 %v12313_v28  ;;  %v3620_v44 = vadd.f32 %v12531_v9, %v3619_v57 }
 0x3f2   :  { %v10300_v49 = vpop.eup %10299  ;;  %v12547_v27 = vadd.f32 1.0, %v10298_v20  ;;  %v9415_v20 = vld [vmem:[#allocation8 + $0x3d0] sm:$0xf0]  ;;  %5418 = vmatpush.bf16.msra.mxu0 %v9034_v34 }
 0x3f3   :  { %v3677_v18 = vmul.f32 %v10300_v49, %v12533_v36  ;;  %10301 = vpow2.f32 %v8890_v25  ;;  %vm3682_vm10 = vweird.f32 %v10300_v49  ;;  %v9971_v25 = vld [vmem:[#allocation8 + $0x1c4] sm:$0xf] }
 0x3f4   :  { %10303 = vrcp.f32 %v12547_v27  ;;  %v3121_v61 = vpop.f32.mrf.mxu2  ;;  %vm3683_vm14 = vmor %vm3681_vm13, %vm3682_vm10  ;;  %vm3741_vm1 = vweird.f32 %v12547_v27 }
 0x3f5   :  { %v3678_v29 = vsub.f32 1.0, %v3677_v18  ;;  %v3122_v7 = vadd.f32 %v3121_v61, %v3073_v59  ;;  %v3170_v24 = vpop.f32.mrf.mxu3  ;;  %v3025_v10 = vpop.f32.mrf.mxu0  ;;  %v9159_v18 = vld [vmem:[#allocation8 + $0x1d0] sm:$0xf0]  ;;  %v9418_v59 = vor.u32 %v10035_v53, %v9415_v20 }
 0x3f6   :  { %v3074_v58 = vpop.f32.mrf.mxu1  ;;  %v3026_v48 = vadd.f32 %v3025_v10, %v12210_v47  ;;  %v9162_v61 = vor.u32 %v9971_v25, %v9159_v18  ;;  %v15041_v25 = vld [vmem:[#allocation55_spill] sm:$0xff] }
 0x3f7   :  { %v3171_v3 = vadd.f32 %v3170_v24, %v3122_v7  ;;  %v3679_v4 = vmul.f32 %v10300_v49, %v3678_v29  ;;  %v3624_v29 = vsel %vm12561_vm11, %v12531_v9, %v3620_v44  ;;  %5565 = vmatpush.bf16.msra.mxu3 %v9418_v59 }
 0x3f8   :  { %5467 = vmatpush.bf16.msra.mxu1 %v9162_v61  ;;  %v3075_v9 = vadd.f32 %v3074_v58, %v3026_v48  ;;  %v3629_v63 = vsel %vm12565_vm12, %v3628_v35, %v3624_v29  ;;  %v3747_v29 = vand.u32 2147483648, %v12547_v27 }
 0x3f9   :  { %v10302_v7 = vpop.eup %10301  ;;  %v8894_v47 = vmul.f32 -1.442695, %v3171_v3  ;;  %v3680_v24 = vadd.f32 %v10300_v49, %v3679_v4 }
 0x3fa   :  { %v12573_v10 = vpop.eup %10303  ;;  %v12575_v6 = vadd.f32 1.0, %v10302_v7  ;;  %v3745_v7 = vand.u32 2147483647, %v12547_v27 }
 0x3fb   :  { %v3737_v45 = vmul.f32 %v12573_v10, %v12547_v27  ;;  %10305 = vpow2.f32 %v8894_v47  ;;  %v3684_v44 = vsel %vm3683_vm14, %v10300_v49, %v3680_v24  ;;  %v15040_v49 = vld [vmem:[#allocation72_spill] sm:$0xff]  ;;  %vm3742_vm0 = vweird.f32 %v12573_v10 }
 0x3fc   :  { %10307 = vrcp.f32 %v12575_v6  ;;  %v3123_v36 = vpop.f32.mrf.mxu2  ;;  %v3689_v23 = vsel %vm3686_vm15, %v3688_v41, %v3684_v44  ;;  %v3805_v24 = vand.u32 2147483647, %v12575_v6  ;;  %vm12606_vm3 = vmor %vm3741_vm1, %vm3742_vm0  ;;  %vm12610_vm4 = vcmp.eq.f32.partialorder %v3745_v7, 8.507059e+37 }
 0x3fd   :  { %v3738_v54 = vsub.f32 1.0, %v3737_v45  ;;  %v3124_v53 = vadd.f32 %v3123_v36, %v3075_v9  ;;  %v3172_v3 = vpop.f32.mrf.mxu3  ;;  %v3028_v32 = vpop.f32.mrf.mxu0  ;;  %v12583_v37 = vpack.c.bf16 %v3689_v23, %v3629_v63  ;;  %v9999_v45 = vld [vmem:[#allocation8 + $0x2a4] sm:$0xf]  ;;  %v9271_v9 = vld [vmem:[#allocation8 + $0x2b0] sm:$0xf0]  ;;  %v3807_v36 = vand.u32 2147483648, %v12575_v6 }
 0x3fe   :  { %v3077_v4 = vpop.f32.mrf.mxu1  ;;  %v3029_v20 = vadd.f32 %v3028_v32, %v12244_v8  ;;  %v9274_v23 = vor.u32 %v9999_v45, %v9271_v9  ;;  %vm3801_vm5 = vweird.f32 %v12575_v6  ;;  %v3748_v7 = vor.u32 1.1754944e-38, %v3747_v29 }
 0x3ff   :  { %v3173_v34 = vadd.f32 %v3172_v3, %v3124_v53  ;;  %5381 = vmatmul.bf16.gmra.mxu3 %v12583_v37  ;;  %v3739_v18 = vmul.f32 %v12573_v10, %v3738_v54  ;;  %v9935_v54 = vld [vmem:[#allocation8 + $0xa4] sm:$0xf]  ;;  %v9015_v53 = vld [vmem:[#allocation8 + $0xb0] sm:$0xf0]  ;;  %vm3806_vm7 = vcmp.eq.f32.partialorder %v3805_v24, 8.507059e+37  ;;  %v3808_v9 = vor.u32 1.1754944e-38, %v3807_v36 }
 0x400   :  { %5249 = vmatmul.bf16.gmra.mxu0 %v15040_v49  ;;  %v3078_v61 = vadd.f32 %v3077_v4, %v3029_v20  ;;  %v10031_v3 = vld [vmem:[#allocation8 + $0x3a4] sm:$0xf]  ;;  %v9018_v20 = vor.u32 %v9935_v54, %v9015_v53  ;;  %5517 = vmatpush.bf16.msra.mxu2 %v9274_v23 }
 0x401   :  { %v10306_v58 = vpop.eup %10305  ;;  %v8898_v48 = vmul.f32 -1.442695, %v3173_v34  ;;  %5298 = vmatmul.bf16.gmra.mxu1 %v15041_v25  ;;  %5347 = vmatmul.bf16.gmra.mxu2 %v12373_v51  ;;  %v3740_v44 = vadd.f32 %v12573_v10, %v3739_v18 }
 0x402   :  { %v10308_v57 = vpop.eup %10307  ;;  %v12593_v59 = vadd.f32 1.0, %v10306_v58  ;;  %v9399_v58 = vld [vmem:[#allocation8 + $0x3b0] sm:$0xf0]  ;;  %5419 = vmatpush.bf16.msra.mxu0 %v9018_v20 }
 0x403   :  { %v3797_v8 = vmul.f32 %v10308_v57, %v12575_v6  ;;  %10309 = vpow2.f32 %v8898_v48  ;;  %vm3802_vm2 = vweird.f32 %v10308_v57  ;;  %v9967_v48 = vld [vmem:[#allocation8 + $0x1a4] sm:$0xf] }
 0x404   :  { %10311 = vrcp.f32 %v12593_v59  ;;  %v3126_v47 = vpop.f32.mrf.mxu2  ;;  %vm3803_vm6 = vmor %vm3801_vm5, %vm3802_vm2  ;;  %vm3861_vm8 = vweird.f32 %v12593_v59 }
 0x405   :  { %v3798_v35 = vsub.f32 1.0, %v3797_v8  ;;  %v3127_v41 = vadd.f32 %v3126_v47, %v3078_v61  ;;  %v3175_v26 = vpop.f32.mrf.mxu3  ;;  %v3030_v14 = vpop.f32.mrf.mxu0  ;;  %v9143_v8 = vld [vmem:[#allocation8 + $0x1b0] sm:$0xf0]  ;;  %v9402_v61 = vor.u32 %v10031_v3, %v9399_v58 }
 0x406   :  { %v3079_v63 = vpop.f32.mrf.mxu1  ;;  %v3031_v4 = vadd.f32 %v3030_v14, %v2982_v1  ;;  %v9146_v47 = vor.u32 %v9967_v48, %v9143_v8  ;;  %v9995_v48 = vld [vmem:[#allocation8 + $0x284] sm:$0xf]  ;;  %v9255_v8 = vld [vmem:[#allocation8 + $0x290] sm:$0xf0] }
 0x407   :  { %v3176_v32 = vadd.f32 %v3175_v26, %v3127_v41  ;;  %v3799_v34 = vmul.f32 %v10308_v57, %v3798_v35  ;;  %v3744_v35 = vsel %vm12606_vm3, %v12573_v10, %v3740_v44  ;;  %5566 = vmatpush.bf16.msra.mxu3 %v9402_v61  ;;  %v2987_v61 = vadd.f32 %v12335_v13, %v12333_v21 }
 0x408   :  { %5468 = vmatpush.bf16.msra.mxu1 %v9146_v47  ;;  %v3080_v10 = vadd.f32 %v3079_v63, %v3031_v4  ;;  %v3749_v54 = vsel %vm12610_vm4, %v3748_v7, %v3744_v35  ;;  %v9258_v47 = vor.u32 %v9995_v48, %v9255_v8  ;;  %v3865_v7 = vand.u32 2147483647, %v12593_v59  ;;  %v9239_v48 = vld [vmem:[#allocation8 + $0x270] sm:$0xf0] }
 0x409   :  { %v10310_v41 = vpop.eup %10309  ;;  %v8902_v1 = vmul.f32 -1.442695, %v3176_v32  ;;  %v3800_v26 = vadd.f32 %v10308_v57, %v3799_v34 }
 0x40a   :  { %v12618_v14 = vpop.eup %10311  ;;  %v12620_v45 = vadd.f32 1.0, %v10310_v41  ;;  %v9931_v41 = vld [vmem:[#allocation8 + $0x84] sm:$0xf]  ;;  %5518 = vmatpush.bf16.msra.mxu2 %v9258_v47  ;;  %vm12662_vm12 = vcmp.eq.f32.partialorder %v3865_v7, 8.507059e+37 }
 0x40b   :  { %v3857_v23 = vmul.f32 %v12618_v14, %v12593_v59  ;;  %10313 = vpow2.f32 %v8902_v1  ;;  %v3804_v44 = vsel %vm3803_vm6, %v10308_v57, %v3800_v26  ;;  %v15046_v57 = vld [vmem:[#allocation73_spill] sm:$0xff]  ;;  %vm3862_vm9 = vweird.f32 %v12618_v14 }
 0x40c   :  { %10315 = vrcp.f32 %v12620_v45  ;;  %v3128_v6 = vpop.f32.mrf.mxu2  ;;  %v3809_v53 = vsel %vm3806_vm7, %v3808_v9, %v3804_v44  ;;  %v8999_v1 = vld [vmem:[#allocation8 + $0x90] sm:$0xf0]  ;;  %v9963_v9 = vld [vmem:[#allocation8 + $0x184] sm:$0xf]  ;;  %v3925_v21 = vand.u32 2147483647, %v12620_v45  ;;  %vm12658_vm11 = vmor %vm3861_vm8, %vm3862_vm9  ;;  %vm3921_vm13 = vweird.f32 %v12620_v45 }
 0x40d   :  { %v3858_v29 = vsub.f32 1.0, %v3857_v23  ;;  %v3129_v3 = vadd.f32 %v3128_v6, %v3080_v10  ;;  %v3177_v32 = vpop.f32.mrf.mxu3  ;;  %v3033_v24 = vpop.f32.mrf.mxu0  ;;  %v12628_v36 = vpack.c.bf16 %v3809_v53, %v3749_v54  ;;  %v9127_v23 = vld [vmem:[#allocation8 + $0x190] sm:$0xf0]  ;;  %v9002_v13 = vor.u32 %v9931_v41, %v8999_v1  ;;  %v9927_v1 = vld [vmem:[#allocation8 + $0x64] sm:$0xf] }
 0x40e   :  { %v3082_v34 = vpop.f32.mrf.mxu1  ;;  %v3034_v58 = vadd.f32 %v3033_v24, %v12316_v22  ;;  %v9130_v44 = vor.u32 %v9963_v9, %v9127_v23  ;;  %v9383_v24 = vld [vmem:[#allocation8 + $0x390] sm:$0xf0]  ;;  %v9959_v23 = vld [vmem:[#allocation8 + $0x164] sm:$0xf]  ;;  %vm3926_vm15 = vcmp.eq.f32.partialorder %v3925_v21, 8.507059e+37 }
 0x40f   :  { %v3178_v20 = vadd.f32 %v3177_v32, %v3129_v3  ;;  %5386 = vmatmul.bf16.gmra.mxu3 %v12628_v36  ;;  %v3859_v18 = vmul.f32 %v12618_v14, %v3858_v29  ;;  %v10027_v32 = vld [vmem:[#allocation8 + $0x384] sm:$0xf]  ;;  %5420 = vmatpush.bf16.msra.mxu0 %v9002_v13 }
 0x410   :  { %5254 = vmatmul.bf16.gmra.mxu0 %v15046_v57  ;;  %v3083_v26 = vadd.f32 %v3082_v34, %v3034_v58  ;;  %v3927_v58 = vand.u32 2147483648, %v12620_v45  ;;  %5469 = vmatpush.bf16.msra.mxu1 %v9130_v44 }
 0x411   :  { %v10314_v63 = vpop.eup %10313  ;;  %v8906_v4 = vmul.f32 -1.442695, %v3178_v20  ;;  %5303 = vmatmul.bf16.gmra.mxu1 %v11905_v55  ;;  %5352 = vmatmul.bf16.gmra.mxu2 %v12423_v30  ;;  %v3860_v3 = vadd.f32 %v12618_v14, %v3859_v18  ;;  %v3867_v20 = vand.u32 2147483648, %v12593_v59 }
 0x412   :  { %v12636_v27 = vpop.eup %10315  ;;  %v12640_v22 = vadd.f32 1.0, %v10314_v63  ;;  %v9386_v63 = vor.u32 %v10027_v32, %v9383_v24  ;;  %v3928_v32 = vor.u32 1.1754944e-38, %v3927_v58  ;;  %v9923_v24 = vld [vmem:[#allocation8 + $0x44] sm:$0xf] }
 0x413   :  { %v3917_v35 = vmul.f32 %v12636_v27, %v12620_v45  ;;  %10317 = vpow2.f32 %v8906_v4  ;;  %vm3922_vm10 = vweird.f32 %v12636_v27  ;;  %v9991_v4 = vld [vmem:[#allocation8 + $0x264] sm:$0xf]  ;;  %v3864_v59 = vsel %vm12658_vm11, %v12618_v14, %v3860_v3 }
 0x414   :  { %10319 = vrcp.f32 %v12640_v22  ;;  %v3131_v10 = vpop.f32.mrf.mxu2  ;;  %v9242_v41 = vor.u32 %v9991_v4, %v9239_v48  ;;  %5567 = vmatpush.bf16.msra.mxu3 %v9386_v63  ;;  %vm12677_vm14 = vmor %vm3921_vm13, %vm3922_vm10  ;;  %v9955_v4 = vld [vmem:[#allocation8 + $0x144] sm:$0xf]  ;;  %v9095_v48 = vld [vmem:[#allocation8 + $0x150] sm:$0xf0]  ;;  %vm3981_vm0 = vweird.f32 %v12640_v22 }
 0x415   :  { %v3918_v6 = vsub.f32 1.0, %v3917_v35  ;;  %v3132_v54 = vadd.f32 %v3131_v10, %v3083_v26  ;;  %v3180_v53 = vpop.f32.mrf.mxu3  ;;  %v3035_v29 = vpop.f32.mrf.mxu0  ;;  %v8983_v35 = vld [vmem:[#allocation8 + $0x70] sm:$0xf0] }
 0x416   :  { %v3084_v34 = vpop.f32.mrf.mxu1  ;;  %v3036_v47 = vadd.f32 %v3035_v29, %v2987_v61  ;;  %v8986_v61 = vor.u32 %v9927_v1, %v8983_v35  ;;  %v9111_v10 = vld [vmem:[#allocation8 + $0x170] sm:$0xf0]  ;;  %5519 = vmatpush.bf16.msra.mxu2 %v9242_v41  ;;  %v3868_v29 = vor.u32 1.1754944e-38, %v3867_v20 }
 0x417   :  { %v3181_v8 = vadd.f32 %v3180_v53, %v3132_v54  ;;  %v3919_v18 = vmul.f32 %v12636_v27, %v3918_v6  ;;  %v9114_v54 = vor.u32 %v9959_v23, %v9111_v10  ;;  %v8967_v20 = vld [vmem:[#allocation8 + $0x50] sm:$0xf0]  ;;  %v9098_v23 = vor.u32 %v9955_v4, %v9095_v48  ;;  %v9919_v10 = vld [vmem:[#allocation8 + $0x24] sm:$0xf] }
 0x418   :  { %5421 = vmatpush.bf16.msra.mxu0 %v8986_v61  ;;  %v3085_v3 = vadd.f32 %v3084_v34, %v3036_v47  ;;  %v3869_v21 = vsel %vm12662_vm12, %v3868_v29, %v3864_v59  ;;  %v9223_v41 = vld [vmem:[#allocation8 + $0x250] sm:$0xf0]  ;;  %v8970_v61 = vor.u32 %v9923_v24, %v8967_v20  ;;  %v15053_v29 = vld [vmem:[#allocation48_spill] sm:$0xff]  ;;  %v3987_v24 = vand.u32 2147483648, %v12640_v22 }
 0x419   :  { %v10318_v13 = vpop.eup %10317  ;;  %v8910_v44 = vmul.f32 -1.442695, %v3181_v8  ;;  %v3920_v6 = vadd.f32 %v12636_v27, %v3919_v18  ;;  %5470 = vmatpush.bf16.msra.mxu1 %v9114_v54  ;;  %v9987_v18 = vld [vmem:[#allocation8 + $0x244] sm:$0xf]  ;;  %v8951_v59 = vld [vmem:[#allocation8 + $0x30] sm:$0xf0] }
 0x41a   :  { %v12671_v7 = vpop.eup %10319  ;;  %v12673_v53 = vadd.f32 1.0, %v10318_v13  ;;  %v9226_v9 = vor.u32 %v9987_v18, %v9223_v41  ;;  %v9079_v54 = vld [vmem:[#allocation8 + $0x130] sm:$0xf0]  ;;  %v3985_v48 = vand.u32 2147483647, %v12640_v22  ;;  %v2992_v18 = vadd.f32 %v12390_v42, %v12388_v33 }
 0x41b   :  { %v3977_v14 = vmul.f32 %v12671_v7, %v12640_v22  ;;  %10321 = vpow2.f32 %v8910_v44  ;;  %v3924_v63 = vsel %vm12677_vm14, %v12636_v27, %v3920_v6  ;;  %v9951_v6 = vld [vmem:[#allocation8 + $0x124] sm:$0xf]  ;;  %vm3982_vm1 = vweird.f32 %v12671_v7  ;;  %v9191_v33 = vld [vmem:[#allocation8 + $0x210] sm:$0xf0] }
 0x41c   :  { %10323 = vrcp.f32 %v12673_v53  ;;  %v3133_v8 = vpop.f32.mrf.mxu2  ;;  %v3929_v58 = vsel %vm3926_vm15, %v3928_v32, %v3924_v63  ;;  %v9082_v45 = vor.u32 %v9951_v6, %v9079_v54  ;;  %v9983_v32 = vld [vmem:[#allocation8 + $0x224] sm:$0xf]  ;;  %5422 = vmatpush.bf16.msra.mxu0 %v8970_v61  ;;  %5520 = vmatpush.bf16.msra.mxu2 %v9226_v9  ;;  %v4045_v61 = vand.u32 2147483647, %v12673_v53  ;;  %v9367_v6 = vld [vmem:[#allocation8 + $0x370] sm:$0xf0]  ;;  %vm12719_vm3 = vmor %vm3981_vm0, %vm3982_vm1 }
 0x41d   :  { %v3978_v1 = vsub.f32 1.0, %v3977_v14  ;;  %v3134_v35 = vadd.f32 %v3133_v8, %v3085_v3  ;;  %v3182_v34 = vpop.f32.mrf.mxu3  ;;  %v3038_v47 = vpop.f32.mrf.mxu0  ;;  %v12689_v26 = vpack.c.bf16 %v3929_v58, %v3869_v21  ;;  %5471 = vmatpush.bf16.msra.mxu1 %v9098_v23  ;;  %v9207_v14 = vld [vmem:[#allocation8 + $0x230] sm:$0xf0]  ;;  %v8954_v8 = vor.u32 %v9919_v10, %v8951_v59  ;;  %v9915_v58 = vld [vmem:[#allocation8 + $0x4] sm:$0xf] }
 0x41e   :  { %v3087_v27 = vpop.f32.mrf.mxu1  ;;  %v3039_v44 = vadd.f32 %v3038_v47, %v12376_v12  ;;  %v9210_v21 = vor.u32 %v9983_v32, %v9207_v14  ;;  %v9063_v47 = vld [vmem:[#allocation8 + $0x110] sm:$0xf0]  ;;  %v9979_v10 = vld [vmem:[#allocation8 + $0x204] sm:$0xf]  ;;  %v4047_v14 = vand.u32 2147483648, %v12673_v53  ;;  %vm4041_vm4 = vweird.f32 %v12673_v53 }
 0x41f   :  { %v3183_v13 = vadd.f32 %v3182_v34, %v3134_v35  ;;  %5391 = vmatmul.bf16.gmra.mxu3 %v12689_v26  ;;  %v3979_v12 = vmul.f32 %v12671_v7, %v3978_v1  ;;  %v8935_v35 = vld [vmem:[#allocation8 + $0x10] sm:$0xf0]  ;;  %v9947_v34 = vld [vmem:[#allocation8 + $0x104] sm:$0xf]  ;;  %vm3986_vm5 = vcmp.eq.f32.partialorder %v3985_v48, 8.507059e+37  ;;  %vm4046_vm7 = vcmp.eq.f32.partialorder %v4045_v61, 8.507059e+37 }
 0x420   :  { %5259 = vmatmul.bf16.gmra.mxu0 %v15053_v29  ;;  %v3088_v1 = vadd.f32 %v3087_v27, %v3039_v44  ;;  %v10023_v44 = vld [vmem:[#allocation8 + $0x364] sm:$0xf]  ;;  %v9066_v54 = vor.u32 %v9947_v34, %v9063_v47  ;;  %5521 = vmatpush.bf16.msra.mxu2 %v9210_v21 }
 0x421   :  { %v10322_v3 = vpop.eup %10321  ;;  %v8914_v63 = vmul.f32 -1.442695, %v3183_v13  ;;  %5308 = vmatmul.bf16.gmra.mxu1 %v11960_v5  ;;  %5357 = vmatmul.bf16.gmra.mxu2 %v12464_v62  ;;  %v3980_v27 = vadd.f32 %v12671_v7, %v3979_v12  ;;  %v9194_v62 = vor.u32 %v9979_v10, %v9191_v33 }
 0x422   :  { %v12698_v20 = vpop.eup %10323  ;;  %v12700_v4 = vadd.f32 1.0, %v10322_v3  ;;  %5472 = vmatpush.bf16.msra.mxu1 %v9082_v45  ;;  %v9370_v3 = vor.u32 %v10023_v44, %v9367_v6  ;;  %5423 = vmatpush.bf16.msra.mxu0 %v8954_v8 }
 0x423   :  { %v4037_v41 = vmul.f32 %v12698_v20, %v12673_v53  ;;  %10325 = vpow2.f32 %v8914_v63  ;;  %v8938_v63 = vor.u32 %v9915_v58, %v8935_v35  ;;  %vm4042_vm2 = vweird.f32 %v12698_v20 }
 0x424   :  { %10327 = vrcp.f32 %v12700_v4  ;;  %v3136_v23 = vpop.f32.mrf.mxu2  ;;  %5568 = vmatpush.bf16.msra.mxu3 %v9370_v3  ;;  %v3984_v58 = vsel %vm12719_vm3, %v12671_v7, %v3980_v27  ;;  %vm4043_vm6 = vmor %vm4041_vm4, %vm4042_vm2  ;;  %5522 = vmatpush.bf16.msra.mxu2 %v9194_v62  ;;  %vm4101_vm9 = vweird.f32 %v12700_v4 }
 0x425   :  { %v4038_v42 = vsub.f32 1.0, %v4037_v41  ;;  %v3137_v13 = vadd.f32 %v3136_v23, %v3088_v1  ;;  %v3185_v9 = vpop.f32.mrf.mxu3  ;;  %v3040_v59 = vpop.f32.mrf.mxu0  ;;  %v3988_v1 = vor.u32 1.1754944e-38, %v3987_v24  ;;  %v4048_v24 = vor.u32 1.1754944e-38, %v4047_v14 }
 0x426   :  { %v3089_v32 = vpop.f32.mrf.mxu1  ;;  %v3041_v5 = vadd.f32 %v3040_v59, %v2992_v18  ;;  %5473 = vmatpush.bf16.msra.mxu1 %v9066_v54  ;;  %5424 = vmatpush.bf16.msra.mxu0 %v8938_v63  ;;  %v4571_v63 = vld [vmem:[#allocation10] sm:$0xf] }
 0x427   :  { %v3186_v45 = vadd.f32 %v3185_v9, %v3137_v13  ;;  %v4039_v41 = vmul.f32 %v12698_v20, %v4038_v42  ;;  %v3989_v23 = vsel %vm3986_vm5, %v3988_v1, %v3984_v58 }
 0x428   :  { %v3090_v47 = vadd.f32 %v3089_v32, %v3041_v5  ;;  %v15056_v5 = vld [vmem:[#allocation19_spill] sm:$0xff] }
 0x429   :  { %v10326_v8 = vpop.eup %10325  ;;  %v8918_v21 = vmul.f32 -1.442695, %v3186_v45  ;;  %v4040_v18 = vadd.f32 %v12698_v20, %v4039_v41  ;;  %v4105_v45 = vand.u32 2147483647, %v12700_v4 }
 0x42a   :  { %v12728_v35 = vpop.eup %10327  ;;  %v12730_v22 = vadd.f32 1.0, %v10326_v8 }
 0x42b   :  { %v4097_v34 = vmul.f32 %v12728_v35, %v12700_v4  ;;  %10329 = vpow2.f32 %v8918_v21  ;;  %v4044_v7 = vsel %vm4043_vm6, %v12698_v20, %v4040_v18  ;;  %vm4102_vm8 = vweird.f32 %v12728_v35  ;;  %v10019_v18 = vld [vmem:[#allocation8 + $0x344] sm:$0xf] }
 0x42c   :  { %10331 = vrcp.f32 %v12730_v22  ;;  %v3138_v53 = vpop.f32.mrf.mxu2  ;;  %v4049_v10 = vsel %vm4046_vm7, %v4048_v24, %v4044_v7  ;;  %v4165_v41 = vand.u32 2147483647, %v12730_v22  ;;  %v9351_v24 = vld [vmem:[#allocation8 + $0x350] sm:$0xf0]  ;;  %v10015_v7 = vld [vmem:[#allocation8 + $0x324] sm:$0xf]  ;;  %vm12761_vm11 = vmor %vm4101_vm9, %vm4102_vm8  ;;  %vm4161_vm13 = vweird.f32 %v12730_v22 }
 0x42d   :  { %v4098_v33 = vsub.f32 1.0, %v4097_v34  ;;  %v3139_v42 = vadd.f32 %v3138_v53, %v3090_v47  ;;  %v3187_v48 = vpop.f32.mrf.mxu3  ;;  %v3043_v13 = vpop.f32.mrf.mxu0  ;;  %v12736_v61 = vpack.c.bf16 %v4049_v10, %v3989_v23  ;;  %v9354_v47 = vor.u32 %v10019_v18, %v9351_v24  ;;  %v9335_v53 = vld [vmem:[#allocation8 + $0x330] sm:$0xf0] }
 0x42e   :  { %v3092_v9 = vpop.f32.mrf.mxu1  ;;  %v3044_v59 = vadd.f32 %v3043_v13, %v12426_v16  ;;  %v2997_v16 = vadd.f32 %v12438_v46, %v12436_v38  ;;  %v4107_v38 = vand.u32 2147483648, %v12700_v4  ;;  %v4167_v46 = vand.u32 2147483648, %v12730_v22 }
 0x42f   :  { %v3188_v62 = vadd.f32 %v3187_v48, %v3139_v42  ;;  %5396 = vmatmul.bf16.gmra.mxu3 %v12736_v61  ;;  %v4099_v44 = vmul.f32 %v12728_v35, %v4098_v33  ;;  %v12757_v42 = vperm.slane %v4571_v63, 0  ;;  %vm12765_vm12 = vcmp.eq.f32.partialorder %v4105_v45, 8.507059e+37 }
 0x430   :  { %5264 = vmatmul.bf16.gmra.mxu0 %v15056_v5  ;;  %v3093_v14 = vadd.f32 %v3092_v9, %v3044_v59  ;;  %5569 = vmatpush.bf16.msra.mxu3 %v9354_v47  ;;  %v9338_v4 = vor.u32 %v10015_v7, %v9335_v53  ;;  %vm4166_vm15 = vcmp.eq.f32.partialorder %v4165_v41, 8.507059e+37 }
 0x431   :  { %v10330_v20 = vpop.eup %10329  ;;  %v8922_v27 = vmul.f32 -1.442695, %v3188_v62  ;;  %5313 = vmatmul.bf16.gmra.mxu1 %v12001_v17  ;;  %5362 = vmatmul.bf16.gmra.mxu2 %v12494_v43  ;;  %v4100_v58 = vadd.f32 %v12728_v35, %v4099_v44 }
 0x432   :  { %v10332_v6 = vpop.eup %10331  ;;  %v12744_v54 = vadd.f32 1.0, %v10330_v20 }
 0x433   :  { %v4157_v32 = vmul.f32 %v10332_v6, %v12730_v22  ;;  %10333 = vpow2.f32 %v8922_v27  ;;  %vm4162_vm10 = vweird.f32 %v10332_v6  ;;  %v4104_v59 = vsel %vm12761_vm11, %v12728_v35, %v4100_v58 }
 0x434   :  { %10335 = vrcp.f32 %v12744_v54  ;;  %v3141_v3 = vpop.f32.mrf.mxu2  ;;  %vm4163_vm14 = vmor %vm4161_vm13, %vm4162_vm10  ;;  %5570 = vmatpush.bf16.msra.mxu3 %v9338_v4  ;;  %vm4221_vm1 = vweird.f32 %v12744_v54 }
 0x435   :  { %v4158_v12 = vsub.f32 1.0, %v4157_v32  ;;  %v3142_v1 = vadd.f32 %v3141_v3, %v3093_v14  ;;  %v3190_v8 = vpop.f32.mrf.mxu3  ;;  %v3045_v21 = vpop.f32.mrf.mxu0  ;;  %v4108_v32 = vor.u32 1.1754944e-38, %v4107_v38  ;;  %v4168_v14 = vor.u32 1.1754944e-38, %v4167_v46  ;;  %v9319_v38 = vld [vmem:[#allocation8 + $0x310] sm:$0xf0] }
 0x436   :  { %v3094_v34 = vpop.f32.mrf.mxu1  ;;  %v3046_v10 = vadd.f32 %v3045_v21, %v2997_v16 }
 0x437   :  { %v3191_v23 = vadd.f32 %v3190_v8, %v3142_v1  ;;  %v4159_v33 = vmul.f32 %v10332_v6, %v4158_v12  ;;  %v4109_v22 = vsel %vm12765_vm12, %v4108_v32, %v4104_v59  ;;  %v4227_v32 = vand.u32 2147483648, %v12744_v54 }
 0x438   :  { %v3095_v3 = vadd.f32 %v3094_v34, %v3046_v10  ;;  %v10011_v34 = vld [vmem:[#allocation8 + $0x304] sm:$0xf] }
 0x439   :  { %v10334_v9 = vpop.eup %10333  ;;  %v8926_v62 = vmul.f32 -1.442695, %v3191_v23  ;;  %v4160_v20 = vadd.f32 %v10332_v6, %v4159_v33  ;;  %v9322_v53 = vor.u32 %v10011_v34, %v9319_v38 }
 0x43a   :  { %v12773_v27 = vpop.eup %10335  ;;  %v12775_v44 = vadd.f32 1.0, %v10334_v9 }
 0x43b   :  { %v4217_v16 = vmul.f32 %v12773_v27, %v12744_v54  ;;  %10337 = vpow2.f32 %v8926_v62  ;;  %v4164_v63 = vsel %vm4163_vm14, %v10332_v6, %v4160_v20  ;;  %5571 = vmatpush.bf16.msra.mxu3 %v9322_v53  ;;  %vm4222_vm0 = vweird.f32 %v12773_v27  ;;  %v10010_v53 = vld [vmem:[#allocation8 + $0x2f4] sm:$0xf0] }
 0x43c   :  { %10339 = vrcp.f32 %v12775_v44  ;;  %v3143_v35 = vpop.f32.mrf.mxu2  ;;  %v4169_v45 = vsel %vm4166_vm15, %v4168_v14, %v4164_v63  ;;  %v4287_v14 = vand.u32 2147483648, %v12775_v44  ;;  %v4285_v63 = vand.u32 2147483647, %v12775_v44  ;;  %vm12804_vm3 = vmor %vm4221_vm1, %vm4222_vm0 }
 0x43d   :  { %v4218_v12 = vsub.f32 1.0, %v4217_v16  ;;  %v3144_v1 = vadd.f32 %v3143_v35, %v3095_v3  ;;  %v5230_v8 = vpop.f32.mrf.mxu0  ;;  %v12782_v21 = vpack.c.bf16 %v4169_v45, %v4109_v22  ;;  %v3192_v41 = vpop.f32.mrf.mxu3  ;;  %v4225_v16 = vand.u32 2147483647, %v12744_v54 }
 0x43e   :  { %v5231_v58 = vadd.f32 %v5230_v8, %v12757_v42  ;;  %v5279_v18 = vpop.f32.mrf.mxu1  ;;  %vm4281_vm4 = vweird.f32 %v12775_v44  ;;  %vm4286_vm7 = vcmp.eq.f32.partialorder %v4285_v63, 8.507059e+37 }
 0x43f   :  { %v3193_v24 = vadd.f32 %v3192_v41, %v3144_v1  ;;  %5401 = vmatmul.bf16.gmra.mxu3 %v12782_v21  ;;  %v4219_v7 = vmul.f32 %v12773_v27, %v4218_v12  ;;  %v4228_v41 = vor.u32 1.1754944e-38, %v4227_v32  ;;  %vm4226_vm6 = vcmp.eq.f32.partialorder %v4225_v16, 8.507059e+37  ;;  %v9181_v16 = vld [vmem:[#allocation8 + $0x1e8] sm:$0xf] }
 0x440   :  { %v5280_v6 = vadd.f32 %v5279_v18, %v5231_v58  ;;  %5425 = vmatmul.bf16.vlgmr.msra.gmra.mxu0 %v15023_v52  ;;  %v4288_v58 = vor.u32 1.1754944e-38, %v4287_v14  ;;  %v10042_v14 = vld [vmem:[#allocation8 + $0x3f4] sm:$0xf0] }
 0x441   :  { %v10338_v46 = vpop.eup %10337  ;;  %v8930_v47 = vmul.f32 -1.442695, %v3193_v24  ;;  %5474 = vmatmul.bf16.vlgmr.msra.gmra.mxu1 %v15024_v56  ;;  %5523 = vmatmul.bf16.vlgmr.msra.gmra.mxu2 %v12141_v2  ;;  %v4220_v62 = vadd.f32 %v12773_v27, %v4219_v7  ;;  %v9309_v7 = vld [vmem:[#allocation8 + $0x2e8] sm:$0xf] }
 0x442   :  { %v10340_v23 = vpop.eup %10339  ;;  %v12790_v10 = vadd.f32 1.0, %v10338_v46 }
 0x443   :  { %v4277_v33 = vmul.f32 %v10340_v23, %v12775_v44  ;;  %10341 = vpow2.f32 %v8930_v47  ;;  %vm4282_vm2 = vweird.f32 %v10340_v23  ;;  %v4224_v12 = vsel %vm12804_vm3, %v12773_v27, %v4220_v62  ;;  %v9946_v62 = vld [vmem:[#allocation8 + $0xf4] sm:$0xf0] }
 0x444   :  { %10343 = vrcp.f32 %v12790_v10  ;;  %v5328_v48 = vpop.f32.mrf.mxu2  ;;  %vm4283_vm5 = vmor %vm4281_vm4, %vm4282_vm2  ;;  %v4229_v27 = vsel %vm4226_vm6, %v4228_v41, %v4224_v12  ;;  %vm4341_vm9 = vweird.f32 %v12790_v10 }
 0x445   :  { %v4278_v13 = vsub.f32 1.0, %v4277_v33  ;;  %v12794_v4 = vadd.f32 %v5328_v48, %v5280_v6  ;;  %v5232_v9 = vpop.f32.mrf.mxu0 }
 0x446   :  { %v5233_v59 = vadd.f32 %v5232_v9, %v12757_v42  ;;  %v5281_v20 = vpop.f32.mrf.mxu1  ;;  %v9053_v9 = vld [vmem:[#allocation8 + $0xe8] sm:$0xf] }
 0x447   :  { %v4279_v3 = vmul.f32 %v10340_v23, %v4278_v13  ;;  %v9310_v13 = vor.u32 %v10010_v53, %v9309_v7  ;;  %v9054_v32 = vor.u32 %v9946_v62, %v9053_v9 }
 0x448   :  { %v5282_v35 = vadd.f32 %v5281_v20, %v5233_v59  ;;  %v9437_v59 = vld [vmem:[#allocation8 + $0x3e8] sm:$0xf] }
 0x449   :  { %v10342_v45 = vpop.eup %10341  ;;  %v4280_v1 = vadd.f32 %v10340_v23, %v4279_v3  ;;  %5711 = vmatpush.bf16.msrb.mxu2 %v9310_v13  ;;  %v9978_v3 = vld [vmem:[#allocation8 + $0x1f4] sm:$0xf0]  ;;  %5613 = vmatpush.bf16.msrb.mxu0 %v9054_v32 }
 0x44a   :  { %v12812_v8 = vpop.eup %10343  ;;  %v12814_v54 = vadd.f32 1.0, %v10342_v45  ;;  %v9182_v22 = vor.u32 %v9978_v3, %v9181_v16 }
 0x44b   :  { %v4337_v18 = vmul.f32 %v12812_v8, %v12790_v10  ;;  %v4284_v24 = vsel %vm4283_vm5, %v10340_v23, %v4280_v1  ;;  %vm4342_vm8 = vweird.f32 %v12812_v8 }
 0x44c   :  { %10345 = vrcp.f32 %v12814_v54  ;;  %v5330_v6 = vpop.f32.mrf.mxu2  ;;  %v4289_v34 = vsel %vm4286_vm7, %v4288_v58, %v4284_v24  ;;  %5662 = vmatpush.bf16.msrb.mxu1 %v9182_v22  ;;  %v4405_v7 = vand.u32 2147483647, %v12814_v54  ;;  %vm4343_vm11 = vmor %vm4341_vm9, %vm4342_vm8  ;;  %vm4401_vm12 = vweird.f32 %v12814_v54 }
 0x44d   :  { %v4338_v38 = vsub.f32 1.0, %v4337_v18  ;;  %v12819_v44 = vadd.f32 %v5330_v6, %v5282_v35  ;;  %v5235_v46 = vpop.f32.mrf.mxu0  ;;  %v12821_v47 = vpack.c.bf16 %v4289_v34, %v4229_v27  ;;  %v9438_v35 = vor.u32 %v10042_v14, %v9437_v59 }
 0x44e   :  { %v5236_v33 = vadd.f32 %v5235_v46, %v12757_v42  ;;  %v5284_v48 = vpop.f32.mrf.mxu1  ;;  %v4347_v27 = vand.u32 2147483648, %v12790_v10  ;;  %v4407_v34 = vand.u32 2147483648, %v12814_v54  ;;  %vm4406_vm15 = vcmp.eq.f32.partialorder %v4405_v7, 8.507059e+37  ;;  %v10006_v7 = vld [vmem:[#allocation8 + $0x2d4] sm:$0xf0] }
 0x44f   :  { %15063 = vst [vmem:[#allocation40_spill] sm:$0xff] %v12821_v47  ;;  %5406 = vmatmul.bf16.gmra.mxu3 %v12821_v47  ;;  %v4339_v20 = vmul.f32 %v12812_v8, %v4338_v38  ;;  %v4345_v38 = vand.u32 2147483647, %v12790_v10 }
 0x450   :  { %v5285_v23 = vadd.f32 %v5284_v48, %v5236_v33  ;;  %5430 = vmatmul.bf16.gmra.mxu0 %v15026_v0  ;;  %5760 = vmatpush.bf16.msrb.mxu3 %v9438_v35  ;;  %v4348_v13 = vor.u32 1.1754944e-38, %v4347_v27 }
 0x451   :  { %5479 = vmatmul.bf16.gmra.mxu1 %v15029_v31  ;;  %5528 = vmatmul.bf16.gmra.mxu2 %v12191_v11  ;;  %v4340_v18 = vadd.f32 %v12812_v8, %v4339_v20  ;;  %vm4346_vm14 = vcmp.eq.f32.partialorder %v4345_v38, 8.507059e+37 }
 0x452   :  { %v10346_v63 = vpop.eup %10345 }
 0x453   :  { %v4397_v45 = vmul.f32 %v10346_v63, %v12814_v54  ;;  %vm4402_vm10 = vweird.f32 %v10346_v63  ;;  %v4344_v33 = vsel %vm4343_vm11, %v12812_v8, %v4340_v18 }
 0x454   :  { %v5333_v12 = vpop.f32.mrf.mxu2  ;;  %vm4403_vm13 = vmor %vm4401_vm12, %vm4402_vm10  ;;  %v4349_v59 = vsel %vm4346_vm14, %v4348_v13, %v4344_v33  ;;  %v9942_v13 = vld [vmem:[#allocation8 + $0xd4] sm:$0xf0] }
 0x455   :  { %v4398_v1 = vsub.f32 1.0, %v4397_v45  ;;  %v12830_v41 = vadd.f32 %v5333_v12, %v5285_v23  ;;  %v5237_v58 = vpop.f32.mrf.mxu0  ;;  %v4408_v23 = vor.u32 1.1754944e-38, %v4407_v34 }
 0x456   :  { %v5238_v24 = vadd.f32 %v5237_v58, %v12757_v42  ;;  %v5286_v6 = vpop.f32.mrf.mxu1 }
 0x457   :  { %v4399_v46 = vmul.f32 %v10346_v63, %v4398_v1 }
 0x458   :  { %v5287_v53 = vadd.f32 %v5286_v6, %v5238_v24 }
 0x459   :  { %v4400_v48 = vadd.f32 %v10346_v63, %v4399_v46  ;;  %v9293_v46 = vld [vmem:[#allocation8 + $0x2c8] sm:$0xf] }
 0x45b   :  { %v4404_v9 = vsel %vm4403_vm13, %v10346_v63, %v4400_v48  ;;  %v9294_v48 = vor.u32 %v10006_v7, %v9293_v46  ;;  %v9149_v7 = vld [vmem:[#allocation8 + $0x1a8] sm:$0xf] }
 0x45c   :  { %v5335_v62 = vpop.f32.mrf.mxu2  ;;  %v4409_v10 = vsel %vm4406_vm15, %v4408_v23, %v4404_v9  ;;  %v9421_v23 = vld [vmem:[#allocation8 + $0x3c8] sm:$0xf]  ;;  %v10038_v9 = vld [vmem:[#allocation8 + $0x3d4] sm:$0xf0] }
 0x45d   :  { %v12842_v20 = vadd.f32 %v5335_v62, %v5287_v53  ;;  %v5240_v32 = vpop.f32.mrf.mxu0  ;;  %v12844_v14 = vpack.c.bf16 %v4409_v10, %v4349_v59  ;;  %v9037_v53 = vld [vmem:[#allocation8 + $0xc8] sm:$0xf]  ;;  %5712 = vmatpush.bf16.msrb.mxu2 %v9294_v48 }
 0x45e   :  { %v5241_v16 = vadd.f32 %v5240_v32, %v12757_v42  ;;  %v5289_v8 = vpop.f32.mrf.mxu1  ;;  %v9038_v32 = vor.u32 %v9942_v13, %v9037_v53  ;;  %v9970_v53 = vld [vmem:[#allocation8 + $0x1b4] sm:$0xf0] }
 0x45f   :  { %15064 = vst [vmem:[#allocation44_spill] sm:$0xff] %v12844_v14  ;;  %5411 = vmatmul.bf16.gmra.mxu3 %v12844_v14  ;;  %v9150_v48 = vor.u32 %v9970_v53, %v9149_v7  ;;  %v9005_v53 = vld [vmem:[#allocation8 + $0x88] sm:$0xf] }
 0x460   :  { %v5290_v54 = vadd.f32 %v5289_v8, %v5241_v16  ;;  %5435 = vmatmul.bf16.gmra.mxu0 %v15030_v15  ;;  %v9422_v16 = vor.u32 %v10038_v9, %v9421_v23  ;;  %v9165_v8 = vld [vmem:[#allocation8 + $0x1c8] sm:$0xf] }
 0x461   :  { %5484 = vmatmul.bf16.gmra.mxu1 %v15031_v19  ;;  %5533 = vmatmul.bf16.gmra.mxu2 %v12241_v40 }
 0x462   :  { %5614 = vmatpush.bf16.msrb.mxu0 %v9038_v32  ;;  %5761 = vmatpush.bf16.msrb.mxu3 %v9422_v16 }
 0x464   :  { %v5338_v3 = vpop.f32.mrf.mxu2 }
 0x465   :  { %v12851_v63 = vadd.f32 %v5338_v3, %v5290_v54  ;;  %v5242_v35 = vpop.f32.mrf.mxu0  ;;  %v9974_v54 = vld [vmem:[#allocation8 + $0x1d4] sm:$0xf0] }
 0x466   :  { %v5243_v22 = vadd.f32 %v5242_v35, %v12757_v42  ;;  %v5291_v45 = vpop.f32.mrf.mxu1 }
 0x468   :  { %v5292_v12 = vadd.f32 %v5291_v45, %v5243_v22  ;;  %v9277_v45 = vld [vmem:[#allocation8 + $0x2a8] sm:$0xf] }
 0x46c   :  { %v5340_v1 = vpop.f32.mrf.mxu2 }
 0x46d   :  { %v12854_v58 = vadd.f32 %v5340_v1, %v5292_v12  ;;  %v5245_v18 = vpop.f32.mrf.mxu0  ;;  %v10002_v12 = vld [vmem:[#allocation8 + $0x2b4] sm:$0xf0]  ;;  %v9021_v1 = vld [vmem:[#allocation8 + $0xa8] sm:$0xf] }
 0x46e   :  { %v5246_v24 = vadd.f32 %v5245_v18, %v12757_v42  ;;  %v5294_v6 = vpop.f32.mrf.mxu1  ;;  %v9278_v18 = vor.u32 %v10002_v12, %v9277_v45 }
 0x46f   :  { %5572 = vmatmul.bf16.vlgmr.msra.gmra.mxu3 %v12539_v60 }
 0x470   :  { %v5295_v27 = vadd.f32 %v5294_v6, %v5246_v24  ;;  %5440 = vmatmul.bf16.gmra.mxu0 %v15034_v39  ;;  %v9938_v24 = vld [vmem:[#allocation8 + $0xb4] sm:$0xf0]  ;;  %v9405_v6 = vld [vmem:[#allocation8 + $0x3a8] sm:$0xf]  ;;  %5713 = vmatpush.bf16.msrb.mxu2 %v9278_v18 }
 0x471   :  { %5489 = vmatmul.bf16.gmra.mxu1 %v15035_v50  ;;  %5538 = vmatmul.bf16.gmra.mxu2 %v12313_v28 }
 0x472   :  { %v5377_v34 = vpop.f32.mrf.mxu3 }
 0x473   :  { %v5378_v38 = vadd.f32 %v5377_v34, %v12794_v4  ;;  %v9166_v4 = vor.u32 %v9974_v54, %v9165_v8 }
 0x474   :  { %v5343_v33 = vpop.f32.mrf.mxu2 }
 0x475   :  { %v9443_v62 = vmul.f32 -1.442695, %v5378_v38  ;;  %v12862_v59 = vadd.f32 %v5343_v33, %v5295_v27  ;;  %v5247_v10 = vpop.f32.mrf.mxu0  ;;  %5663 = vmatpush.bf16.msrb.mxu1 %v9166_v4  ;;  %v10034_v27 = vld [vmem:[#allocation8 + $0x3b4] sm:$0xf0]  ;;  %v9022_v38 = vor.u32 %v9938_v24, %v9021_v1 }
 0x476   :  { %v5248_v3 = vadd.f32 %v5247_v10, %v12757_v42  ;;  %v5296_v35 = vpop.f32.mrf.mxu1  ;;  %v9406_v46 = vor.u32 %v10034_v27, %v9405_v6 }
 0x477   :  { %10347 = vpow2.f32 %v9443_v62  ;;  %5615 = vmatpush.bf16.msrb.mxu0 %v9022_v38  ;;  %v9998_v38 = vld [vmem:[#allocation8 + $0x294] sm:$0xf0] }
 0x478   :  { %v5297_v22 = vadd.f32 %v5296_v35, %v5248_v3  ;;  %5762 = vmatpush.bf16.msrb.mxu3 %v9406_v46 }
 0x479   :  { %5664 = vmatpush.bf16.msrb.mxu1 %v9150_v48 }
 0x47a   :  { %v5379_v34 = vpop.f32.mrf.mxu3 }
 0x47b   :  { %v5380_v33 = vadd.f32 %v5379_v34, %v12819_v44  ;;  %v9261_v34 = vld [vmem:[#allocation8 + $0x288] sm:$0xf] }
 0x47c   :  { %v5345_v13 = vpop.f32.mrf.mxu2  ;;  %v9262_v7 = vor.u32 %v9998_v38, %v9261_v34 }
 0x47d   :  { %v10348_v23 = vpop.eup %10347  ;;  %v9447_v9 = vmul.f32 -1.442695, %v5380_v33  ;;  %v12866_v62 = vadd.f32 %v5345_v13, %v5297_v22  ;;  %v5250_v10 = vpop.f32.mrf.mxu0  ;;  %v9934_v33 = vld [vmem:[#allocation8 + $0x94] sm:$0xf0] }
 0x47e   :  { %v12868_v32 = vadd.f32 1.0, %v10348_v23  ;;  %v5251_v16 = vadd.f32 %v5250_v10, %v12757_v42  ;;  %v5299_v8 = vpop.f32.mrf.mxu1  ;;  %v9006_v13 = vor.u32 %v9934_v33, %v9005_v53  ;;  %v9389_v23 = vld [vmem:[#allocation8 + $0x388] sm:$0xf]  ;;  %5714 = vmatpush.bf16.msrb.mxu2 %v9262_v7 }
 0x47f   :  { %10349 = vpow2.f32 %v9447_v9  ;;  %5577 = vmatmul.bf16.gmra.mxu3 %v12583_v37  ;;  %v10030_v9 = vld [vmem:[#allocation8 + $0x394] sm:$0xf0]  ;;  %v9133_v10 = vld [vmem:[#allocation8 + $0x188] sm:$0xf] }
 0x480   :  { %10351 = vrcp.f32 %v12868_v32  ;;  %v5300_v44 = vadd.f32 %v5299_v8, %v5251_v16  ;;  %5445 = vmatmul.bf16.gmra.mxu0 %v15040_v49  ;;  %v6270_v53 = vand.u32 2147483647, %v12868_v32  ;;  %vm6266_vm1 = vweird.f32 %v12868_v32 }
 0x481   :  { %5494 = vmatmul.bf16.gmra.mxu1 %v15041_v25  ;;  %5543 = vmatmul.bf16.gmra.mxu2 %v12373_v51 }
 0x482   :  { %v5382_v54 = vpop.f32.mrf.mxu3  ;;  %5616 = vmatpush.bf16.msrb.mxu0 %v9006_v13  ;;  %vm6271_vm5 = vcmp.eq.f32.partialorder %v6270_v53, 8.507059e+37  ;;  %v9930_v13 = vld [vmem:[#allocation8 + $0x74] sm:$0xf0] }
 0x483   :  { %v5383_v3 = vadd.f32 %v5382_v54, %v12830_v41  ;;  %v9966_v54 = vld [vmem:[#allocation8 + $0x194] sm:$0xf0] }
 0x484   :  { %v5348_v35 = vpop.f32.mrf.mxu2 }
 0x485   :  { %v10350_v4 = vpop.eup %10349  ;;  %v9451_v22 = vmul.f32 -1.442695, %v5383_v3  ;;  %v12877_v45 = vadd.f32 %v5348_v35, %v5300_v44  ;;  %v5252_v12 = vpop.f32.mrf.mxu0  ;;  %v9390_v44 = vor.u32 %v10030_v9, %v9389_v23  ;;  %v9134_v35 = vor.u32 %v9966_v54, %v9133_v10 }
 0x486   :  { %v12879_v1 = vpop.eup %10351  ;;  %v12881_v18 = vadd.f32 1.0, %v10350_v4  ;;  %v5253_v24 = vadd.f32 %v5252_v12, %v12757_v42  ;;  %v5301_v6 = vpop.f32.mrf.mxu1 }
 0x487   :  { %v6262_v27 = vmul.f32 %v12879_v1, %v12868_v32  ;;  %10353 = vpow2.f32 %v9451_v22  ;;  %5763 = vmatpush.bf16.msrb.mxu3 %v9390_v44  ;;  %5665 = vmatpush.bf16.msrb.mxu1 %v9134_v35  ;;  %vm6267_vm0 = vweird.f32 %v12879_v1 }
 0x488   :  { %10355 = vrcp.f32 %v12881_v18  ;;  %v5302_v41 = vadd.f32 %v5301_v6, %v5253_v24  ;;  %vm12908_vm2 = vmor %vm6266_vm1, %vm6267_vm0  ;;  %v6330_v9 = vand.u32 2147483647, %v12881_v18  ;;  %vm6326_vm4 = vweird.f32 %v12881_v18 }
 0x489   :  { %v6263_v46 = vsub.f32 1.0, %v6262_v27 }
 0x48a   :  { %v5384_v48 = vpop.f32.mrf.mxu3  ;;  %vm6331_vm7 = vcmp.eq.f32.partialorder %v6330_v9, 8.507059e+37 }
 0x48b   :  { %v6264_v16 = vmul.f32 %v12879_v1, %v6263_v46  ;;  %v5385_v8 = vadd.f32 %v5384_v48, %v12842_v20  ;;  %v6332_v48 = vand.u32 2147483648, %v12881_v18 }
 0x48c   :  { %v5350_v3 = vpop.f32.mrf.mxu2 }
 0x48d   :  { %v10354_v4 = vpop.eup %10353  ;;  %v9455_v22 = vmul.f32 -1.442695, %v5385_v8  ;;  %v12889_v12 = vadd.f32 %v5350_v3, %v5302_v41  ;;  %v5255_v24 = vpop.f32.mrf.mxu0  ;;  %v6265_v46 = vadd.f32 %v12879_v1, %v6264_v16  ;;  %v6272_v41 = vand.u32 2147483648, %v12868_v32 }
 0x48e   :  { %v10356_v6 = vpop.eup %10355  ;;  %v12891_v27 = vadd.f32 1.0, %v10354_v4  ;;  %v5256_v34 = vadd.f32 %v5255_v24, %v12757_v42  ;;  %v5304_v38 = vpop.f32.mrf.mxu1  ;;  %v6333_v24 = vor.u32 1.1754944e-38, %v6332_v48  ;;  %v8989_v48 = vld [vmem:[#allocation8 + $0x68] sm:$0xf] }
 0x48f   :  { %v6322_v20 = vmul.f32 %v10356_v6, %v12881_v18  ;;  %10357 = vpow2.f32 %v9455_v22  ;;  %5582 = vmatmul.bf16.gmra.mxu3 %v12628_v36  ;;  %v6269_v32 = vsel %vm12908_vm2, %v12879_v1, %v6265_v46  ;;  %vm6327_vm3 = vweird.f32 %v10356_v6  ;;  %v9994_v46 = vld [vmem:[#allocation8 + $0x274] sm:$0xf0] }
 0x490   :  { %10359 = vrcp.f32 %v12891_v27  ;;  %v5305_v7 = vadd.f32 %v5304_v38, %v5256_v34  ;;  %5450 = vmatmul.bf16.gmra.mxu0 %v15046_v57  ;;  %v6273_v8 = vor.u32 1.1754944e-38, %v6272_v41  ;;  %vm12930_vm6 = vmor %vm6326_vm4, %vm6327_vm3  ;;  %v8990_v18 = vor.u32 %v9930_v13, %v8989_v48  ;;  %v9958_v48 = vld [vmem:[#allocation8 + $0x154] sm:$0xf0] }
 0x491   :  { %v6323_v33 = vsub.f32 1.0, %v6322_v20  ;;  %5499 = vmatmul.bf16.gmra.mxu1 %v11905_v55  ;;  %5548 = vmatmul.bf16.gmra.mxu2 %v12423_v30  ;;  %v9245_v20 = vld [vmem:[#allocation8 + $0x268] sm:$0xf]  ;;  %v9990_v13 = vld [vmem:[#allocation8 + $0x254] sm:$0xf0]  ;;  %vm6386_vm9 = vweird.f32 %v12891_v27 }
 0x492   :  { %v5387_v23 = vpop.f32.mrf.mxu3  ;;  %v12925_v41 = vsel %vm6271_vm5, %v6273_v8, %v6269_v32  ;;  %v9373_v32 = vld [vmem:[#allocation8 + $0x368] sm:$0xf]  ;;  %v10026_v8 = vld [vmem:[#allocation8 + $0x374] sm:$0xf0]  ;;  %5617 = vmatpush.bf16.msrb.mxu0 %v8990_v18 }
 0x493   :  { %v6324_v10 = vmul.f32 %v10356_v6, %v6323_v33  ;;  %v5388_v16 = vadd.f32 %v5387_v23, %v12851_v63  ;;  %15067 = vst [vmem:[#allocation45_spill] sm:$0xff] %v12925_v41  ;;  %v9246_v33 = vor.u32 %v9994_v46, %v9245_v20  ;;  %v9117_v23 = vld [vmem:[#allocation8 + $0x168] sm:$0xf]  ;;  %v9374_v9 = vor.u32 %v10026_v8, %v9373_v32 }
 0x494   :  { %v5353_v44 = vpop.f32.mrf.mxu2 }
 0x495   :  { %v10358_v54 = vpop.eup %10357  ;;  %v9459_v3 = vmul.f32 -1.442695, %v5388_v16  ;;  %v12918_v35 = vadd.f32 %v5353_v44, %v5305_v7  ;;  %v5257_v4 = vpop.f32.mrf.mxu0  ;;  %v6325_v22 = vadd.f32 %v10356_v6, %v6324_v10  ;;  %v9962_v44 = vld [vmem:[#allocation8 + $0x174] sm:$0xf0]  ;;  %5715 = vmatpush.bf16.msrb.mxu2 %v9246_v33  ;;  %v8973_v7 = vld [vmem:[#allocation8 + $0x48] sm:$0xf]  ;;  %5764 = vmatpush.bf16.msrb.mxu3 %v9374_v9 }
 0x496   :  { %v12920_v34 = vpop.eup %10359  ;;  %v12922_v63 = vadd.f32 1.0, %v10358_v54  ;;  %v5258_v38 = vadd.f32 %v5257_v4, %v12757_v42  ;;  %v5306_v1 = vpop.f32.mrf.mxu1  ;;  %v9118_v4 = vor.u32 %v9962_v44, %v9117_v23 }
 0x497   :  { %v6382_v53 = vmul.f32 %v12920_v34, %v12891_v27  ;;  %10361 = vpow2.f32 %v9459_v3  ;;  %v6329_v10 = vsel %vm12930_vm6, %v10356_v6, %v6325_v22  ;;  %v9926_v6 = vld [vmem:[#allocation8 + $0x54] sm:$0xf0]  ;;  %v9101_v22 = vld [vmem:[#allocation8 + $0x148] sm:$0xf]  ;;  %v6390_v3 = vand.u32 2147483647, %v12891_v27 }
 0x498   :  { %10363 = vrcp.f32 %v12922_v63  ;;  %v5307_v16 = vadd.f32 %v5306_v1, %v5258_v38  ;;  %v12939_v54 = vsel %vm6331_vm7, %v6333_v24, %v6329_v10  ;;  %5666 = vmatpush.bf16.msrb.mxu1 %v9118_v4  ;;  %v8974_v1 = vor.u32 %v9926_v6, %v8973_v7  ;;  %v9229_v24 = vld [vmem:[#allocation8 + $0x248] sm:$0xf]  ;;  %v9922_v7 = vld [vmem:[#allocation8 + $0x34] sm:$0xf0] }
 0x499   :  { %15070 = vst [vmem:[#allocation66_spill] sm:$0xff] %v12939_v54  ;;  %v6383_v20 = vsub.f32 1.0, %v6382_v53  ;;  %v9102_v10 = vor.u32 %v9958_v48, %v9101_v22  ;;  %v9230_v23 = vor.u32 %v9990_v13, %v9229_v24  ;;  %v6392_v6 = vand.u32 2147483648, %v12891_v27  ;;  %v9954_v22 = vld [vmem:[#allocation8 + $0x134] sm:$0xf0] }
 0x49a   :  { %v5389_v46 = vpop.f32.mrf.mxu3  ;;  %5618 = vmatpush.bf16.msrb.mxu0 %v8974_v1  ;;  %vm6387_vm8 = vweird.f32 %v12920_v34  ;;  %v9986_v13 = vld [vmem:[#allocation8 + $0x234] sm:$0xf0]  ;;  %v8941_v54 = vld [vmem:[#allocation8 + $0x8] sm:$0xf]  ;;  %vm12975_vm12 = vcmp.eq.f32.partialorder %v6390_v3, 8.507059e+37  ;;  %vm6446_vm13 = vweird.f32 %v12922_v63 }
 0x49b   :  { %v5390_v38 = vadd.f32 %v5389_v46, %v12854_v58  ;;  %v6384_v18 = vmul.f32 %v12920_v34, %v6383_v20  ;;  %5716 = vmatpush.bf16.msrb.mxu2 %v9230_v23  ;;  %v8957_v46 = vld [vmem:[#allocation8 + $0x28] sm:$0xf]  ;;  %v15071_v23 = vld [vmem:[#allocation20_spill] sm:$0xff]  ;;  %vm12971_vm11 = vmor %vm6386_vm9, %vm6387_vm8 }
 0x49c   :  { %v5355_v33 = vpop.f32.mrf.mxu2  ;;  %5667 = vmatpush.bf16.msrb.mxu1 %v9102_v10  ;;  %v9085_v20 = vld [vmem:[#allocation8 + $0x128] sm:$0xf]  ;;  %v15072_v10 = vld [vmem:[#allocation36_spill] sm:$0xff] }
 0x49d   :  { %v10362_v32 = vpop.eup %10361  ;;  %v9463_v8 = vmul.f32 -1.442695, %v5390_v38  ;;  %v12944_v44 = vadd.f32 %v5355_v33, %v5307_v16  ;;  %v5260_v53 = vpop.f32.mrf.mxu0  ;;  %v8958_v16 = vor.u32 %v9922_v7, %v8957_v46  ;;  %v9213_v38 = vld [vmem:[#allocation8 + $0x228] sm:$0xf]  ;;  %v9086_v24 = vor.u32 %v9954_v22, %v9085_v20 }
 0x49e   :  { %v12948_v41 = vpop.eup %10363  ;;  %v12950_v58 = vadd.f32 1.0, %v10362_v32  ;;  %v5261_v9 = vadd.f32 %v5260_v53, %v12757_v42  ;;  %v5309_v4 = vpop.f32.mrf.mxu1  ;;  %v6450_v33 = vand.u32 2147483647, %v12922_v63  ;;  %v9214_v32 = vor.u32 %v9986_v13, %v9213_v38  ;;  %v9982_v38 = vld [vmem:[#allocation8 + $0x214] sm:$0xf0] }
 0x49f   :  { %10365 = vpow2.f32 %v9463_v8  ;;  %5587 = vmatmul.bf16.gmra.mxu3 %v12689_v26  ;;  %v6442_v48 = vmul.f32 %v12948_v41, %v12922_v63  ;;  %v6385_v8 = vadd.f32 %v12920_v34, %v6384_v18  ;;  %v6452_v46 = vand.u32 2147483648, %v12922_v63  ;;  %5619 = vmatpush.bf16.msrb.mxu0 %v8958_v16 }
 0x4a0   :  { %10367 = vrcp.f32 %v12950_v58  ;;  %v5310_v1 = vadd.f32 %v5309_v4, %v5261_v9  ;;  %5455 = vmatmul.bf16.gmra.mxu0 %v15053_v29  ;;  %v9918_v9 = vld [vmem:[#allocation8 + $0x14] sm:$0xf0]  ;;  %v9069_v4 = vld [vmem:[#allocation8 + $0x108] sm:$0xf]  ;;  %5668 = vmatpush.bf16.msrb.mxu1 %v9086_v24  ;;  %vm6447_vm10 = vweird.f32 %v12948_v41  ;;  %v6393_v63 = vor.u32 1.1754944e-38, %v6392_v6 }
 0x4a1   :  { %5504 = vmatmul.bf16.gmra.mxu1 %v15071_v23  ;;  %5553 = vmatmul.bf16.gmra.mxu2 %v15072_v10  ;;  %v6443_v53 = vsub.f32 1.0, %v6442_v48  ;;  %v8942_v22 = vor.u32 %v9918_v9, %v8941_v54  ;;  %v9950_v23 = vld [vmem:[#allocation8 + $0x114] sm:$0xf0]  ;;  %v9197_v10 = vld [vmem:[#allocation8 + $0x208] sm:$0xf]  ;;  %vm6448_vm14 = vmor %vm6446_vm13, %vm6447_vm10  ;;  %vm6451_vm15 = vcmp.eq.f32.partialorder %v6450_v33, 8.507059e+37  ;;  %vm6506_vm1 = vweird.f32 %v12950_v58 }
 0x4a2   :  { %v5392_v7 = vpop.f32.mrf.mxu3  ;;  %5717 = vmatpush.bf16.msrb.mxu2 %v9214_v32  ;;  %v9070_v13 = vor.u32 %v9950_v23, %v9069_v4  ;;  %v9198_v16 = vor.u32 %v9982_v38, %v9197_v10  ;;  %v6389_v23 = vsel %vm12971_vm11, %v12920_v34, %v6385_v8  ;;  %v9357_v8 = vld [vmem:[#allocation8 + $0x348] sm:$0xf] }
 0x4a3   :  { %v5393_v20 = vadd.f32 %v5392_v7, %v12862_v59  ;;  %v6444_v18 = vmul.f32 %v12948_v41, %v6443_v53  ;;  %5620 = vmatpush.bf16.msrb.mxu0 %v8942_v22  ;;  %v12999_v6 = vsel %vm12975_vm12, %v6393_v63, %v6389_v23  ;;  %v6510_v63 = vand.u32 2147483647, %v12950_v58 }
 0x4a4   :  { %v5358_v48 = vpop.f32.mrf.mxu2  ;;  %5669 = vmatpush.bf16.msrb.mxu1 %v9070_v13  ;;  %15077 = vst [vmem:[#allocation26_spill] sm:$0xff] %v12999_v6 }
 0x4a5   :  { %v10366_v27 = vpop.eup %10365  ;;  %v9467_v54 = vmul.f32 -1.442695, %v5393_v20  ;;  %v12980_v24 = vadd.f32 %v5358_v48, %v5310_v1  ;;  %v5262_v32 = vpop.f32.mrf.mxu0  ;;  %v6445_v10 = vadd.f32 %v12948_v41, %v6444_v18  ;;  %v6453_v1 = vor.u32 1.1754944e-38, %v6452_v46  ;;  %v10022_v20 = vld [vmem:[#allocation8 + $0x354] sm:$0xf0] }
 0x4a6   :  { %v12986_v53 = vpop.eup %10367  ;;  %v12988_v7 = vadd.f32 1.0, %v10366_v27  ;;  %v5263_v3 = vadd.f32 %v5262_v32, %v12757_v42  ;;  %v5311_v9 = vpop.f32.mrf.mxu1  ;;  %5718 = vmatpush.bf16.msrb.mxu2 %v9198_v16  ;;  %v9358_v46 = vor.u32 %v10022_v20, %v9357_v8  ;;  %vm13030_vm4 = vcmp.eq.f32.partialorder %v6510_v63, 8.507059e+37 }
 0x4a7   :  { %v6502_v4 = vmul.f32 %v12986_v53, %v12950_v58  ;;  %10369 = vpow2.f32 %v9467_v54  ;;  %v6449_v29 = vsel %vm6448_vm14, %v12948_v41, %v6445_v10  ;;  %vm6507_vm0 = vweird.f32 %v12986_v53 }
 0x4a8   :  { %10371 = vrcp.f32 %v12988_v7  ;;  %v5312_v34 = vadd.f32 %v5311_v9, %v5263_v3  ;;  %v13001_v22 = vsel %vm6451_vm15, %v6453_v1, %v6449_v29  ;;  %5765 = vmatpush.bf16.msrb.mxu3 %v9358_v46  ;;  %v6572_v8 = vand.u32 2147483648, %v12988_v7  ;;  %vm13026_vm3 = vmor %vm6506_vm1, %vm6507_vm0 }
 0x4a9   :  { %15078 = vst [vmem:[#allocation27_spill] sm:$0xff] %v13001_v22  ;;  %v6503_v18 = vsub.f32 1.0, %v6502_v4  ;;  %vm6566_vm5 = vweird.f32 %v12988_v7  ;;  %v9972_v22 = vld [vmem:[#allocation8 + $0x1cc] sm:$0xf] }
 0x4aa   :  { %v5394_v48 = vpop.f32.mrf.mxu3 }
 0x4ab   :  { %v5395_v41 = vadd.f32 %v5394_v48, %v12866_v62  ;;  %v6504_v59 = vmul.f32 %v12986_v53, %v6503_v18  ;;  %v6570_v18 = vand.u32 2147483647, %v12988_v7 }
 0x4ac   :  { %v5360_v33 = vpop.f32.mrf.mxu2 }
 0x4ad   :  { %v10370_v13 = vpop.eup %10369  ;;  %v9471_v16 = vmul.f32 -1.442695, %v5395_v41  ;;  %v13006_v27 = vadd.f32 %v5360_v33, %v5312_v34  ;;  %v5265_v54 = vpop.f32.mrf.mxu0  ;;  %v6505_v1 = vadd.f32 %v12986_v53, %v6504_v59  ;;  %v6512_v34 = vand.u32 2147483648, %v12950_v58 }
 0x4ae   :  { %v10372_v32 = vpop.eup %10371  ;;  %v13009_v23 = vadd.f32 1.0, %v10370_v13  ;;  %v5266_v10 = vadd.f32 %v5265_v54, %v12757_v42  ;;  %v5314_v3 = vpop.f32.mrf.mxu1  ;;  %vm6571_vm7 = vcmp.eq.f32.partialorder %v6570_v18, 8.507059e+37 }
 0x4af   :  { %10373 = vpow2.f32 %v9471_v16  ;;  %5592 = vmatmul.bf16.gmra.mxu3 %v12736_v61  ;;  %v6562_v62 = vmul.f32 %v10372_v32, %v12988_v7  ;;  %vm6567_vm2 = vweird.f32 %v10372_v32  ;;  %v6509_v54 = vsel %vm13026_vm3, %v12986_v53, %v6505_v1  ;;  %v9341_v1 = vld [vmem:[#allocation8 + $0x328] sm:$0xf] }
 0x4b0   :  { %10375 = vrcp.f32 %v13009_v23  ;;  %v5315_v9 = vadd.f32 %v5314_v3, %v5266_v10  ;;  %5460 = vmatmul.bf16.gmra.mxu0 %v15056_v5  ;;  %vm6568_vm6 = vmor %vm6566_vm5, %vm6567_vm2  ;;  %v6573_v7 = vor.u32 1.1754944e-38, %v6572_v8  ;;  %vm6626_vm9 = vweird.f32 %v13009_v23 }
 0x4b1   :  { %5509 = vmatmul.bf16.gmra.mxu1 %v12001_v17  ;;  %5558 = vmatmul.bf16.gmra.mxu2 %v12494_v43  ;;  %v6563_v4 = vsub.f32 1.0, %v6562_v62 }
 0x4b2   :  { %v5397_v29 = vpop.f32.mrf.mxu3 }
 0x4b3   :  { %v5398_v20 = vadd.f32 %v5397_v29, %v12877_v45  ;;  %v6564_v46 = vmul.f32 %v10372_v32, %v6563_v4  ;;  %v6513_v4 = vor.u32 1.1754944e-38, %v6512_v34 }
 0x4b4   :  { %v5363_v48 = vpop.f32.mrf.mxu2 }
 0x4b5   :  { %v10374_v58 = vpop.eup %10373  ;;  %v9475_v13 = vmul.f32 -1.442695, %v5398_v20  ;;  %v13035_v16 = vadd.f32 %v5363_v48, %v5315_v9  ;;  %v5267_v45 = vpop.f32.mrf.mxu0  ;;  %v6565_v59 = vadd.f32 %v10372_v32, %v6564_v46  ;;  %v10018_v20 = vld [vmem:[#allocation8 + $0x334] sm:$0xf0]  ;;  %v13051_v46 = vsel %vm13030_vm4, %v6513_v4, %v6509_v54 }
 0x4b6   :  { %v13040_v10 = vpop.eup %10375  ;;  %v13042_v3 = vadd.f32 1.0, %v10374_v58  ;;  %v5268_v62 = vadd.f32 %v5267_v45, %v12757_v42  ;;  %v5316_v63 = vpop.f32.mrf.mxu1  ;;  %15083 = vst [vmem:[#allocation56_spill] sm:$0xff] %v13051_v46  ;;  %v9342_v34 = vor.u32 %v10018_v20, %v9341_v1  ;;  %v10605_v58 = vld [vmem:[#allocation10] sm:$0xf]  ;;  %v9439_v46 = vld [vmem:[#allocation8 + $0x3f8] sm:$0xf0] }
 0x4b7   :  { %v6622_v9 = vmul.f32 %v13040_v10, %v13009_v23  ;;  %10377 = vpow2.f32 %v9475_v13  ;;  %v6569_v29 = vsel %vm6568_vm6, %v10372_v32, %v6565_v59  ;;  %v13057_v32 = vperm.slane %v10605_v58, 1 }
 0x4b8   :  { %10379 = vrcp.f32 %v13042_v3  ;;  %v5317_v53 = vadd.f32 %v5316_v63, %v5268_v62  ;;  %v13053_v42 = vsel %vm6571_vm7, %v6573_v7, %v6569_v29  ;;  %5766 = vmatpush.bf16.msrb.mxu3 %v9342_v34  ;;  %vm6627_vm8 = vweird.f32 %v13040_v10 }
 0x4b9   :  { %15084 = vst [vmem:[#allocation29_spill] sm:$0xff] %v13053_v42  ;;  %v6623_v48 = vsub.f32 1.0, %v6622_v9  ;;  %vm13080_vm11 = vmor %vm6626_vm9, %vm6627_vm8  ;;  %vm6686_vm13 = vweird.f32 %v13042_v3 }
 0x4ba   :  { %v5399_v41 = vpop.f32.mrf.mxu3 }
 0x4bb   :  { %v5400_v18 = vadd.f32 %v5399_v41, %v12889_v12  ;;  %v6624_v62 = vmul.f32 %v13040_v10, %v6623_v48  ;;  %v6632_v48 = vand.u32 2147483648, %v13009_v23  ;;  %v6692_v41 = vand.u32 2147483648, %v13042_v3 }
 0x4bc   :  { %v5365_v13 = vpop.f32.mrf.mxu2 }
 0x4bd   :  { %v10378_v45 = vpop.eup %10377  ;;  %v9479_v59 = vmul.f32 -1.442695, %v5400_v18  ;;  %v13060_v33 = vadd.f32 %v5365_v13, %v5317_v53  ;;  %v5426_v54 = vpop.f32.mrf.mxu0  ;;  %v6630_v53 = vand.u32 2147483647, %v13009_v23  ;;  %v6625_v1 = vadd.f32 %v13040_v10, %v6624_v62 }
 0x4be   :  { %v10380_v63 = vpop.eup %10379  ;;  %v13063_v4 = vadd.f32 1.0, %v10378_v45  ;;  %v5427_v7 = vadd.f32 %v5426_v54, %v13057_v32  ;;  %v5475_v9 = vpop.f32.mrf.mxu1  ;;  %v6690_v13 = vand.u32 2147483647, %v13042_v3  ;;  %v6633_v38 = vor.u32 1.1754944e-38, %v6632_v48 }
 0x4bf   :  { %10381 = vpow2.f32 %v9479_v59  ;;  %5597 = vmatmul.bf16.gmra.mxu3 %v12782_v21  ;;  %v6682_v12 = vmul.f32 %v10380_v63, %v13042_v3  ;;  %vm6687_vm10 = vweird.f32 %v10380_v63  ;;  %vm13084_vm12 = vcmp.eq.f32.partialorder %v6630_v53, 8.507059e+37 }
 0x4c0   :  { %10383 = vrcp.f32 %v13063_v4  ;;  %v5476_v29 = vadd.f32 %v5475_v9, %v5427_v7  ;;  %5621 = vmatmul.bf16.vlgmr.msrb.gmra.mxu0 %v15023_v52  ;;  %v6629_v9 = vsel %vm13080_vm11, %v13040_v10, %v6625_v1  ;;  %vm6688_vm14 = vmor %vm6686_vm13, %vm6687_vm10  ;;  %v6693_v3 = vor.u32 1.1754944e-38, %v6692_v41  ;;  %v9325_v1 = vld [vmem:[#allocation8 + $0x308] sm:$0xf] }
 0x4c1   :  { %5670 = vmatmul.bf16.vlgmr.msrb.gmra.mxu1 %v15024_v56  ;;  %5719 = vmatmul.bf16.vlgmr.msrb.gmra.mxu2 %v12141_v2  ;;  %v6683_v20 = vsub.f32 1.0, %v6682_v12  ;;  %vm6691_vm15 = vcmp.eq.f32.partialorder %v6690_v13, 8.507059e+37  ;;  %vm6746_vm1 = vweird.f32 %v13063_v4 }
 0x4c2   :  { %v5402_v34 = vpop.f32.mrf.mxu3 }
 0x4c3   :  { %v5403_v58 = vadd.f32 %v5402_v34, %v12918_v35  ;;  %v6684_v18 = vmul.f32 %v10380_v63, %v6683_v20 }
 0x4c4   :  { %v5524_v45 = vpop.f32.mrf.mxu2 }
 0x4c5   :  { %v10382_v23 = vpop.eup %10381  ;;  %v9483_v62 = vmul.f32 -1.442695, %v5403_v58  ;;  %v13089_v7 = vadd.f32 %v5524_v45, %v5476_v29  ;;  %v5428_v35 = vpop.f32.mrf.mxu0  ;;  %v6685_v12 = vadd.f32 %v10380_v63, %v6684_v18  ;;  %v10014_v18 = vld [vmem:[#allocation8 + $0x314] sm:$0xf0]  ;;  %v13105_v45 = vsel %vm13084_vm12, %v6633_v38, %v6629_v9 }
 0x4c6   :  { %v13094_v20 = vpop.eup %10383  ;;  %v13096_v34 = vadd.f32 1.0, %v10382_v23  ;;  %v5429_v53 = vadd.f32 %v5428_v35, %v13057_v32  ;;  %v5477_v8 = vpop.f32.mrf.mxu1  ;;  %15089 = vst [vmem:[#allocation30_spill] sm:$0xff] %v13105_v45  ;;  %v9326_v48 = vor.u32 %v10014_v18, %v9325_v1 }
 0x4c7   :  { %v6742_v29 = vmul.f32 %v13094_v20, %v13063_v4  ;;  %10385 = vpow2.f32 %v9483_v62  ;;  %v6689_v58 = vsel %vm6688_vm14, %v10380_v63, %v6685_v12  ;;  %vm6747_vm0 = vweird.f32 %v13094_v20 }
 0x4c8   :  { %10387 = vrcp.f32 %v13096_v34  ;;  %v5478_v10 = vadd.f32 %v5477_v8, %v5429_v53  ;;  %v13107_v59 = vsel %vm6691_vm15, %v6693_v3, %v6689_v58  ;;  %5767 = vmatpush.bf16.msrb.mxu3 %v9326_v48  ;;  %vm13132_vm3 = vmor %vm6746_vm1, %vm6747_vm0  ;;  %vm6806_vm5 = vweird.f32 %v13096_v34 }
 0x4c9   :  { %15090 = vst [vmem:[#allocation59_spill] sm:$0xff] %v13107_v59  ;;  %v6743_v23 = vsub.f32 1.0, %v6742_v29 }
 0x4ca   :  { %v5404_v35 = vpop.f32.mrf.mxu3 }
 0x4cb   :  { %v5405_v63 = vadd.f32 %v5404_v35, %v12944_v44  ;;  %v6744_v38 = vmul.f32 %v13094_v20, %v6743_v23  ;;  %v6752_v23 = vand.u32 2147483648, %v13063_v4  ;;  %v6812_v35 = vand.u32 2147483648, %v13096_v34 }
 0x4cc   :  { %v5526_v13 = vpop.f32.mrf.mxu2 }
 0x4cd   :  { %v10386_v62 = vpop.eup %10385  ;;  %v9487_v8 = vmul.f32 -1.442695, %v5405_v63  ;;  %v13112_v12 = vadd.f32 %v5526_v13, %v5478_v10  ;;  %v5431_v53 = vpop.f32.mrf.mxu0  ;;  %v6750_v10 = vand.u32 2147483647, %v13063_v4  ;;  %v6745_v1 = vadd.f32 %v13094_v20, %v6744_v38 }
 0x4ce   :  { %v10388_v54 = vpop.eup %10387  ;;  %v13115_v9 = vadd.f32 1.0, %v10386_v62  ;;  %v5432_v3 = vadd.f32 %v5431_v53, %v13057_v32  ;;  %v5480_v58 = vpop.f32.mrf.mxu1  ;;  %v6810_v62 = vand.u32 2147483647, %v13096_v34  ;;  %v6753_v59 = vor.u32 1.1754944e-38, %v6752_v23 }
 0x4cf   :  { %10389 = vpow2.f32 %v9487_v8  ;;  %5602 = vmatmul.bf16.gmra.mxu3 %v12821_v47  ;;  %v6802_v44 = vmul.f32 %v10388_v54, %v13096_v34  ;;  %vm6807_vm2 = vweird.f32 %v10388_v54  ;;  %vm13136_vm4 = vcmp.eq.f32.partialorder %v6750_v10, 8.507059e+37 }
 0x4d0   :  { %10391 = vrcp.f32 %v13115_v9  ;;  %v5481_v29 = vadd.f32 %v5480_v58, %v5432_v3  ;;  %5626 = vmatmul.bf16.gmra.mxu0 %v15026_v0  ;;  %vm6808_vm6 = vmor %vm6806_vm5, %vm6807_vm2  ;;  %v6813_v34 = vor.u32 1.1754944e-38, %v6812_v35  ;;  %vm6811_vm7 = vcmp.eq.f32.partialorder %v6810_v62, 8.507059e+37  ;;  %v9055_v35 = vld [vmem:[#allocation8 + $0xf8] sm:$0xf0] }
 0x4d1   :  { %5675 = vmatmul.bf16.gmra.mxu1 %v15029_v31  ;;  %5724 = vmatmul.bf16.gmra.mxu2 %v12191_v11  ;;  %v6803_v18 = vsub.f32 1.0, %v6802_v44  ;;  %v6749_v44 = vsel %vm13132_vm3, %v13094_v20, %v6745_v1  ;;  %v10008_v1 = vld [vmem:[#allocation8 + $0x2ec] sm:$0xf]  ;;  %vm6866_vm9 = vweird.f32 %v13115_v9 }
 0x4d2   :  { %v5407_v48 = vpop.f32.mrf.mxu3  ;;  %v13157_v53 = vsel %vm13136_vm4, %v6753_v59, %v6749_v44 }
 0x4d3   :  { %v5408_v63 = vadd.f32 %v5407_v48, %v12980_v24  ;;  %v6804_v13 = vmul.f32 %v10388_v54, %v6803_v18  ;;  %15095 = vst [vmem:[#allocation31_spill] sm:$0xff] %v13157_v53 }
 0x4d4   :  { %v5529_v8 = vpop.f32.mrf.mxu2 }
 0x4d5   :  { %v10390_v4 = vpop.eup %10389  ;;  %v9491_v3 = vmul.f32 -1.442695, %v5408_v63  ;;  %v13141_v58 = vadd.f32 %v5529_v8, %v5481_v29  ;;  %v5433_v24 = vpop.f32.mrf.mxu0  ;;  %v6805_v18 = vadd.f32 %v10388_v54, %v6804_v13  ;;  %v9311_v13 = vld [vmem:[#allocation8 + $0x2f8] sm:$0xf0]  ;;  %v9944_v8 = vld [vmem:[#allocation8 + $0xec] sm:$0xf] }
 0x4d6   :  { %v13146_v48 = vpop.eup %10391  ;;  %v13148_v41 = vadd.f32 1.0, %v10390_v4  ;;  %v5434_v10 = vadd.f32 %v5433_v24, %v13057_v32  ;;  %v5482_v45 = vpop.f32.mrf.mxu1  ;;  %v9314_v4 = vor.u32 %v10008_v1, %v9311_v13  ;;  %v10040_v24 = vld [vmem:[#allocation8 + $0x3ec] sm:$0xf] }
 0x4d7   :  { %v6862_v29 = vmul.f32 %v13146_v48, %v13115_v9  ;;  %10393 = vpow2.f32 %v9491_v3  ;;  %v6809_v63 = vsel %vm6808_vm6, %v10388_v54, %v6805_v18  ;;  %v9058_v3 = vor.u32 %v9944_v8, %v9055_v35  ;;  %v9039_v54 = vld [vmem:[#allocation8 + $0xd8] sm:$0xf0] }
 0x4d8   :  { %10395 = vrcp.f32 %v13148_v41  ;;  %v5483_v20 = vadd.f32 %v5482_v45, %v5434_v10  ;;  %v13159_v23 = vsel %vm6811_vm7, %v6813_v34, %v6809_v63  ;;  %v9442_v18 = vor.u32 %v10040_v24, %v9439_v46  ;;  %v9976_v45 = vld [vmem:[#allocation8 + $0x1ec] sm:$0xf]  ;;  %v9183_v10 = vld [vmem:[#allocation8 + $0x1f8] sm:$0xf0]  ;;  %5907 = vmatpush.bf16.msra.mxu2 %v9314_v4 }
 0x4d9   :  { %15096 = vst [vmem:[#allocation32_spill] sm:$0xff] %v13159_v23  ;;  %v6863_v42 = vsub.f32 1.0, %v6862_v29  ;;  %v9186_v59 = vor.u32 %v9976_v45, %v9183_v10  ;;  %5809 = vmatpush.bf16.msra.mxu0 %v9058_v3  ;;  %vm6867_vm8 = vweird.f32 %v13146_v48  ;;  %v6932_v3 = vand.u32 2147483648, %v13148_v41 }
 0x4da   :  { %v5409_v62 = vpop.f32.mrf.mxu3  ;;  %5956 = vmatpush.bf16.msra.mxu3 %v9442_v18  ;;  %v6930_v10 = vand.u32 2147483647, %v13148_v41  ;;  %vm13184_vm11 = vmor %vm6866_vm9, %vm6867_vm8  ;;  %vm6926_vm13 = vweird.f32 %v13148_v41 }
 0x4db   :  { %v5410_v6 = vadd.f32 %v5409_v62, %v13006_v27  ;;  %5858 = vmatpush.bf16.msra.mxu1 %v9186_v59  ;;  %v6864_v13 = vmul.f32 %v13146_v48, %v6863_v42  ;;  %v6872_v62 = vand.u32 2147483648, %v13115_v9 }
 0x4dc   :  { %v5531_v38 = vpop.f32.mrf.mxu2  ;;  %vm6931_vm15 = vcmp.eq.f32.partialorder %v6930_v10, 8.507059e+37 }
 0x4dd   :  { %v10394_v44 = vpop.eup %10393  ;;  %v9495_v34 = vmul.f32 -1.442695, %v5410_v6  ;;  %v13164_v63 = vadd.f32 %v5531_v38, %v5483_v20  ;;  %v5436_v1 = vpop.f32.mrf.mxu0  ;;  %v6870_v20 = vand.u32 2147483647, %v13115_v9  ;;  %v6865_v42 = vadd.f32 %v13146_v48, %v6864_v13 }
 0x4de   :  { %v10396_v8 = vpop.eup %10395  ;;  %v13167_v46 = vadd.f32 1.0, %v10394_v44  ;;  %v5437_v29 = vadd.f32 %v5436_v1, %v13057_v32  ;;  %v5485_v35 = vpop.f32.mrf.mxu1 }
 0x4df   :  { %10397 = vpow2.f32 %v9495_v34  ;;  %5607 = vmatmul.bf16.gmra.mxu3 %v12844_v14  ;;  %v6922_v27 = vmul.f32 %v10396_v8, %v13148_v41  ;;  %vm6927_vm10 = vweird.f32 %v10396_v8  ;;  %vm13188_vm12 = vcmp.eq.f32.partialorder %v6870_v20, 8.507059e+37 }
 0x4e0   :  { %10399 = vrcp.f32 %v13167_v46  ;;  %v5486_v6 = vadd.f32 %v5485_v35, %v5437_v29  ;;  %5631 = vmatmul.bf16.gmra.mxu0 %v15030_v15  ;;  %v6869_v13 = vsel %vm13184_vm11, %v13146_v48, %v6865_v42  ;;  %vm6928_vm14 = vmor %vm6926_vm13, %vm6927_vm10  ;;  %v6933_v41 = vor.u32 1.1754944e-38, %v6932_v3 }
 0x4e1   :  { %5680 = vmatmul.bf16.gmra.mxu1 %v15031_v19  ;;  %5729 = vmatmul.bf16.gmra.mxu2 %v12241_v40  ;;  %v6923_v4 = vsub.f32 1.0, %v6922_v27  ;;  %vm6986_vm1 = vweird.f32 %v13167_v46 }
 0x4e2   :  { %v5412_v24 = vpop.f32.mrf.mxu3 }
 0x4e3   :  { %v5413_v18 = vadd.f32 %v5412_v24, %v13035_v16  ;;  %v6924_v45 = vmul.f32 %v10396_v8, %v6923_v4  ;;  %v6873_v24 = vor.u32 1.1754944e-38, %v6872_v62 }
 0x4e4   :  { %v5534_v59 = vpop.f32.mrf.mxu2 }
 0x4e5   :  { %v10398_v9 = vpop.eup %10397  ;;  %v9499_v34 = vmul.f32 -1.442695, %v5413_v18  ;;  %v13193_v1 = vadd.f32 %v5534_v59, %v5486_v6  ;;  %v5438_v16 = vpop.f32.mrf.mxu0  ;;  %v6925_v29 = vadd.f32 %v10396_v8, %v6924_v45  ;;  %v13209_v42 = vsel %vm13188_vm12, %v6873_v24, %v6869_v13 }
 0x4e6   :  { %v13198_v35 = vpop.eup %10399  ;;  %v13200_v27 = vadd.f32 1.0, %v10398_v9  ;;  %v5439_v20 = vadd.f32 %v5438_v16, %v13057_v32  ;;  %v5487_v4 = vpop.f32.mrf.mxu1  ;;  %15101 = vst [vmem:[#allocation62_spill] sm:$0xff] %v13209_v42  ;;  %v6990_v24 = vand.u32 2147483647, %v13167_v46  ;;  %v10036_v42 = vld [vmem:[#allocation8 + $0x3cc] sm:$0xf] }
 0x4e7   :  { %v6982_v6 = vmul.f32 %v13198_v35, %v13167_v46  ;;  %10401 = vpow2.f32 %v9499_v34  ;;  %v6929_v18 = vsel %vm6928_vm14, %v10396_v8, %v6925_v29  ;;  %vm6987_vm0 = vweird.f32 %v13198_v35 }
 0x4e8   :  { %10403 = vrcp.f32 %v13200_v27  ;;  %v5488_v48 = vadd.f32 %v5487_v4, %v5439_v20  ;;  %v13211_v45 = vsel %vm6931_vm15, %v6933_v41, %v6929_v18  ;;  %v6992_v41 = vand.u32 2147483648, %v13167_v46  ;;  %vm13236_vm2 = vmor %vm6986_vm1, %vm6987_vm0  ;;  %v9940_v46 = vld [vmem:[#allocation8 + $0xcc] sm:$0xf] }
 0x4e9   :  { %15102 = vst [vmem:[#allocation34_spill] sm:$0xff] %v13211_v45  ;;  %v6983_v59 = vsub.f32 1.0, %v6982_v6  ;;  %vm13240_vm3 = vcmp.eq.f32.partialorder %v6990_v24, 8.507059e+37  ;;  %v9423_v24 = vld [vmem:[#allocation8 + $0x3d8] sm:$0xf0]  ;;  %vm7046_vm4 = vweird.f32 %v13200_v27  ;;  %v9042_v23 = vor.u32 %v9940_v46, %v9039_v54 }
 0x4ea   :  { %v5414_v3 = vpop.f32.mrf.mxu3  ;;  %v9023_v46 = vld [vmem:[#allocation8 + $0xb8] sm:$0xf0] }
 0x4eb   :  { %v5415_v38 = vadd.f32 %v5414_v3, %v13060_v33  ;;  %v6984_v8 = vmul.f32 %v13198_v35, %v6983_v59  ;;  %5810 = vmatpush.bf16.msra.mxu0 %v9042_v23 }
 0x4ec   :  { %v5536_v9 = vpop.f32.mrf.mxu2 }
 0x4ed   :  { %v10402_v10 = vpop.eup %10401  ;;  %v9503_v34 = vmul.f32 -1.442695, %v5415_v38  ;;  %v13217_v16 = vadd.f32 %v5536_v9, %v5488_v48  ;;  %v5441_v29 = vpop.f32.mrf.mxu0  ;;  %v6985_v18 = vadd.f32 %v13198_v35, %v6984_v8  ;;  %v6993_v9 = vor.u32 1.1754944e-38, %v6992_v41 }
 0x4ee   :  { %v13219_v44 = vpop.eup %10403  ;;  %v13221_v13 = vadd.f32 1.0, %v10402_v10  ;;  %v5442_v20 = vadd.f32 %v5441_v29, %v13057_v32  ;;  %v5490_v4 = vpop.f32.mrf.mxu1  ;;  %v7050_v10 = vand.u32 2147483647, %v13200_v27  ;;  %v7052_v8 = vand.u32 2147483648, %v13200_v27  ;;  %v10004_v29 = vld [vmem:[#allocation8 + $0x2cc] sm:$0xf] }
 0x4ef   :  { %10405 = vpow2.f32 %v9503_v34  ;;  %5768 = vmatmul.bf16.vlgmr.msrb.gmra.mxu3 %v12539_v60  ;;  %v7042_v33 = vmul.f32 %v13219_v44, %v13200_v27  ;;  %v6989_v41 = vsel %vm13236_vm2, %v13198_v35, %v6985_v18  ;;  %vm7047_vm5 = vweird.f32 %v13219_v44  ;;  %v10032_v27 = vld [vmem:[#allocation8 + $0x3ac] sm:$0xf] }
 0x4f0   :  { %10407 = vrcp.f32 %v13221_v13  ;;  %v5491_v6 = vadd.f32 %v5490_v4, %v5442_v20  ;;  %5636 = vmatmul.bf16.gmra.mxu0 %v15034_v39  ;;  %v9295_v20 = vld [vmem:[#allocation8 + $0x2d8] sm:$0xf0]  ;;  %vm13267_vm6 = vmor %vm7046_vm4, %vm7047_vm5  ;;  %vm7051_vm7 = vcmp.eq.f32.partialorder %v7050_v10, 8.507059e+37  ;;  %vm7106_vm10 = vweird.f32 %v13221_v13 }
 0x4f1   :  { %5685 = vmatmul.bf16.gmra.mxu1 %v15035_v50  ;;  %5734 = vmatmul.bf16.gmra.mxu2 %v12313_v28  ;;  %v7043_v48 = vsub.f32 1.0, %v7042_v33  ;;  %v9298_v62 = vor.u32 %v10004_v29, %v9295_v20  ;;  %v9167_v29 = vld [vmem:[#allocation8 + $0x1d8] sm:$0xf0] }
 0x4f2   :  { %v5573_v59 = vpop.f32.mrf.mxu3  ;;  %v9170_v18 = vor.u32 %v9972_v22, %v9167_v29  ;;  %v9151_v29 = vld [vmem:[#allocation8 + $0x1b8] sm:$0xf0] }
 0x4f3   :  { %v5574_v34 = vadd.f32 %v5573_v59, %v13089_v7  ;;  %v7044_v4 = vmul.f32 %v13219_v44, %v7043_v48  ;;  %v9426_v48 = vor.u32 %v10036_v42, %v9423_v24  ;;  %5908 = vmatpush.bf16.msra.mxu2 %v9298_v62  ;;  %v10000_v42 = vld [vmem:[#allocation8 + $0x2ac] sm:$0xf] }
 0x4f4   :  { %v5539_v33 = vpop.f32.mrf.mxu2  ;;  %5859 = vmatpush.bf16.msra.mxu1 %v9170_v18  ;;  %v9936_v62 = vld [vmem:[#allocation8 + $0xac] sm:$0xf] }
 0x4f5   :  { %v10406_v45 = vpop.eup %10405  ;;  %v9444_v7 = vmul.f32 -1.442695, %v5574_v34  ;;  %v13253_v59 = vadd.f32 %v5539_v33, %v5491_v6  ;;  %v5443_v53 = vpop.f32.mrf.mxu0  ;;  %v7045_v50 = vadd.f32 %v13219_v44, %v7044_v4  ;;  %5957 = vmatpush.bf16.msra.mxu3 %v9426_v48  ;;  %v9407_v4 = vld [vmem:[#allocation8 + $0x3b8] sm:$0xf0]  ;;  %v13277_v33 = vsel %vm13240_vm3, %v6993_v9, %v6989_v41  ;;  %v9968_v48 = vld [vmem:[#allocation8 + $0x1ac] sm:$0xf] }
 0x4f6   :  { %v13255_v20 = vpop.eup %10407  ;;  %v13257_v28 = vadd.f32 1.0, %v10406_v45  ;;  %v5444_v3 = vadd.f32 %v5443_v53, %v13057_v32  ;;  %v5492_v35 = vpop.f32.mrf.mxu1  ;;  %v7053_v53 = vor.u32 1.1754944e-38, %v7052_v8  ;;  %v9279_v45 = vld [vmem:[#allocation8 + $0x2b8] sm:$0xf0]  ;;  %15109 = vst [vmem:[#allocation35_spill] sm:$0xff] %v13277_v33  ;;  %v9026_v24 = vor.u32 %v9936_v62, %v9023_v46 }
 0x4f7   :  { %v7102_v6 = vmul.f32 %v13255_v20, %v13221_v13  ;;  %10409 = vpow2.f32 %v9444_v7  ;;  %v7049_v23 = vsel %vm13267_vm6, %v13219_v44, %v7045_v50  ;;  %v9282_v34 = vor.u32 %v10000_v42, %v9279_v45 }
 0x4f8   :  { %10411 = vrcp.f32 %v13257_v28  ;;  %v5493_v22 = vadd.f32 %v5492_v35, %v5444_v3  ;;  %v13279_v10 = vsel %vm7051_vm7, %v7053_v53, %v7049_v23  ;;  %v9410_v7 = vor.u32 %v10032_v27, %v9407_v4  ;;  %5811 = vmatpush.bf16.msra.mxu0 %v9026_v24 }
 0x4f9   :  { %15110 = vst [vmem:[#allocation65_spill] sm:$0xff] %v13279_v10  ;;  %v7103_v35 = vsub.f32 1.0, %v7102_v6  ;;  %5909 = vmatpush.bf16.msra.mxu2 %v9282_v34  ;;  %v9154_v44 = vor.u32 %v9968_v48, %v9151_v29  ;;  %vm7107_vm8 = vweird.f32 %v13255_v20  ;;  %v7112_v27 = vand.u32 2147483648, %v13221_v13  ;;  %v9916_v10 = vld [vmem:[#allocation8 + $0xc] sm:$0xf] }
 0x4fa   :  { %v5575_v8 = vpop.f32.mrf.mxu3  ;;  %5958 = vmatpush.bf16.msra.mxu3 %v9410_v7  ;;  %v7172_v24 = vand.u32 2147483648, %v13257_v28  ;;  %v7110_v48 = vand.u32 2147483647, %v13221_v13  ;;  %v7170_v29 = vand.u32 2147483647, %v13257_v28  ;;  %vm13306_vm11 = vmor %vm7106_vm10, %vm7107_vm8  ;;  %vm7166_vm12 = vweird.f32 %v13257_v28 }
 0x4fb   :  { %v5576_v50 = vadd.f32 %v5575_v8, %v13112_v12  ;;  %5860 = vmatpush.bf16.msra.mxu1 %v9154_v44  ;;  %v7104_v6 = vmul.f32 %v13255_v20, %v7103_v35 }
 0x4fc   :  { %v5541_v18 = vpop.f32.mrf.mxu2  ;;  %vm7111_vm14 = vcmp.eq.f32.partialorder %v7110_v48, 8.507059e+37  ;;  %vm7171_vm15 = vcmp.eq.f32.partialorder %v7170_v29, 8.507059e+37 }
 0x4fd   :  { %v10410_v38 = vpop.eup %10409  ;;  %v9448_v9 = vmul.f32 -1.442695, %v5576_v50  ;;  %v13284_v41 = vadd.f32 %v5541_v18, %v5493_v22  ;;  %v5446_v54 = vpop.f32.mrf.mxu0  ;;  %v7105_v46 = vadd.f32 %v13255_v20, %v7104_v6  ;;  %v7113_v6 = vor.u32 1.1754944e-38, %v7112_v27  ;;  %v9932_v27 = vld [vmem:[#allocation8 + $0x8c] sm:$0xf] }
 0x4fe   :  { %v10412_v53 = vpop.eup %10411  ;;  %v13286_v42 = vadd.f32 1.0, %v10410_v38  ;;  %v5447_v45 = vadd.f32 %v5446_v54, %v13057_v32  ;;  %v5495_v62 = vpop.f32.mrf.mxu1 }
 0x4ff   :  { %10413 = vpow2.f32 %v9448_v9  ;;  %5773 = vmatmul.bf16.gmra.mxu3 %v12583_v37  ;;  %v7162_v12 = vmul.f32 %v10412_v53, %v13257_v28  ;;  %vm7167_vm9 = vweird.f32 %v10412_v53 }
 0x500   :  { %10415 = vrcp.f32 %v13286_v42  ;;  %v5496_v23 = vadd.f32 %v5495_v62, %v5447_v45  ;;  %5641 = vmatmul.bf16.gmra.mxu0 %v15040_v49  ;;  %v7109_v62 = vsel %vm13306_vm11, %v13255_v20, %v7105_v46  ;;  %vm13320_vm13 = vmor %vm7166_vm12, %vm7167_vm9  ;;  %vm6281_vm1 = vweird.f32 %v13286_v42 }
 0x501   :  { %5690 = vmatmul.bf16.gmra.mxu1 %v15041_v25  ;;  %5739 = vmatmul.bf16.gmra.mxu2 %v12373_v51  ;;  %v7163_v22 = vsub.f32 1.0, %v7162_v12  ;;  %v10028_v12 = vld [vmem:[#allocation8 + $0x38c] sm:$0xf] }
 0x502   :  { %v5578_v34 = vpop.f32.mrf.mxu3 }
 0x503   :  { %v5579_v4 = vadd.f32 %v5578_v34, %v13141_v58  ;;  %v7164_v8 = vmul.f32 %v10412_v53, %v7163_v22  ;;  %v7173_v22 = vor.u32 1.1754944e-38, %v7172_v24  ;;  %v9964_v24 = vld [vmem:[#allocation8 + $0x18c] sm:$0xf] }
 0x504   :  { %v5544_v7 = vpop.f32.mrf.mxu2 }
 0x505   :  { %v10414_v35 = vpop.eup %10413  ;;  %v9452_v50 = vmul.f32 -1.442695, %v5579_v4  ;;  %v13304_v44 = vadd.f32 %v5544_v7, %v5496_v23  ;;  %v5448_v18 = vpop.f32.mrf.mxu0  ;;  %v7165_v58 = vadd.f32 %v10412_v53, %v7164_v8  ;;  %v9996_v4 = vld [vmem:[#allocation8 + $0x28c] sm:$0xf]  ;;  %v9263_v8 = vld [vmem:[#allocation8 + $0x298] sm:$0xf0] }
 0x506   :  { %v13311_v9 = vpop.eup %10415  ;;  %v13313_v54 = vadd.f32 1.0, %v10414_v35  ;;  %v5449_v13 = vadd.f32 %v5448_v18, %v13057_v32  ;;  %v5497_v45 = vpop.f32.mrf.mxu1  ;;  %v9266_v46 = vor.u32 %v9996_v4, %v9263_v8  ;;  %v9007_v7 = vld [vmem:[#allocation8 + $0x98] sm:$0xf0]  ;;  %v13329_v35 = vsel %vm7111_vm14, %v7113_v6, %v7109_v62 }
 0x507   :  { %v6277_v28 = vmul.f32 %v13311_v9, %v13286_v42  ;;  %10417 = vpow2.f32 %v9452_v50  ;;  %v7169_v23 = vsel %vm13320_vm13, %v10412_v53, %v7165_v58  ;;  %15115 = vst [vmem:[#allocation38_spill] sm:$0xff] %v13329_v35  ;;  %v9010_v38 = vor.u32 %v9932_v27, %v9007_v7  ;;  %v9391_v53 = vld [vmem:[#allocation8 + $0x398] sm:$0xf0] }
 0x508   :  { %10419 = vrcp.f32 %v13313_v54  ;;  %v5498_v34 = vadd.f32 %v5497_v45, %v5449_v13  ;;  %v13331_v18 = vsel %vm7171_vm15, %v7173_v22, %v7169_v23  ;;  %5910 = vmatpush.bf16.msra.mxu2 %v9266_v46  ;;  %v9394_v29 = vor.u32 %v10028_v12, %v9391_v53  ;;  %v9135_v45 = vld [vmem:[#allocation8 + $0x198] sm:$0xf0] }
 0x509   :  { %v6278_v20 = vsub.f32 1.0, %v6277_v28  ;;  %15116 = vst [vmem:[#allocation39_spill] sm:$0xff] %v13331_v18  ;;  %5812 = vmatpush.bf16.msra.mxu0 %v9010_v38  ;;  %v9138_v62 = vor.u32 %v9964_v24, %v9135_v45  ;;  %vm6282_vm0 = vweird.f32 %v13311_v9  ;;  %v6285_v38 = vand.u32 2147483647, %v13286_v42  ;;  %v9119_v58 = vld [vmem:[#allocation8 + $0x178] sm:$0xf0] }
 0x50a   :  { %v5580_v50 = vpop.f32.mrf.mxu3  ;;  %5959 = vmatpush.bf16.msra.mxu3 %v9394_v29  ;;  %v6347_v53 = vand.u32 2147483648, %v13313_v54  ;;  %vm13356_vm2 = vmor %vm6281_vm1, %vm6282_vm0  ;;  %vm6341_vm4 = vweird.f32 %v13313_v54 }
 0x50b   :  { %v6279_v13 = vmul.f32 %v13311_v9, %v6278_v20  ;;  %v5581_v48 = vadd.f32 %v5580_v50, %v13164_v63  ;;  %5861 = vmatpush.bf16.msra.mxu1 %v9138_v62  ;;  %vm6286_vm5 = vcmp.eq.f32.partialorder %v6285_v38, 8.507059e+37 }
 0x50c   :  { %v5546_v28 = vpop.f32.mrf.mxu2 }
 0x50d   :  { %v10418_v6 = vpop.eup %10417  ;;  %v9456_v23 = vmul.f32 -1.442695, %v5581_v48  ;;  %v13337_v22 = vadd.f32 %v5546_v28, %v5498_v34  ;;  %v5451_v4 = vpop.f32.mrf.mxu0  ;;  %v6280_v46 = vadd.f32 %v13311_v9, %v6279_v13  ;;  %v6287_v34 = vand.u32 2147483648, %v13286_v42 }
 0x50e   :  { %v10420_v8 = vpop.eup %10419  ;;  %v13339_v27 = vadd.f32 1.0, %v10418_v6  ;;  %v5452_v7 = vadd.f32 %v5451_v4, %v13057_v32  ;;  %v5500_v20 = vpop.f32.mrf.mxu1  ;;  %v6345_v48 = vand.u32 2147483647, %v13313_v54 }
 0x50f   :  { %v6337_v63 = vmul.f32 %v10420_v8, %v13313_v54  ;;  %10421 = vpow2.f32 %v9456_v23  ;;  %5778 = vmatmul.bf16.gmra.mxu3 %v12628_v36  ;;  %v6284_v42 = vsel %vm13356_vm2, %v13311_v9, %v6280_v46  ;;  %vm6342_vm3 = vweird.f32 %v10420_v8  ;;  %v9992_v46 = vld [vmem:[#allocation8 + $0x26c] sm:$0xf] }
 0x510   :  { %10423 = vrcp.f32 %v13339_v27  ;;  %v5501_v50 = vadd.f32 %v5500_v20, %v5452_v7  ;;  %5646 = vmatmul.bf16.gmra.mxu0 %v15046_v57  ;;  %v6288_v28 = vor.u32 1.1754944e-38, %v6287_v34  ;;  %v9247_v34 = vld [vmem:[#allocation8 + $0x278] sm:$0xf0]  ;;  %vm13378_vm6 = vmor %vm6341_vm4, %vm6342_vm3  ;;  %vm6346_vm7 = vcmp.eq.f32.partialorder %v6345_v48, 8.507059e+37 }
 0x511   :  { %v6338_v12 = vsub.f32 1.0, %v6337_v63  ;;  %5695 = vmatmul.bf16.gmra.mxu1 %v11905_v55  ;;  %5744 = vmatmul.bf16.gmra.mxu2 %v12423_v30  ;;  %v6348_v63 = vor.u32 1.1754944e-38, %v6347_v53  ;;  %v9250_v53 = vor.u32 %v9992_v46, %v9247_v34  ;;  %vm6401_vm9 = vweird.f32 %v13339_v27 }
 0x512   :  { %v5583_v13 = vpop.f32.mrf.mxu3 }
 0x513   :  { %v6339_v29 = vmul.f32 %v10420_v8, %v6338_v12  ;;  %v5584_v45 = vadd.f32 %v5583_v13, %v13193_v1  ;;  %v13373_v13 = vsel %vm6286_vm5, %v6288_v28, %v6284_v42  ;;  %5911 = vmatpush.bf16.msra.mxu2 %v9250_v53 }
 0x514   :  { %v5549_v62 = vpop.f32.mrf.mxu2  ;;  %15119 = vst [vmem:[#allocation67_spill] sm:$0xff] %v13373_v13  ;;  %v9071_v13 = vld [vmem:[#allocation8 + $0x118] sm:$0xf0] }
 0x515   :  { %v10422_v6 = vpop.eup %10421  ;;  %v9460_v23 = vmul.f32 -1.442695, %v5584_v45  ;;  %v13366_v4 = vadd.f32 %v5549_v62, %v5501_v50  ;;  %v5453_v7 = vpop.f32.mrf.mxu0  ;;  %v6340_v20 = vadd.f32 %v10420_v8, %v6339_v29  ;;  %v9928_v29 = vld [vmem:[#allocation8 + $0x6c] sm:$0xf]  ;;  %v8991_v45 = vld [vmem:[#allocation8 + $0x78] sm:$0xf0] }
 0x516   :  { %v13368_v12 = vpop.eup %10423  ;;  %v13370_v1 = vadd.f32 1.0, %v10422_v6  ;;  %v5454_v24 = vadd.f32 %v5453_v7, %v13057_v32  ;;  %v5502_v9 = vpop.f32.mrf.mxu1  ;;  %v9960_v62 = vld [vmem:[#allocation8 + $0x16c] sm:$0xf]  ;;  %v8994_v54 = vor.u32 %v9928_v29, %v8991_v45  ;;  %v9375_v7 = vld [vmem:[#allocation8 + $0x378] sm:$0xf0] }
 0x517   :  { %v6397_v38 = vmul.f32 %v13368_v12, %v13339_v27  ;;  %10425 = vpow2.f32 %v9460_v23  ;;  %v6344_v42 = vsel %vm13378_vm6, %v10420_v8, %v6340_v20  ;;  %v10024_v6 = vld [vmem:[#allocation8 + $0x36c] sm:$0xf]  ;;  %v9122_v35 = vor.u32 %v9960_v62, %v9119_v58  ;;  %v8975_v8 = vld [vmem:[#allocation8 + $0x58] sm:$0xf0] }
 0x518   :  { %10427 = vrcp.f32 %v13370_v1  ;;  %v5503_v28 = vadd.f32 %v5502_v9, %v5454_v24  ;;  %v13387_v3 = vsel %vm6346_vm7, %v6348_v63, %v6344_v42  ;;  %v9378_v48 = vor.u32 %v10024_v6, %v9375_v7  ;;  %5813 = vmatpush.bf16.msra.mxu0 %v8994_v54  ;;  %v9924_v50 = vld [vmem:[#allocation8 + $0x4c] sm:$0xf]  ;;  %v9103_v29 = vld [vmem:[#allocation8 + $0x158] sm:$0xf0] }
 0x519   :  { %15122 = vst [vmem:[#allocation42_spill] sm:$0xff] %v13387_v3  ;;  %v6398_v46 = vsub.f32 1.0, %v6397_v38  ;;  %v9956_v20 = vld [vmem:[#allocation8 + $0x14c] sm:$0xf]  ;;  %5862 = vmatpush.bf16.msra.mxu1 %v9122_v35  ;;  %v8978_v9 = vor.u32 %v9924_v50, %v8975_v8  ;;  %v9231_v45 = vld [vmem:[#allocation8 + $0x258] sm:$0xf0]  ;;  %vm6402_vm8 = vweird.f32 %v13368_v12  ;;  %vm6461_vm13 = vweird.f32 %v13370_v1 }
 0x51a   :  { %v5585_v34 = vpop.f32.mrf.mxu3  ;;  %5960 = vmatpush.bf16.msra.mxu3 %v9378_v48  ;;  %v9988_v63 = vld [vmem:[#allocation8 + $0x24c] sm:$0xf]  ;;  %v9106_v42 = vor.u32 %v9956_v20, %v9103_v29  ;;  %v6405_v23 = vand.u32 2147483647, %v13339_v27  ;;  %v8959_v50 = vld [vmem:[#allocation8 + $0x38] sm:$0xf0]  ;;  %vm13419_vm11 = vmor %vm6401_vm9, %vm6402_vm8 }
 0x51b   :  { %v5586_v24 = vadd.f32 %v5585_v34, %v13217_v16  ;;  %v9234_v58 = vor.u32 %v9988_v63, %v9231_v45  ;;  %v6399_v54 = vmul.f32 %v13368_v12, %v6398_v46  ;;  %v9920_v34 = vld [vmem:[#allocation8 + $0x2c] sm:$0xf]  ;;  %v6407_v8 = vand.u32 2147483648, %v13339_v27  ;;  %v9087_v20 = vld [vmem:[#allocation8 + $0x138] sm:$0xf0] }
 0x51c   :  { %v5551_v53 = vpop.f32.mrf.mxu2  ;;  %5814 = vmatpush.bf16.msra.mxu0 %v8978_v9  ;;  %v9952_v46 = vld [vmem:[#allocation8 + $0x12c] sm:$0xf]  ;;  %vm13423_vm12 = vcmp.eq.f32.partialorder %v6405_v23, 8.507059e+37 }
 0x51d   :  { %v10426_v62 = vpop.eup %10425  ;;  %v9464_v6 = vmul.f32 -1.442695, %v5586_v24  ;;  %v13392_v7 = vadd.f32 %v5551_v53, %v5503_v28  ;;  %v5456_v38 = vpop.f32.mrf.mxu0  ;;  %5912 = vmatpush.bf16.msra.mxu2 %v9234_v58  ;;  %5863 = vmatpush.bf16.msra.mxu1 %v9106_v42  ;;  %v8962_v28 = vor.u32 %v9920_v34, %v8959_v50  ;;  %v9984_v24 = vld [vmem:[#allocation8 + $0x22c] sm:$0xf]  ;;  %v9090_v45 = vor.u32 %v9952_v46, %v9087_v20  ;;  %v9215_v53 = vld [vmem:[#allocation8 + $0x238] sm:$0xf0] }
 0x51e   :  { %v13396_v18 = vpop.eup %10427  ;;  %v13398_v16 = vadd.f32 1.0, %v10426_v62  ;;  %v5457_v35 = vadd.f32 %v5456_v38, %v13057_v32  ;;  %v5505_v48 = vpop.f32.mrf.mxu1  ;;  %v15123_v63 = vld [vmem:[#allocation48_spill] sm:$0xff]  ;;  %v6465_v58 = vand.u32 2147483647, %v13370_v1  ;;  %v6400_v38 = vadd.f32 %v13368_v12, %v6399_v54 }
 0x51f   :  { %10429 = vpow2.f32 %v9464_v6  ;;  %5783 = vmatmul.bf16.gmra.mxu3 %v12689_v26  ;;  %v6457_v29 = vmul.f32 %v13396_v18, %v13370_v1  ;;  %v15124_v62 = vld [vmem:[#allocation20_spill] sm:$0xff]  ;;  %v9218_v6 = vor.u32 %v9984_v24, %v9215_v53  ;;  %v6467_v50 = vand.u32 2147483648, %v13370_v1  ;;  %v9199_v24 = vld [vmem:[#allocation8 + $0x218] sm:$0xf0] }
 0x520   :  { %10431 = vrcp.f32 %v13398_v16  ;;  %v5506_v9 = vadd.f32 %v5505_v48, %v5457_v35  ;;  %5651 = vmatmul.bf16.gmra.mxu0 %v15123_v63  ;;  %v15125_v42 = vld [vmem:[#allocation36_spill] sm:$0xff]  ;;  %v8943_v35 = vld [vmem:[#allocation8 + $0x18] sm:$0xf0]  ;;  %vm6462_vm10 = vweird.f32 %v13396_v18  ;;  %v6408_v1 = vor.u32 1.1754944e-38, %v6407_v8 }
 0x521   :  { %5700 = vmatmul.bf16.gmra.mxu1 %v15124_v62  ;;  %5749 = vmatmul.bf16.gmra.mxu2 %v15125_v42  ;;  %v6458_v34 = vsub.f32 1.0, %v6457_v29  ;;  %v9948_v48 = vld [vmem:[#allocation8 + $0x10c] sm:$0xf]  ;;  %v8946_v20 = vor.u32 %v9916_v10, %v8943_v35  ;;  %vm6463_vm14 = vmor %vm6461_vm13, %vm6462_vm10  ;;  %vm6466_vm15 = vcmp.eq.f32.partialorder %v6465_v58, 8.507059e+37  ;;  %vm6521_vm1 = vweird.f32 %v13398_v16 }
 0x522   :  { %v5588_v33 = vpop.f32.mrf.mxu3  ;;  %5815 = vmatpush.bf16.msra.mxu0 %v8962_v28  ;;  %5864 = vmatpush.bf16.msra.mxu1 %v9090_v45  ;;  %v9980_v3 = vld [vmem:[#allocation8 + $0x20c] sm:$0xf]  ;;  %v9074_v53 = vor.u32 %v9948_v48, %v9071_v13 }
 0x523   :  { %v5589_v46 = vadd.f32 %v5588_v33, %v13253_v59  ;;  %5913 = vmatpush.bf16.msra.mxu2 %v9218_v6  ;;  %v6459_v54 = vmul.f32 %v13396_v18, %v6458_v34  ;;  %v9202_v28 = vor.u32 %v9980_v3, %v9199_v24  ;;  %v6404_v3 = vsel %vm13419_vm11, %v13368_v12, %v6400_v38  ;;  %v10020_v38 = vld [vmem:[#allocation8 + $0x34c] sm:$0xf] }
 0x524   :  { %v5554_v29 = vpop.f32.mrf.mxu2  ;;  %v13447_v8 = vsel %vm13423_vm12, %v6408_v1, %v6404_v3  ;;  %v6525_v1 = vand.u32 2147483647, %v13398_v16 }
 0x525   :  { %v10430_v33 = vpop.eup %10429  ;;  %v9468_v10 = vmul.f32 -1.442695, %v5589_v46  ;;  %v13428_v27 = vadd.f32 %v5554_v29, %v5506_v9  ;;  %v5458_v45 = vpop.f32.mrf.mxu0  ;;  %v6460_v13 = vadd.f32 %v13396_v18, %v6459_v54  ;;  %v6468_v9 = vor.u32 1.1754944e-38, %v6467_v50  ;;  %v9359_v46 = vld [vmem:[#allocation8 + $0x358] sm:$0xf0]  ;;  %15130 = vst [vmem:[#allocation43_spill] sm:$0xff] %v13447_v8 }
 0x526   :  { %v13434_v6 = vpop.eup %10431  ;;  %v13436_v34 = vadd.f32 1.0, %v10430_v33  ;;  %v5459_v23 = vadd.f32 %v5458_v45, %v13057_v32  ;;  %v5507_v35 = vpop.f32.mrf.mxu1  ;;  %5816 = vmatpush.bf16.msra.mxu0 %v8946_v20  ;;  %5865 = vmatpush.bf16.msra.mxu1 %v9074_v53  ;;  %v9362_v50 = vor.u32 %v10020_v38, %v9359_v46  ;;  %vm13478_vm4 = vcmp.eq.f32.partialorder %v6525_v1, 8.507059e+37  ;;  %v10058_v8 = vld [vmem:[#allocation11 + $0x78] sm:$0xff] }
 0x527   :  { %v6517_v48 = vmul.f32 %v13434_v6, %v13398_v16  ;;  %10433 = vpow2.f32 %v9468_v10  ;;  %5914 = vmatpush.bf16.msra.mxu2 %v9202_v28  ;;  %v6464_v12 = vsel %vm6463_vm14, %v13396_v18, %v6460_v13  ;;  %vm6522_vm0 = vweird.f32 %v13434_v6 }
 0x528   :  { %10435 = vrcp.f32 %v13436_v34  ;;  %v5508_v42 = vadd.f32 %v5507_v35, %v5459_v23  ;;  %v13449_v20 = vsel %vm6466_vm15, %v6468_v9, %v6464_v12  ;;  %5961 = vmatpush.bf16.msra.mxu3 %v9362_v50  ;;  %v6587_v38 = vand.u32 2147483648, %v13436_v34  ;;  %vm13474_vm3 = vmor %vm6521_vm1, %vm6522_vm0 }
 0x529   :  { %15131 = vst [vmem:[#allocation21_spill] sm:$0xff] %v13449_v20  ;;  %v6518_v54 = vsub.f32 1.0, %v6517_v48  ;;  %vm6581_vm5 = vweird.f32 %v13436_v34 }
 0x52a   :  { %v5590_v29 = vpop.f32.mrf.mxu3  ;;  %7562 = vmatpush.bf16.msrb.mxu1 %v10058_v8  ;;  %v10048_v8 = vld [vmem:[#allocation11 + $0x28] sm:$0xff] }
 0x52b   :  { %v5591_v18 = vadd.f32 %v5590_v29, %v13284_v41  ;;  %v6519_v59 = vmul.f32 %v13434_v6, %v6518_v54  ;;  %v6585_v54 = vand.u32 2147483647, %v13436_v34 }
 0x52c   :  { %v5556_v58 = vpop.f32.mrf.mxu2 }
 0x52d   :  { %v10434_v53 = vpop.eup %10433  ;;  %v9472_v28 = vmul.f32 -1.442695, %v5591_v18  ;;  %v13454_v33 = vadd.f32 %v5556_v58, %v5508_v42  ;;  %v5461_v10 = vpop.f32.mrf.mxu0  ;;  %v6520_v9 = vadd.f32 %v13434_v6, %v6519_v59  ;;  %v6527_v42 = vand.u32 2147483648, %v13398_v16 }
 0x52e   :  { %v10436_v45 = vpop.eup %10435  ;;  %v13457_v3 = vadd.f32 1.0, %v10434_v53  ;;  %v5462_v13 = vadd.f32 %v5461_v10, %v13057_v32  ;;  %v5510_v23 = vpop.f32.mrf.mxu1  ;;  %vm6586_vm7 = vcmp.eq.f32.partialorder %v6585_v54, 8.507059e+37 }
 0x52f   :  { %10437 = vpow2.f32 %v9472_v28  ;;  %5788 = vmatmul.bf16.gmra.mxu3 %v12736_v61  ;;  %v6577_v41 = vmul.f32 %v10436_v45, %v13436_v34  ;;  %vm6582_vm2 = vweird.f32 %v10436_v45  ;;  %v6524_v10 = vsel %vm13474_vm3, %v13434_v6, %v6520_v9  ;;  %v10016_v9 = vld [vmem:[#allocation8 + $0x32c] sm:$0xf] }
 0x530   :  { %10439 = vrcp.f32 %v13457_v3  ;;  %v5511_v35 = vadd.f32 %v5510_v23, %v5462_v13  ;;  %5656 = vmatmul.bf16.gmra.mxu0 %v15056_v5  ;;  %vm6583_vm6 = vmor %vm6581_vm5, %vm6582_vm2  ;;  %v6588_v34 = vor.u32 1.1754944e-38, %v6587_v38  ;;  %vm6641_vm9 = vweird.f32 %v13457_v3 }
 0x531   :  { %5705 = vmatmul.bf16.gmra.mxu1 %v12001_v17  ;;  %5754 = vmatmul.bf16.gmra.mxu2 %v12494_v43  ;;  %v6578_v48 = vsub.f32 1.0, %v6577_v41 }
 0x532   :  { %v5593_v12 = vpop.f32.mrf.mxu3 }
 0x533   :  { %v5594_v46 = vadd.f32 %v5593_v12, %v13304_v44  ;;  %v6579_v50 = vmul.f32 %v10436_v45, %v6578_v48  ;;  %v6528_v48 = vor.u32 1.1754944e-38, %v6527_v42 }
 0x534   :  { %v5559_v29 = vpop.f32.mrf.mxu2 }
 0x535   :  { %v10438_v16 = vpop.eup %10437  ;;  %v9476_v53 = vmul.f32 -1.442695, %v5594_v46  ;;  %v13483_v28 = vadd.f32 %v5559_v29, %v5511_v35  ;;  %v5463_v44 = vpop.f32.mrf.mxu0  ;;  %v6580_v59 = vadd.f32 %v10436_v45, %v6579_v50  ;;  %v9343_v46 = vld [vmem:[#allocation8 + $0x338] sm:$0xf0]  ;;  %v13499_v50 = vsel %vm13478_vm4, %v6528_v48, %v6524_v10 }
 0x536   :  { %v13488_v13 = vpop.eup %10439  ;;  %v13490_v23 = vadd.f32 1.0, %v10438_v16  ;;  %v5464_v41 = vadd.f32 %v5463_v44, %v13057_v32  ;;  %v5512_v1 = vpop.f32.mrf.mxu1  ;;  %15136 = vst [vmem:[#allocation46_spill] sm:$0xff] %v13499_v50  ;;  %v9346_v42 = vor.u32 %v10016_v9, %v9343_v46 }
 0x537   :  { %v6637_v35 = vmul.f32 %v13488_v13, %v13457_v3  ;;  %10441 = vpow2.f32 %v9476_v53  ;;  %v6584_v12 = vsel %vm6583_vm6, %v10436_v45, %v6580_v59  ;;  %vm6642_vm8 = vweird.f32 %v13488_v13 }
 0x538   :  { %10443 = vrcp.f32 %v13490_v23  ;;  %v5513_v6 = vadd.f32 %v5512_v1, %v5464_v41  ;;  %v13501_v32 = vsel %vm6586_vm7, %v6588_v34, %v6584_v12  ;;  %5962 = vmatpush.bf16.msra.mxu3 %v9346_v42  ;;  %v6645_v12 = vand.u32 2147483647, %v13457_v3  ;;  %vm13531_vm11 = vmor %vm6641_vm9, %vm6642_vm8 }
 0x539   :  { %15137 = vst [vmem:[#allocation47_spill] sm:$0xff] %v13501_v32  ;;  %v6638_v29 = vsub.f32 1.0, %v6637_v35  ;;  %v6707_v9 = vand.u32 2147483648, %v13490_v23  ;;  %vm6701_vm12 = vweird.f32 %v13490_v23 }
 0x53a   :  { %v5595_v18 = vpop.f32.mrf.mxu3  ;;  %vm6646_vm13 = vcmp.eq.f32.partialorder %v6645_v12, 8.507059e+37 }
 0x53b   :  { %v5596_v45 = vadd.f32 %v5595_v18, %v13337_v22  ;;  %v6639_v58 = vmul.f32 %v13488_v13, %v6638_v29 }
 0x53c   :  { %v5561_v54 = vpop.f32.mrf.mxu2 }
 0x53d   :  { %v10442_v16 = vpop.eup %10441  ;;  %v9480_v53 = vmul.f32 -1.442695, %v5596_v45  ;;  %v13506_v44 = vadd.f32 %v5561_v54, %v5513_v6  ;;  %v13508_v59 = vpop.f32.mrf.mxu0  ;;  %v6640_v48 = vadd.f32 %v13488_v13, %v6639_v58  ;;  %v6647_v6 = vand.u32 2147483648, %v13457_v3 }
 0x53e   :  { %v10444_v10 = vpop.eup %10443  ;;  %v13511_v41 = vadd.f32 1.0, %v10442_v16  ;;  %v13513_v1 = vpop.f32.mrf.mxu1 }
 0x53f   :  { %10445 = vpow2.f32 %v9480_v53  ;;  %5793 = vmatmul.bf16.gmra.mxu3 %v12782_v21  ;;  %v6697_v22 = vmul.f32 %v10444_v10, %v13490_v23  ;;  %vm6702_vm10 = vweird.f32 %v10444_v10  ;;  %v6644_v3 = vsel %vm13531_vm11, %v13488_v13, %v6640_v48  ;;  %v10012_v13 = vld [vmem:[#allocation8 + $0x30c] sm:$0xf] }
 0x540   :  { %10447 = vrcp.f32 %v13511_v41  ;;  %5817 = vmatmul.bf16.vlgmr.msra.gmra.mxu0 %v15023_v52  ;;  %v6648_v58 = vor.u32 1.1754944e-38, %v6647_v6  ;;  %vm6703_vm14 = vmor %vm6701_vm12, %vm6702_vm10  ;;  %vm6761_vm1 = vweird.f32 %v13511_v41 }
 0x541   :  { %5866 = vmatmul.bf16.vlgmr.msra.gmra.mxu1 %v15024_v56  ;;  %5915 = vmatmul.bf16.vlgmr.msra.gmra.mxu2 %v12141_v2  ;;  %v6698_v34 = vsub.f32 1.0, %v6697_v22  ;;  %v6705_v2 = vand.u32 2147483647, %v13490_v23  ;;  %v6708_v22 = vor.u32 1.1754944e-38, %v6707_v9  ;;  %v9327_v23 = vld [vmem:[#allocation8 + $0x318] sm:$0xf0] }
 0x542   :  { %v5598_v35 = vpop.f32.mrf.mxu3  ;;  %v13551_v48 = vsel %vm6646_vm13, %v6648_v58, %v6644_v3 }
 0x543   :  { %v5599_v52 = vadd.f32 %v5598_v35, %v13366_v4  ;;  %v6699_v46 = vmul.f32 %v10444_v10, %v6698_v34  ;;  %vm6706_vm15 = vcmp.eq.f32.partialorder %v6705_v2, 8.507059e+37  ;;  %15140 = vst [vmem:[#allocation24_spill] sm:$0xff] %v13551_v48 }
 0x544   :  { %v13529_v56 = vpop.f32.mrf.mxu2 }
 0x545   :  { %v10446_v29 = vpop.eup %10445  ;;  %v9484_v18 = vmul.f32 -1.442695, %v5599_v52  ;;  %v13535_v45 = vpop.f32.mrf.mxu0  ;;  %v6700_v54 = vadd.f32 %v10444_v10, %v6699_v46  ;;  %v9330_v46 = vor.u32 %v10012_v13, %v9327_v23  ;;  %v6765_v23 = vand.u32 2147483647, %v13511_v41 }
 0x546   :  { %v13541_v4 = vpop.eup %10447  ;;  %v13543_v16 = vadd.f32 1.0, %v10446_v29  ;;  %v13545_v53 = vpop.f32.mrf.mxu1 }
 0x547   :  { %v6757_v34 = vmul.f32 %v13541_v4, %v13511_v41  ;;  %10449 = vpow2.f32 %v9484_v18  ;;  %v6704_v35 = vsel %vm6703_vm14, %v10444_v10, %v6700_v54  ;;  %5963 = vmatpush.bf16.msra.mxu3 %v9330_v46  ;;  %vm6762_vm0 = vweird.f32 %v13541_v4 }
 0x548   :  { %10451 = vrcp.f32 %v13543_v16  ;;  %v13553_v52 = vsel %vm6706_vm15, %v6708_v22, %v6704_v35  ;;  %v6767_v46 = vand.u32 2147483648, %v13511_v41  ;;  %vm13583_vm3 = vmor %vm6761_vm1, %vm6762_vm0  ;;  %vm6821_vm4 = vweird.f32 %v13543_v16 }
 0x549   :  { %15141 = vst [vmem:[#allocation49_spill] sm:$0xff] %v13553_v52  ;;  %v6758_v6 = vsub.f32 1.0, %v6757_v34  ;;  %vm6766_vm5 = vcmp.eq.f32.partialorder %v6765_v23, 8.507059e+37 }
 0x54a   :  { %v5600_v9 = vpop.f32.mrf.mxu3  ;;  %v6768_v12 = vor.u32 1.1754944e-38, %v6767_v46 }
 0x54b   :  { %v5601_v42 = vadd.f32 %v5600_v9, %v13392_v7  ;;  %v6759_v3 = vmul.f32 %v13541_v4, %v6758_v6  ;;  %v6827_v6 = vand.u32 2147483648, %v13543_v16 }
 0x54c   :  { %v13558_v29 = vpop.f32.mrf.mxu2 }
 0x54d   :  { %v10450_v10 = vpop.eup %10449  ;;  %v9488_v2 = vmul.f32 -1.442695, %v5601_v42  ;;  %v13560_v18 = vpop.f32.mrf.mxu0  ;;  %v6760_v7 = vadd.f32 %v13541_v4, %v6759_v3 }
 0x54e   :  { %v10452_v54 = vpop.eup %10451  ;;  %v13563_v58 = vadd.f32 1.0, %v10450_v10  ;;  %v13565_v22 = vpop.f32.mrf.mxu1 }
 0x54f   :  { %10453 = vpow2.f32 %v9488_v2  ;;  %5798 = vmatmul.bf16.gmra.mxu3 %v12821_v47  ;;  %v6817_v34 = vmul.f32 %v10452_v54, %v13543_v16  ;;  %vm6822_vm2 = vweird.f32 %v10452_v54  ;;  %v6764_v41 = vsel %vm13583_vm3, %v13541_v4, %v6760_v7 }
 0x550   :  { %10455 = vrcp.f32 %v13563_v58  ;;  %5822 = vmatmul.bf16.gmra.mxu0 %v15026_v0  ;;  %vm6823_vm6 = vmor %vm6821_vm4, %vm6822_vm2  ;;  %v13603_v4 = vsel %vm6766_vm5, %v6768_v12, %v6764_v41  ;;  %vm6881_vm9 = vweird.f32 %v13563_v58 }
 0x551   :  { %5871 = vmatmul.bf16.gmra.mxu1 %v15029_v31  ;;  %5920 = vmatmul.bf16.gmra.mxu2 %v12191_v11  ;;  %v6818_v35 = vsub.f32 1.0, %v6817_v34  ;;  %v6825_v11 = vand.u32 2147483647, %v13543_v16  ;;  %15144 = vst [vmem:[#allocation50_spill] sm:$0xff] %v13603_v4 }
 0x552   :  { %v5603_v13 = vpop.f32.mrf.mxu3 }
 0x553   :  { %v5604_v0 = vadd.f32 %v5603_v13, %v13428_v27  ;;  %v6819_v9 = vmul.f32 %v10452_v54, %v6818_v35  ;;  %vm6826_vm7 = vcmp.eq.f32.partialorder %v6825_v11, 8.507059e+37 }
 0x554   :  { %v13581_v31 = vpop.f32.mrf.mxu2 }
 0x555   :  { %v10454_v10 = vpop.eup %10453  ;;  %v9492_v2 = vmul.f32 -1.442695, %v5604_v0  ;;  %v13587_v3 = vpop.f32.mrf.mxu0  ;;  %v6820_v34 = vadd.f32 %v10452_v54, %v6819_v9  ;;  %v6828_v0 = vor.u32 1.1754944e-38, %v6827_v6 }
 0x556   :  { %v13593_v27 = vpop.eup %10455  ;;  %v13595_v35 = vadd.f32 1.0, %v10454_v10  ;;  %v13597_v13 = vpop.f32.mrf.mxu1 }
 0x557   :  { %v6877_v38 = vmul.f32 %v13593_v27, %v13563_v58  ;;  %10457 = vpow2.f32 %v9492_v2  ;;  %v6824_v42 = vsel %vm6823_vm6, %v10452_v54, %v6820_v34  ;;  %vm6882_vm8 = vweird.f32 %v13593_v27 }
 0x558   :  { %10459 = vrcp.f32 %v13595_v35  ;;  %v13605_v16 = vsel %vm6826_vm7, %v6828_v0, %v6824_v42  ;;  %v6887_v42 = vand.u32 2147483648, %v13563_v58  ;;  %vm13635_vm11 = vmor %vm6881_vm9, %vm6882_vm8  ;;  %vm6941_vm12 = vweird.f32 %v13595_v35 }
 0x559   :  { %15145 = vst [vmem:[#allocation28_spill] sm:$0xff] %v13605_v16  ;;  %v6878_v23 = vsub.f32 1.0, %v6877_v38 }
 0x55a   :  { %v5605_v46 = vpop.f32.mrf.mxu3  ;;  %v6888_v4 = vor.u32 1.1754944e-38, %v6887_v42 }
 0x55b   :  { %v5606_v9 = vadd.f32 %v5605_v46, %v13454_v33  ;;  %v6879_v54 = vmul.f32 %v13593_v27, %v6878_v23  ;;  %v6947_v23 = vand.u32 2147483648, %v13595_v35 }
 0x55c   :  { %v13610_v6 = vpop.f32.mrf.mxu2 }
 0x55d   :  { %v10458_v10 = vpop.eup %10457  ;;  %v9496_v24 = vmul.f32 -1.442695, %v5606_v9  ;;  %v13612_v2 = vpop.f32.mrf.mxu0  ;;  %v6880_v33 = vadd.f32 %v13593_v27, %v6879_v54  ;;  %v6948_v16 = vor.u32 1.1754944e-38, %v6947_v23 }
 0x55e   :  { %v10460_v11 = vpop.eup %10459  ;;  %v13615_v12 = vadd.f32 1.0, %v10458_v10  ;;  %v13617_v41 = vpop.f32.mrf.mxu1 }
 0x55f   :  { %10461 = vpow2.f32 %v9496_v24  ;;  %5803 = vmatmul.bf16.gmra.mxu3 %v12844_v14  ;;  %v6937_v38 = vmul.f32 %v10460_v11, %v13595_v35  ;;  %v6885_v24 = vand.u32 2147483647, %v13563_v58  ;;  %vm6942_vm10 = vweird.f32 %v10460_v11 }
 0x560   :  { %10463 = vrcp.f32 %v13615_v12  ;;  %5827 = vmatmul.bf16.gmra.mxu0 %v15030_v15  ;;  %v6884_v58 = vsel %vm13635_vm11, %v13593_v27, %v6880_v33  ;;  %vm6943_vm14 = vmor %vm6941_vm12, %vm6942_vm10  ;;  %vm7001_vm1 = vweird.f32 %v13615_v12 }
 0x561   :  { %5876 = vmatmul.bf16.gmra.mxu1 %v15031_v19  ;;  %5925 = vmatmul.bf16.gmra.mxu2 %v12241_v40  ;;  %v6938_v34 = vsub.f32 1.0, %v6937_v38  ;;  %v6945_v40 = vand.u32 2147483647, %v13595_v35  ;;  %vm6886_vm13 = vcmp.eq.f32.partialorder %v6885_v24, 8.507059e+37 }
 0x562   :  { %v5608_v0 = vpop.f32.mrf.mxu3  ;;  %v13652_v27 = vsel %vm6886_vm13, %v6888_v4, %v6884_v58 }
 0x563   :  { %v5609_v15 = vadd.f32 %v5608_v0, %v13483_v28  ;;  %v6939_v46 = vmul.f32 %v10460_v11, %v6938_v34  ;;  %vm6946_vm15 = vcmp.eq.f32.partialorder %v6945_v40, 8.507059e+37  ;;  %15148 = vst [vmem:[#allocation52_spill] sm:$0xff] %v13652_v27  ;;  %v15151_v40 = vld [vmem:[#allocation23_spill] sm:$0xff] }
 0x564   :  { %v13633_v19 = vpop.f32.mrf.mxu2 }
 0x565   :  { %v10462_v10 = vpop.eup %10461  ;;  %v9500_v54 = vmul.f32 -1.442695, %v5609_v15  ;;  %v13639_v38 = vpop.f32.mrf.mxu0  ;;  %v6940_v7 = vadd.f32 %v10460_v11, %v6939_v46 }
 0x566   :  { %v13645_v28 = vpop.eup %10463  ;;  %v6250_v34 = vadd.f32 1.0, %v10462_v10  ;;  %v13647_v0 = vpop.f32.mrf.mxu1 }
 0x567   :  { %v6997_v15 = vmul.f32 %v13645_v28, %v13615_v12  ;;  %10465 = vpow2.f32 %v9500_v54  ;;  %v6944_v48 = vsel %vm6943_vm14, %v10460_v11, %v6940_v7  ;;  %vm7002_vm0 = vweird.f32 %v13645_v28 }
 0x568   :  { %10467 = vrcp.f32 %v6250_v34  ;;  %v13654_v35 = vsel %vm6946_vm15, %v6948_v16, %v6944_v48  ;;  %vm13682_vm3 = vmor %vm7001_vm1, %vm7002_vm0  ;;  %vm7061_vm4 = vweird.f32 %v6250_v34 }
 0x569   :  { %15149 = vst [vmem:[#allocation53_spill] sm:$0xff] %v13654_v35  ;;  %v6998_v46 = vsub.f32 1.0, %v6997_v15 }
 0x56a   :  { %v5610_v24 = vpop.f32.mrf.mxu3 }
 0x56b   :  { %v5611_v42 = vadd.f32 %v5610_v24, %v13506_v44  ;;  %v6999_v7 = vmul.f32 %v13645_v28, %v6998_v46  ;;  %v15150_v44 = vld [vmem:[#allocation25_spill] sm:$0xff]  ;;  %v7067_v46 = vand.u32 2147483648, %v6250_v34  ;;  %v7005_v24 = vand.u32 2147483647, %v13615_v12 }
 0x56c   :  { %v13659_v9 = vpop.f32.mrf.mxu2 }
 0x56d   :  { %v10466_v23 = vpop.eup %10465  ;;  %v9504_v10 = vmul.f32 -1.442695, %v5611_v42  ;;  %v13661_v52 = vpop.f32.mrf.mxu0  ;;  %v7000_v54 = vadd.f32 %v13645_v28, %v6999_v7  ;;  %v7068_v35 = vor.u32 1.1754944e-38, %v7067_v46  ;;  %vm7006_vm6 = vcmp.eq.f32.partialorder %v7005_v24, 8.507059e+37  ;;  %v13711_v24 = vld [vmem:[#allocation10] sm:$0xf] }
 0x56e   :  { %v10468_v11 = vpop.eup %10467  ;;  %v13664_v4 = vadd.f32 1.0, %v10466_v23  ;;  %v13666_v48 = vpop.f32.mrf.mxu1  ;;  %15156 = vst [vmem:[#allocation58_spill] sm:$0xff] %v13711_v24 }
 0x56f   :  { %10469 = vpow2.f32 %v9504_v10  ;;  %5964 = vmatmul.bf16.vlgmr.msra.gmra.mxu3 %v12539_v60  ;;  %v7057_v16 = vmul.f32 %v10468_v11, %v6250_v34  ;;  %v7007_v60 = vand.u32 2147483648, %v13615_v12  ;;  %vm7062_vm2 = vweird.f32 %v10468_v11 }
 0x570   :  { %10471 = vrcp.f32 %v13664_v4  ;;  %5832 = vmatmul.bf16.gmra.mxu0 %v15034_v39  ;;  %v7065_v39 = vand.u32 2147483647, %v6250_v34  ;;  %vm7063_vm5 = vmor %vm7061_vm4, %vm7062_vm2  ;;  %vm7121_vm10 = vweird.f32 %v13664_v4 }
 0x571   :  { %5881 = vmatmul.bf16.gmra.mxu1 %v15150_v44  ;;  %5930 = vmatmul.bf16.gmra.mxu2 %v15151_v40  ;;  %v7058_v58 = vsub.f32 1.0, %v7057_v16  ;;  %v7004_v44 = vsel %vm13682_vm3, %v13645_v28, %v7000_v54  ;;  %v7008_v27 = vor.u32 1.1754944e-38, %v7007_v60 }
 0x572   :  { %v13675_v15 = vpop.f32.mrf.mxu3  ;;  %vm7066_vm7 = vcmp.eq.f32.partialorder %v7065_v39, 8.507059e+37 }
 0x573   :  { %v7059_v42 = vmul.f32 %v10468_v11, %v7058_v58  ;;  %v13697_v14 = vsel %vm7006_vm6, %v7008_v27, %v7004_v44  ;;  %v7127_v44 = vand.u32 2147483648, %v13664_v4 }
 0x574   :  { %v13680_v23 = vpop.f32.mrf.mxu2  ;;  %15154 = vst [vmem:[#allocation33_spill] sm:$0xff] %v13697_v14 }
 0x575   :  { %v10470_v7 = vpop.eup %10469  ;;  %v13686_v16 = vpop.f32.mrf.mxu0  ;;  %v7060_v40 = vadd.f32 %v10468_v11, %v7059_v42  ;;  %v7128_v20 = vor.u32 1.1754944e-38, %v7127_v44  ;;  %v10049_v44 = vld [vmem:[#allocation11 + $0x30] sm:$0xff] }
 0x576   :  { %v13691_v33 = vpop.eup %10471  ;;  %v6258_v12 = vadd.f32 1.0, %v10470_v7  ;;  %v13693_v58 = vpop.f32.mrf.mxu1 }
 0x577   :  { %v7117_v50 = vmul.f32 %v13691_v33, %v13664_v4  ;;  %v7064_v32 = vsel %vm7063_vm5, %v10468_v11, %v7060_v40  ;;  %vm7122_vm8 = vweird.f32 %v13691_v33 }
 0x578   :  { %10473 = vrcp.f32 %v6258_v12  ;;  %v13699_v28 = vsel %vm7066_vm7, %v7068_v35, %v7064_v32  ;;  %v13714_v32 = vperm.slane %v13711_v24, 2  ;;  %vm13734_vm11 = vmor %vm7121_vm10, %vm7122_vm8  ;;  %vm7181_vm12 = vweird.f32 %v6258_v12  ;;  %v10050_v24 = vld [vmem:[#allocation11 + $0x38] sm:$0xff] }
 0x579   :  { %15155 = vst [vmem:[#allocation57_spill] sm:$0xff] %v13699_v28  ;;  %v7118_v42 = vsub.f32 1.0, %v7117_v50  ;;  %v10066_v28 = vld [vmem:[#allocation11 + $0xb8] sm:$0xff]  ;;  %7513 = vmatpush.bf16.msrb.mxu0 %v10050_v24  ;;  %v10064_v24 = vld [vmem:[#allocation11 + $0xa8] sm:$0xff] }
 0x57a   :  { %v5771_v54 = vpop.f32.mrf.mxu3  ;;  %v5625_v35 = vadd.f32 %v13535_v45, %v13714_v32  ;;  %v7185_v45 = vand.u32 2147483647, %v6258_v12  ;;  %7611 = vmatpush.bf16.msrb.mxu2 %v10066_v28  ;;  %v10056_v28 = vld [vmem:[#allocation11 + $0x68] sm:$0xff] }
 0x57b   :  { %v7119_v11 = vmul.f32 %v13691_v33, %v7118_v42  ;;  %v7187_v42 = vand.u32 2147483648, %v6258_v12 }
 0x57c   :  { %v13703_v10 = vpop.f32.mrf.mxu2  ;;  %v5674_v14 = vadd.f32 %v13545_v53, %v5625_v35  ;;  %vm7186_vm15 = vcmp.eq.f32.partialorder %v7185_v45, 8.507059e+37  ;;  %v10055_v45 = vld [vmem:[#allocation11 + $0x60] sm:$0xff] }
 0x57d   :  { %v13705_v60 = vpop.f32.mrf.mxu0  ;;  %7514 = vmatpush.bf16.msrb.mxu0 %v10049_v44 }
 0x57e   :  { %v10474_v46 = vpop.eup %10473  ;;  %v13707_v7 = vpop.f32.mrf.mxu1 }
 0x57f   :  { %5969 = vmatmul.bf16.gmra.mxu3 %v12583_v37  ;;  %v7177_v27 = vmul.f32 %v10474_v46, %v6258_v12  ;;  %v7120_v37 = vadd.f32 %v13691_v33, %v7119_v11  ;;  %vm7182_vm9 = vweird.f32 %v10474_v46  ;;  %v7188_v12 = vor.u32 1.1754944e-38, %v7187_v42  ;;  %v10074_v11 = vld [vmem:[#allocation11 + $0xf8] sm:$0xff]  ;;  %v10057_v42 = vld [vmem:[#allocation11 + $0x70] sm:$0xff] }
 0x580   :  { %5837 = vmatmul.bf16.gmra.mxu0 %v15040_v49  ;;  %v5623_v49 = vadd.f32 %v13508_v59, %v13714_v32  ;;  %vm13741_vm13 = vmor %vm7181_vm12, %vm7182_vm9  ;;  %7660 = vmatpush.bf16.msrb.mxu3 %v10074_v11  ;;  %v5628_v59 = vadd.f32 %v13560_v18, %v13714_v32  ;;  %v10073_v11 = vld [vmem:[#allocation11 + $0xf0] sm:$0xff] }
 0x581   :  { %5886 = vmatmul.bf16.gmra.mxu1 %v15041_v25  ;;  %5935 = vmatmul.bf16.gmra.mxu2 %v12373_v51  ;;  %v7178_v50 = vsub.f32 1.0, %v7177_v27  ;;  %v7125_v51 = vand.u32 2147483647, %v13664_v4 }
 0x582   :  { %v13721_v39 = vpop.f32.mrf.mxu3  ;;  %v5672_v47 = vadd.f32 %v13513_v1, %v5623_v49  ;;  %v10065_v49 = vld [vmem:[#allocation11 + $0xb0] sm:$0xff]  ;;  %7563 = vmatpush.bf16.msrb.mxu1 %v10057_v42  ;;  %7515 = vmatpush.bf16.msrb.mxu0 %v10048_v8 }
 0x583   :  { %v7179_v40 = vmul.f32 %v10474_v46, %v7178_v50  ;;  %v7124_v50 = vsel %vm13734_vm11, %v13691_v33, %v7120_v37  ;;  %vm7126_vm14 = vcmp.eq.f32.partialorder %v7125_v51, 8.507059e+37  ;;  %v5723_v33 = vadd.f32 %v13558_v29, %v5674_v14  ;;  %7612 = vmatpush.bf16.msrb.mxu2 %v10065_v49 }
 0x584   :  { %v13728_v25 = vpop.f32.mrf.mxu2  ;;  %v13752_v53 = vsel %vm7126_vm14, %v7128_v20, %v7124_v50  ;;  %v10063_v50 = vld [vmem:[#allocation11 + $0xa0] sm:$0xff]  ;;  %7661 = vmatpush.bf16.msrb.mxu3 %v10073_v11 }
 0x585   :  { %v13732_v27 = vpop.f32.mrf.mxu0  ;;  %v7180_v34 = vadd.f32 %v10474_v46, %v7179_v40  ;;  %v5772_v1 = vadd.f32 %v5771_v54, %v5723_v33  ;;  %v5630_v54 = vadd.f32 %v13587_v3, %v13714_v32  ;;  %v10054_v3 = vld [vmem:[#allocation11 + $0x58] sm:$0xff] }
 0x586   :  { %v13746_v4 = vpop.f32.mrf.mxu1  ;;  %7564 = vmatpush.bf16.msrb.mxu1 %v10056_v28  ;;  %v10061_v28 = vld [vmem:[#allocation11 + $0x90] sm:$0xff] }
 0x587   :  { %v7184_v40 = vsel %vm13741_vm13, %v10474_v46, %v7180_v34  ;;  %v5721_v46 = vadd.f32 %v13529_v56, %v5672_v47  ;;  %v9449_v29 = vmul.f32 -1.442695, %v5772_v1  ;;  %7613 = vmatpush.bf16.msrb.mxu2 %v10064_v24 }
 0x588   :  { %v13754_v35 = vsel %vm7186_vm15, %v7188_v12, %v7184_v40  ;;  %v10046_v40 = vld [vmem:[#allocation11 + $0x18] sm:$0xff] }
 0x589   :  { %v7250_v34 = vpack.c.bf16 %v13754_v35, %v13752_v53  ;;  %v5770_v14 = vadd.f32 %v13675_v15, %v5721_v46  ;;  %10475 = vpow2.f32 %v9449_v29  ;;  %v10062_v12 = vld [vmem:[#allocation11 + $0x98] sm:$0xff]  ;;  %v5677_v46 = vadd.f32 %v13565_v22, %v5628_v59  ;;  %v10053_v29 = vld [vmem:[#allocation11 + $0x50] sm:$0xff]  ;;  %v10043_v59 = vld [vmem:[#allocation11] sm:$0xff] }
 0x58a   :  { %v5776_v37 = vpop.f32.mrf.mxu3  ;;  %7565 = vmatpush.bf16.msrb.mxu1 %v10055_v45  ;;  %v15161_v45 = vld [vmem:[#allocation36_spill] sm:$0xff] }
 0x58b   :  { %v9445_v47 = vmul.f32 -1.442695, %v5770_v14  ;;  %7614 = vmatpush.bf16.msrb.mxu2 %v10063_v50  ;;  %v5726_v42 = vadd.f32 %v13581_v31, %v5677_v46  ;;  %v10044_v31 = vld [vmem:[#allocation11 + $0x8] sm:$0xff] }
 0x58c   :  { %v13759_v51 = vpop.f32.mrf.mxu2 }
 0x58d   :  { %v13762_v20 = vpop.f32.mrf.mxu0  ;;  %10477 = vpow2.f32 %v9445_v47  ;;  %v5775_v22 = vadd.f32 %v13721_v39, %v5726_v42 }
 0x58e   :  { %v13766_v56 = vpop.f32.mrf.mxu1  ;;  %7566 = vmatpush.bf16.msrb.mxu1 %v10054_v3 }
 0x58f   :  { %5974 = vmatmul.bf16.gmra.mxu3 %v12628_v36  ;;  %v10047_v36 = vld [vmem:[#allocation11 + $0x20] sm:$0xff]  ;;  %v10476_v33 = vpop.eup %10475  ;;  %7615 = vmatpush.bf16.msrb.mxu2 %v10062_v12  ;;  %v9453_v39 = vmul.f32 -1.442695, %v5775_v22 }
 0x590   :  { %5842 = vmatmul.bf16.gmra.mxu0 %v15046_v57  ;;  %v13786_v8 = vadd.f32 1.0, %v10476_v33  ;;  %v10072_v33 = vld [vmem:[#allocation11 + $0xe8] sm:$0xff] }
 0x591   :  { %5891 = vmatmul.bf16.gmra.mxu1 %v11905_v55  ;;  %5940 = vmatmul.bf16.gmra.mxu2 %v12423_v30  ;;  %v5679_v30 = vadd.f32 %v13597_v13, %v5630_v54  ;;  %v10045_v13 = vld [vmem:[#allocation11 + $0x10] sm:$0xff] }
 0x592   :  { %v13770_v15 = vpop.f32.mrf.mxu3  ;;  %7516 = vmatpush.bf16.msrb.mxu0 %v10047_v36  ;;  %7567 = vmatpush.bf16.msrb.mxu1 %v10053_v29  ;;  %10479 = vrcp.f32 %v13786_v8  ;;  %v10060_v36 = vld [vmem:[#allocation11 + $0x88] sm:$0xff]  ;;  %vm6356_vm2 = vweird.f32 %v13786_v8 }
 0x593   :  { %v5728_v1 = vadd.f32 %v13610_v6, %v5679_v30  ;;  %v10478_v18 = vpop.eup %10477  ;;  %7616 = vmatpush.bf16.msrb.mxu2 %v10061_v28  ;;  %v10051_v30 = vld [vmem:[#allocation11 + $0x40] sm:$0xff]  ;;  %7662 = vmatpush.bf16.msrb.mxu3 %v10072_v33 }
 0x594   :  { %v13774_v57 = vpop.f32.mrf.mxu2  ;;  %v13789_v24 = vadd.f32 1.0, %v10478_v18 }
 0x595   :  { %v13778_v55 = vpop.f32.mrf.mxu0  ;;  %v5777_v49 = vadd.f32 %v5776_v37, %v5728_v1  ;;  %v10052_v37 = vld [vmem:[#allocation11 + $0x48] sm:$0xff] }
 0x596   :  { %7517 = vmatpush.bf16.msrb.mxu0 %v10046_v40  ;;  %v13784_v14 = vpop.f32.mrf.mxu1  ;;  %10481 = vrcp.f32 %v13789_v24  ;;  %7568 = vmatpush.bf16.msrb.mxu1 %v10052_v37  ;;  %v5633_v40 = vadd.f32 %v13612_v2, %v13714_v32  ;;  %vm6296_vm4 = vweird.f32 %v13789_v24 }
 0x597   :  { %v9457_v47 = vmul.f32 -1.442695, %v5777_v49  ;;  %7617 = vmatpush.bf16.msrb.mxu2 %v10060_v36 }
 0x598   :  { %v13809_v3 = vpop.eup %10479  ;;  %v5682_v1 = vadd.f32 %v13617_v41, %v5633_v40 }
 0x599   :  { %10483 = vpow2.f32 %v9457_v47  ;;  %v6352_v18 = vmul.f32 %v13809_v3, %v13786_v8  ;;  %vm6357_vm0 = vweird.f32 %v13809_v3 }
 0x59a   :  { %v5781_v44 = vpop.f32.mrf.mxu3  ;;  %7518 = vmatpush.bf16.msrb.mxu0 %v10045_v13  ;;  %10485 = vpow2.f32 %v9453_v39  ;;  %7569 = vmatpush.bf16.msrb.mxu1 %v10051_v30  ;;  %v5731_v13 = vadd.f32 %v13633_v19, %v5682_v1  ;;  %vm13865_vm3 = vmor %vm6356_vm2, %vm6357_vm0 }
 0x59b   :  { %v6353_v47 = vsub.f32 1.0, %v6352_v18 }
 0x59c   :  { %v13791_v6 = vpop.f32.mrf.mxu2  ;;  %v13812_v11 = vpop.eup %10481  ;;  %v5780_v41 = vadd.f32 %v13770_v15, %v5731_v13  ;;  %v5640_v15 = vadd.f32 %v13686_v16, %v13714_v32 }
 0x59d   :  { %v13793_v54 = vpop.f32.mrf.mxu0  ;;  %v6292_v29 = vmul.f32 %v13812_v11, %v13789_v24  ;;  %v6354_v19 = vmul.f32 %v13809_v3, %v6353_v47  ;;  %vm6297_vm1 = vweird.f32 %v13812_v11 }
 0x59e   :  { %7519 = vmatpush.bf16.msrb.mxu0 %v10044_v31  ;;  %v5689_v16 = vadd.f32 %v13693_v58, %v5640_v15  ;;  %vm13880_vm5 = vmor %vm6296_vm4, %vm6297_vm1  ;;  %v5645_v58 = vadd.f32 %v13732_v27, %v13714_v32 }
 0x59f   :  { %5979 = vmatmul.bf16.gmra.mxu3 %v12689_v26  ;;  %v5635_v26 = vadd.f32 %v13639_v38, %v13714_v32  ;;  %v10484_v46 = vpop.eup %10483  ;;  %v6293_v31 = vsub.f32 1.0, %v6292_v29 }
 0x5a0   :  { %5847 = vmatmul.bf16.gmra.mxu0 %v15123_v63  ;;  %v10059_v63 = vld [vmem:[#allocation11 + $0x80] sm:$0xff]  ;;  %v13825_v22 = vadd.f32 1.0, %v10484_v46  ;;  %v5738_v33 = vadd.f32 %v13703_v10, %v5689_v16  ;;  %v15166_v16 = vld [vmem:[#allocation66_spill] sm:$0xff]  ;;  %v5694_v27 = vadd.f32 %v13746_v4, %v5645_v58 }
 0x5a1   :  { %5896 = vmatmul.bf16.gmra.mxu1 %v15124_v62  ;;  %5945 = vmatmul.bf16.gmra.mxu2 %v15161_v45  ;;  %v13807_v62 = vpop.f32.mrf.mxu1  ;;  %v5684_v12 = vadd.f32 %v13647_v0, %v5635_v26  ;;  %v10486_v0 = vpop.eup %10485  ;;  %v5638_v26 = vadd.f32 %v13661_v52, %v13714_v32  ;;  %v10071_v46 = vld [vmem:[#allocation11 + $0xe0] sm:$0xff] }
 0x5a2   :  { %v13801_v50 = vpop.f32.mrf.mxu3  ;;  %7520 = vmatpush.bf16.msrb.mxu0 %v10043_v59  ;;  %7618 = vmatpush.bf16.msrb.mxu2 %v10059_v63  ;;  %10487 = vrcp.f32 %v13825_v22  ;;  %v6362_v59 = vand.u32 2147483648, %v13786_v8  ;;  %v6360_v63 = vand.u32 2147483647, %v13786_v8  ;;  %v6300_v8 = vand.u32 2147483647, %v13789_v24 }
 0x5a3   :  { %v5733_v2 = vadd.f32 %v13659_v9, %v5684_v12  ;;  %v13828_v9 = vadd.f32 1.0, %v10486_v0  ;;  %v5687_v40 = vadd.f32 %v13666_v48, %v5638_v26  ;;  %v6302_v12 = vand.u32 2147483648, %v13789_v24  ;;  %7663 = vmatpush.bf16.msrb.mxu3 %v10071_v46 }
 0x5a4   :  { %v13814_v38 = vpop.f32.mrf.mxu2  ;;  %v6363_v29 = vor.u32 1.1754944e-38, %v6362_v59  ;;  %vm6361_vm6 = vcmp.eq.f32.partialorder %v6360_v63, 8.507059e+37  ;;  %vm6301_vm7 = vcmp.eq.f32.partialorder %v6300_v8, 8.507059e+37  ;;  %v15167_v59 = vld [vmem:[#allocation45_spill] sm:$0xff]  ;;  %v5643_v8 = vadd.f32 %v13705_v60, %v13714_v32 }
 0x5a5   :  { %v13820_v42 = vpop.f32.mrf.mxu0  ;;  %v5782_v28 = vadd.f32 %v5781_v44, %v5733_v2  ;;  %v9461_v44 = vmul.f32 -1.442695, %v5780_v41  ;;  %10489 = vrcp.f32 %v13828_v9  ;;  %v5736_v0 = vadd.f32 %v13680_v23, %v5687_v40  ;;  %v15170_v40 = vld [vmem:[#allocation67_spill] sm:$0xff] }
 0x5a6   :  { %v6303_v41 = vor.u32 1.1754944e-38, %v6302_v12  ;;  %vm6476_vm10 = vweird.f32 %v13825_v22  ;;  %v6480_v60 = vand.u32 2147483647, %v13825_v22  ;;  %v5743_v4 = vadd.f32 %v13759_v51, %v5694_v27  ;;  %v15178_v27 = vld [vmem:[#allocation26_spill] sm:$0xff] }
 0x5a7   :  { %v9465_v37 = vmul.f32 -1.442695, %v5782_v28  ;;  %vm6416_vm12 = vweird.f32 %v13828_v9 }
 0x5a8   :  { %vm6481_vm14 = vcmp.eq.f32.partialorder %v6480_v60, 8.507059e+37 }
 0x5a9   :  { %v13830_v36 = vpop.f32.mrf.mxu1  ;;  %10491 = vpow2.f32 %v9465_v37 }
 0x5aa   :  { %v5786_v49 = vpop.f32.mrf.mxu3  ;;  %10493 = vpow2.f32 %v9461_v44 }
 0x5ac   :  { %v13841_v39 = vpop.f32.mrf.mxu2 }
 0x5af   :  { %5984 = vmatmul.bf16.gmra.mxu3 %v12736_v61  ;;  %v6294_v61 = vmul.f32 %v13812_v11, %v6293_v31 }
 0x5b0   :  { %5852 = vmatmul.bf16.gmra.mxu0 %v15056_v5  ;;  %v13846_v5 = vpop.f32.mrf.mxu0 }
 0x5b1   :  { %5901 = vmatmul.bf16.gmra.mxu1 %v12001_v17  ;;  %5950 = vmatmul.bf16.gmra.mxu2 %v12494_v43  ;;  %v6355_v17 = vadd.f32 %v13809_v3, %v6354_v19  ;;  %v13852_v43 = vpop.eup %10487  ;;  %v6295_v30 = vadd.f32 %v13812_v11, %v6294_v61  ;;  %v13870_v2 = vpop.f32.mrf.mxu1  ;;  %v5785_v19 = vadd.f32 %v13801_v50, %v5736_v0  ;;  %v15169_v50 = vld [vmem:[#allocation42_spill] sm:$0xff]  ;;  %v6482_v0 = vand.u32 2147483648, %v13825_v22 }
 0x5b2   :  { %v13843_v45 = vpop.f32.mrf.mxu3  ;;  %v13860_v52 = vpop.eup %10489  ;;  %v6472_v18 = vmul.f32 %v13852_v43, %v13825_v22  ;;  %v15171_v12 = vpack.c.bf16 %v15169_v50, %v15170_v40  ;;  %vm6477_vm8 = vweird.f32 %v13852_v43 }
 0x5b3   :  { %v10492_v1 = vpop.eup %10491  ;;  %v6359_v48 = vsel %vm13865_vm3, %v13809_v3, %v6355_v17  ;;  %v6412_v28 = vmul.f32 %v13860_v52, %v13828_v9  ;;  %v5787_v3 = vadd.f32 %v5786_v49, %v5738_v33  ;;  %v6299_v47 = vsel %vm13880_vm5, %v13812_v11, %v6295_v30  ;;  %vm13939_vm11 = vmor %vm6476_vm10, %vm6477_vm8 }
 0x5b4   :  { %v10494_v24 = vpop.eup %10493  ;;  %v13892_v31 = vadd.f32 1.0, %v10492_v1  ;;  %v13894_v37 = vpop.f32.mrf.mxu2  ;;  %v6364_v23 = vsel %vm6361_vm6, %v6363_v29, %v6359_v48  ;;  %v6473_v15 = vsub.f32 1.0, %v6472_v18  ;;  %v6304_v49 = vsel %vm6301_vm7, %v6303_v41, %v6299_v47 }
 0x5b5   :  { %v13899_v61 = vadd.f32 1.0, %v10494_v24  ;;  %v9473_v26 = vmul.f32 -1.442695, %v5787_v3  ;;  %v7223_v11 = vpack.c.bf16 %v6364_v23, %v6304_v49  ;;  %v6413_v17 = vsub.f32 1.0, %v6412_v28  ;;  %v10070_v23 = vld [vmem:[#allocation11 + $0xd8] sm:$0xff] }
 0x5b6   :  { %10495 = vrcp.f32 %v13892_v31  ;;  %v15168_v30 = vpack.c.bf16 %v15166_v16, %v15167_v59  ;;  %v9469_v63 = vmul.f32 -1.442695, %v5785_v19  ;;  %v6474_v33 = vmul.f32 %v13852_v43, %v6473_v15  ;;  %7664 = vmatpush.bf16.msrb.mxu3 %v10070_v23 }
 0x5b7   :  { %10497 = vrcp.f32 %v13899_v61  ;;  %v6414_v1 = vmul.f32 %v13860_v52, %v6413_v17  ;;  %vm6417_vm9 = vweird.f32 %v13860_v52  ;;  %v5692_v3 = vadd.f32 %v13707_v7, %v5643_v8 }
 0x5b8   :  { %v13897_v44 = vpop.f32.mrf.mxu0  ;;  %10499 = vpow2.f32 %v9473_v26  ;;  %v6475_v48 = vadd.f32 %v13852_v43, %v6474_v33  ;;  %v6422_v47 = vand.u32 2147483648, %v13828_v9  ;;  %v6420_v15 = vand.u32 2147483647, %v13828_v9  ;;  %vm13955_vm13 = vmor %vm6416_vm12, %vm6417_vm9 }
 0x5b9   :  { %v13915_v46 = vpop.f32.mrf.mxu1  ;;  %10501 = vpow2.f32 %v9469_v63  ;;  %v6415_v24 = vadd.f32 %v13860_v52, %v6414_v1  ;;  %v5741_v51 = vadd.f32 %v13728_v25, %v5692_v3  ;;  %v15180_v3 = vld [vmem:[#allocation21_spill] sm:$0xff]  ;;  %v6602_v26 = vand.u32 2147483648, %v13892_v31 }
 0x5ba   :  { %v13885_v13 = vpop.f32.mrf.mxu3  ;;  %v6479_v22 = vsel %vm13939_vm11, %v13852_v43, %v6475_v48  ;;  %v6423_v59 = vor.u32 1.1754944e-38, %v6422_v47  ;;  %vm6421_vm15 = vcmp.eq.f32.partialorder %v6420_v15, 8.507059e+37  ;;  %vm6596_vm2 = vweird.f32 %v13892_v31 }
 0x5bb   :  { %v5792_v43 = vadd.f32 %v13885_v13, %v5743_v4  ;;  %v6419_v25 = vsel %vm13955_vm13, %v13860_v52, %v6415_v24  ;;  %v5790_v63 = vadd.f32 %v13843_v45, %v5741_v51  ;;  %v15176_v13 = vld [vmem:[#allocation40_spill] sm:$0xff]  ;;  %v5648_v52 = vadd.f32 %v13762_v20, %v13714_v32  ;;  %v15177_v45 = vld [vmem:[#allocation27_spill] sm:$0xff] }
 0x5bc   :  { %v13922_v18 = vpop.eup %10495  ;;  %v13925_v10 = vpop.f32.mrf.mxu2  ;;  %v6424_v33 = vsel %vm6421_vm15, %v6423_v59, %v6419_v25  ;;  %v15181_v4 = vld [vmem:[#allocation43_spill] sm:$0xff]  ;;  %v5650_v20 = vadd.f32 %v13778_v55, %v13714_v32  ;;  %vm6536_vm3 = vweird.f32 %v13899_v61  ;;  %v10069_v25 = vld [vmem:[#allocation11 + $0xd0] sm:$0xff] }
 0x5bd   :  { %v13934_v28 = vpop.eup %10497  ;;  %v6592_v7 = vmul.f32 %v13922_v18, %v13892_v31  ;;  %v9481_v58 = vmul.f32 -1.442695, %v5792_v43  ;;  %v9477_v24 = vmul.f32 -1.442695, %v5790_v63  ;;  %v15182_v47 = vpack.c.bf16 %v15180_v3, %v15181_v4  ;;  %7665 = vmatpush.bf16.msrb.mxu3 %v10069_v25 }
 0x5be   :  { %v10500_v19 = vpop.eup %10499  ;;  %v6532_v17 = vmul.f32 %v13934_v28, %v13899_v61  ;;  %v5697_v15 = vadd.f32 %v13766_v56, %v5648_v52  ;;  %vm6597_vm0 = vweird.f32 %v13922_v18  ;;  %v5699_v55 = vadd.f32 %v13784_v14, %v5650_v20 }
 0x5bf   :  { %5989 = vmatmul.bf16.gmra.mxu3 %v12782_v21  ;;  %v10502_v9 = vpop.eup %10501  ;;  %v13965_v16 = vadd.f32 1.0, %v10500_v19  ;;  %v6593_v40 = vsub.f32 1.0, %v6592_v7  ;;  %vm6537_vm1 = vweird.f32 %v13934_v28  ;;  %v6600_v56 = vand.u32 2147483647, %v13892_v31  ;;  %vm14012_vm4 = vmor %vm6596_vm2, %vm6597_vm0 }
 0x5c0   :  { %7521 = vmatmul.bf16.vlgmr.msrb.gmra.mxu0 %v15168_v30  ;;  %v13928_v29 = vpop.f32.mrf.mxu0  ;;  %v6533_v8 = vsub.f32 1.0, %v6532_v17  ;;  %v5746_v51 = vadd.f32 %v13774_v57, %v5697_v15  ;;  %v5748_v43 = vadd.f32 %v13791_v6, %v5699_v55  ;;  %v6542_v57 = vand.u32 2147483648, %v13899_v61  ;;  %vm14027_vm5 = vmor %vm6536_vm3, %vm6537_vm1  ;;  %v15188_v15 = vld [vmem:[#allocation29_spill] sm:$0xff] }
 0x5c1   :  { %7570 = vmatmul.bf16.vlgmr.msrb.gmra.mxu1 %v15171_v12  ;;  %7619 = vmatmul.bf16.vlgmr.msrb.gmra.mxu2 %v7223_v11  ;;  %v6483_v11 = vor.u32 1.1754944e-38, %v6482_v0  ;;  %v13968_v50 = vpop.f32.mrf.mxu1  ;;  %v13970_v12 = vadd.f32 1.0, %v10502_v9  ;;  %10503 = vrcp.f32 %v13965_v16  ;;  %v15179_v0 = vpack.c.bf16 %v15177_v45, %v15178_v27 }
 0x5c2   :  { %v13913_v21 = vpop.f32.mrf.mxu3  ;;  %v6594_v41 = vmul.f32 %v13922_v18, %v6593_v40  ;;  %v6534_v19 = vmul.f32 %v13934_v28, %v6533_v8  ;;  %v6540_v63 = vand.u32 2147483647, %v13899_v61  ;;  %vm6601_vm6 = vcmp.eq.f32.partialorder %v6600_v56, 8.507059e+37 }
 0x5c3   :  { %v6484_v30 = vsel %vm6481_vm14, %v6483_v11, %v6479_v22  ;;  %10505 = vrcp.f32 %v13970_v12  ;;  %v6543_v45 = vor.u32 1.1754944e-38, %v6542_v57  ;;  %vm6716_vm10 = vweird.f32 %v13965_v16 }
 0x5c4   :  { %v7227_v1 = vpack.c.bf16 %v6484_v30, %v6424_v33  ;;  %v13976_v48 = vpop.f32.mrf.mxu2  ;;  %10507 = vpow2.f32 %v9481_v58  ;;  %v6595_v22 = vadd.f32 %v13922_v18, %v6594_v41  ;;  %v6535_v9 = vadd.f32 %v13934_v28, %v6534_v19  ;;  %v15187_v41 = vld [vmem:[#allocation44_spill] sm:$0xff] }
 0x5c5   :  { %10509 = vpow2.f32 %v9477_v24  ;;  %v5795_v30 = vadd.f32 %v13913_v21, %v5746_v51  ;;  %vm6541_vm7 = vcmp.eq.f32.partialorder %v6540_v63, 8.507059e+37  ;;  %vm6656_vm11 = vweird.f32 %v13970_v12 }
 0x5c6   :  { %v6599_v31 = vsel %vm14012_vm4, %v13922_v18, %v6595_v22  ;;  %v6539_v8 = vsel %vm14027_vm5, %v13934_v28, %v6535_v9  ;;  %v5655_v28 = vadd.f32 %v13820_v42, %v13714_v32  ;;  %v15189_v22 = vld [vmem:[#allocation56_spill] sm:$0xff]  ;;  %v15192_v9 = vld [vmem:[#allocation46_spill] sm:$0xff] }
 0x5c7   :  { %v13996_v7 = vpop.eup %10503  ;;  %v6544_v4 = vsel %vm6541_vm7, %v6543_v45, %v6539_v8  ;;  %v15190_v51 = vpack.c.bf16 %v15188_v15, %v15189_v22  ;;  %v5658_v22 = vadd.f32 %v13846_v5, %v13714_v32  ;;  %v15199_v5 = vld [vmem:[#allocation59_spill] sm:$0xff] }
 0x5c8   :  { %v13981_v60 = vpop.f32.mrf.mxu0  ;;  %v6712_v6 = vmul.f32 %v13996_v7, %v13965_v16  ;;  %v5704_v14 = vadd.f32 %v13830_v36, %v5655_v28  ;;  %vm6717_vm8 = vweird.f32 %v13996_v7  ;;  %v6722_v36 = vand.u32 2147483648, %v13965_v16 }
 0x5c9   :  { %v14001_v11 = vpop.f32.mrf.mxu1  ;;  %v14007_v17 = vpop.eup %10505  ;;  %vm14087_vm12 = vmor %vm6716_vm10, %vm6717_vm8 }
 0x5ca   :  { %v13951_v49 = vpop.f32.mrf.mxu3  ;;  %v10508_v59 = vpop.eup %10507  ;;  %v6652_v61 = vmul.f32 %v14007_v17, %v13970_v12  ;;  %v6713_v24 = vsub.f32 1.0, %v6712_v6  ;;  %v5753_v6 = vadd.f32 %v13841_v39, %v5704_v14  ;;  %vm6657_vm9 = vweird.f32 %v14007_v17  ;;  %v15200_v14 = vld [vmem:[#allocation30_spill] sm:$0xff] }
 0x5cb   :  { %v10510_v21 = vpop.eup %10509  ;;  %v5797_v18 = vadd.f32 %v13951_v49, %v5748_v43  ;;  %v14039_v52 = vadd.f32 1.0, %v10508_v59  ;;  %v5653_v49 = vadd.f32 %v13793_v54, %v13714_v32  ;;  %v6662_v39 = vand.u32 2147483648, %v13970_v12  ;;  %vm14101_vm13 = vmor %vm6656_vm11, %vm6657_vm9 }
 0x5cc   :  { %v14023_v40 = vpop.f32.mrf.mxu2  ;;  %v14041_v3 = vadd.f32 1.0, %v10510_v21  ;;  %v6653_v19 = vsub.f32 1.0, %v6652_v61  ;;  %v6714_v56 = vmul.f32 %v13996_v7, %v6713_v24 }
 0x5cd   :  { %10511 = vrcp.f32 %v14039_v52  ;;  %v5702_v42 = vadd.f32 %v13807_v62, %v5653_v49  ;;  %v15194_v62 = vld [vmem:[#allocation58_spill] sm:$0xff]  ;;  %v6663_v28 = vor.u32 1.1754944e-38, %v6662_v39  ;;  %vm6836_vm3 = vweird.f32 %v14039_v52 }
 0x5ce   :  { %v6654_v57 = vmul.f32 %v14007_v17, %v6653_v19  ;;  %v6715_v63 = vadd.f32 %v13996_v7, %v6714_v56  ;;  %v14075_v58 = vperm.slane %v15194_v62, 3  ;;  %vm6776_vm0 = vweird.f32 %v14041_v3 }
 0x5cf   :  { %5994 = vmatmul.bf16.gmra.mxu3 %v15176_v13  ;;  %v6603_v13 = vor.u32 1.1754944e-38, %v6602_v26  ;;  %v15191_v26 = vld [vmem:[#allocation47_spill] sm:$0xff]  ;;  %v5751_v59 = vadd.f32 %v13814_v38, %v5702_v42 }
 0x5d0   :  { %7526 = vmatmul.bf16.gmra.mxu0 %v15179_v0  ;;  %v9485_v0 = vmul.f32 -1.442695, %v5795_v30  ;;  %v15193_v54 = vpack.c.bf16 %v15191_v26, %v15192_v9  ;;  %v6655_v61 = vadd.f32 %v14007_v17, %v6654_v57 }
 0x5d1   :  { %7575 = vmatmul.bf16.gmra.mxu1 %v15182_v47  ;;  %7624 = vmatmul.bf16.gmra.mxu2 %v7227_v1  ;;  %v14034_v1 = vpop.f32.mrf.mxu0  ;;  %v6604_v27 = vsel %vm6601_vm6, %v6603_v13, %v6599_v31  ;;  %v9489_v47 = vmul.f32 -1.442695, %v5797_v18  ;;  %v14052_v55 = vpop.f32.mrf.mxu1  ;;  %v6720_v13 = vand.u32 2147483647, %v13965_v16 }
 0x5d2   :  { %v13990_v23 = vpop.f32.mrf.mxu3  ;;  %v7231_v20 = vpack.c.bf16 %v6604_v27, %v6544_v4  ;;  %10513 = vpow2.f32 %v9485_v0  ;;  %v6719_v0 = vsel %vm14087_vm12, %v13996_v7, %v6715_v63  ;;  %v15202_v63 = vld [vmem:[#allocation49_spill] sm:$0xff] }
 0x5d3   :  { %10515 = vrcp.f32 %v14041_v3  ;;  %v14071_v31 = vpop.eup %10511  ;;  %v5800_v38 = vadd.f32 %v13990_v23, %v5751_v59  ;;  %v6660_v23 = vand.u32 2147483647, %v13970_v12  ;;  %vm6721_vm14 = vcmp.eq.f32.partialorder %v6720_v13, 8.507059e+37 }
 0x5d4   :  { %10517 = vpow2.f32 %v9489_v47  ;;  %v14064_v25 = vpop.f32.mrf.mxu2  ;;  %v6832_v16 = vmul.f32 %v14071_v31, %v14039_v52  ;;  %v6723_v47 = vor.u32 1.1754944e-38, %v6722_v36  ;;  %v15201_v59 = vpack.c.bf16 %v15199_v5, %v15200_v14 }
 0x5d5   :  { %v9493_v7 = vmul.f32 -1.442695, %v5800_v38  ;;  %vm6661_vm15 = vcmp.eq.f32.partialorder %v6660_v23, 8.507059e+37  ;;  %v5821_v36 = vadd.f32 %v13981_v60, %v14075_v58  ;;  %vm6837_vm1 = vweird.f32 %v14071_v31 }
 0x5d6   :  { %v6724_v15 = vsel %vm6721_vm14, %v6723_v47, %v6719_v0  ;;  %v6833_v26 = vsub.f32 1.0, %v6832_v16  ;;  %v6842_v16 = vand.u32 2147483648, %v14039_v52  ;;  %v6840_v47 = vand.u32 2147483647, %v14039_v52  ;;  %vm14169_vm4 = vmor %vm6836_vm3, %vm6837_vm1 }
 0x5d7   :  { %v5870_v0 = vadd.f32 %v14001_v11, %v5821_v36 }
 0x5d8   :  { %v10514_v21 = vpop.eup %10513  ;;  %vm6841_vm7 = vcmp.eq.f32.partialorder %v6840_v47, 8.507059e+37 }
 0x5d9   :  { %v14067_v30 = vpop.f32.mrf.mxu0  ;;  %v14083_v18 = vpop.eup %10515  ;;  %v14097_v24 = vadd.f32 1.0, %v10514_v21 }
 0x5da   :  { %v5801_v33 = vpop.f32.mrf.mxu3  ;;  %v10518_v45 = vpop.eup %10517  ;;  %v6772_v12 = vmul.f32 %v14083_v18, %v14041_v3  ;;  %vm6777_vm2 = vweird.f32 %v14083_v18  ;;  %v5826_v36 = vadd.f32 %v14067_v30, %v14075_v58 }
 0x5db   :  { %v5802_v27 = vadd.f32 %v5801_v33, %v5753_v6  ;;  %v5819_v33 = vadd.f32 %v13928_v29, %v14075_v58  ;;  %v14114_v19 = vadd.f32 1.0, %v10518_v45  ;;  %v5660_v29 = vadd.f32 %v13897_v44, %v13714_v32  ;;  %v15203_v6 = vld [vmem:[#allocation24_spill] sm:$0xff]  ;;  %vm14187_vm5 = vmor %vm6776_vm0, %vm6777_vm2 }
 0x5dc   :  { %10519 = vrcp.f32 %v14097_v24  ;;  %v14121_v9 = vpop.f32.mrf.mxu2  ;;  %v6773_v57 = vsub.f32 1.0, %v6772_v12  ;;  %v5707_v32 = vadd.f32 %v13870_v2, %v5658_v22  ;;  %v15204_v62 = vpack.c.bf16 %v15202_v63, %v15203_v6  ;;  %v10068_v2 = vld [vmem:[#allocation11 + $0xc8] sm:$0xff] }
 0x5dd   :  { %10521 = vpow2.f32 %v9493_v7  ;;  %v5709_v13 = vadd.f32 %v13915_v46, %v5660_v29  ;;  %7666 = vmatpush.bf16.msrb.mxu3 %v10068_v2  ;;  %vm6896_vm8 = vweird.f32 %v14097_v24  ;;  %vm6956_vm11 = vweird.f32 %v14114_v19 }
 0x5de   :  { %10523 = vrcp.f32 %v14114_v19  ;;  %v5756_v38 = vadd.f32 %v13894_v37, %v5707_v32 }
 0x5df   :  { %5999 = vmatmul.bf16.gmra.mxu3 %v15187_v41  ;;  %v14109_v41 = vpop.f32.mrf.mxu1  ;;  %v5758_v8 = vadd.f32 %v13925_v10, %v5709_v13  ;;  %v6780_v10 = vand.u32 2147483647, %v14041_v3 }
 0x5e0   :  { %7531 = vmatmul.bf16.gmra.mxu0 %v15190_v51  ;;  %v9497_v51 = vmul.f32 -1.442695, %v5802_v27 }
 0x5e1   :  { %7580 = vmatmul.bf16.gmra.mxu1 %v15193_v54  ;;  %7629 = vmatmul.bf16.gmra.mxu2 %v7231_v20  ;;  %v6659_v20 = vsel %vm14101_vm13, %v14007_v17, %v6655_v61  ;;  %v5868_v17 = vadd.f32 %v13968_v50, %v5819_v33  ;;  %v14124_v56 = vpop.f32.mrf.mxu0  ;;  %v6834_v50 = vmul.f32 %v14071_v31, %v6833_v26  ;;  %vm14191_vm6 = vcmp.eq.f32.partialorder %v6780_v10, 8.507059e+37 }
 0x5e2   :  { %v14059_v43 = vpop.f32.mrf.mxu3  ;;  %v6664_v54 = vsel %vm6661_vm15, %v6663_v28, %v6659_v20  ;;  %10525 = vpow2.f32 %v9497_v51  ;;  %v14141_v39 = vpop.eup %10519  ;;  %v5919_v33 = vadd.f32 %v14023_v40, %v5870_v0  ;;  %v6782_v20 = vand.u32 2147483648, %v14041_v3 }
 0x5e3   :  { %v7235_v42 = vpack.c.bf16 %v6724_v15, %v6664_v54  ;;  %v5917_v44 = vadd.f32 %v13976_v48, %v5868_v17  ;;  %v6774_v48 = vmul.f32 %v14083_v18, %v6773_v57  ;;  %v10522_v45 = vpop.eup %10521  ;;  %v5805_v46 = vadd.f32 %v14059_v43, %v5756_v38  ;;  %v10067_v15 = vld [vmem:[#allocation11 + $0xc0] sm:$0xff] }
 0x5e4   :  { %v6835_v60 = vadd.f32 %v14071_v31, %v6834_v50  ;;  %v14150_v37 = vpop.eup %10523  ;;  %v6892_v12 = vmul.f32 %v14141_v39, %v14097_v24  ;;  %v14162_v11 = vadd.f32 1.0, %v10522_v45  ;;  %v14164_v7 = vpop.f32.mrf.mxu2  ;;  %7667 = vmatpush.bf16.msrb.mxu3 %v10067_v15  ;;  %v6783_v3 = vor.u32 1.1754944e-38, %v6782_v20  ;;  %v15212_v38 = vld [vmem:[#allocation31_spill] sm:$0xff] }
 0x5e5   :  { %v6775_v43 = vadd.f32 %v14083_v18, %v6774_v48  ;;  %v9501_v22 = vmul.f32 -1.442695, %v5805_v46  ;;  %v6952_v26 = vmul.f32 %v14150_v37, %v14114_v19  ;;  %vm6897_vm9 = vweird.f32 %v14141_v39 }
 0x5e6   :  { %v6839_v40 = vsel %vm14169_vm4, %v14071_v31, %v6835_v60  ;;  %v5824_v31 = vadd.f32 %v14034_v1, %v14075_v58  ;;  %vm6957_vm10 = vweird.f32 %v14150_v37  ;;  %vm14256_vm12 = vmor %vm6896_vm8, %vm6897_vm9  ;;  %vm7016_vm3 = vweird.f32 %v14162_v11 }
 0x5e7   :  { %v14145_v27 = vpop.f32.mrf.mxu1  ;;  %v6779_v5 = vsel %vm14187_vm5, %v14083_v18, %v6775_v43  ;;  %v6953_v6 = vsub.f32 1.0, %v6952_v26  ;;  %v5875_v43 = vadd.f32 %v14109_v41, %v5826_v36  ;;  %v6960_v41 = vand.u32 2147483647, %v14114_v19  ;;  %vm14268_vm14 = vmor %vm6956_vm11, %vm6957_vm10 }
 0x5e8   :  { %v10526_v49 = vpop.eup %10525  ;;  %v6784_v1 = vsel %vm14191_vm6, %v6783_v3, %v6779_v5  ;;  %v5873_v18 = vadd.f32 %v14052_v55, %v5824_v31  ;;  %v15215_v55 = vld [vmem:[#allocation50_spill] sm:$0xff]  ;;  %v7020_v36 = vand.u32 2147483647, %v14162_v11 }
 0x5e9   :  { %v14173_v52 = vpop.f32.mrf.mxu0  ;;  %v14181_v29 = vadd.f32 1.0, %v10526_v49  ;;  %v6954_v46 = vmul.f32 %v14150_v37, %v6953_v6  ;;  %vm6961_vm15 = vcmp.eq.f32.partialorder %v6960_v41, 8.507059e+37 }
 0x5ea   :  { %v14099_v4 = vpop.f32.mrf.mxu3  ;;  %v5922_v48 = vadd.f32 %v14064_v25, %v5873_v18  ;;  %v6900_v25 = vand.u32 2147483647, %v14097_v24 }
 0x5eb   :  { %v5807_v51 = vadd.f32 %v14099_v4, %v5758_v8  ;;  %v15214_v8 = vld [vmem:[#allocation28_spill] sm:$0xff]  ;;  %v6955_v15 = vadd.f32 %v14150_v37, %v6954_v46  ;;  %vm7076_vm1 = vweird.f32 %v14181_v29 }
 0x5ec   :  { %v15216_v45 = vpack.c.bf16 %v15214_v8, %v15215_v55  ;;  %v14223_v30 = vpop.f32.mrf.mxu2  ;;  %vm14262_vm13 = vcmp.eq.f32.partialorder %v6900_v25, 8.507059e+37  ;;  %v15224_v25 = vld [vmem:[#allocation62_spill] sm:$0xff] }
 0x5ed   :  { %v6959_v3 = vsel %vm14268_vm14, %v14150_v37, %v6955_v15 }
 0x5ef   :  { %v14207_v50 = vpop.f32.mrf.mxu1 }
 0x5f0   :  { %7536 = vmatmul.bf16.gmra.mxu0 %v15201_v59  ;;  %v6893_v59 = vsub.f32 1.0, %v6892_v12  ;;  %v6902_v12 = vand.u32 2147483648, %v14097_v24 }
 0x5f1   :  { %7585 = vmatmul.bf16.gmra.mxu1 %v15204_v62  ;;  %7634 = vmatmul.bf16.gmra.mxu2 %v7235_v42  ;;  %v6843_v42 = vor.u32 1.1754944e-38, %v6842_v16  ;;  %v14225_v10 = vpop.f32.mrf.mxu0 }
 0x5f2   :  { %v5965_v21 = vpop.f32.mrf.mxu3  ;;  %v6894_v2 = vmul.f32 %v14141_v39, %v6893_v59  ;;  %v5831_v59 = vadd.f32 %v14173_v52, %v14075_v58 }
 0x5f3   :  { %v5966_v61 = vadd.f32 %v5965_v21, %v5917_v44  ;;  %v6844_v14 = vsel %vm6841_vm7, %v6843_v42, %v6839_v40  ;;  %v9505_v44 = vmul.f32 -1.442695, %v5807_v51  ;;  %v15211_v21 = vld [vmem:[#allocation32_spill] sm:$0xff]  ;;  %v6962_v40 = vand.u32 2147483648, %v14114_v19 }
 0x5f4   :  { %v7239_v13 = vpack.c.bf16 %v6844_v14, %v6784_v1  ;;  %v6895_v47 = vadd.f32 %v14141_v39, %v6894_v2  ;;  %v5924_v19 = vadd.f32 %v14121_v9, %v5875_v43 }
 0x5f5   :  { %v9446_v23 = vmul.f32 -1.442695, %v5966_v61  ;;  %v15213_v61 = vpack.c.bf16 %v15211_v21, %v15212_v38  ;;  %v6963_v6 = vor.u32 1.1754944e-38, %v6962_v40 }
 0x5f6   :  { %v6899_v9 = vsel %vm14256_vm12, %v14141_v39, %v6895_v47  ;;  %v14288_v39 = vpop.f32.mrf.mxu2  ;;  %v7082_v47 = vand.u32 2147483648, %v14181_v29 }
 0x5f7   :  { %10527 = vpow2.f32 %v9446_v23 }
 0x5f8   :  { %10529 = vrcp.f32 %v14162_v11 }
 0x5f9   :  { %10531 = vpow2.f32 %v9501_v22 }
 0x5fa   :  { %v5967_v54 = vpop.f32.mrf.mxu3  ;;  %10533 = vrcp.f32 %v14181_v29 }
 0x5fb   :  { %v5968_v57 = vadd.f32 %v5967_v54, %v5919_v33  ;;  %v5829_v54 = vadd.f32 %v14124_v56, %v14075_v58 }
 0x5fd   :  { %v10528_v32 = vpop.eup %10527  ;;  %v9450_v63 = vmul.f32 -1.442695, %v5968_v57  ;;  %v14274_v57 = vpop.f32.mrf.mxu1  ;;  %v5878_v1 = vadd.f32 %v14145_v27, %v5829_v54 }
 0x5fe   :  { %v14202_v62 = vadd.f32 1.0, %v10528_v32  ;;  %v14221_v23 = vpop.eup %10529 }
 0x5ff   :  { %10535 = vpow2.f32 %v9450_v63  ;;  %v10532_v0 = vpop.eup %10531  ;;  %v7012_v20 = vmul.f32 %v14221_v23, %v14162_v11  ;;  %v6903_v63 = vor.u32 1.1754944e-38, %v6902_v12  ;;  %v5927_v55 = vadd.f32 %v14164_v7, %v5878_v1 }
 0x600   :  { %10537 = vrcp.f32 %v14202_v62  ;;  %7541 = vmatmul.bf16.gmra.mxu0 %v15213_v61  ;;  %v14229_v49 = vpop.eup %10533  ;;  %v14248_v17 = vadd.f32 1.0, %v10532_v0  ;;  %v14294_v61 = vpop.f32.mrf.mxu0  ;;  %vm7017_vm0 = vweird.f32 %v14221_v23  ;;  %vm6311_vm4 = vweird.f32 %v14202_v62 }
 0x601   :  { %10539 = vpow2.f32 %v9505_v44  ;;  %7590 = vmatmul.bf16.gmra.mxu1 %v15216_v45  ;;  %7639 = vmatmul.bf16.gmra.mxu2 %v7239_v13  ;;  %v7072_v24 = vmul.f32 %v14229_v49, %v14181_v29  ;;  %v7013_v14 = vsub.f32 1.0, %v7012_v20  ;;  %v6904_v37 = vsel %vm14262_vm13, %v6903_v63, %v6899_v9  ;;  %v15226_v20 = vld [vmem:[#allocation53_spill] sm:$0xff]  ;;  %vm14379_vm13 = vmor %vm7016_vm3, %vm7017_vm0 }
 0x602   :  { %v5970_v60 = vpop.f32.mrf.mxu3  ;;  %v6964_v13 = vsel %vm6961_vm15, %v6963_v6, %v6959_v3  ;;  %v5880_v45 = vadd.f32 %v14207_v50, %v5831_v59  ;;  %v7080_v50 = vand.u32 2147483647, %v14181_v29  ;;  %v6315_v42 = vand.u32 2147483647, %v14202_v62 }
 0x603   :  { %v5971_v16 = vadd.f32 %v5970_v60, %v5922_v48  ;;  %v7073_v52 = vsub.f32 1.0, %v7072_v24  ;;  %v7014_v27 = vmul.f32 %v14221_v23, %v7013_v14  ;;  %v7022_v48 = vand.u32 2147483648, %v14162_v11  ;;  %v15235_v11 = vld [vmem:[#allocation65_spill] sm:$0xff] }
 0x604   :  { %v7243_v0 = vpack.c.bf16 %v6964_v13, %v6904_v37  ;;  %v5834_v3 = vadd.f32 %v14225_v10, %v14075_v58  ;;  %vm7077_vm7 = vweird.f32 %v14229_v49  ;;  %vm6316_vm9 = vcmp.eq.f32.partialorder %v6315_v42, 8.507059e+37 }
 0x605   :  { %v10536_v33 = vpop.eup %10535  ;;  %v9454_v28 = vmul.f32 -1.442695, %v5971_v16  ;;  %v15223_v16 = vld [vmem:[#allocation34_spill] sm:$0xff]  ;;  %v7074_v7 = vmul.f32 %v14229_v49, %v7073_v52  ;;  %v14321_v40 = vadd.f32 %v14221_v23, %v7014_v27  ;;  %vm14365_vm12 = vmor %vm7076_vm1, %vm7077_vm7  ;;  %vm7081_vm14 = vcmp.eq.f32.partialorder %v7080_v50, 8.507059e+37 }
 0x606   :  { %v14239_v22 = vpop.eup %10537  ;;  %v14241_v51 = vadd.f32 1.0, %v10536_v33  ;;  %v15225_v43 = vpack.c.bf16 %v15223_v16, %v15224_v25  ;;  %v7023_v25 = vor.u32 1.1754944e-38, %v7022_v48  ;;  %vm7021_vm15 = vcmp.eq.f32.partialorder %v7020_v36, 8.507059e+37  ;;  %v15236_v36 = vld [vmem:[#allocation35_spill] sm:$0xff] }
 0x607   :  { %v10540_v26 = vpop.eup %10539  ;;  %v6307_v4 = vmul.f32 %v14239_v22, %v14202_v62  ;;  %10541 = vpow2.f32 %v9454_v28  ;;  %vm6312_vm2 = vweird.f32 %v14239_v22  ;;  %v15227_v28 = vld [vmem:[#allocation52_spill] sm:$0xff]  ;;  %vm7136_vm3 = vweird.f32 %v14248_v17 }
 0x608   :  { %10543 = vrcp.f32 %v14241_v51  ;;  %v14284_v32 = vadd.f32 1.0, %v10540_v26  ;;  %v15228_v15 = vpack.c.bf16 %v15226_v20, %v15227_v28  ;;  %v6317_v26 = vand.u32 2147483648, %v14202_v62  ;;  %vm14339_vm6 = vmor %vm6311_vm4, %vm6312_vm2  ;;  %v14356_v52 = vpop.f32.mrf.mxu0 }
 0x609   :  { %v6308_v5 = vsub.f32 1.0, %v6307_v4  ;;  %10545 = vrcp.f32 %v14248_v17  ;;  %v6377_v54 = vand.u32 2147483648, %v14241_v51  ;;  %v6375_v24 = vand.u32 2147483647, %v14241_v51 }
 0x60a   :  { %v5972_v44 = vpop.f32.mrf.mxu3  ;;  %10547 = vrcp.f32 %v14284_v32  ;;  %v7075_v62 = vadd.f32 %v14229_v49, %v7074_v7  ;;  %vm6371_vm8 = vweird.f32 %v14241_v51  ;;  %v6318_v1 = vor.u32 1.1754944e-38, %v6317_v26 }
 0x60b   :  { %v5973_v18 = vadd.f32 %v5972_v44, %v5924_v19  ;;  %v6309_v38 = vmul.f32 %v14239_v22, %v6308_v5  ;;  %v5884_v19 = vpop.f32.mrf.mxu1  ;;  %v6378_v13 = vor.u32 1.1754944e-38, %v6377_v54  ;;  %vm6376_vm11 = vcmp.eq.f32.partialorder %v6375_v24, 8.507059e+37  ;;  %v15238_v24 = vld [vmem:[#allocation57_spill] sm:$0xff] }
 0x60c   :  { %v5883_v7 = vadd.f32 %v14274_v57, %v5834_v3  ;;  %v7140_v57 = vand.u32 2147483647, %v14248_v17  ;;  %vm7196_vm1 = vweird.f32 %v14284_v32 }
 0x60d   :  { %v10542_v21 = vpop.eup %10541  ;;  %v9458_v2 = vmul.f32 -1.442695, %v5973_v18  ;;  %v6310_v41 = vadd.f32 %v14239_v22, %v6309_v38  ;;  %v14351_v18 = vpop.f32.mrf.mxu2 }
 0x60e   :  { %v10544_v8 = vpop.eup %10543  ;;  %v14301_v46 = vadd.f32 1.0, %v10542_v21  ;;  %v5932_v26 = vadd.f32 %v14288_v39, %v5883_v7 }
 0x60f   :  { %v6367_v60 = vmul.f32 %v10544_v8, %v14241_v51  ;;  %10549 = vpow2.f32 %v9458_v2  ;;  %v14313_v12 = vpop.eup %10545  ;;  %vm6372_vm5 = vweird.f32 %v10544_v8  ;;  %v6314_v63 = vsel %vm14339_vm6, %v14239_v22, %v6310_v41 }
 0x610   :  { %10551 = vrcp.f32 %v14301_v46  ;;  %7546 = vmatmul.bf16.gmra.mxu0 %v15225_v43  ;;  %v14329_v5 = vpop.eup %10547  ;;  %v14333_v9 = vmul.f32 %v14313_v12, %v14248_v17  ;;  %vm6373_vm10 = vmor %vm6371_vm8, %vm6372_vm5  ;;  %v6319_v22 = vsel %vm6316_vm9, %v6318_v1, %v6314_v63  ;;  %v7083_v43 = vor.u32 1.1754944e-38, %v7082_v47 }
 0x611   :  { %v6368_v33 = vsub.f32 1.0, %v6367_v60  ;;  %7595 = vmatmul.bf16.gmra.mxu1 %v15228_v15  ;;  %7644 = vmatmul.bf16.gmra.mxu2 %v7243_v0  ;;  %v7192_v27 = vmul.f32 %v14329_v5, %v14284_v32  ;;  %vm7137_vm0 = vweird.f32 %v14313_v12  ;;  %vm6431_vm4 = vweird.f32 %v14301_v46 }
 0x612   :  { %v5975_v4 = vpop.f32.mrf.mxu3  ;;  %v7133_v20 = vsub.f32 1.0, %v14333_v9  ;;  %v15239_v9 = vld [vmem:[#allocation33_spill] sm:$0xff]  ;;  %v6435_v63 = vand.u32 2147483647, %v14301_v46  ;;  %vm7197_vm7 = vweird.f32 %v14329_v5 }
 0x613   :  { %v6369_v56 = vmul.f32 %v10544_v8, %v6368_v33  ;;  %v5976_v31 = vadd.f32 %v5975_v4, %v5927_v55  ;;  %v5929_v55 = vadd.f32 %v14223_v30, %v5880_v45  ;;  %v5836_v30 = vadd.f32 %v14294_v61, %v14075_v58  ;;  %v14393_v48 = vpop.f32.mrf.mxu1 }
 0x614   :  { %v7193_v28 = vsub.f32 1.0, %v7192_v27  ;;  %v7134_v39 = vmul.f32 %v14313_v12, %v7133_v20  ;;  %v15240_v3 = vpack.c.bf16 %v15238_v24, %v15239_v9  ;;  %v7202_v27 = vand.u32 2147483648, %v14284_v32 }
 0x615   :  { %v10550_v59 = vpop.eup %10549  ;;  %v9462_v44 = vmul.f32 -1.442695, %v5976_v31  ;;  %v6370_v6 = vadd.f32 %v10544_v8, %v6369_v56  ;;  %v14404_v42 = vpop.f32.mrf.mxu2  ;;  %v15237_v56 = vpack.c.bf16 %v15235_v11, %v15236_v36  ;;  %vm6436_vm9 = vcmp.eq.f32.partialorder %v6435_v63, 8.507059e+37 }
 0x616   :  { %v14349_v10 = vpop.eup %10551  ;;  %v14353_v37 = vadd.f32 1.0, %v10550_v59  ;;  %v7194_v31 = vmul.f32 %v14329_v5, %v7193_v28  ;;  %v7200_v59 = vand.u32 2147483647, %v14284_v32 }
 0x617   :  { %v6427_v51 = vmul.f32 %v14349_v10, %v14301_v46  ;;  %10553 = vpow2.f32 %v9462_v44  ;;  %v6374_v21 = vsel %vm6373_vm10, %v10544_v8, %v6370_v6  ;;  %v7079_v8 = vsel %vm14365_vm12, %v14229_v49, %v7075_v62  ;;  %vm14452_vm12 = vmor %vm7196_vm1, %vm7197_vm7 }
 0x618   :  { %10555 = vrcp.f32 %v14353_v37  ;;  %v6379_v38 = vsel %vm6376_vm11, %v6378_v13, %v6374_v21  ;;  %v7019_v49 = vsel %vm14379_vm13, %v14221_v23, %v14321_v40  ;;  %v7084_v33 = vsel %vm7081_vm14, %v7083_v43, %v7079_v8  ;;  %vm14466_vm13 = vmor %vm7136_vm3, %vm7137_vm0 }
 0x619   :  { %v7224_v60 = vpack.c.bf16 %v6379_v38, %v6319_v22  ;;  %v6428_v0 = vsub.f32 1.0, %v6427_v51  ;;  %v7024_v50 = vsel %vm7021_vm15, %v7023_v25, %v7019_v49  ;;  %v5885_v40 = vadd.f32 %v5884_v19, %v5836_v30  ;;  %v14413_v19 = vpop.f32.mrf.mxu0 }
 0x61a   :  { %v5977_v16 = vpop.f32.mrf.mxu3  ;;  %v7247_v54 = vpack.c.bf16 %v7084_v33, %v7024_v50  ;;  %vm6432_vm2 = vweird.f32 %v14349_v10  ;;  %v6437_v6 = vand.u32 2147483648, %v14301_v46  ;;  %v6497_v1 = vand.u32 2147483648, %v14353_v37 }
 0x61b   :  { %v5978_v45 = vadd.f32 %v5977_v16, %v5929_v55  ;;  %7668 = vmatmul.bf16.vlgmr.msrb.gmra.mxu3 %v7224_v60  ;;  %v6429_v61 = vmul.f32 %v14349_v10, %v6428_v0  ;;  %v6495_v21 = vand.u32 2147483647, %v14353_v37  ;;  %vm14427_vm6 = vmor %vm6431_vm4, %vm6432_vm2  ;;  %v7135_v38 = vadd.f32 %v14313_v12, %v7134_v39  ;;  %v5889_v43 = vpop.f32.mrf.mxu1 }
 0x61c   :  { %v7195_v2 = vadd.f32 %v14329_v5, %v7194_v31  ;;  %vm6491_vm8 = vweird.f32 %v14353_v37  ;;  %v6438_v29 = vor.u32 1.1754944e-38, %v6437_v6  ;;  %v6498_v25 = vor.u32 1.1754944e-38, %v6497_v1 }
 0x61d   :  { %v10554_v15 = vpop.eup %10553  ;;  %v9466_v47 = vmul.f32 -1.442695, %v5978_v45  ;;  %v6430_v14 = vadd.f32 %v14349_v10, %v6429_v61  ;;  %vm6496_vm11 = vcmp.eq.f32.partialorder %v6495_v21, 8.507059e+37  ;;  %v7142_v49 = vand.u32 2147483648, %v14248_v17  ;;  %v15248_v17 = vld [vmem:[#allocation38_spill] sm:$0xff] }
 0x61e   :  { %v10556_v41 = vpop.eup %10555  ;;  %v14399_v23 = vadd.f32 1.0, %v10554_v15  ;;  %v5934_v33 = vadd.f32 %v14351_v18, %v5885_v40  ;;  %v7199_v28 = vsel %vm14452_vm12, %v14329_v5, %v7195_v2  ;;  %v5839_v18 = vadd.f32 %v14356_v52, %v14075_v58 }
 0x61f   :  { %10557 = vpow2.f32 %v9466_v47  ;;  %v6487_v4 = vmul.f32 %v10556_v41, %v14353_v37  ;;  %vm6492_vm5 = vweird.f32 %v10556_v41  ;;  %v6434_v60 = vsel %vm14427_vm6, %v14349_v10, %v6430_v14  ;;  %v14460_v47 = vpop.f32.mrf.mxu2 }
 0x620   :  { %10559 = vrcp.f32 %v14399_v23  ;;  %7551 = vmatmul.bf16.gmra.mxu0 %v15237_v56  ;;  %vm6493_vm10 = vmor %vm6491_vm8, %vm6492_vm5  ;;  %v6439_v10 = vsel %vm6436_vm9, %v6438_v29, %v6434_v60  ;;  %v7139_v5 = vsel %vm14466_vm13, %v14313_v12, %v7135_v38  ;;  %vm7201_vm14 = vcmp.eq.f32.partialorder %v7200_v59, 8.507059e+37 }
 0x621   :  { %7600 = vmatmul.bf16.gmra.mxu1 %v15240_v3  ;;  %7649 = vmatmul.bf16.gmra.mxu2 %v7247_v54  ;;  %v6488_v62 = vsub.f32 1.0, %v6487_v4  ;;  %v7143_v40 = vor.u32 1.1754944e-38, %v7142_v49  ;;  %vm7141_vm15 = vcmp.eq.f32.partialorder %v7140_v57, 8.507059e+37  ;;  %v5888_v31 = vadd.f32 %v14393_v48, %v5839_v18  ;;  %v15247_v3 = vld [vmem:[#allocation39_spill] sm:$0xff] }
 0x622   :  { %v5980_v44 = vpop.f32.mrf.mxu3  ;;  %v5841_v9 = vadd.f32 %v14413_v19, %v14075_v58  ;;  %v15249_v57 = vpack.c.bf16 %v15247_v3, %v15248_v17  ;;  %vm6551_vm1 = vweird.f32 %v14399_v23  ;;  %v6557_v63 = vand.u32 2147483648, %v14399_v23 }
 0x623   :  { %v5981_v13 = vadd.f32 %v5980_v44, %v5932_v26  ;;  %v6489_v51 = vmul.f32 %v10556_v41, %v6488_v62  ;;  %v14472_v26 = vpop.f32.mrf.mxu0  ;;  %v7144_v39 = vsel %vm7141_vm15, %v7143_v40, %v7139_v5  ;;  %v5937_v14 = vadd.f32 %v14404_v42, %v5888_v31  ;;  %v5892_v62 = vpop.f32.mrf.mxu1 }
 0x624   :  { %v6555_v44 = vand.u32 2147483647, %v14399_v23  ;;  %v5890_v35 = vadd.f32 %v5889_v43, %v5841_v9 }
 0x625   :  { %v10558_v46 = vpop.eup %10557  ;;  %v9470_v55 = vmul.f32 -1.442695, %v5981_v13  ;;  %v6490_v8 = vadd.f32 %v10556_v41, %v6489_v51 }
 0x626   :  { %v14439_v0 = vpop.eup %10559  ;;  %v14441_v16 = vadd.f32 1.0, %v10558_v46  ;;  %vm6556_vm5 = vcmp.eq.f32.partialorder %v6555_v44, 8.507059e+37  ;;  %v6558_v46 = vor.u32 1.1754944e-38, %v6557_v63 }
 0x627   :  { %v6547_v30 = vmul.f32 %v14439_v0, %v14399_v23  ;;  %10561 = vpow2.f32 %v9470_v55  ;;  %v6494_v45 = vsel %vm6493_vm10, %v10556_v41, %v6490_v8  ;;  %v7203_v41 = vor.u32 1.1754944e-38, %v7202_v27 }
 0x628   :  { %10563 = vrcp.f32 %v14441_v16  ;;  %v6499_v37 = vsel %vm6496_vm11, %v6498_v25, %v6494_v45  ;;  %vm6552_vm0 = vweird.f32 %v14439_v0  ;;  %v6617_v42 = vand.u32 2147483648, %v14441_v16 }
 0x629   :  { %v7228_v20 = vpack.c.bf16 %v6499_v37, %v6439_v10  ;;  %v6548_v15 = vsub.f32 1.0, %v6547_v30  ;;  %v7204_v54 = vsel %vm7201_vm14, %v7203_v41, %v7199_v28  ;;  %v6615_v53 = vand.u32 2147483647, %v14441_v16  ;;  %vm14501_vm3 = vmor %vm6551_vm1, %vm6552_vm0 }
 0x62a   :  { %v5982_v61 = vpop.f32.mrf.mxu3  ;;  %v7251_v24 = vpack.c.bf16 %v7204_v54, %v7144_v39  ;;  %vm6611_vm4 = vweird.f32 %v14441_v16  ;;  %v6618_v55 = vor.u32 1.1754944e-38, %v6617_v42  ;;  %v5844_v45 = vadd.f32 %v14472_v26, %v14075_v58 }
 0x62b   :  { %v5983_v50 = vadd.f32 %v5982_v61, %v5934_v33  ;;  %7673 = vmatmul.bf16.gmra.mxu3 %v7228_v20  ;;  %v6549_v36 = vmul.f32 %v14439_v0, %v6548_v15  ;;  %v5845_v21 = vpop.f32.mrf.mxu0  ;;  %vm6616_vm7 = vcmp.eq.f32.partialorder %v6615_v53, 8.507059e+37  ;;  %v5894_v10 = vpop.f32.mrf.mxu1 }
 0x62c   :  { %v5893_v61 = vadd.f32 %v5892_v62, %v5844_v45  ;;  %v5846_v41 = vadd.f32 %v5845_v21, %v14075_v58 }
 0x62d   :  { %v10562_v4 = vpop.eup %10561  ;;  %v9474_v11 = vmul.f32 -1.442695, %v5983_v50  ;;  %v6550_v48 = vadd.f32 %v14439_v0, %v6549_v36 }
 0x62e   :  { %v10564_v56 = vpop.eup %10563  ;;  %v14480_v52 = vadd.f32 1.0, %v10562_v4  ;;  %v5895_v39 = vadd.f32 %v5894_v10, %v5846_v41 }
 0x62f   :  { %10565 = vpow2.f32 %v9474_v11  ;;  %v6607_v12 = vmul.f32 %v10564_v56, %v14441_v16  ;;  %vm6612_vm2 = vweird.f32 %v10564_v56  ;;  %v6554_v23 = vsel %vm14501_vm3, %v14439_v0, %v6550_v48 }
 0x630   :  { %10567 = vrcp.f32 %v14480_v52  ;;  %7556 = vmatmul.bf16.gmra.mxu0 %v15249_v57  ;;  %vm6613_vm6 = vmor %vm6611_vm4, %vm6612_vm2  ;;  %v6559_v0 = vsel %vm6556_vm5, %v6558_v46, %v6554_v23  ;;  %v5939_v16 = vadd.f32 %v14460_v47, %v5890_v35  ;;  %vm6671_vm9 = vweird.f32 %v14480_v52 }
 0x631   :  { %7605 = vmatmul.bf16.gmra.mxu1 %v7250_v34  ;;  %7654 = vmatmul.bf16.gmra.mxu2 %v7251_v24  ;;  %v6608_v59 = vsub.f32 1.0, %v6607_v12  ;;  %v5941_v34 = vpop.f32.mrf.mxu2  ;;  %v6675_v40 = vand.u32 2147483647, %v14480_v52  ;;  %v6677_v54 = vand.u32 2147483648, %v14480_v52 }
 0x632   :  { %v5985_v19 = vpop.f32.mrf.mxu3  ;;  %v5942_v18 = vadd.f32 %v5941_v34, %v5893_v61 }
 0x633   :  { %v5986_v6 = vadd.f32 %v5985_v19, %v5937_v14  ;;  %v6609_v1 = vmul.f32 %v10564_v56, %v6608_v59  ;;  %v5848_v32 = vpop.f32.mrf.mxu0  ;;  %v5897_v12 = vpop.f32.mrf.mxu1  ;;  %vm6676_vm13 = vcmp.eq.f32.partialorder %v6675_v40, 8.507059e+37  ;;  %v6678_v14 = vor.u32 1.1754944e-38, %v6677_v54 }
 0x634   :  { %v5849_v34 = vadd.f32 %v5848_v32, %v14075_v58 }
 0x635   :  { %v10566_v51 = vpop.eup %10565  ;;  %v9478_v22 = vmul.f32 -1.442695, %v5986_v6  ;;  %v6610_v38 = vadd.f32 %v10564_v56, %v6609_v1 }
 0x636   :  { %v14509_v2 = vpop.eup %10567  ;;  %v14511_v27 = vadd.f32 1.0, %v10566_v51 }
 0x637   :  { %v6667_v60 = vmul.f32 %v14509_v2, %v14480_v52  ;;  %10569 = vpow2.f32 %v9478_v22  ;;  %v6614_v8 = vsel %vm6613_vm6, %v10564_v56, %v6610_v38  ;;  %vm6672_vm8 = vweird.f32 %v14509_v2 }
 0x638   :  { %10571 = vrcp.f32 %v14511_v27  ;;  %v6619_v29 = vsel %vm6616_vm7, %v6618_v55, %v6614_v8  ;;  %v6737_v4 = vand.u32 2147483648, %v14511_v27  ;;  %v6735_v56 = vand.u32 2147483647, %v14511_v27  ;;  %vm14533_vm11 = vmor %vm6671_vm9, %vm6672_vm8 }
 0x639   :  { %v7232_v25 = vpack.c.bf16 %v6619_v29, %v6559_v0  ;;  %v6668_v43 = vsub.f32 1.0, %v6667_v60  ;;  %v5943_v28 = vpop.f32.mrf.mxu2  ;;  %vm6731_vm12 = vweird.f32 %v14511_v27 }
 0x63a   :  { %v5987_v30 = vpop.f32.mrf.mxu3  ;;  %v6738_v62 = vor.u32 1.1754944e-38, %v6737_v4  ;;  %vm6736_vm15 = vcmp.eq.f32.partialorder %v6735_v56, 8.507059e+37  ;;  %v5944_v42 = vadd.f32 %v5943_v28, %v5895_v39 }
 0x63b   :  { %v5988_v37 = vadd.f32 %v5987_v30, %v5939_v16  ;;  %7678 = vmatmul.bf16.gmra.mxu3 %v7232_v25  ;;  %v6669_v33 = vmul.f32 %v14509_v2, %v6668_v43  ;;  %v5850_v6 = vpop.f32.mrf.mxu0 }
 0x63c   :  { %v5851_v55 = vadd.f32 %v5850_v6, %v14075_v58 }
 0x63d   :  { %v10570_v49 = vpop.eup %10569  ;;  %v9482_v7 = vmul.f32 -1.442695, %v5988_v37  ;;  %v6670_v26 = vadd.f32 %v14509_v2, %v6669_v33 }
 0x63e   :  { %v10572_v20 = vpop.eup %10571  ;;  %v14521_v15 = vadd.f32 1.0, %v10570_v49 }
 0x63f   :  { %10573 = vpow2.f32 %v9482_v7  ;;  %v6727_v47 = vmul.f32 %v10572_v20, %v14511_v27  ;;  %vm6732_vm10 = vweird.f32 %v10572_v20  ;;  %v6674_v3 = vsel %vm14533_vm11, %v14509_v2, %v6670_v26  ;;  %v5899_v27 = vpop.f32.mrf.mxu1 }
 0x640   :  { %10575 = vrcp.f32 %v14521_v15  ;;  %vm6733_vm14 = vmor %vm6731_vm12, %vm6732_vm10  ;;  %v6679_v44 = vsel %vm6676_vm13, %v6678_v14, %v6674_v3  ;;  %v5898_v2 = vadd.f32 %v5897_v12, %v5849_v34  ;;  %vm6791_vm1 = vweird.f32 %v14521_v15 }
 0x641   :  { %v6728_v50 = vsub.f32 1.0, %v6727_v47  ;;  %v5946_v19 = vpop.f32.mrf.mxu2  ;;  %v6795_v25 = vand.u32 2147483647, %v14521_v15  ;;  %v6797_v43 = vand.u32 2147483648, %v14521_v15  ;;  %v5900_v7 = vadd.f32 %v5899_v27, %v5851_v55 }
 0x642   :  { %v5990_v5 = vpop.f32.mrf.mxu3  ;;  %v5947_v60 = vadd.f32 %v5946_v19, %v5898_v2 }
 0x643   :  { %v5991_v11 = vadd.f32 %v5990_v5, %v5942_v18  ;;  %v6729_v36 = vmul.f32 %v10572_v20, %v6728_v50  ;;  %v5853_v45 = vpop.f32.mrf.mxu0  ;;  %vm6796_vm5 = vcmp.eq.f32.partialorder %v6795_v25, 8.507059e+37  ;;  %v6798_v41 = vor.u32 1.1754944e-38, %v6797_v43 }
 0x644   :  { %v5854_v39 = vadd.f32 %v5853_v45, %v14075_v58 }
 0x645   :  { %v10574_v24 = vpop.eup %10573  ;;  %v9486_v9 = vmul.f32 -1.442695, %v5991_v11  ;;  %v6730_v52 = vadd.f32 %v10572_v20, %v6729_v36 }
 0x646   :  { %v14541_v17 = vpop.eup %10575  ;;  %v14543_v57 = vadd.f32 1.0, %v10574_v24 }
 0x647   :  { %v6787_v48 = vmul.f32 %v14541_v17, %v14521_v15  ;;  %10577 = vpow2.f32 %v9486_v9  ;;  %v6734_v59 = vsel %vm6733_vm14, %v10572_v20, %v6730_v52  ;;  %vm6792_vm0 = vweird.f32 %v14541_v17  ;;  %v5902_v4 = vpop.f32.mrf.mxu1 }
 0x648   :  { %10579 = vrcp.f32 %v14543_v57  ;;  %v6739_v63 = vsel %vm6736_vm15, %v6738_v62, %v6734_v59  ;;  %v6857_v30 = vand.u32 2147483648, %v14543_v57  ;;  %v6855_v49 = vand.u32 2147483647, %v14543_v57  ;;  %vm14562_vm3 = vmor %vm6791_vm1, %vm6792_vm0 }
 0x649   :  { %v7236_v1 = vpack.c.bf16 %v6739_v63, %v6679_v44  ;;  %v6788_v53 = vsub.f32 1.0, %v6787_v48  ;;  %v5948_v29 = vpop.f32.mrf.mxu2  ;;  %vm6851_vm4 = vweird.f32 %v14543_v57  ;;  %v5903_v14 = vadd.f32 %v5902_v4, %v5854_v39 }
 0x64a   :  { %v5992_v35 = vpop.f32.mrf.mxu3  ;;  %v6858_v18 = vor.u32 1.1754944e-38, %v6857_v30  ;;  %vm6856_vm7 = vcmp.eq.f32.partialorder %v6855_v49, 8.507059e+37  ;;  %v5949_v54 = vadd.f32 %v5948_v29, %v5900_v7 }
 0x64b   :  { %v5993_v13 = vadd.f32 %v5992_v35, %v5944_v42  ;;  %7683 = vmatmul.bf16.gmra.mxu3 %v7236_v1  ;;  %v6789_v22 = vmul.f32 %v14541_v17, %v6788_v53  ;;  %v5855_v9 = vpop.f32.mrf.mxu0 }
 0x64c   :  { %v5856_v48 = vadd.f32 %v5855_v9, %v14075_v58 }
 0x64d   :  { %v10578_v51 = vpop.eup %10577  ;;  %v9490_v21 = vmul.f32 -1.442695, %v5993_v13  ;;  %v6790_v8 = vadd.f32 %v14541_v17, %v6789_v22 }
 0x64e   :  { %v10580_v23 = vpop.eup %10579  ;;  %v14550_v38 = vadd.f32 1.0, %v10578_v51 }
 0x64f   :  { %v6847_v46 = vmul.f32 %v10580_v23, %v14543_v57  ;;  %10581 = vpow2.f32 %v9490_v21  ;;  %vm6852_vm2 = vweird.f32 %v10580_v23  ;;  %v6794_v61 = vsel %vm14562_vm3, %v14541_v17, %v6790_v8  ;;  %v5904_v53 = vpop.f32.mrf.mxu1 }
 0x650   :  { %10583 = vrcp.f32 %v14550_v38  ;;  %vm6853_vm6 = vmor %vm6851_vm4, %vm6852_vm2  ;;  %v6799_v5 = vsel %vm6796_vm5, %v6798_v41, %v6794_v61  ;;  %vm6911_vm9 = vweird.f32 %v14550_v38  ;;  %v6915_v42 = vand.u32 2147483647, %v14550_v38 }
 0x651   :  { %v6848_v0 = vsub.f32 1.0, %v6847_v46  ;;  %v5951_v24 = vpop.f32.mrf.mxu2  ;;  %v6917_v6 = vand.u32 2147483648, %v14550_v38  ;;  %v5905_v13 = vadd.f32 %v5904_v53, %v5856_v48 }
 0x652   :  { %v5995_v16 = vpop.f32.mrf.mxu3  ;;  %v5952_v59 = vadd.f32 %v5951_v24, %v5903_v14  ;;  %vm6916_vm13 = vcmp.eq.f32.partialorder %v6915_v42, 8.507059e+37 }
 0x653   :  { %v5996_v10 = vadd.f32 %v5995_v16, %v5947_v60  ;;  %v6849_v37 = vmul.f32 %v10580_v23, %v6848_v0  ;;  %v6918_v55 = vor.u32 1.1754944e-38, %v6917_v6 }
 0x655   :  { %v10582_v20 = vpop.eup %10581  ;;  %v9494_v28 = vmul.f32 -1.442695, %v5996_v10  ;;  %v6850_v15 = vadd.f32 %v10580_v23, %v6849_v37 }
 0x656   :  { %v14570_v32 = vpop.eup %10583  ;;  %v14572_v47 = vadd.f32 1.0, %v10582_v20 }
 0x657   :  { %v6907_v26 = vmul.f32 %v14570_v32, %v14550_v38  ;;  %10585 = vpow2.f32 %v9494_v28  ;;  %v6854_v50 = vsel %vm6853_vm6, %v10580_v23, %v6850_v15  ;;  %vm6912_vm8 = vweird.f32 %v14570_v32 }
 0x658   :  { %10587 = vrcp.f32 %v14572_v47  ;;  %v6859_v40 = vsel %vm6856_vm7, %v6858_v18, %v6854_v50  ;;  %v6977_v1 = vand.u32 2147483648, %v14572_v47  ;;  %v6975_v34 = vand.u32 2147483647, %v14572_v47  ;;  %vm14591_vm11 = vmor %vm6911_vm9, %vm6912_vm8 }
 0x659   :  { %v7240_v11 = vpack.c.bf16 %v6859_v40, %v6799_v5  ;;  %v6908_v36 = vsub.f32 1.0, %v6907_v26  ;;  %vm6971_vm12 = vweird.f32 %v14572_v47  ;;  %v5953_v27 = vpop.f32.mrf.mxu2 }
 0x65a   :  { %v5997_v56 = vpop.f32.mrf.mxu3  ;;  %v6978_v60 = vor.u32 1.1754944e-38, %v6977_v1  ;;  %vm6976_vm15 = vcmp.eq.f32.partialorder %v6975_v34, 8.507059e+37  ;;  %v5954_v25 = vadd.f32 %v5953_v27, %v5905_v13 }
 0x65b   :  { %v5998_v31 = vadd.f32 %v5997_v56, %v5949_v54  ;;  %7688 = vmatmul.bf16.gmra.mxu3 %v7240_v11  ;;  %v6909_v52 = vmul.f32 %v14570_v32, %v6908_v36  ;;  %v7522_v11 = vpop.f32.mrf.mxu0 }
 0x65d   :  { %v10586_v12 = vpop.eup %10585  ;;  %v9498_v3 = vmul.f32 -1.442695, %v5998_v31  ;;  %v6910_v19 = vadd.f32 %v14570_v32, %v6909_v52 }
 0x65e   :  { %v10588_v17 = vpop.eup %10587  ;;  %v14579_v57 = vadd.f32 1.0, %v10586_v12 }
 0x65f   :  { %v6967_v62 = vmul.f32 %v10588_v17, %v14572_v47  ;;  %10589 = vpow2.f32 %v9498_v3  ;;  %vm6972_vm10 = vweird.f32 %v10588_v17  ;;  %v6914_v23 = vsel %vm14591_vm11, %v14570_v32, %v6910_v19 }
 0x660   :  { %10591 = vrcp.f32 %v14579_v57  ;;  %vm6973_vm14 = vmor %vm6971_vm12, %vm6972_vm10  ;;  %v6919_v29 = vsel %vm6916_vm13, %v6918_v55, %v6914_v23  ;;  %vm7031_vm1 = vweird.f32 %v14579_v57  ;;  %v7037_v32 = vand.u32 2147483648, %v14579_v57 }
 0x661   :  { %v6968_v44 = vsub.f32 1.0, %v6967_v62  ;;  %v7035_v41 = vand.u32 2147483647, %v14579_v57 }
 0x662   :  { %v6000_v63 = vpop.f32.mrf.mxu3  ;;  %v7038_v56 = vor.u32 1.1754944e-38, %v7037_v32 }
 0x663   :  { %v6001_v35 = vadd.f32 %v6000_v63, %v5952_v59  ;;  %v6969_v58 = vmul.f32 %v10588_v17, %v6968_v44  ;;  %vm7036_vm6 = vcmp.eq.f32.partialorder %v7035_v41, 8.507059e+37  ;;  %v7524_v59 = vpop.f32.mrf.mxu0 }
 0x665   :  { %v10590_v21 = vpop.eup %10589  ;;  %v9502_v22 = vmul.f32 -1.442695, %v6001_v35  ;;  %v6970_v38 = vadd.f32 %v10588_v17, %v6969_v58 }
 0x666   :  { %v10592_v2 = vpop.eup %10591  ;;  %v6252_v46 = vadd.f32 1.0, %v10590_v21 }
 0x667   :  { %v7027_v8 = vmul.f32 %v10592_v2, %v14579_v57  ;;  %10593 = vpow2.f32 %v9502_v22  ;;  %v6974_v0 = vsel %vm6973_vm14, %v10588_v17, %v6970_v38  ;;  %vm7032_vm0 = vweird.f32 %v10592_v2  ;;  %v7571_v17 = vpop.f32.mrf.mxu1  ;;  %v7620_v57 = vpop.f32.mrf.mxu2 }
 0x668   :  { %10595 = vrcp.f32 %v6252_v46  ;;  %v6979_v16 = vsel %vm6976_vm15, %v6978_v60, %v6974_v0  ;;  %v7097_v47 = vand.u32 2147483648, %v6252_v46  ;;  %v7095_v26 = vand.u32 2147483647, %v6252_v46  ;;  %vm14603_vm3 = vmor %vm7031_vm1, %vm7032_vm0  ;;  %v14612_v60 = vld [vmem:[%s14639_s6] ss:$0 sm:$0xff]  ;;  %s10797_s6 = smov [#allocation13]  }
 0x669   :  { %v7244_v43 = vpack.c.bf16 %v6979_v16, %v6919_v29  ;;  %v7028_v30 = vsub.f32 1.0, %v7027_v8  ;;  %vm7091_vm4 = vweird.f32 %v6252_v46  ;;  %v7523_v0 = vadd.f32 %v14612_v60, %v7522_v11  ;;  %s7729_s10 = sshll.u32 %s10797_s6, 4  ;;  %s7730_s10 = int_to_ptr.vmem [resolvable:$true] %s7729_s10 }
 0x66a   :  { %v6002_v45 = vpop.f32.mrf.mxu3  ;;  %v7098_v39 = vor.u32 1.1754944e-38, %v7097_v47  ;;  %vm7096_vm7 = vcmp.eq.f32.partialorder %v7095_v26, 8.507059e+37 }
 0x66b   :  { %v6003_v10 = vadd.f32 %v6002_v45, %v5954_v25  ;;  %7693 = vmatmul.bf16.gmra.mxu3 %v7244_v43  ;;  %v7029_v7 = vmul.f32 %v10592_v2, %v7028_v30  ;;  %v7527_v27 = vpop.f32.mrf.mxu0  ;;  %v7572_v25 = vadd.f32 %v7571_v17, %v7523_v0 }
 0x66d   :  { %v10594_v37 = vpop.eup %10593  ;;  %v9506_v49 = vmul.f32 -1.442695, %v6003_v10  ;;  %v7030_v61 = vadd.f32 %v10592_v2, %v7029_v7  ;;  %v7621_v43 = vadd.f32 %v7620_v57, %v7572_v25  ;;  %v7525_v10 = vadd.f32 %v14612_v60, %v7524_v59 }
 0x66e   :  { %v10596_v33 = vpop.eup %10595  ;;  %v6256_v20 = vadd.f32 1.0, %v10594_v37 }
 0x66f   :  { %v7087_v28 = vmul.f32 %v10596_v33, %v6252_v46  ;;  %10597 = vpow2.f32 %v9506_v49  ;;  %vm7092_vm2 = vweird.f32 %v10596_v33  ;;  %v7034_v40 = vsel %vm14603_vm3, %v10592_v2, %v7030_v61  ;;  %v7573_v35 = vpop.f32.mrf.mxu1  ;;  %v7622_v13 = vpop.f32.mrf.mxu2 }
 0x670   :  { %10599 = vrcp.f32 %v6256_v20  ;;  %vm7093_vm5 = vmor %vm7091_vm4, %vm7092_vm2  ;;  %v7039_v12 = vsel %vm7036_vm6, %v7038_v56, %v7034_v40  ;;  %vm7151_vm9 = vweird.f32 %v6256_v20  ;;  %v7157_v63 = vand.u32 2147483648, %v6256_v20 }
 0x671   :  { %v7088_v15 = vsub.f32 1.0, %v7087_v28  ;;  %v7155_v6 = vand.u32 2147483647, %v6256_v20  ;;  %v7574_v49 = vadd.f32 %v7573_v35, %v7525_v10  ;;  %v7528_v61 = vadd.f32 %v14612_v60, %v7527_v27 }
 0x672   :  { %v7158_v51 = vor.u32 1.1754944e-38, %v7157_v63 }
 0x673   :  { %v7089_v18 = vmul.f32 %v10596_v33, %v7088_v15  ;;  %vm7156_vm14 = vcmp.eq.f32.partialorder %v7155_v6, 8.507059e+37  ;;  %v7529_v8 = vpop.f32.mrf.mxu0 }
 0x675   :  { %v10598_v5 = vpop.eup %10597  ;;  %v7090_v54 = vadd.f32 %v10596_v33, %v7089_v18 }
 0x676   :  { %v10600_v4 = vpop.eup %10599  ;;  %v6260_v36 = vadd.f32 1.0, %v10598_v5  ;;  %v7530_v5 = vadd.f32 %v14612_v60, %v7529_v8 }
 0x677   :  { %v7147_v31 = vmul.f32 %v10600_v4, %v6256_v20  ;;  %v7094_v24 = vsel %vm7093_vm5, %v10596_v33, %v7090_v54  ;;  %vm7152_vm8 = vweird.f32 %v10600_v4  ;;  %v7576_v46 = vpop.f32.mrf.mxu1  ;;  %v7625_v55 = vpop.f32.mrf.mxu2  ;;  %v7623_v20 = vadd.f32 %v7622_v13, %v7574_v49 }
 0x678   :  { %10601 = vrcp.f32 %v6260_v36  ;;  %v7099_v9 = vsel %vm7096_vm7, %v7098_v39, %v7094_v24  ;;  %v7217_v42 = vand.u32 2147483648, %v6260_v36  ;;  %v7215_v53 = vand.u32 2147483647, %v6260_v36  ;;  %vm7153_vm11 = vmor %vm7151_vm9, %vm7152_vm8 }
 0x679   :  { %v7248_v3 = vpack.c.bf16 %v7099_v9, %v7039_v12  ;;  %v7148_v52 = vsub.f32 1.0, %v7147_v31  ;;  %vm7211_vm12 = vweird.f32 %v6260_v36  ;;  %v7577_v47 = vadd.f32 %v7576_v46, %v7528_v61 }
 0x67a   :  { %v7218_v21 = vor.u32 1.1754944e-38, %v7217_v42  ;;  %vm7216_vm15 = vcmp.eq.f32.partialorder %v7215_v53, 8.507059e+37 }
 0x67b   :  { %7698 = vmatmul.bf16.gmra.mxu3 %v7248_v3  ;;  %v7149_v14 = vmul.f32 %v10600_v4, %v7148_v52  ;;  %v7532_v30 = vpop.f32.mrf.mxu0  ;;  %v7626_v41 = vadd.f32 %v7625_v55, %v7577_v47 }
 0x67c   :  { %v7533_v56 = vadd.f32 %v14612_v60, %v7532_v30 }
 0x67d   :  { %v7150_v19 = vadd.f32 %v10600_v4, %v7149_v14 }
 0x67e   :  { %v10602_v62 = vpop.eup %10601 }
 0x67f   :  { %v7207_v48 = vmul.f32 %v10602_v62, %v6260_v36  ;;  %vm7212_vm10 = vweird.f32 %v10602_v62  ;;  %v7154_v58 = vsel %vm7153_vm11, %v10600_v4, %v7150_v19  ;;  %v7578_v29 = vpop.f32.mrf.mxu1  ;;  %v7627_v16 = vpop.f32.mrf.mxu2 }
 0x680   :  { %vm7213_vm13 = vmor %vm7211_vm12, %vm7212_vm10  ;;  %v7159_v23 = vsel %vm7156_vm14, %v7158_v51, %v7154_v58  ;;  %v7579_v4 = vadd.f32 %v7578_v29, %v7530_v5 }
 0x681   :  { %v7208_v44 = vsub.f32 1.0, %v7207_v48 }
 0x682   :  { %v7628_v11 = vadd.f32 %v7627_v16, %v7579_v4 }
 0x683   :  { %v7209_v1 = vmul.f32 %v10602_v62, %v7208_v44  ;;  %v7534_v32 = vpop.f32.mrf.mxu0 }
 0x684   :  { %v7535_v17 = vadd.f32 %v14612_v60, %v7534_v32 }
 0x685   :  { %v7210_v34 = vadd.f32 %v10602_v62, %v7209_v1 }
 0x687   :  { %v7214_v22 = vsel %vm7213_vm13, %v10602_v62, %v7210_v34  ;;  %v7581_v7 = vpop.f32.mrf.mxu1  ;;  %v7630_v33 = vpop.f32.mrf.mxu2 }
 0x688   :  { %v7219_v38 = vsel %vm7216_vm15, %v7218_v21, %v7214_v22  ;;  %v7582_v12 = vadd.f32 %v7581_v7, %v7533_v56 }
 0x689   :  { %v7252_v2 = vpack.c.bf16 %v7219_v38, %v7159_v23 }
 0x68a   :  { %v7631_v3 = vadd.f32 %v7630_v33, %v7582_v12 }
 0x68b   :  { %7703 = vmatmul.bf16.gmra.mxu3 %v7252_v2  ;;  %v7537_v54 = vpop.f32.mrf.mxu0 }
 0x68c   :  { %v7538_v63 = vadd.f32 %v14612_v60, %v7537_v54 }
 0x68f   :  { %v7583_v18 = vpop.f32.mrf.mxu1  ;;  %v7632_v26 = vpop.f32.mrf.mxu2 }
 0x690   :  { %v7584_v48 = vadd.f32 %v7583_v18, %v7535_v17 }
 0x692   :  { %v7633_v59 = vadd.f32 %v7632_v26, %v7584_v48 }
 0x693   :  { %v7539_v9 = vpop.f32.mrf.mxu0 }
 0x694   :  { %v7540_v34 = vadd.f32 %v14612_v60, %v7539_v9 }
 0x697   :  { %v7586_v39 = vpop.f32.mrf.mxu1  ;;  %v7635_v24 = vpop.f32.mrf.mxu2 }
 0x698   :  { %v7587_v6 = vadd.f32 %v7586_v39, %v7538_v63 }
 0x69a   :  { %v7636_v35 = vadd.f32 %v7635_v24, %v7587_v6 }
 0x69b   :  { %v7542_v19 = vpop.f32.mrf.mxu0 }
 0x69c   :  { %v7543_v27 = vadd.f32 %v14612_v60, %v7542_v19 }
 0x69e   :  { %v7669_v45 = vpop.f32.mrf.mxu3 }
 0x69f   :  { %v7670_v37 = vadd.f32 %v7669_v45, %v7621_v43  ;;  %v7588_v14 = vpop.f32.mrf.mxu1  ;;  %v7637_v62 = vpop.f32.mrf.mxu2 }
 0x6a0   :  { %v7589_v21 = vadd.f32 %v7588_v14, %v7540_v34 }
 0x6a1   :  { %7709 = vst [vmem:[#allocation13] sm:$0xff] %v7670_v37 }
 0x6a2   :  { %v7638_v22 = vadd.f32 %v7637_v62, %v7589_v21 }
 0x6a3   :  { %v7544_v51 = vpop.f32.mrf.mxu0 }
 0x6a4   :  { %v7545_v16 = vadd.f32 %v14612_v60, %v7544_v51 }
 0x6a6   :  { %v7671_v28 = vpop.f32.mrf.mxu3 }
 0x6a7   :  { %v7672_v15 = vadd.f32 %v7671_v28, %v7623_v20  ;;  %v7591_v1 = vpop.f32.mrf.mxu1  ;;  %v7640_v53 = vpop.f32.mrf.mxu2 }
 0x6a8   :  { %v7592_v8 = vadd.f32 %v7591_v1, %v7543_v27 }
 0x6a9   :  { %7710 = vst [vmem:[#allocation13 + $0x8] sm:$0xff] %v7672_v15 }
 0x6aa   :  { %v7641_v0 = vadd.f32 %v7640_v53, %v7592_v8 }
 0x6ab   :  { %v7547_v55 = vpop.f32.mrf.mxu0 }
 0x6ac   :  { %v7548_v7 = vadd.f32 %v14612_v60, %v7547_v55 }
 0x6ae   :  { %v7674_v50 = vpop.f32.mrf.mxu3 }
 0x6af   :  { %v7675_v40 = vadd.f32 %v7674_v50, %v7626_v41  ;;  %v7593_v23 = vpop.f32.mrf.mxu1  ;;  %v7642_v38 = vpop.f32.mrf.mxu2 }
 0x6b0   :  { %v7594_v45 = vadd.f32 %v7593_v23, %v7545_v16 }
 0x6b1   :  { %7711 = vst [vmem:[#allocation13 + $0x10] sm:$0xff] %v7675_v40 }
 0x6b2   :  { %v7643_v37 = vadd.f32 %v7642_v38, %v7594_v45 }
 0x6b3   :  { %v7549_v10 = vpop.f32.mrf.mxu0 }
 0x6b4   :  { %v7550_v41 = vadd.f32 %v14612_v60, %v7549_v10 }
 0x6b6   :  { %v7676_v36 = vpop.f32.mrf.mxu3 }
 0x6b7   :  { %v7677_v31 = vadd.f32 %v7676_v36, %v7628_v11  ;;  %v7596_v25 = vpop.f32.mrf.mxu1  ;;  %v7645_v30 = vpop.f32.mrf.mxu2 }
 0x6b8   :  { %v7597_v61 = vadd.f32 %v7596_v25, %v7548_v7 }
 0x6b9   :  { %7712 = vst [vmem:[#allocation13 + $0x18] sm:$0xff] %v7677_v31 }
 0x6ba   :  { %v7646_v15 = vadd.f32 %v7645_v30, %v7597_v61 }
 0x6bb   :  { %v7552_v32 = vpop.f32.mrf.mxu0 }
 0x6bc   :  { %v7553_v4 = vadd.f32 %v14612_v60, %v7552_v32 }
 0x6be   :  { %v7679_v52 = vpop.f32.mrf.mxu3 }
 0x6bf   :  { %v7680_v57 = vadd.f32 %v7679_v52, %v7631_v3  ;;  %v7598_v20 = vpop.f32.mrf.mxu1  ;;  %v7647_v28 = vpop.f32.mrf.mxu2 }
 0x6c0   :  { %v7599_v26 = vadd.f32 %v7598_v20, %v7550_v41 }
 0x6c1   :  { %7713 = vst [vmem:[#allocation13 + $0x20] sm:$0xff] %v7680_v57 }
 0x6c2   :  { %v7648_v40 = vadd.f32 %v7647_v28, %v7599_v26 }
 0x6c3   :  { %v7554_v36 = vpop.f32.mrf.mxu0 }
 0x6c4   :  { %v7555_v9 = vadd.f32 %v14612_v60, %v7554_v36 }
 0x6c6   :  { %v7681_v44 = vpop.f32.mrf.mxu3 }
 0x6c7   :  { %v7682_v42 = vadd.f32 %v7681_v44, %v7633_v59  ;;  %v7601_v50 = vpop.f32.mrf.mxu1  ;;  %v7650_v5 = vpop.f32.mrf.mxu2 }
 0x6c8   :  { %v7602_v56 = vadd.f32 %v7601_v50, %v7553_v4 }
 0x6c9   :  { %7714 = vst [vmem:[#allocation13 + $0x28] sm:$0xff] %v7682_v42 }
 0x6ca   :  { %v7651_v39 = vadd.f32 %v7650_v5, %v7602_v56 }
 0x6cb   :  { %v7557_v52 = vpop.f32.mrf.mxu0 }
 0x6cc   :  { %v7558_v62 = vadd.f32 %v14612_v60, %v7557_v52 }
 0x6ce   :  { %v7684_v58 = vpop.f32.mrf.mxu3 }
 0x6cf   :  { %v7685_v13 = vadd.f32 %v7684_v58, %v7636_v35  ;;  %v7603_v31 = vpop.f32.mrf.mxu1  ;;  %v7652_v24 = vpop.f32.mrf.mxu2 }
 0x6d0   :  { %v7604_v17 = vadd.f32 %v7603_v31, %v7555_v9 }
 0x6d1   :  { %7715 = vst [vmem:[#allocation13 + $0x30] sm:$0xff] %v7685_v13 }
 0x6d2   :  { %v7653_v57 = vadd.f32 %v7652_v24, %v7604_v17 }
 0x6d3   :  { %v7559_v63 = vpop.f32.mrf.mxu0 }
 0x6d4   :  { %v7560_v1 = vadd.f32 %v14612_v60, %v7559_v63 }
 0x6d6   :  { %v7686_v2 = vpop.f32.mrf.mxu3 }
 0x6d7   :  { %v7687_v46 = vadd.f32 %v7686_v2, %v7638_v22  ;;  %v7606_v59 = vpop.f32.mrf.mxu1  ;;  %v7655_v19 = vpop.f32.mrf.mxu2 }
 0x6d8   :  { %v7607_v44 = vadd.f32 %v7606_v59, %v7558_v62 }
 0x6d9   :  { %7716 = vst [vmem:[#allocation13 + $0x38] sm:$0xff] %v7687_v46 }
 0x6da   :  { %v7656_v42 = vadd.f32 %v7655_v19, %v7607_v44 }
 0x6de   :  { %v7689_v29 = vpop.f32.mrf.mxu3 }
 0x6df   :  { %v7690_v43 = vadd.f32 %v7689_v29, %v7641_v0  ;;  %v7608_v35 = vpop.f32.mrf.mxu1  ;;  %v7657_v58 = vpop.f32.mrf.mxu2 }
 0x6e0   :  { %v7609_v34 = vadd.f32 %v7608_v35, %v7560_v1 }
 0x6e1   :  { %7717 = vst [vmem:[#allocation13 + $0x40] sm:$0xff] %v7690_v43 }
 0x6e2   :  { %v7658_v13 = vadd.f32 %v7657_v58, %v7609_v34 }
 0x6e6   :  { %v7691_v49 = vpop.f32.mrf.mxu3 }
 0x6e7   :  { %v7692_v33 = vadd.f32 %v7691_v49, %v7643_v37 }
 0x6e9   :  { %7718 = vst [vmem:[#allocation13 + $0x48] sm:$0xff] %v7692_v33 }
 0x6ee   :  { %v7694_v47 = vpop.f32.mrf.mxu3 }
 0x6ef   :  { %v7695_v18 = vadd.f32 %v7694_v47, %v7646_v15 }
 0x6f1   :  { %7719 = vst [vmem:[#allocation13 + $0x50] sm:$0xff] %v7695_v18 }
 0x6f6   :  { %v7696_v54 = vpop.f32.mrf.mxu3 }
 0x6f7   :  { %v7697_v11 = vadd.f32 %v7696_v54, %v7648_v40 }
 0x6f9   :  { %7720 = vst [vmem:[#allocation13 + $0x58] sm:$0xff] %v7697_v11 }
 0x6fe   :  { %v7699_v12 = vpop.f32.mrf.mxu3 }
 0x6ff   :  { %v7700_v3 = vadd.f32 %v7699_v12, %v7651_v39 }
 0x701   :  { %7721 = vst [vmem:[#allocation13 + $0x60] sm:$0xff] %v7700_v3 }
 0x706   :  { %v7701_v14 = vpop.f32.mrf.mxu3 }
 0x707   :  { %v7702_v48 = vadd.f32 %v7701_v14, %v7653_v57 }
 0x709   :  { %7722 = vst [vmem:[#allocation13 + $0x68] sm:$0xff] %v7702_v48 }
 0x70e   :  { %v7704_v6 = vpop.f32.mrf.mxu3 }
 0x70f   :  { %v7705_v53 = vadd.f32 %v7704_v6, %v7656_v42 }
 0x711   :  { %7723 = vst [vmem:[#allocation13 + $0x70] sm:$0xff] %v7705_v53 }
 0x716   :  { %v7706_v51 = vpop.f32.mrf.mxu3 }
 0x717   :  { %v7707_v21 = vadd.f32 %v7706_v51, %v7658_v13 }
 0x719   :  { %7724 = vst [vmem:[#allocation13 + $0x78] sm:$0xff] %v7707_v21 }
 0x71a   :  { %7737 = dma.vmem_to_hbm [thread:$0]  %s7730_s10, 2048, %s7732_s13, [#allocation4], %s10798_s14, %s10798_s14, %s10799_s15  }
 0x71b   :  { %10783 = dma.done.wait [#allocation4], 2048  }
 0x71c   :  { %10784 = vsyncadd [#allocation4], 4294965248 }
 0x71d   :  { %7742 = vsyncpa [#allocation3], 1 }
 0x71e   :  { %7743 = vsyncpa [#allocation6], 1 }
 0x71f   :  { %7744 = vsyncpa [#allocation9], 1 }
 0x720   :  { %7745 = vsyncpa [#allocation12], 1 }
 0x721   :  { %7746 = vsyncpa [#allocation4], 1 }

</bundles_post_ra>
